<compile_context>
chip_gen: v7x
topology: tpu7x:2x2x1
jax: 0.10.0
libtpu: 0.0.40
codegen_flags: <defaults>
</compile_context>

<pallas_src>
import functools

import jax
import jax.numpy as jnp
from jax import lax
from jax.experimental import pallas as pl
from jax.experimental.pallas import tpu as pltpu


def _round_up(x, m):
    return (x + m - 1) // m * m


def _as_i32(c):
    c &= 0xFFFFFFFF
    return c - 0x100000000 if c >= 0x80000000 else c


_MIX1 = _as_i32(0x85EBCA6B)
_MIX2 = _as_i32(0xC2B2AE35)
_GOLDEN = _as_i32(0x9E3779B9)
_MANT_MASK = 0x007FFFFF
_ONE_BITS = 0x3F800000          # f32 1.0 bit pattern
_HALF_ULP = 5.9604645e-08       # 2^-24


def _srl(x, n):
    # logical right shift for int32 (arithmetic shift + mask) — pure VPU
    return (x >> n) & ((1 << (32 - n)) - 1)


def _hash32(x):
    # murmur3 fmix32 finalizer: sequential counters -> well-mixed 32 bits
    x = x ^ _srl(x, 16)
    x = x * _MIX1
    x = x ^ _srl(x, 13)
    x = x * _MIX2
    x = x ^ _srl(x, 16)
    return x


def _fast_log(x):
    # Natural log of a strictly-positive f32: exponent extraction + degree-4
    # polynomial for ln(mantissa) on [1,2).  Pure VPU (no EUP transcendentals);
    # abs error ~1e-4, ample for sampling noise.
    bits = lax.bitcast_convert_type(x, jnp.int32)
    e = ((bits >> 23) & 0xFF) - 127
    m = lax.bitcast_convert_type((bits & _MANT_MASK) | _ONE_BITS, jnp.float32)
    p = jnp.float32(-0.056570851)
    p = p * m + jnp.float32(0.44717955)
    p = p * m + jnp.float32(-1.4699568)
    p = p * m + jnp.float32(2.8212026)
    p = p * m + jnp.float32(-1.7417939)
    return jnp.float32(0.6931471805599453) * e.astype(jnp.float32) + p


def _fused_sampler_kernel(seed_ref, h_ref, e_ref, rtemp_ref,
                          outv_ref, outi_ref, bval_ref, bidx_ref, *,
                          num_draws, vocab_limit, v_padded, tv, tiles_per_split):
    p_split = pl.program_id(0)          # vocab split (parallel; 2 TCs on v7x)
    j = pl.program_id(1)                # vocab tile within split (reduction)
    tile_id = p_split * tiles_per_split + j

    @pl.when(j == 0)
    def _init():
        bval_ref[...] = jnp.full(bval_ref.shape, -jnp.inf, jnp.float32)
        bidx_ref[...] = jnp.zeros(bidx_ref.shape, jnp.int32)

    # ---- logits tile (t_pad, tv) f32 = hidden (t_pad,H) @ emb_t tile (H,tv) ----
    logits = jnp.dot(h_ref[...], e_ref[...], preferred_element_type=jnp.float32)
    # temperature divide (reference divides by an all-ones tensor)
    logits = logits * rtemp_ref[...]

    # global vocab column index of every lane in this tile
    col = lax.broadcasted_iota(jnp.int32, logits.shape, 1) + tile_id * tv
    if vocab_limit < v_padded:
        # columns beyond org_vocab_size (and vocab padding) can never be sampled
        logits = jnp.where(col < vocab_limit, logits, -jnp.inf)

    # ---- counter-based hash noise + streaming Gumbel-max argmax per draw ------
    # counter is unique per (seed, token row, global vocab col, draw), so the
    # sampled noise is independent of tv / num_splits.
    row = lax.broadcasted_iota(jnp.int32, logits.shape, 0)
    base = (row * v_padded + col) * num_draws + seed_ref[0] * _GOLDEN

    int_max = jnp.int32(2147483647)
    cur_v = bval_ref[...]                       # (t_pad, num_draws) — one load
    cur_i = bidx_ref[...]
    draw_lane = lax.broadcasted_iota(jnp.int32, cur_v.shape, 1)

    for s in range(num_draws):
        bits = _hash32(base + s)
        # uniform in (0,1): 23 mantissa bits -> [1,2) -> subtract 1, add 2^-24
        u = lax.bitcast_convert_type((bits & _MANT_MASK) | _ONE_BITS,
                                     jnp.float32) - jnp.float32(1.0)
        u = u + jnp.float32(_HALF_ULP)
        # q ~ Exp(1) = -log(u); argmax(probs / q) == argmax(logits - log q)
        q = jnp.maximum(-_fast_log(u), jnp.float32(1e-10))
        score = logits - _fast_log(q)           # (t_pad, tv), all VPU noise math

        smax = jnp.max(score, axis=-1, keepdims=True)          # (t_pad, 1)
        cand = jnp.where(score == smax, col, int_max)
        sidx = jnp.min(cand, axis=-1, keepdims=True)           # first argmax

        upd = (draw_lane == s) & (smax > cur_v)  # earlier tile wins ties
        cur_v = jnp.where(upd, smax, cur_v)
        cur_i = jnp.where(upd, sidx, cur_i)

    bval_ref[...] = cur_v                       # one store per scratch per tile
    bidx_ref[...] = cur_i

    @pl.when(j == pl.num_programs(1) - 1)
    def _finalize():
        outv_ref[0] = bval_ref[...]
        outi_ref[0] = bidx_ref[...]


class PallasSampler:
    """TPU sampler.  The transposed+padded embedding table is prepared ONCE at
    construction (model-load time), not per forward call."""

    def __init__(self, embedding, org_vocab_size, *, num_draws=10, tv=1024,
                 num_splits=2, vmem_limit_bytes=48 * 1024 * 1024):
        V, H = embedding.shape
        self.vocab_size = int(V)
        self.hidden_size = int(H)
        self.org_vocab_size = int(org_vocab_size)
        self.num_draws = int(num_draws)
        self.num_splits = max(1, int(num_splits))
        self.vmem_limit_bytes = int(vmem_limit_bytes)

        tv = min(int(tv), _round_up(V, 128))
        tv = _round_up(tv, 128)
        n_tiles = _round_up(-(-V // tv), self.num_splits)
        self.tv = tv
        self.v_padded = n_tiles * tv
        self.tiles_per_split = n_tiles // self.num_splits

        # one-time weight layout change: (V,H) -> (H, V_padded) so the MXU sees
        # a clean (M,K)x(K,N) contraction and streams (H,tv) bf16 tiles.
        emb_t = embedding.T
        if self.v_padded != V:
            emb_t = jnp.pad(emb_t, ((0, 0), (0, self.v_padded - V)))
        self.emb_t = emb_t                      # reused by every __call__

    def __call__(self, hidden_states, selected_token_indices, *, seed=0):
        B, S, H = hidden_states.shape
        assert H == self.hidden_size

        # 1. _prune_hidden_states: flatten + gather selected token rows (XLA glue)
        flat = hidden_states.reshape(B * S, H)
        pruned = jnp.take(flat, selected_token_indices, axis=0)     # (T, H)
        T = pruned.shape[0]
        t_pad = _round_up(max(T, 16), 16)
        if t_pad != T:
            pruned = jnp.pad(pruned, ((0, t_pad - T), (0, 0)))

        # temperature: reference builds a (T,V) all-ones tensor; keep only a
        # (t_pad,1) reciprocal-temperature column broadcast in-kernel.
        recip_temp = jnp.ones((t_pad, 1), jnp.float32)
        seed_arr = jnp.asarray([seed], dtype=jnp.int32)
        vocab_limit = min(self.org_vocab_size, self.vocab_size)

        nd, ns, tv, tps = self.num_draws, self.num_splits, self.tv, self.tiles_per_split

        kernel = functools.partial(
            _fused_sampler_kernel, num_draws=nd, vocab_limit=vocab_limit,
            v_padded=self.v_padded, tv=tv, tiles_per_split=tps)

        out_val, out_idx = pl.pallas_call(
            kernel,
            out_shape=(
                jax.ShapeDtypeStruct((ns, t_pad, nd), jnp.float32),
                jax.ShapeDtypeStruct((ns, t_pad, nd), jnp.int32),
            ),
            grid_spec=pltpu.PrefetchScalarGridSpec(
                num_scalar_prefetch=1,
                grid=(ns, tps),
                in_specs=[
                    # hidden: constant block index -> DMAed once, VMEM-resident
                    pl.BlockSpec((t_pad, H), lambda p, j, seed: (0, 0)),
                    # embedding: stream full-K (H, tv) tiles across the vocab
                    pl.BlockSpec((H, tv), lambda p, j, seed: (0, p * tps + j)),
                    # reciprocal-temperature column: resident
                    pl.BlockSpec((t_pad, 1), lambda p, j, seed: (0, 0)),
                ],
                out_specs=(
                    pl.BlockSpec((1, t_pad, nd), lambda p, j, seed: (p, 0, 0)),
                    pl.BlockSpec((1, t_pad, nd), lambda p, j, seed: (p, 0, 0)),
                ),
                scratch_shapes=[
                    pltpu.VMEM((t_pad, nd), jnp.float32),   # running best value
                    pltpu.VMEM((t_pad, nd), jnp.int32),     # running best index
                ],
            ),
            compiler_params=pltpu.CompilerParams(
                # vocab split axis parallel (2 TCs on v7x); inner vocab axis is
                # a reduction with running argmax carried in scratch
                dimension_semantics=("parallel", "arbitrary"),
                vmem_limit_bytes=self.vmem_limit_bytes,
            ),
        )(seed_arr, pruned, self.emb_t, recip_temp)

        # tiny XLA epilogue: merge the per-split running argmax candidates
        best_split = jnp.argmax(out_val, axis=0)                   # (t_pad, nd)
        idx = jnp.take_along_axis(out_idx, best_split[None, ...], axis=0)[0]

        # (t_pad, nd) -> (nd, T, 1): mirrors torch's list of 10 (T,1) tensors
        # TODO(synk): reference returns int64 ids drawn from torch's global RNG;
        # TPU has no native i64 and noise here is a deterministic counter hash.
        return idx[:T, :].T.reshape(nd, T, 1)


if __name__ == "__main__":
    # Small shapes consistent with the module's forward
    # (torch used B=2, S=209, H=4096, V=32000; scaled down here).
    B, Sq, H = 2, 8, 256
    V = 1024
    NUM_DRAWS = 10
    org_vocab_size = V

    key = jax.random.PRNGKey(0)
    k_h, k_e = jax.random.split(key, 2)

    hidden_states = jax.random.normal(k_h, (B, Sq, H), dtype=jnp.bfloat16)
    embedding = (jax.random.normal(k_e, (V, H), dtype=jnp.float32) * 0.02
                 ).astype(jnp.bfloat16)
    selected_token_indices = jnp.array([3, 11], dtype=jnp.int32)  # analogue of [67, 417]
    T = int(selected_token_indices.shape[0])

    # embedding layout prep happens once here ("model load"), not per call
    sampler = PallasSampler(embedding, org_vocab_size, num_draws=NUM_DRAWS,
                            tv=512, num_splits=2)
    out = sampler(hidden_states, selected_token_indices, seed=0)
    out = jax.block_until_ready(out)

    assert out.shape == (NUM_DRAWS, T, 1)
    assert out.dtype == jnp.int32
    assert bool(jnp.all((out >= 0) & (out < org_vocab_size)))
    print("KERNEL_OK")
</pallas_src>

<mosaic_0001>
module attributes {stable_mosaic.version = 11 : i64} {
  func.func @_fused_sampler_kernel(%arg0: i32, %arg1: i32, %arg2: memref<1xi32, #tpu.memory_space<smem>>, %arg3: memref<16x256xbf16, #tpu.memory_space<vmem>>, %arg4: memref<256x512xbf16, #tpu.memory_space<vmem>>, %arg5: memref<16x1xf32, #tpu.memory_space<vmem>>, %arg6: memref<1x16x10xf32, #tpu.memory_space<vmem>>, %arg7: memref<1x16x10xi32, #tpu.memory_space<vmem>>, %arg8: memref<16x10xf32, #tpu.memory_space<vmem>>, %arg9: memref<16x10xi32, #tpu.memory_space<vmem>>) attributes {dimension_semantics = [#tpu.dimension_semantics<parallel>, #tpu.dimension_semantics<arbitrary>], iteration_bounds = array<i64: 2, 1>, scalar_prefetch = 1 : i64, scratch_operands = 2 : i64, tpu.core_type = #tpu.core_type<tc>, window_params = [{pipeline_mode = #tpu.pipeline_mode<synchronous>, transform_indices = @transform_0, window_bounds = array<i64: 16, 256>}, {transform_indices = @transform_1, window_bounds = array<i64: 256, 512>}, {pipeline_mode = #tpu.pipeline_mode<synchronous>, transform_indices = @transform_2, window_bounds = array<i64: 16, 1>}, {transform_indices = @transform_3, window_bounds = array<i64: 1, 16, 10>}, {transform_indices = @transform_4, window_bounds = array<i64: 1, 16, 10>}]} {
    %c1_i32 = arith.constant 1 : i32
    %0 = arith.muli %arg0, %c1_i32 : i32
    %1 = arith.addi %0, %arg1 : i32
    %c0_i32 = arith.constant 0 : i32
    %2 = arith.cmpi eq, %arg1, %c0_i32 : i32
    %3 = arith.extui %2 : i1 to i32
    %c0_i32_0 = arith.constant 0 : i32
    %4 = arith.cmpi ne, %3, %c0_i32_0 : i32
    scf.if %4 {
      %cst_407 = arith.constant 0xFF800000 : f32
      %1153 = vector.broadcast %cst_407 : f32 to vector<16x10xf32>
      %c0_408 = arith.constant 0 : index
      %c0_409 = arith.constant 0 : index
      %1154 = vector.load %arg8[%c0_408, %c0_409] : memref<16x10xf32, #tpu.memory_space<vmem>>, vector<16x10xf32>
      tpu.vector_store %arg8[%c0_408, %c0_409], %1153 {strides = array<i32>} : memref<16x10xf32, #tpu.memory_space<vmem>>, vector<16x10xf32>,
      %c0_i32_410 = arith.constant 0 : i32
      %1155 = vector.broadcast %c0_i32_410 : i32 to vector<16x10xi32>
      %c0_411 = arith.constant 0 : index
      %c0_412 = arith.constant 0 : index
      %1156 = vector.load %arg9[%c0_411, %c0_412] : memref<16x10xi32, #tpu.memory_space<vmem>>, vector<16x10xi32>
      tpu.vector_store %arg9[%c0_411, %c0_412], %1155 {strides = array<i32>} : memref<16x10xi32, #tpu.memory_space<vmem>>, vector<16x10xi32>,
    } else {
    }
    %c0 = arith.constant 0 : index
    %c0_1 = arith.constant 0 : index
    %5 = vector.load %arg3[%c0, %c0_1] : memref<16x256xbf16, #tpu.memory_space<vmem>>, vector<16x256xbf16>
    %c0_2 = arith.constant 0 : index
    %c0_3 = arith.constant 0 : index
    %6 = vector.load %arg4[%c0_2, %c0_3] : memref<256x512xbf16, #tpu.memory_space<vmem>>, vector<256x512xbf16>
    %cst = arith.constant dense<0.000000e+00> : vector<16x512xf32>
    %7 = tpu.matmul %5, %6, %cst {dimension_numbers = #tpu.dot_dimension_numbers<[1], [0], [0], [1], [0, 0, 1, 1], [], []>} : vector<16x256xbf16>, vector<256x512xbf16>, vector<16x512xf32> -> vector<16x512xf32>
    %c0_4 = arith.constant 0 : index
    %c0_5 = arith.constant 0 : index
    %8 = vector.load %arg5[%c0_4, %c0_5] : memref<16x1xf32, #tpu.memory_space<vmem>>, vector<16x1xf32>
    %9 = vector.broadcast %8 : vector<16x1xf32> to vector<16x512xf32>
    %10 = arith.mulf %7, %9 : vector<16x512xf32>
    %11 = tpu.iota {dimensions = array<i32: 1>} : vector<16x512xi32>
    %c512_i32 = arith.constant 512 : i32
    %12 = arith.muli %1, %c512_i32 : i32
    %13 = vector.broadcast %12 : i32 to vector<16x512xi32>
    %14 = arith.addi %11, %13 : vector<16x512xi32>
    %15 = tpu.iota {dimensions = array<i32: 0>} : vector<16x512xi32>
    %c1024_i32 = arith.constant 1024 : i32
    %16 = vector.broadcast %c1024_i32 : i32 to vector<16x512xi32>
    %17 = arith.muli %15, %16 : vector<16x512xi32>
    %18 = arith.addi %17, %14 : vector<16x512xi32>
    %c10_i32 = arith.constant 10 : i32
    %19 = vector.broadcast %c10_i32 : i32 to vector<16x512xi32>
    %20 = arith.muli %18, %19 : vector<16x512xi32>
    %c0_6 = arith.constant 0 : index
    %21 = memref.load %arg2[%c0_6] : memref<1xi32, #tpu.memory_space<smem>>
    %c-1640531527_i32 = arith.constant -1640531527 : i32
    %22 = arith.muli %21, %c-1640531527_i32 : i32
    %23 = vector.broadcast %22 : i32 to vector<16x512xi32>
    %24 = arith.addi %20, %23 : vector<16x512xi32>
    %c0_7 = arith.constant 0 : index
    %c0_8 = arith.constant 0 : index
    %25 = vector.load %arg8[%c0_7, %c0_8] : memref<16x10xf32, #tpu.memory_space<vmem>>, vector<16x10xf32>
    %c0_9 = arith.constant 0 : index
    %c0_10 = arith.constant 0 : index
    %26 = vector.load %arg9[%c0_9, %c0_10] : memref<16x10xi32, #tpu.memory_space<vmem>>, vector<16x10xi32>
    %27 = tpu.iota {dimensions = array<i32: 1>} : vector<16x10xi32>
    %c0_i32_11 = arith.constant 0 : i32
    %28 = vector.broadcast %c0_i32_11 : i32 to vector<16x512xi32>
    %29 = arith.addi %24, %28 : vector<16x512xi32>
    %c16_i32 = arith.constant 16 : i32
    %30 = vector.broadcast %c16_i32 : i32 to vector<16x512xi32>
    %31 = arith.shrsi %29, %30 : vector<16x512xi32>
    %c65535_i32 = arith.constant 65535 : i32
    %32 = vector.broadcast %c65535_i32 : i32 to vector<16x512xi32>
    %33 = arith.andi %31, %32 : vector<16x512xi32>
    %34 = arith.xori %29, %33 : vector<16x512xi32>
    %c-2048144789_i32 = arith.constant -2048144789 : i32
    %35 = vector.broadcast %c-2048144789_i32 : i32 to vector<16x512xi32>
    %36 = arith.muli %34, %35 : vector<16x512xi32>
    %c13_i32 = arith.constant 13 : i32
    %37 = vector.broadcast %c13_i32 : i32 to vector<16x512xi32>
    %38 = arith.shrsi %36, %37 : vector<16x512xi32>
    %c524287_i32 = arith.constant 524287 : i32
    %39 = vector.broadcast %c524287_i32 : i32 to vector<16x512xi32>
    %40 = arith.andi %38, %39 : vector<16x512xi32>
    %41 = arith.xori %36, %40 : vector<16x512xi32>
    %c-1028477387_i32 = arith.constant -1028477387 : i32
    %42 = vector.broadcast %c-1028477387_i32 : i32 to vector<16x512xi32>
    %43 = arith.muli %41, %42 : vector<16x512xi32>
    %c16_i32_12 = arith.constant 16 : i32
    %44 = vector.broadcast %c16_i32_12 : i32 to vector<16x512xi32>
    %45 = arith.shrsi %43, %44 : vector<16x512xi32>
    %c65535_i32_13 = arith.constant 65535 : i32
    %46 = vector.broadcast %c65535_i32_13 : i32 to vector<16x512xi32>
    %47 = arith.andi %45, %46 : vector<16x512xi32>
    %48 = arith.xori %43, %47 : vector<16x512xi32>
    %c8388607_i32 = arith.constant 8388607 : i32
    %49 = vector.broadcast %c8388607_i32 : i32 to vector<16x512xi32>
    %50 = arith.andi %48, %49 : vector<16x512xi32>
    %c1065353216_i32 = arith.constant 1065353216 : i32
    %51 = vector.broadcast %c1065353216_i32 : i32 to vector<16x512xi32>
    %52 = arith.ori %50, %51 : vector<16x512xi32>
    %53 = tpu.bitcast %52 : vector<16x512xi32> -> vector<16x512xf32>
    %cst_14 = arith.constant 1.000000e+00 : f32
    %54 = vector.broadcast %cst_14 : f32 to vector<16x512xf32>
    %55 = arith.subf %53, %54 : vector<16x512xf32>
    %cst_15 = arith.constant 5.96046448E-8 : f32
    %56 = vector.broadcast %cst_15 : f32 to vector<16x512xf32>
    %57 = arith.addf %55, %56 : vector<16x512xf32>
    %58 = tpu.bitcast %57 : vector<16x512xf32> -> vector<16x512xi32>
    %c23_i32 = arith.constant 23 : i32
    %59 = vector.broadcast %c23_i32 : i32 to vector<16x512xi32>
    %60 = arith.shrsi %58, %59 : vector<16x512xi32>
    %c255_i32 = arith.constant 255 : i32
    %61 = vector.broadcast %c255_i32 : i32 to vector<16x512xi32>
    %62 = arith.andi %60, %61 : vector<16x512xi32>
    %c127_i32 = arith.constant 127 : i32
    %63 = vector.broadcast %c127_i32 : i32 to vector<16x512xi32>
    %64 = arith.subi %62, %63 : vector<16x512xi32>
    %c8388607_i32_16 = arith.constant 8388607 : i32
    %65 = vector.broadcast %c8388607_i32_16 : i32 to vector<16x512xi32>
    %66 = arith.andi %58, %65 : vector<16x512xi32>
    %c1065353216_i32_17 = arith.constant 1065353216 : i32
    %67 = vector.broadcast %c1065353216_i32_17 : i32 to vector<16x512xi32>
    %68 = arith.ori %66, %67 : vector<16x512xi32>
    %69 = tpu.bitcast %68 : vector<16x512xi32> -> vector<16x512xf32>
    %cst_18 = arith.constant -0.0565708503 : f32
    %70 = vector.broadcast %cst_18 : f32 to vector<16x512xf32>
    %71 = arith.mulf %70, %69 : vector<16x512xf32>
    %cst_19 = arith.constant 0.447179556 : f32
    %72 = vector.broadcast %cst_19 : f32 to vector<16x512xf32>
    %73 = arith.addf %71, %72 : vector<16x512xf32>
    %74 = arith.mulf %73, %69 : vector<16x512xf32>
    %cst_20 = arith.constant -1.46995676 : f32
    %75 = vector.broadcast %cst_20 : f32 to vector<16x512xf32>
    %76 = arith.addf %74, %75 : vector<16x512xf32>
    %77 = arith.mulf %76, %69 : vector<16x512xf32>
    %cst_21 = arith.constant 2.82120252 : f32
    %78 = vector.broadcast %cst_21 : f32 to vector<16x512xf32>
    %79 = arith.addf %77, %78 : vector<16x512xf32>
    %80 = arith.mulf %79, %69 : vector<16x512xf32>
    %cst_22 = arith.constant -1.74179387 : f32
    %81 = vector.broadcast %cst_22 : f32 to vector<16x512xf32>
    %82 = arith.addf %80, %81 : vector<16x512xf32>
    %83 = arith.sitofp %64 : vector<16x512xi32> to vector<16x512xf32>
    %cst_23 = arith.constant 0.693147182 : f32
    %84 = vector.broadcast %cst_23 : f32 to vector<16x512xf32>
    %85 = arith.mulf %84, %83 : vector<16x512xf32>
    %86 = arith.addf %85, %82 : vector<16x512xf32>
    %cst_24 = arith.constant 0.000000e+00 : f32
    %87 = vector.broadcast %cst_24 : f32 to vector<16x512xf32>
    %88 = arith.subf %87, %86 : vector<16x512xf32>
    %cst_25 = arith.constant 1.000000e-10 : f32
    %89 = vector.broadcast %cst_25 : f32 to vector<16x512xf32>
    %90 = arith.maximumf %88, %89 : vector<16x512xf32>
    %91 = tpu.bitcast %90 : vector<16x512xf32> -> vector<16x512xi32>
    %c23_i32_26 = arith.constant 23 : i32
    %92 = vector.broadcast %c23_i32_26 : i32 to vector<16x512xi32>
    %93 = arith.shrsi %91, %92 : vector<16x512xi32>
    %c255_i32_27 = arith.constant 255 : i32
    %94 = vector.broadcast %c255_i32_27 : i32 to vector<16x512xi32>
    %95 = arith.andi %93, %94 : vector<16x512xi32>
    %c127_i32_28 = arith.constant 127 : i32
    %96 = vector.broadcast %c127_i32_28 : i32 to vector<16x512xi32>
    %97 = arith.subi %95, %96 : vector<16x512xi32>
    %c8388607_i32_29 = arith.constant 8388607 : i32
    %98 = vector.broadcast %c8388607_i32_29 : i32 to vector<16x512xi32>
    %99 = arith.andi %91, %98 : vector<16x512xi32>
    %c1065353216_i32_30 = arith.constant 1065353216 : i32
    %100 = vector.broadcast %c1065353216_i32_30 : i32 to vector<16x512xi32>
    %101 = arith.ori %99, %100 : vector<16x512xi32>
    %102 = tpu.bitcast %101 : vector<16x512xi32> -> vector<16x512xf32>
    %cst_31 = arith.constant -0.0565708503 : f32
    %103 = vector.broadcast %cst_31 : f32 to vector<16x512xf32>
    %104 = arith.mulf %103, %102 : vector<16x512xf32>
    %cst_32 = arith.constant 0.447179556 : f32
    %105 = vector.broadcast %cst_32 : f32 to vector<16x512xf32>
    %106 = arith.addf %104, %105 : vector<16x512xf32>
    %107 = arith.mulf %106, %102 : vector<16x512xf32>
    %cst_33 = arith.constant -1.46995676 : f32
    %108 = vector.broadcast %cst_33 : f32 to vector<16x512xf32>
    %109 = arith.addf %107, %108 : vector<16x512xf32>
    %110 = arith.mulf %109, %102 : vector<16x512xf32>
    %cst_34 = arith.constant 2.82120252 : f32
    %111 = vector.broadcast %cst_34 : f32 to vector<16x512xf32>
    %112 = arith.addf %110, %111 : vector<16x512xf32>
    %113 = arith.mulf %112, %102 : vector<16x512xf32>
    %cst_35 = arith.constant -1.74179387 : f32
    %114 = vector.broadcast %cst_35 : f32 to vector<16x512xf32>
    %115 = arith.addf %113, %114 : vector<16x512xf32>
    %116 = arith.sitofp %97 : vector<16x512xi32> to vector<16x512xf32>
    %cst_36 = arith.constant 0.693147182 : f32
    %117 = vector.broadcast %cst_36 : f32 to vector<16x512xf32>
    %118 = arith.mulf %117, %116 : vector<16x512xf32>
    %119 = arith.addf %118, %115 : vector<16x512xf32>
    %120 = arith.subf %10, %119 : vector<16x512xf32>
    %cst_37 = arith.constant dense<0xFF800000> : vector<16xf32>
    %121 = vector.multi_reduction <maximumf>, %120, %cst_37 [1] : vector<16x512xf32> to vector<16xf32>
    %122 = vector.shape_cast %121 : vector<16xf32> to vector<16x1xf32>
    %123 = vector.broadcast %122 : vector<16x1xf32> to vector<16x512xf32>
    %124 = arith.cmpf oeq, %120, %123 : vector<16x512xf32>
    %c2147483647_i32 = arith.constant 2147483647 : i32
    %125 = vector.broadcast %c2147483647_i32 : i32 to vector<16x512xi32>
    %126 = arith.select %124, %14, %125 : vector<16x512xi1>, vector<16x512xi32>
    %cst_38 = arith.constant dense<2147483647> : vector<16xi32>
    %127 = vector.multi_reduction <minsi>, %126, %cst_38 [1] : vector<16x512xi32> to vector<16xi32>
    %128 = vector.shape_cast %127 : vector<16xi32> to vector<16x1xi32>
    %c0_i32_39 = arith.constant 0 : i32
    %129 = vector.broadcast %c0_i32_39 : i32 to vector<16x10xi32>
    %130 = arith.cmpi eq, %27, %129 : vector<16x10xi32>
    %131 = vector.broadcast %122 : vector<16x1xf32> to vector<16x10xf32>
    %132 = arith.cmpf ogt, %131, %25 : vector<16x10xf32>
    %133 = arith.andi %130, %132 : vector<16x10xi1>
    %134 = vector.shape_cast %122 : vector<16x1xf32> to vector<16x1xf32>
    %135 = vector.broadcast %134 : vector<16x1xf32> to vector<16x10xf32>
    %136 = arith.select %133, %135, %25 : vector<16x10xi1>, vector<16x10xf32>
    %137 = vector.shape_cast %128 : vector<16x1xi32> to vector<16x1xi32>
    %138 = vector.broadcast %137 : vector<16x1xi32> to vector<16x10xi32>
    %139 = arith.select %133, %138, %26 : vector<16x10xi1>, vector<16x10xi32>
    %c1_i32_40 = arith.constant 1 : i32
    %140 = vector.broadcast %c1_i32_40 : i32 to vector<16x512xi32>
    %141 = arith.addi %24, %140 : vector<16x512xi32>
    %c16_i32_41 = arith.constant 16 : i32
    %142 = vector.broadcast %c16_i32_41 : i32 to vector<16x512xi32>
    %143 = arith.shrsi %141, %142 : vector<16x512xi32>
    %c65535_i32_42 = arith.constant 65535 : i32
    %144 = vector.broadcast %c65535_i32_42 : i32 to vector<16x512xi32>
    %145 = arith.andi %143, %144 : vector<16x512xi32>
    %146 = arith.xori %141, %145 : vector<16x512xi32>
    %c-2048144789_i32_43 = arith.constant -2048144789 : i32
    %147 = vector.broadcast %c-2048144789_i32_43 : i32 to vector<16x512xi32>
    %148 = arith.muli %146, %147 : vector<16x512xi32>
    %c13_i32_44 = arith.constant 13 : i32
    %149 = vector.broadcast %c13_i32_44 : i32 to vector<16x512xi32>
    %150 = arith.shrsi %148, %149 : vector<16x512xi32>
    %c524287_i32_45 = arith.constant 524287 : i32
    %151 = vector.broadcast %c524287_i32_45 : i32 to vector<16x512xi32>
    %152 = arith.andi %150, %151 : vector<16x512xi32>
    %153 = arith.xori %148, %152 : vector<16x512xi32>
    %c-1028477387_i32_46 = arith.constant -1028477387 : i32
    %154 = vector.broadcast %c-1028477387_i32_46 : i32 to vector<16x512xi32>
    %155 = arith.muli %153, %154 : vector<16x512xi32>
    %c16_i32_47 = arith.constant 16 : i32
    %156 = vector.broadcast %c16_i32_47 : i32 to vector<16x512xi32>
    %157 = arith.shrsi %155, %156 : vector<16x512xi32>
    %c65535_i32_48 = arith.constant 65535 : i32
    %158 = vector.broadcast %c65535_i32_48 : i32 to vector<16x512xi32>
    %159 = arith.andi %157, %158 : vector<16x512xi32>
    %160 = arith.xori %155, %159 : vector<16x512xi32>
    %c8388607_i32_49 = arith.constant 8388607 : i32
    %161 = vector.broadcast %c8388607_i32_49 : i32 to vector<16x512xi32>
    %162 = arith.andi %160, %161 : vector<16x512xi32>
    %c1065353216_i32_50 = arith.constant 1065353216 : i32
    %163 = vector.broadcast %c1065353216_i32_50 : i32 to vector<16x512xi32>
    %164 = arith.ori %162, %163 : vector<16x512xi32>
    %165 = tpu.bitcast %164 : vector<16x512xi32> -> vector<16x512xf32>
    %cst_51 = arith.constant 1.000000e+00 : f32
    %166 = vector.broadcast %cst_51 : f32 to vector<16x512xf32>
    %167 = arith.subf %165, %166 : vector<16x512xf32>
    %cst_52 = arith.constant 5.96046448E-8 : f32
    %168 = vector.broadcast %cst_52 : f32 to vector<16x512xf32>
    %169 = arith.addf %167, %168 : vector<16x512xf32>
    %170 = tpu.bitcast %169 : vector<16x512xf32> -> vector<16x512xi32>
    %c23_i32_53 = arith.constant 23 : i32
    %171 = vector.broadcast %c23_i32_53 : i32 to vector<16x512xi32>
    %172 = arith.shrsi %170, %171 : vector<16x512xi32>
    %c255_i32_54 = arith.constant 255 : i32
    %173 = vector.broadcast %c255_i32_54 : i32 to vector<16x512xi32>
    %174 = arith.andi %172, %173 : vector<16x512xi32>
    %c127_i32_55 = arith.constant 127 : i32
    %175 = vector.broadcast %c127_i32_55 : i32 to vector<16x512xi32>
    %176 = arith.subi %174, %175 : vector<16x512xi32>
    %c8388607_i32_56 = arith.constant 8388607 : i32
    %177 = vector.broadcast %c8388607_i32_56 : i32 to vector<16x512xi32>
    %178 = arith.andi %170, %177 : vector<16x512xi32>
    %c1065353216_i32_57 = arith.constant 1065353216 : i32
    %179 = vector.broadcast %c1065353216_i32_57 : i32 to vector<16x512xi32>
    %180 = arith.ori %178, %179 : vector<16x512xi32>
    %181 = tpu.bitcast %180 : vector<16x512xi32> -> vector<16x512xf32>
    %cst_58 = arith.constant -0.0565708503 : f32
    %182 = vector.broadcast %cst_58 : f32 to vector<16x512xf32>
    %183 = arith.mulf %182, %181 : vector<16x512xf32>
    %cst_59 = arith.constant 0.447179556 : f32
    %184 = vector.broadcast %cst_59 : f32 to vector<16x512xf32>
    %185 = arith.addf %183, %184 : vector<16x512xf32>
    %186 = arith.mulf %185, %181 : vector<16x512xf32>
    %cst_60 = arith.constant -1.46995676 : f32
    %187 = vector.broadcast %cst_60 : f32 to vector<16x512xf32>
    %188 = arith.addf %186, %187 : vector<16x512xf32>
    %189 = arith.mulf %188, %181 : vector<16x512xf32>
    %cst_61 = arith.constant 2.82120252 : f32
    %190 = vector.broadcast %cst_61 : f32 to vector<16x512xf32>
    %191 = arith.addf %189, %190 : vector<16x512xf32>
    %192 = arith.mulf %191, %181 : vector<16x512xf32>
    %cst_62 = arith.constant -1.74179387 : f32
    %193 = vector.broadcast %cst_62 : f32 to vector<16x512xf32>
    %194 = arith.addf %192, %193 : vector<16x512xf32>
    %195 = arith.sitofp %176 : vector<16x512xi32> to vector<16x512xf32>
    %cst_63 = arith.constant 0.693147182 : f32
    %196 = vector.broadcast %cst_63 : f32 to vector<16x512xf32>
    %197 = arith.mulf %196, %195 : vector<16x512xf32>
    %198 = arith.addf %197, %194 : vector<16x512xf32>
    %cst_64 = arith.constant 0.000000e+00 : f32
    %199 = vector.broadcast %cst_64 : f32 to vector<16x512xf32>
    %200 = arith.subf %199, %198 : vector<16x512xf32>
    %cst_65 = arith.constant 1.000000e-10 : f32
    %201 = vector.broadcast %cst_65 : f32 to vector<16x512xf32>
    %202 = arith.maximumf %200, %201 : vector<16x512xf32>
    %203 = tpu.bitcast %202 : vector<16x512xf32> -> vector<16x512xi32>
    %c23_i32_66 = arith.constant 23 : i32
    %204 = vector.broadcast %c23_i32_66 : i32 to vector<16x512xi32>
    %205 = arith.shrsi %203, %204 : vector<16x512xi32>
    %c255_i32_67 = arith.constant 255 : i32
    %206 = vector.broadcast %c255_i32_67 : i32 to vector<16x512xi32>
    %207 = arith.andi %205, %206 : vector<16x512xi32>
    %c127_i32_68 = arith.constant 127 : i32
    %208 = vector.broadcast %c127_i32_68 : i32 to vector<16x512xi32>
    %209 = arith.subi %207, %208 : vector<16x512xi32>
    %c8388607_i32_69 = arith.constant 8388607 : i32
    %210 = vector.broadcast %c8388607_i32_69 : i32 to vector<16x512xi32>
    %211 = arith.andi %203, %210 : vector<16x512xi32>
    %c1065353216_i32_70 = arith.constant 1065353216 : i32
    %212 = vector.broadcast %c1065353216_i32_70 : i32 to vector<16x512xi32>
    %213 = arith.ori %211, %212 : vector<16x512xi32>
    %214 = tpu.bitcast %213 : vector<16x512xi32> -> vector<16x512xf32>
    %cst_71 = arith.constant -0.0565708503 : f32
    %215 = vector.broadcast %cst_71 : f32 to vector<16x512xf32>
    %216 = arith.mulf %215, %214 : vector<16x512xf32>
    %cst_72 = arith.constant 0.447179556 : f32
    %217 = vector.broadcast %cst_72 : f32 to vector<16x512xf32>
    %218 = arith.addf %216, %217 : vector<16x512xf32>
    %219 = arith.mulf %218, %214 : vector<16x512xf32>
    %cst_73 = arith.constant -1.46995676 : f32
    %220 = vector.broadcast %cst_73 : f32 to vector<16x512xf32>
    %221 = arith.addf %219, %220 : vector<16x512xf32>
    %222 = arith.mulf %221, %214 : vector<16x512xf32>
    %cst_74 = arith.constant 2.82120252 : f32
    %223 = vector.broadcast %cst_74 : f32 to vector<16x512xf32>
    %224 = arith.addf %222, %223 : vector<16x512xf32>
    %225 = arith.mulf %224, %214 : vector<16x512xf32>
    %cst_75 = arith.constant -1.74179387 : f32
    %226 = vector.broadcast %cst_75 : f32 to vector<16x512xf32>
    %227 = arith.addf %225, %226 : vector<16x512xf32>
    %228 = arith.sitofp %209 : vector<16x512xi32> to vector<16x512xf32>
    %cst_76 = arith.constant 0.693147182 : f32
    %229 = vector.broadcast %cst_76 : f32 to vector<16x512xf32>
    %230 = arith.mulf %229, %228 : vector<16x512xf32>
    %231 = arith.addf %230, %227 : vector<16x512xf32>
    %232 = arith.subf %10, %231 : vector<16x512xf32>
    %cst_77 = arith.constant dense<0xFF800000> : vector<16xf32>
    %233 = vector.multi_reduction <maximumf>, %232, %cst_77 [1] : vector<16x512xf32> to vector<16xf32>
    %234 = vector.shape_cast %233 : vector<16xf32> to vector<16x1xf32>
    %235 = vector.broadcast %234 : vector<16x1xf32> to vector<16x512xf32>
    %236 = arith.cmpf oeq, %232, %235 : vector<16x512xf32>
    %c2147483647_i32_78 = arith.constant 2147483647 : i32
    %237 = vector.broadcast %c2147483647_i32_78 : i32 to vector<16x512xi32>
    %238 = arith.select %236, %14, %237 : vector<16x512xi1>, vector<16x512xi32>
    %cst_79 = arith.constant dense<2147483647> : vector<16xi32>
    %239 = vector.multi_reduction <minsi>, %238, %cst_79 [1] : vector<16x512xi32> to vector<16xi32>
    %240 = vector.shape_cast %239 : vector<16xi32> to vector<16x1xi32>
    %c1_i32_80 = arith.constant 1 : i32
    %241 = vector.broadcast %c1_i32_80 : i32 to vector<16x10xi32>
    %242 = arith.cmpi eq, %27, %241 : vector<16x10xi32>
    %243 = vector.broadcast %234 : vector<16x1xf32> to vector<16x10xf32>
    %244 = arith.cmpf ogt, %243, %136 : vector<16x10xf32>
    %245 = arith.andi %242, %244 : vector<16x10xi1>
    %246 = vector.shape_cast %234 : vector<16x1xf32> to vector<16x1xf32>
    %247 = vector.broadcast %246 : vector<16x1xf32> to vector<16x10xf32>
    %248 = arith.select %245, %247, %136 : vector<16x10xi1>, vector<16x10xf32>
    %249 = vector.shape_cast %240 : vector<16x1xi32> to vector<16x1xi32>
    %250 = vector.broadcast %249 : vector<16x1xi32> to vector<16x10xi32>
    %251 = arith.select %245, %250, %139 : vector<16x10xi1>, vector<16x10xi32>
    %c2_i32 = arith.constant 2 : i32
    %252 = vector.broadcast %c2_i32 : i32 to vector<16x512xi32>
    %253 = arith.addi %24, %252 : vector<16x512xi32>
    %c16_i32_81 = arith.constant 16 : i32
    %254 = vector.broadcast %c16_i32_81 : i32 to vector<16x512xi32>
    %255 = arith.shrsi %253, %254 : vector<16x512xi32>
    %c65535_i32_82 = arith.constant 65535 : i32
    %256 = vector.broadcast %c65535_i32_82 : i32 to vector<16x512xi32>
    %257 = arith.andi %255, %256 : vector<16x512xi32>
    %258 = arith.xori %253, %257 : vector<16x512xi32>
    %c-2048144789_i32_83 = arith.constant -2048144789 : i32
    %259 = vector.broadcast %c-2048144789_i32_83 : i32 to vector<16x512xi32>
    %260 = arith.muli %258, %259 : vector<16x512xi32>
    %c13_i32_84 = arith.constant 13 : i32
    %261 = vector.broadcast %c13_i32_84 : i32 to vector<16x512xi32>
    %262 = arith.shrsi %260, %261 : vector<16x512xi32>
    %c524287_i32_85 = arith.constant 524287 : i32
    %263 = vector.broadcast %c524287_i32_85 : i32 to vector<16x512xi32>
    %264 = arith.andi %262, %263 : vector<16x512xi32>
    %265 = arith.xori %260, %264 : vector<16x512xi32>
    %c-1028477387_i32_86 = arith.constant -1028477387 : i32
    %266 = vector.broadcast %c-1028477387_i32_86 : i32 to vector<16x512xi32>
    %267 = arith.muli %265, %266 : vector<16x512xi32>
    %c16_i32_87 = arith.constant 16 : i32
    %268 = vector.broadcast %c16_i32_87 : i32 to vector<16x512xi32>
    %269 = arith.shrsi %267, %268 : vector<16x512xi32>
    %c65535_i32_88 = arith.constant 65535 : i32
    %270 = vector.broadcast %c65535_i32_88 : i32 to vector<16x512xi32>
    %271 = arith.andi %269, %270 : vector<16x512xi32>
    %272 = arith.xori %267, %271 : vector<16x512xi32>
    %c8388607_i32_89 = arith.constant 8388607 : i32
    %273 = vector.broadcast %c8388607_i32_89 : i32 to vector<16x512xi32>
    %274 = arith.andi %272, %273 : vector<16x512xi32>
    %c1065353216_i32_90 = arith.constant 1065353216 : i32
    %275 = vector.broadcast %c1065353216_i32_90 : i32 to vector<16x512xi32>
    %276 = arith.ori %274, %275 : vector<16x512xi32>
    %277 = tpu.bitcast %276 : vector<16x512xi32> -> vector<16x512xf32>
    %cst_91 = arith.constant 1.000000e+00 : f32
    %278 = vector.broadcast %cst_91 : f32 to vector<16x512xf32>
    %279 = arith.subf %277, %278 : vector<16x512xf32>
    %cst_92 = arith.constant 5.96046448E-8 : f32
    %280 = vector.broadcast %cst_92 : f32 to vector<16x512xf32>
    %281 = arith.addf %279, %280 : vector<16x512xf32>
    %282 = tpu.bitcast %281 : vector<16x512xf32> -> vector<16x512xi32>
    %c23_i32_93 = arith.constant 23 : i32
    %283 = vector.broadcast %c23_i32_93 : i32 to vector<16x512xi32>
    %284 = arith.shrsi %282, %283 : vector<16x512xi32>
    %c255_i32_94 = arith.constant 255 : i32
    %285 = vector.broadcast %c255_i32_94 : i32 to vector<16x512xi32>
    %286 = arith.andi %284, %285 : vector<16x512xi32>
    %c127_i32_95 = arith.constant 127 : i32
    %287 = vector.broadcast %c127_i32_95 : i32 to vector<16x512xi32>
    %288 = arith.subi %286, %287 : vector<16x512xi32>
    %c8388607_i32_96 = arith.constant 8388607 : i32
    %289 = vector.broadcast %c8388607_i32_96 : i32 to vector<16x512xi32>
    %290 = arith.andi %282, %289 : vector<16x512xi32>
    %c1065353216_i32_97 = arith.constant 1065353216 : i32
    %291 = vector.broadcast %c1065353216_i32_97 : i32 to vector<16x512xi32>
    %292 = arith.ori %290, %291 : vector<16x512xi32>
    %293 = tpu.bitcast %292 : vector<16x512xi32> -> vector<16x512xf32>
    %cst_98 = arith.constant -0.0565708503 : f32
    %294 = vector.broadcast %cst_98 : f32 to vector<16x512xf32>
    %295 = arith.mulf %294, %293 : vector<16x512xf32>
    %cst_99 = arith.constant 0.447179556 : f32
    %296 = vector.broadcast %cst_99 : f32 to vector<16x512xf32>
    %297 = arith.addf %295, %296 : vector<16x512xf32>
    %298 = arith.mulf %297, %293 : vector<16x512xf32>
    %cst_100 = arith.constant -1.46995676 : f32
    %299 = vector.broadcast %cst_100 : f32 to vector<16x512xf32>
    %300 = arith.addf %298, %299 : vector<16x512xf32>
    %301 = arith.mulf %300, %293 : vector<16x512xf32>
    %cst_101 = arith.constant 2.82120252 : f32
    %302 = vector.broadcast %cst_101 : f32 to vector<16x512xf32>
    %303 = arith.addf %301, %302 : vector<16x512xf32>
    %304 = arith.mulf %303, %293 : vector<16x512xf32>
    %cst_102 = arith.constant -1.74179387 : f32
    %305 = vector.broadcast %cst_102 : f32 to vector<16x512xf32>
    %306 = arith.addf %304, %305 : vector<16x512xf32>
    %307 = arith.sitofp %288 : vector<16x512xi32> to vector<16x512xf32>
    %cst_103 = arith.constant 0.693147182 : f32
    %308 = vector.broadcast %cst_103 : f32 to vector<16x512xf32>
    %309 = arith.mulf %308, %307 : vector<16x512xf32>
    %310 = arith.addf %309, %306 : vector<16x512xf32>
    %cst_104 = arith.constant 0.000000e+00 : f32
    %311 = vector.broadcast %cst_104 : f32 to vector<16x512xf32>
    %312 = arith.subf %311, %310 : vector<16x512xf32>
    %cst_105 = arith.constant 1.000000e-10 : f32
    %313 = vector.broadcast %cst_105 : f32 to vector<16x512xf32>
    %314 = arith.maximumf %312, %313 : vector<16x512xf32>
    %315 = tpu.bitcast %314 : vector<16x512xf32> -> vector<16x512xi32>
    %c23_i32_106 = arith.constant 23 : i32
    %316 = vector.broadcast %c23_i32_106 : i32 to vector<16x512xi32>
    %317 = arith.shrsi %315, %316 : vector<16x512xi32>
    %c255_i32_107 = arith.constant 255 : i32
    %318 = vector.broadcast %c255_i32_107 : i32 to vector<16x512xi32>
    %319 = arith.andi %317, %318 : vector<16x512xi32>
    %c127_i32_108 = arith.constant 127 : i32
    %320 = vector.broadcast %c127_i32_108 : i32 to vector<16x512xi32>
    %321 = arith.subi %319, %320 : vector<16x512xi32>
    %c8388607_i32_109 = arith.constant 8388607 : i32
    %322 = vector.broadcast %c8388607_i32_109 : i32 to vector<16x512xi32>
    %323 = arith.andi %315, %322 : vector<16x512xi32>
    %c1065353216_i32_110 = arith.constant 1065353216 : i32
    %324 = vector.broadcast %c1065353216_i32_110 : i32 to vector<16x512xi32>
    %325 = arith.ori %323, %324 : vector<16x512xi32>
    %326 = tpu.bitcast %325 : vector<16x512xi32> -> vector<16x512xf32>
    %cst_111 = arith.constant -0.0565708503 : f32
    %327 = vector.broadcast %cst_111 : f32 to vector<16x512xf32>
    %328 = arith.mulf %327, %326 : vector<16x512xf32>
    %cst_112 = arith.constant 0.447179556 : f32
    %329 = vector.broadcast %cst_112 : f32 to vector<16x512xf32>
    %330 = arith.addf %328, %329 : vector<16x512xf32>
    %331 = arith.mulf %330, %326 : vector<16x512xf32>
    %cst_113 = arith.constant -1.46995676 : f32
    %332 = vector.broadcast %cst_113 : f32 to vector<16x512xf32>
    %333 = arith.addf %331, %332 : vector<16x512xf32>
    %334 = arith.mulf %333, %326 : vector<16x512xf32>
    %cst_114 = arith.constant 2.82120252 : f32
    %335 = vector.broadcast %cst_114 : f32 to vector<16x512xf32>
    %336 = arith.addf %334, %335 : vector<16x512xf32>
    %337 = arith.mulf %336, %326 : vector<16x512xf32>
    %cst_115 = arith.constant -1.74179387 : f32
    %338 = vector.broadcast %cst_115 : f32 to vector<16x512xf32>
    %339 = arith.addf %337, %338 : vector<16x512xf32>
    %340 = arith.sitofp %321 : vector<16x512xi32> to vector<16x512xf32>
    %cst_116 = arith.constant 0.693147182 : f32
    %341 = vector.broadcast %cst_116 : f32 to vector<16x512xf32>
    %342 = arith.mulf %341, %340 : vector<16x512xf32>
    %343 = arith.addf %342, %339 : vector<16x512xf32>
    %344 = arith.subf %10, %343 : vector<16x512xf32>
    %cst_117 = arith.constant dense<0xFF800000> : vector<16xf32>
    %345 = vector.multi_reduction <maximumf>, %344, %cst_117 [1] : vector<16x512xf32> to vector<16xf32>
    %346 = vector.shape_cast %345 : vector<16xf32> to vector<16x1xf32>
    %347 = vector.broadcast %346 : vector<16x1xf32> to vector<16x512xf32>
    %348 = arith.cmpf oeq, %344, %347 : vector<16x512xf32>
    %c2147483647_i32_118 = arith.constant 2147483647 : i32
    %349 = vector.broadcast %c2147483647_i32_118 : i32 to vector<16x512xi32>
    %350 = arith.select %348, %14, %349 : vector<16x512xi1>, vector<16x512xi32>
    %cst_119 = arith.constant dense<2147483647> : vector<16xi32>
    %351 = vector.multi_reduction <minsi>, %350, %cst_119 [1] : vector<16x512xi32> to vector<16xi32>
    %352 = vector.shape_cast %351 : vector<16xi32> to vector<16x1xi32>
    %c2_i32_120 = arith.constant 2 : i32
    %353 = vector.broadcast %c2_i32_120 : i32 to vector<16x10xi32>
    %354 = arith.cmpi eq, %27, %353 : vector<16x10xi32>
    %355 = vector.broadcast %346 : vector<16x1xf32> to vector<16x10xf32>
    %356 = arith.cmpf ogt, %355, %248 : vector<16x10xf32>
    %357 = arith.andi %354, %356 : vector<16x10xi1>
    %358 = vector.shape_cast %346 : vector<16x1xf32> to vector<16x1xf32>
    %359 = vector.broadcast %358 : vector<16x1xf32> to vector<16x10xf32>
    %360 = arith.select %357, %359, %248 : vector<16x10xi1>, vector<16x10xf32>
    %361 = vector.shape_cast %352 : vector<16x1xi32> to vector<16x1xi32>
    %362 = vector.broadcast %361 : vector<16x1xi32> to vector<16x10xi32>
    %363 = arith.select %357, %362, %251 : vector<16x10xi1>, vector<16x10xi32>
    %c3_i32 = arith.constant 3 : i32
    %364 = vector.broadcast %c3_i32 : i32 to vector<16x512xi32>
    %365 = arith.addi %24, %364 : vector<16x512xi32>
    %c16_i32_121 = arith.constant 16 : i32
    %366 = vector.broadcast %c16_i32_121 : i32 to vector<16x512xi32>
    %367 = arith.shrsi %365, %366 : vector<16x512xi32>
    %c65535_i32_122 = arith.constant 65535 : i32
    %368 = vector.broadcast %c65535_i32_122 : i32 to vector<16x512xi32>
    %369 = arith.andi %367, %368 : vector<16x512xi32>
    %370 = arith.xori %365, %369 : vector<16x512xi32>
    %c-2048144789_i32_123 = arith.constant -2048144789 : i32
    %371 = vector.broadcast %c-2048144789_i32_123 : i32 to vector<16x512xi32>
    %372 = arith.muli %370, %371 : vector<16x512xi32>
    %c13_i32_124 = arith.constant 13 : i32
    %373 = vector.broadcast %c13_i32_124 : i32 to vector<16x512xi32>
    %374 = arith.shrsi %372, %373 : vector<16x512xi32>
    %c524287_i32_125 = arith.constant 524287 : i32
    %375 = vector.broadcast %c524287_i32_125 : i32 to vector<16x512xi32>
    %376 = arith.andi %374, %375 : vector<16x512xi32>
    %377 = arith.xori %372, %376 : vector<16x512xi32>
    %c-1028477387_i32_126 = arith.constant -1028477387 : i32
    %378 = vector.broadcast %c-1028477387_i32_126 : i32 to vector<16x512xi32>
    %379 = arith.muli %377, %378 : vector<16x512xi32>
    %c16_i32_127 = arith.constant 16 : i32
    %380 = vector.broadcast %c16_i32_127 : i32 to vector<16x512xi32>
    %381 = arith.shrsi %379, %380 : vector<16x512xi32>
    %c65535_i32_128 = arith.constant 65535 : i32
    %382 = vector.broadcast %c65535_i32_128 : i32 to vector<16x512xi32>
    %383 = arith.andi %381, %382 : vector<16x512xi32>
    %384 = arith.xori %379, %383 : vector<16x512xi32>
    %c8388607_i32_129 = arith.constant 8388607 : i32
    %385 = vector.broadcast %c8388607_i32_129 : i32 to vector<16x512xi32>
    %386 = arith.andi %384, %385 : vector<16x512xi32>
    %c1065353216_i32_130 = arith.constant 1065353216 : i32
    %387 = vector.broadcast %c1065353216_i32_130 : i32 to vector<16x512xi32>
    %388 = arith.ori %386, %387 : vector<16x512xi32>
    %389 = tpu.bitcast %388 : vector<16x512xi32> -> vector<16x512xf32>
    %cst_131 = arith.constant 1.000000e+00 : f32
    %390 = vector.broadcast %cst_131 : f32 to vector<16x512xf32>
    %391 = arith.subf %389, %390 : vector<16x512xf32>
    %cst_132 = arith.constant 5.96046448E-8 : f32
    %392 = vector.broadcast %cst_132 : f32 to vector<16x512xf32>
    %393 = arith.addf %391, %392 : vector<16x512xf32>
    %394 = tpu.bitcast %393 : vector<16x512xf32> -> vector<16x512xi32>
    %c23_i32_133 = arith.constant 23 : i32
    %395 = vector.broadcast %c23_i32_133 : i32 to vector<16x512xi32>
    %396 = arith.shrsi %394, %395 : vector<16x512xi32>
    %c255_i32_134 = arith.constant 255 : i32
    %397 = vector.broadcast %c255_i32_134 : i32 to vector<16x512xi32>
    %398 = arith.andi %396, %397 : vector<16x512xi32>
    %c127_i32_135 = arith.constant 127 : i32
    %399 = vector.broadcast %c127_i32_135 : i32 to vector<16x512xi32>
    %400 = arith.subi %398, %399 : vector<16x512xi32>
    %c8388607_i32_136 = arith.constant 8388607 : i32
    %401 = vector.broadcast %c8388607_i32_136 : i32 to vector<16x512xi32>
    %402 = arith.andi %394, %401 : vector<16x512xi32>
    %c1065353216_i32_137 = arith.constant 1065353216 : i32
    %403 = vector.broadcast %c1065353216_i32_137 : i32 to vector<16x512xi32>
    %404 = arith.ori %402, %403 : vector<16x512xi32>
    %405 = tpu.bitcast %404 : vector<16x512xi32> -> vector<16x512xf32>
    %cst_138 = arith.constant -0.0565708503 : f32
    %406 = vector.broadcast %cst_138 : f32 to vector<16x512xf32>
    %407 = arith.mulf %406, %405 : vector<16x512xf32>
    %cst_139 = arith.constant 0.447179556 : f32
    %408 = vector.broadcast %cst_139 : f32 to vector<16x512xf32>
    %409 = arith.addf %407, %408 : vector<16x512xf32>
    %410 = arith.mulf %409, %405 : vector<16x512xf32>
    %cst_140 = arith.constant -1.46995676 : f32
    %411 = vector.broadcast %cst_140 : f32 to vector<16x512xf32>
    %412 = arith.addf %410, %411 : vector<16x512xf32>
    %413 = arith.mulf %412, %405 : vector<16x512xf32>
    %cst_141 = arith.constant 2.82120252 : f32
    %414 = vector.broadcast %cst_141 : f32 to vector<16x512xf32>
    %415 = arith.addf %413, %414 : vector<16x512xf32>
    %416 = arith.mulf %415, %405 : vector<16x512xf32>
    %cst_142 = arith.constant -1.74179387 : f32
    %417 = vector.broadcast %cst_142 : f32 to vector<16x512xf32>
    %418 = arith.addf %416, %417 : vector<16x512xf32>
    %419 = arith.sitofp %400 : vector<16x512xi32> to vector<16x512xf32>
    %cst_143 = arith.constant 0.693147182 : f32
    %420 = vector.broadcast %cst_143 : f32 to vector<16x512xf32>
    %421 = arith.mulf %420, %419 : vector<16x512xf32>
    %422 = arith.addf %421, %418 : vector<16x512xf32>
    %cst_144 = arith.constant 0.000000e+00 : f32
    %423 = vector.broadcast %cst_144 : f32 to vector<16x512xf32>
    %424 = arith.subf %423, %422 : vector<16x512xf32>
    %cst_145 = arith.constant 1.000000e-10 : f32
    %425 = vector.broadcast %cst_145 : f32 to vector<16x512xf32>
    %426 = arith.maximumf %424, %425 : vector<16x512xf32>
    %427 = tpu.bitcast %426 : vector<16x512xf32> -> vector<16x512xi32>
    %c23_i32_146 = arith.constant 23 : i32
    %428 = vector.broadcast %c23_i32_146 : i32 to vector<16x512xi32>
    %429 = arith.shrsi %427, %428 : vector<16x512xi32>
    %c255_i32_147 = arith.constant 255 : i32
    %430 = vector.broadcast %c255_i32_147 : i32 to vector<16x512xi32>
    %431 = arith.andi %429, %430 : vector<16x512xi32>
    %c127_i32_148 = arith.constant 127 : i32
    %432 = vector.broadcast %c127_i32_148 : i32 to vector<16x512xi32>
    %433 = arith.subi %431, %432 : vector<16x512xi32>
    %c8388607_i32_149 = arith.constant 8388607 : i32
    %434 = vector.broadcast %c8388607_i32_149 : i32 to vector<16x512xi32>
    %435 = arith.andi %427, %434 : vector<16x512xi32>
    %c1065353216_i32_150 = arith.constant 1065353216 : i32
    %436 = vector.broadcast %c1065353216_i32_150 : i32 to vector<16x512xi32>
    %437 = arith.ori %435, %436 : vector<16x512xi32>
    %438 = tpu.bitcast %437 : vector<16x512xi32> -> vector<16x512xf32>
    %cst_151 = arith.constant -0.0565708503 : f32
    %439 = vector.broadcast %cst_151 : f32 to vector<16x512xf32>
    %440 = arith.mulf %439, %438 : vector<16x512xf32>
    %cst_152 = arith.constant 0.447179556 : f32
    %441 = vector.broadcast %cst_152 : f32 to vector<16x512xf32>
    %442 = arith.addf %440, %441 : vector<16x512xf32>
    %443 = arith.mulf %442, %438 : vector<16x512xf32>
    %cst_153 = arith.constant -1.46995676 : f32
    %444 = vector.broadcast %cst_153 : f32 to vector<16x512xf32>
    %445 = arith.addf %443, %444 : vector<16x512xf32>
    %446 = arith.mulf %445, %438 : vector<16x512xf32>
    %cst_154 = arith.constant 2.82120252 : f32
    %447 = vector.broadcast %cst_154 : f32 to vector<16x512xf32>
    %448 = arith.addf %446, %447 : vector<16x512xf32>
    %449 = arith.mulf %448, %438 : vector<16x512xf32>
    %cst_155 = arith.constant -1.74179387 : f32
    %450 = vector.broadcast %cst_155 : f32 to vector<16x512xf32>
    %451 = arith.addf %449, %450 : vector<16x512xf32>
    %452 = arith.sitofp %433 : vector<16x512xi32> to vector<16x512xf32>
    %cst_156 = arith.constant 0.693147182 : f32
    %453 = vector.broadcast %cst_156 : f32 to vector<16x512xf32>
    %454 = arith.mulf %453, %452 : vector<16x512xf32>
    %455 = arith.addf %454, %451 : vector<16x512xf32>
    %456 = arith.subf %10, %455 : vector<16x512xf32>
    %cst_157 = arith.constant dense<0xFF800000> : vector<16xf32>
    %457 = vector.multi_reduction <maximumf>, %456, %cst_157 [1] : vector<16x512xf32> to vector<16xf32>
    %458 = vector.shape_cast %457 : vector<16xf32> to vector<16x1xf32>
    %459 = vector.broadcast %458 : vector<16x1xf32> to vector<16x512xf32>
    %460 = arith.cmpf oeq, %456, %459 : vector<16x512xf32>
    %c2147483647_i32_158 = arith.constant 2147483647 : i32
    %461 = vector.broadcast %c2147483647_i32_158 : i32 to vector<16x512xi32>
    %462 = arith.select %460, %14, %461 : vector<16x512xi1>, vector<16x512xi32>
    %cst_159 = arith.constant dense<2147483647> : vector<16xi32>
    %463 = vector.multi_reduction <minsi>, %462, %cst_159 [1] : vector<16x512xi32> to vector<16xi32>
    %464 = vector.shape_cast %463 : vector<16xi32> to vector<16x1xi32>
    %c3_i32_160 = arith.constant 3 : i32
    %465 = vector.broadcast %c3_i32_160 : i32 to vector<16x10xi32>
    %466 = arith.cmpi eq, %27, %465 : vector<16x10xi32>
    %467 = vector.broadcast %458 : vector<16x1xf32> to vector<16x10xf32>
    %468 = arith.cmpf ogt, %467, %360 : vector<16x10xf32>
    %469 = arith.andi %466, %468 : vector<16x10xi1>
    %470 = vector.shape_cast %458 : vector<16x1xf32> to vector<16x1xf32>
    %471 = vector.broadcast %470 : vector<16x1xf32> to vector<16x10xf32>
    %472 = arith.select %469, %471, %360 : vector<16x10xi1>, vector<16x10xf32>
    %473 = vector.shape_cast %464 : vector<16x1xi32> to vector<16x1xi32>
    %474 = vector.broadcast %473 : vector<16x1xi32> to vector<16x10xi32>
    %475 = arith.select %469, %474, %363 : vector<16x10xi1>, vector<16x10xi32>
    %c4_i32 = arith.constant 4 : i32
    %476 = vector.broadcast %c4_i32 : i32 to vector<16x512xi32>
    %477 = arith.addi %24, %476 : vector<16x512xi32>
    %c16_i32_161 = arith.constant 16 : i32
    %478 = vector.broadcast %c16_i32_161 : i32 to vector<16x512xi32>
    %479 = arith.shrsi %477, %478 : vector<16x512xi32>
    %c65535_i32_162 = arith.constant 65535 : i32
    %480 = vector.broadcast %c65535_i32_162 : i32 to vector<16x512xi32>
    %481 = arith.andi %479, %480 : vector<16x512xi32>
    %482 = arith.xori %477, %481 : vector<16x512xi32>
    %c-2048144789_i32_163 = arith.constant -2048144789 : i32
    %483 = vector.broadcast %c-2048144789_i32_163 : i32 to vector<16x512xi32>
    %484 = arith.muli %482, %483 : vector<16x512xi32>
    %c13_i32_164 = arith.constant 13 : i32
    %485 = vector.broadcast %c13_i32_164 : i32 to vector<16x512xi32>
    %486 = arith.shrsi %484, %485 : vector<16x512xi32>
    %c524287_i32_165 = arith.constant 524287 : i32
    %487 = vector.broadcast %c524287_i32_165 : i32 to vector<16x512xi32>
    %488 = arith.andi %486, %487 : vector<16x512xi32>
    %489 = arith.xori %484, %488 : vector<16x512xi32>
    %c-1028477387_i32_166 = arith.constant -1028477387 : i32
    %490 = vector.broadcast %c-1028477387_i32_166 : i32 to vector<16x512xi32>
    %491 = arith.muli %489, %490 : vector<16x512xi32>
    %c16_i32_167 = arith.constant 16 : i32
    %492 = vector.broadcast %c16_i32_167 : i32 to vector<16x512xi32>
    %493 = arith.shrsi %491, %492 : vector<16x512xi32>
    %c65535_i32_168 = arith.constant 65535 : i32
    %494 = vector.broadcast %c65535_i32_168 : i32 to vector<16x512xi32>
    %495 = arith.andi %493, %494 : vector<16x512xi32>
    %496 = arith.xori %491, %495 : vector<16x512xi32>
    %c8388607_i32_169 = arith.constant 8388607 : i32
    %497 = vector.broadcast %c8388607_i32_169 : i32 to vector<16x512xi32>
    %498 = arith.andi %496, %497 : vector<16x512xi32>
    %c1065353216_i32_170 = arith.constant 1065353216 : i32
    %499 = vector.broadcast %c1065353216_i32_170 : i32 to vector<16x512xi32>
    %500 = arith.ori %498, %499 : vector<16x512xi32>
    %501 = tpu.bitcast %500 : vector<16x512xi32> -> vector<16x512xf32>
    %cst_171 = arith.constant 1.000000e+00 : f32
    %502 = vector.broadcast %cst_171 : f32 to vector<16x512xf32>
    %503 = arith.subf %501, %502 : vector<16x512xf32>
    %cst_172 = arith.constant 5.96046448E-8 : f32
    %504 = vector.broadcast %cst_172 : f32 to vector<16x512xf32>
    %505 = arith.addf %503, %504 : vector<16x512xf32>
    %506 = tpu.bitcast %505 : vector<16x512xf32> -> vector<16x512xi32>
    %c23_i32_173 = arith.constant 23 : i32
    %507 = vector.broadcast %c23_i32_173 : i32 to vector<16x512xi32>
    %508 = arith.shrsi %506, %507 : vector<16x512xi32>
    %c255_i32_174 = arith.constant 255 : i32
    %509 = vector.broadcast %c255_i32_174 : i32 to vector<16x512xi32>
    %510 = arith.andi %508, %509 : vector<16x512xi32>
    %c127_i32_175 = arith.constant 127 : i32
    %511 = vector.broadcast %c127_i32_175 : i32 to vector<16x512xi32>
    %512 = arith.subi %510, %511 : vector<16x512xi32>
    %c8388607_i32_176 = arith.constant 8388607 : i32
    %513 = vector.broadcast %c8388607_i32_176 : i32 to vector<16x512xi32>
    %514 = arith.andi %506, %513 : vector<16x512xi32>
    %c1065353216_i32_177 = arith.constant 1065353216 : i32
    %515 = vector.broadcast %c1065353216_i32_177 : i32 to vector<16x512xi32>
    %516 = arith.ori %514, %515 : vector<16x512xi32>
    %517 = tpu.bitcast %516 : vector<16x512xi32> -> vector<16x512xf32>
    %cst_178 = arith.constant -0.0565708503 : f32
    %518 = vector.broadcast %cst_178 : f32 to vector<16x512xf32>
    %519 = arith.mulf %518, %517 : vector<16x512xf32>
    %cst_179 = arith.constant 0.447179556 : f32
    %520 = vector.broadcast %cst_179 : f32 to vector<16x512xf32>
    %521 = arith.addf %519, %520 : vector<16x512xf32>
    %522 = arith.mulf %521, %517 : vector<16x512xf32>
    %cst_180 = arith.constant -1.46995676 : f32
    %523 = vector.broadcast %cst_180 : f32 to vector<16x512xf32>
    %524 = arith.addf %522, %523 : vector<16x512xf32>
    %525 = arith.mulf %524, %517 : vector<16x512xf32>
    %cst_181 = arith.constant 2.82120252 : f32
    %526 = vector.broadcast %cst_181 : f32 to vector<16x512xf32>
    %527 = arith.addf %525, %526 : vector<16x512xf32>
    %528 = arith.mulf %527, %517 : vector<16x512xf32>
    %cst_182 = arith.constant -1.74179387 : f32
    %529 = vector.broadcast %cst_182 : f32 to vector<16x512xf32>
    %530 = arith.addf %528, %529 : vector<16x512xf32>
    %531 = arith.sitofp %512 : vector<16x512xi32> to vector<16x512xf32>
    %cst_183 = arith.constant 0.693147182 : f32
    %532 = vector.broadcast %cst_183 : f32 to vector<16x512xf32>
    %533 = arith.mulf %532, %531 : vector<16x512xf32>
    %534 = arith.addf %533, %530 : vector<16x512xf32>
    %cst_184 = arith.constant 0.000000e+00 : f32
    %535 = vector.broadcast %cst_184 : f32 to vector<16x512xf32>
    %536 = arith.subf %535, %534 : vector<16x512xf32>
    %cst_185 = arith.constant 1.000000e-10 : f32
    %537 = vector.broadcast %cst_185 : f32 to vector<16x512xf32>
    %538 = arith.maximumf %536, %537 : vector<16x512xf32>
    %539 = tpu.bitcast %538 : vector<16x512xf32> -> vector<16x512xi32>
    %c23_i32_186 = arith.constant 23 : i32
    %540 = vector.broadcast %c23_i32_186 : i32 to vector<16x512xi32>
    %541 = arith.shrsi %539, %540 : vector<16x512xi32>
    %c255_i32_187 = arith.constant 255 : i32
    %542 = vector.broadcast %c255_i32_187 : i32 to vector<16x512xi32>
    %543 = arith.andi %541, %542 : vector<16x512xi32>
    %c127_i32_188 = arith.constant 127 : i32
    %544 = vector.broadcast %c127_i32_188 : i32 to vector<16x512xi32>
    %545 = arith.subi %543, %544 : vector<16x512xi32>
    %c8388607_i32_189 = arith.constant 8388607 : i32
    %546 = vector.broadcast %c8388607_i32_189 : i32 to vector<16x512xi32>
    %547 = arith.andi %539, %546 : vector<16x512xi32>
    %c1065353216_i32_190 = arith.constant 1065353216 : i32
    %548 = vector.broadcast %c1065353216_i32_190 : i32 to vector<16x512xi32>
    %549 = arith.ori %547, %548 : vector<16x512xi32>
    %550 = tpu.bitcast %549 : vector<16x512xi32> -> vector<16x512xf32>
    %cst_191 = arith.constant -0.0565708503 : f32
    %551 = vector.broadcast %cst_191 : f32 to vector<16x512xf32>
    %552 = arith.mulf %551, %550 : vector<16x512xf32>
    %cst_192 = arith.constant 0.447179556 : f32
    %553 = vector.broadcast %cst_192 : f32 to vector<16x512xf32>
    %554 = arith.addf %552, %553 : vector<16x512xf32>
    %555 = arith.mulf %554, %550 : vector<16x512xf32>
    %cst_193 = arith.constant -1.46995676 : f32
    %556 = vector.broadcast %cst_193 : f32 to vector<16x512xf32>
    %557 = arith.addf %555, %556 : vector<16x512xf32>
    %558 = arith.mulf %557, %550 : vector<16x512xf32>
    %cst_194 = arith.constant 2.82120252 : f32
    %559 = vector.broadcast %cst_194 : f32 to vector<16x512xf32>
    %560 = arith.addf %558, %559 : vector<16x512xf32>
    %561 = arith.mulf %560, %550 : vector<16x512xf32>
    %cst_195 = arith.constant -1.74179387 : f32
    %562 = vector.broadcast %cst_195 : f32 to vector<16x512xf32>
    %563 = arith.addf %561, %562 : vector<16x512xf32>
    %564 = arith.sitofp %545 : vector<16x512xi32> to vector<16x512xf32>
    %cst_196 = arith.constant 0.693147182 : f32
    %565 = vector.broadcast %cst_196 : f32 to vector<16x512xf32>
    %566 = arith.mulf %565, %564 : vector<16x512xf32>
    %567 = arith.addf %566, %563 : vector<16x512xf32>
    %568 = arith.subf %10, %567 : vector<16x512xf32>
    %cst_197 = arith.constant dense<0xFF800000> : vector<16xf32>
    %569 = vector.multi_reduction <maximumf>, %568, %cst_197 [1] : vector<16x512xf32> to vector<16xf32>
    %570 = vector.shape_cast %569 : vector<16xf32> to vector<16x1xf32>
    %571 = vector.broadcast %570 : vector<16x1xf32> to vector<16x512xf32>
    %572 = arith.cmpf oeq, %568, %571 : vector<16x512xf32>
    %c2147483647_i32_198 = arith.constant 2147483647 : i32
    %573 = vector.broadcast %c2147483647_i32_198 : i32 to vector<16x512xi32>
    %574 = arith.select %572, %14, %573 : vector<16x512xi1>, vector<16x512xi32>
    %cst_199 = arith.constant dense<2147483647> : vector<16xi32>
    %575 = vector.multi_reduction <minsi>, %574, %cst_199 [1] : vector<16x512xi32> to vector<16xi32>
    %576 = vector.shape_cast %575 : vector<16xi32> to vector<16x1xi32>
    %c4_i32_200 = arith.constant 4 : i32
    %577 = vector.broadcast %c4_i32_200 : i32 to vector<16x10xi32>
    %578 = arith.cmpi eq, %27, %577 : vector<16x10xi32>
    %579 = vector.broadcast %570 : vector<16x1xf32> to vector<16x10xf32>
    %580 = arith.cmpf ogt, %579, %472 : vector<16x10xf32>
    %581 = arith.andi %578, %580 : vector<16x10xi1>
    %582 = vector.shape_cast %570 : vector<16x1xf32> to vector<16x1xf32>
    %583 = vector.broadcast %582 : vector<16x1xf32> to vector<16x10xf32>
    %584 = arith.select %581, %583, %472 : vector<16x10xi1>, vector<16x10xf32>
    %585 = vector.shape_cast %576 : vector<16x1xi32> to vector<16x1xi32>
    %586 = vector.broadcast %585 : vector<16x1xi32> to vector<16x10xi32>
    %587 = arith.select %581, %586, %475 : vector<16x10xi1>, vector<16x10xi32>
    %c5_i32 = arith.constant 5 : i32
    %588 = vector.broadcast %c5_i32 : i32 to vector<16x512xi32>
    %589 = arith.addi %24, %588 : vector<16x512xi32>
    %c16_i32_201 = arith.constant 16 : i32
    %590 = vector.broadcast %c16_i32_201 : i32 to vector<16x512xi32>
    %591 = arith.shrsi %589, %590 : vector<16x512xi32>
    %c65535_i32_202 = arith.constant 65535 : i32
    %592 = vector.broadcast %c65535_i32_202 : i32 to vector<16x512xi32>
    %593 = arith.andi %591, %592 : vector<16x512xi32>
    %594 = arith.xori %589, %593 : vector<16x512xi32>
    %c-2048144789_i32_203 = arith.constant -2048144789 : i32
    %595 = vector.broadcast %c-2048144789_i32_203 : i32 to vector<16x512xi32>
    %596 = arith.muli %594, %595 : vector<16x512xi32>
    %c13_i32_204 = arith.constant 13 : i32
    %597 = vector.broadcast %c13_i32_204 : i32 to vector<16x512xi32>
    %598 = arith.shrsi %596, %597 : vector<16x512xi32>
    %c524287_i32_205 = arith.constant 524287 : i32
    %599 = vector.broadcast %c524287_i32_205 : i32 to vector<16x512xi32>
    %600 = arith.andi %598, %599 : vector<16x512xi32>
    %601 = arith.xori %596, %600 : vector<16x512xi32>
    %c-1028477387_i32_206 = arith.constant -1028477387 : i32
    %602 = vector.broadcast %c-1028477387_i32_206 : i32 to vector<16x512xi32>
    %603 = arith.muli %601, %602 : vector<16x512xi32>
    %c16_i32_207 = arith.constant 16 : i32
    %604 = vector.broadcast %c16_i32_207 : i32 to vector<16x512xi32>
    %605 = arith.shrsi %603, %604 : vector<16x512xi32>
    %c65535_i32_208 = arith.constant 65535 : i32
    %606 = vector.broadcast %c65535_i32_208 : i32 to vector<16x512xi32>
    %607 = arith.andi %605, %606 : vector<16x512xi32>
    %608 = arith.xori %603, %607 : vector<16x512xi32>
    %c8388607_i32_209 = arith.constant 8388607 : i32
    %609 = vector.broadcast %c8388607_i32_209 : i32 to vector<16x512xi32>
    %610 = arith.andi %608, %609 : vector<16x512xi32>
    %c1065353216_i32_210 = arith.constant 1065353216 : i32
    %611 = vector.broadcast %c1065353216_i32_210 : i32 to vector<16x512xi32>
    %612 = arith.ori %610, %611 : vector<16x512xi32>
    %613 = tpu.bitcast %612 : vector<16x512xi32> -> vector<16x512xf32>
    %cst_211 = arith.constant 1.000000e+00 : f32
    %614 = vector.broadcast %cst_211 : f32 to vector<16x512xf32>
    %615 = arith.subf %613, %614 : vector<16x512xf32>
    %cst_212 = arith.constant 5.96046448E-8 : f32
    %616 = vector.broadcast %cst_212 : f32 to vector<16x512xf32>
    %617 = arith.addf %615, %616 : vector<16x512xf32>
    %618 = tpu.bitcast %617 : vector<16x512xf32> -> vector<16x512xi32>
    %c23_i32_213 = arith.constant 23 : i32
    %619 = vector.broadcast %c23_i32_213 : i32 to vector<16x512xi32>
    %620 = arith.shrsi %618, %619 : vector<16x512xi32>
    %c255_i32_214 = arith.constant 255 : i32
    %621 = vector.broadcast %c255_i32_214 : i32 to vector<16x512xi32>
    %622 = arith.andi %620, %621 : vector<16x512xi32>
    %c127_i32_215 = arith.constant 127 : i32
    %623 = vector.broadcast %c127_i32_215 : i32 to vector<16x512xi32>
    %624 = arith.subi %622, %623 : vector<16x512xi32>
    %c8388607_i32_216 = arith.constant 8388607 : i32
    %625 = vector.broadcast %c8388607_i32_216 : i32 to vector<16x512xi32>
    %626 = arith.andi %618, %625 : vector<16x512xi32>
    %c1065353216_i32_217 = arith.constant 1065353216 : i32
    %627 = vector.broadcast %c1065353216_i32_217 : i32 to vector<16x512xi32>
    %628 = arith.ori %626, %627 : vector<16x512xi32>
    %629 = tpu.bitcast %628 : vector<16x512xi32> -> vector<16x512xf32>
    %cst_218 = arith.constant -0.0565708503 : f32
    %630 = vector.broadcast %cst_218 : f32 to vector<16x512xf32>
    %631 = arith.mulf %630, %629 : vector<16x512xf32>
    %cst_219 = arith.constant 0.447179556 : f32
    %632 = vector.broadcast %cst_219 : f32 to vector<16x512xf32>
    %633 = arith.addf %631, %632 : vector<16x512xf32>
    %634 = arith.mulf %633, %629 : vector<16x512xf32>
    %cst_220 = arith.constant -1.46995676 : f32
    %635 = vector.broadcast %cst_220 : f32 to vector<16x512xf32>
    %636 = arith.addf %634, %635 : vector<16x512xf32>
    %637 = arith.mulf %636, %629 : vector<16x512xf32>
    %cst_221 = arith.constant 2.82120252 : f32
    %638 = vector.broadcast %cst_221 : f32 to vector<16x512xf32>
    %639 = arith.addf %637, %638 : vector<16x512xf32>
    %640 = arith.mulf %639, %629 : vector<16x512xf32>
    %cst_222 = arith.constant -1.74179387 : f32
    %641 = vector.broadcast %cst_222 : f32 to vector<16x512xf32>
    %642 = arith.addf %640, %641 : vector<16x512xf32>
    %643 = arith.sitofp %624 : vector<16x512xi32> to vector<16x512xf32>
    %cst_223 = arith.constant 0.693147182 : f32
    %644 = vector.broadcast %cst_223 : f32 to vector<16x512xf32>
    %645 = arith.mulf %644, %643 : vector<16x512xf32>
    %646 = arith.addf %645, %642 : vector<16x512xf32>
    %cst_224 = arith.constant 0.000000e+00 : f32
    %647 = vector.broadcast %cst_224 : f32 to vector<16x512xf32>
    %648 = arith.subf %647, %646 : vector<16x512xf32>
    %cst_225 = arith.constant 1.000000e-10 : f32
    %649 = vector.broadcast %cst_225 : f32 to vector<16x512xf32>
    %650 = arith.maximumf %648, %649 : vector<16x512xf32>
    %651 = tpu.bitcast %650 : vector<16x512xf32> -> vector<16x512xi32>
    %c23_i32_226 = arith.constant 23 : i32
    %652 = vector.broadcast %c23_i32_226 : i32 to vector<16x512xi32>
    %653 = arith.shrsi %651, %652 : vector<16x512xi32>
    %c255_i32_227 = arith.constant 255 : i32
    %654 = vector.broadcast %c255_i32_227 : i32 to vector<16x512xi32>
    %655 = arith.andi %653, %654 : vector<16x512xi32>
    %c127_i32_228 = arith.constant 127 : i32
    %656 = vector.broadcast %c127_i32_228 : i32 to vector<16x512xi32>
    %657 = arith.subi %655, %656 : vector<16x512xi32>
    %c8388607_i32_229 = arith.constant 8388607 : i32
    %658 = vector.broadcast %c8388607_i32_229 : i32 to vector<16x512xi32>
    %659 = arith.andi %651, %658 : vector<16x512xi32>
    %c1065353216_i32_230 = arith.constant 1065353216 : i32
    %660 = vector.broadcast %c1065353216_i32_230 : i32 to vector<16x512xi32>
    %661 = arith.ori %659, %660 : vector<16x512xi32>
    %662 = tpu.bitcast %661 : vector<16x512xi32> -> vector<16x512xf32>
    %cst_231 = arith.constant -0.0565708503 : f32
    %663 = vector.broadcast %cst_231 : f32 to vector<16x512xf32>
    %664 = arith.mulf %663, %662 : vector<16x512xf32>
    %cst_232 = arith.constant 0.447179556 : f32
    %665 = vector.broadcast %cst_232 : f32 to vector<16x512xf32>
    %666 = arith.addf %664, %665 : vector<16x512xf32>
    %667 = arith.mulf %666, %662 : vector<16x512xf32>
    %cst_233 = arith.constant -1.46995676 : f32
    %668 = vector.broadcast %cst_233 : f32 to vector<16x512xf32>
    %669 = arith.addf %667, %668 : vector<16x512xf32>
    %670 = arith.mulf %669, %662 : vector<16x512xf32>
    %cst_234 = arith.constant 2.82120252 : f32
    %671 = vector.broadcast %cst_234 : f32 to vector<16x512xf32>
    %672 = arith.addf %670, %671 : vector<16x512xf32>
    %673 = arith.mulf %672, %662 : vector<16x512xf32>
    %cst_235 = arith.constant -1.74179387 : f32
    %674 = vector.broadcast %cst_235 : f32 to vector<16x512xf32>
    %675 = arith.addf %673, %674 : vector<16x512xf32>
    %676 = arith.sitofp %657 : vector<16x512xi32> to vector<16x512xf32>
    %cst_236 = arith.constant 0.693147182 : f32
    %677 = vector.broadcast %cst_236 : f32 to vector<16x512xf32>
    %678 = arith.mulf %677, %676 : vector<16x512xf32>
    %679 = arith.addf %678, %675 : vector<16x512xf32>
    %680 = arith.subf %10, %679 : vector<16x512xf32>
    %cst_237 = arith.constant dense<0xFF800000> : vector<16xf32>
    %681 = vector.multi_reduction <maximumf>, %680, %cst_237 [1] : vector<16x512xf32> to vector<16xf32>
    %682 = vector.shape_cast %681 : vector<16xf32> to vector<16x1xf32>
    %683 = vector.broadcast %682 : vector<16x1xf32> to vector<16x512xf32>
    %684 = arith.cmpf oeq, %680, %683 : vector<16x512xf32>
    %c2147483647_i32_238 = arith.constant 2147483647 : i32
    %685 = vector.broadcast %c2147483647_i32_238 : i32 to vector<16x512xi32>
    %686 = arith.select %684, %14, %685 : vector<16x512xi1>, vector<16x512xi32>
    %cst_239 = arith.constant dense<2147483647> : vector<16xi32>
    %687 = vector.multi_reduction <minsi>, %686, %cst_239 [1] : vector<16x512xi32> to vector<16xi32>
    %688 = vector.shape_cast %687 : vector<16xi32> to vector<16x1xi32>
    %c5_i32_240 = arith.constant 5 : i32
    %689 = vector.broadcast %c5_i32_240 : i32 to vector<16x10xi32>
    %690 = arith.cmpi eq, %27, %689 : vector<16x10xi32>
    %691 = vector.broadcast %682 : vector<16x1xf32> to vector<16x10xf32>
    %692 = arith.cmpf ogt, %691, %584 : vector<16x10xf32>
    %693 = arith.andi %690, %692 : vector<16x10xi1>
    %694 = vector.shape_cast %682 : vector<16x1xf32> to vector<16x1xf32>
    %695 = vector.broadcast %694 : vector<16x1xf32> to vector<16x10xf32>
    %696 = arith.select %693, %695, %584 : vector<16x10xi1>, vector<16x10xf32>
    %697 = vector.shape_cast %688 : vector<16x1xi32> to vector<16x1xi32>
    %698 = vector.broadcast %697 : vector<16x1xi32> to vector<16x10xi32>
    %699 = arith.select %693, %698, %587 : vector<16x10xi1>, vector<16x10xi32>
    %c6_i32 = arith.constant 6 : i32
    %700 = vector.broadcast %c6_i32 : i32 to vector<16x512xi32>
    %701 = arith.addi %24, %700 : vector<16x512xi32>
    %c16_i32_241 = arith.constant 16 : i32
    %702 = vector.broadcast %c16_i32_241 : i32 to vector<16x512xi32>
    %703 = arith.shrsi %701, %702 : vector<16x512xi32>
    %c65535_i32_242 = arith.constant 65535 : i32
    %704 = vector.broadcast %c65535_i32_242 : i32 to vector<16x512xi32>
    %705 = arith.andi %703, %704 : vector<16x512xi32>
    %706 = arith.xori %701, %705 : vector<16x512xi32>
    %c-2048144789_i32_243 = arith.constant -2048144789 : i32
    %707 = vector.broadcast %c-2048144789_i32_243 : i32 to vector<16x512xi32>
    %708 = arith.muli %706, %707 : vector<16x512xi32>
    %c13_i32_244 = arith.constant 13 : i32
    %709 = vector.broadcast %c13_i32_244 : i32 to vector<16x512xi32>
    %710 = arith.shrsi %708, %709 : vector<16x512xi32>
    %c524287_i32_245 = arith.constant 524287 : i32
    %711 = vector.broadcast %c524287_i32_245 : i32 to vector<16x512xi32>
    %712 = arith.andi %710, %711 : vector<16x512xi32>
    %713 = arith.xori %708, %712 : vector<16x512xi32>
    %c-1028477387_i32_246 = arith.constant -1028477387 : i32
    %714 = vector.broadcast %c-1028477387_i32_246 : i32 to vector<16x512xi32>
    %715 = arith.muli %713, %714 : vector<16x512xi32>
    %c16_i32_247 = arith.constant 16 : i32
    %716 = vector.broadcast %c16_i32_247 : i32 to vector<16x512xi32>
    %717 = arith.shrsi %715, %716 : vector<16x512xi32>
    %c65535_i32_248 = arith.constant 65535 : i32
    %718 = vector.broadcast %c65535_i32_248 : i32 to vector<16x512xi32>
    %719 = arith.andi %717, %718 : vector<16x512xi32>
    %720 = arith.xori %715, %719 : vector<16x512xi32>
    %c8388607_i32_249 = arith.constant 8388607 : i32
    %721 = vector.broadcast %c8388607_i32_249 : i32 to vector<16x512xi32>
    %722 = arith.andi %720, %721 : vector<16x512xi32>
    %c1065353216_i32_250 = arith.constant 1065353216 : i32
    %723 = vector.broadcast %c1065353216_i32_250 : i32 to vector<16x512xi32>
    %724 = arith.ori %722, %723 : vector<16x512xi32>
    %725 = tpu.bitcast %724 : vector<16x512xi32> -> vector<16x512xf32>
    %cst_251 = arith.constant 1.000000e+00 : f32
    %726 = vector.broadcast %cst_251 : f32 to vector<16x512xf32>
    %727 = arith.subf %725, %726 : vector<16x512xf32>
    %cst_252 = arith.constant 5.96046448E-8 : f32
    %728 = vector.broadcast %cst_252 : f32 to vector<16x512xf32>
    %729 = arith.addf %727, %728 : vector<16x512xf32>
    %730 = tpu.bitcast %729 : vector<16x512xf32> -> vector<16x512xi32>
    %c23_i32_253 = arith.constant 23 : i32
    %731 = vector.broadcast %c23_i32_253 : i32 to vector<16x512xi32>
    %732 = arith.shrsi %730, %731 : vector<16x512xi32>
    %c255_i32_254 = arith.constant 255 : i32
    %733 = vector.broadcast %c255_i32_254 : i32 to vector<16x512xi32>
    %734 = arith.andi %732, %733 : vector<16x512xi32>
    %c127_i32_255 = arith.constant 127 : i32
    %735 = vector.broadcast %c127_i32_255 : i32 to vector<16x512xi32>
    %736 = arith.subi %734, %735 : vector<16x512xi32>
    %c8388607_i32_256 = arith.constant 8388607 : i32
    %737 = vector.broadcast %c8388607_i32_256 : i32 to vector<16x512xi32>
    %738 = arith.andi %730, %737 : vector<16x512xi32>
    %c1065353216_i32_257 = arith.constant 1065353216 : i32
    %739 = vector.broadcast %c1065353216_i32_257 : i32 to vector<16x512xi32>
    %740 = arith.ori %738, %739 : vector<16x512xi32>
    %741 = tpu.bitcast %740 : vector<16x512xi32> -> vector<16x512xf32>
    %cst_258 = arith.constant -0.0565708503 : f32
    %742 = vector.broadcast %cst_258 : f32 to vector<16x512xf32>
    %743 = arith.mulf %742, %741 : vector<16x512xf32>
    %cst_259 = arith.constant 0.447179556 : f32
    %744 = vector.broadcast %cst_259 : f32 to vector<16x512xf32>
    %745 = arith.addf %743, %744 : vector<16x512xf32>
    %746 = arith.mulf %745, %741 : vector<16x512xf32>
    %cst_260 = arith.constant -1.46995676 : f32
    %747 = vector.broadcast %cst_260 : f32 to vector<16x512xf32>
    %748 = arith.addf %746, %747 : vector<16x512xf32>
    %749 = arith.mulf %748, %741 : vector<16x512xf32>
    %cst_261 = arith.constant 2.82120252 : f32
    %750 = vector.broadcast %cst_261 : f32 to vector<16x512xf32>
    %751 = arith.addf %749, %750 : vector<16x512xf32>
    %752 = arith.mulf %751, %741 : vector<16x512xf32>
    %cst_262 = arith.constant -1.74179387 : f32
    %753 = vector.broadcast %cst_262 : f32 to vector<16x512xf32>
    %754 = arith.addf %752, %753 : vector<16x512xf32>
    %755 = arith.sitofp %736 : vector<16x512xi32> to vector<16x512xf32>
    %cst_263 = arith.constant 0.693147182 : f32
    %756 = vector.broadcast %cst_263 : f32 to vector<16x512xf32>
    %757 = arith.mulf %756, %755 : vector<16x512xf32>
    %758 = arith.addf %757, %754 : vector<16x512xf32>
    %cst_264 = arith.constant 0.000000e+00 : f32
    %759 = vector.broadcast %cst_264 : f32 to vector<16x512xf32>
    %760 = arith.subf %759, %758 : vector<16x512xf32>
    %cst_265 = arith.constant 1.000000e-10 : f32
    %761 = vector.broadcast %cst_265 : f32 to vector<16x512xf32>
    %762 = arith.maximumf %760, %761 : vector<16x512xf32>
    %763 = tpu.bitcast %762 : vector<16x512xf32> -> vector<16x512xi32>
    %c23_i32_266 = arith.constant 23 : i32
    %764 = vector.broadcast %c23_i32_266 : i32 to vector<16x512xi32>
    %765 = arith.shrsi %763, %764 : vector<16x512xi32>
    %c255_i32_267 = arith.constant 255 : i32
    %766 = vector.broadcast %c255_i32_267 : i32 to vector<16x512xi32>
    %767 = arith.andi %765, %766 : vector<16x512xi32>
    %c127_i32_268 = arith.constant 127 : i32
    %768 = vector.broadcast %c127_i32_268 : i32 to vector<16x512xi32>
    %769 = arith.subi %767, %768 : vector<16x512xi32>
    %c8388607_i32_269 = arith.constant 8388607 : i32
    %770 = vector.broadcast %c8388607_i32_269 : i32 to vector<16x512xi32>
    %771 = arith.andi %763, %770 : vector<16x512xi32>
    %c1065353216_i32_270 = arith.constant 1065353216 : i32
    %772 = vector.broadcast %c1065353216_i32_270 : i32 to vector<16x512xi32>
    %773 = arith.ori %771, %772 : vector<16x512xi32>
    %774 = tpu.bitcast %773 : vector<16x512xi32> -> vector<16x512xf32>
    %cst_271 = arith.constant -0.0565708503 : f32
    %775 = vector.broadcast %cst_271 : f32 to vector<16x512xf32>
    %776 = arith.mulf %775, %774 : vector<16x512xf32>
    %cst_272 = arith.constant 0.447179556 : f32
    %777 = vector.broadcast %cst_272 : f32 to vector<16x512xf32>
    %778 = arith.addf %776, %777 : vector<16x512xf32>
    %779 = arith.mulf %778, %774 : vector<16x512xf32>
    %cst_273 = arith.constant -1.46995676 : f32
    %780 = vector.broadcast %cst_273 : f32 to vector<16x512xf32>
    %781 = arith.addf %779, %780 : vector<16x512xf32>
    %782 = arith.mulf %781, %774 : vector<16x512xf32>
    %cst_274 = arith.constant 2.82120252 : f32
    %783 = vector.broadcast %cst_274 : f32 to vector<16x512xf32>
    %784 = arith.addf %782, %783 : vector<16x512xf32>
    %785 = arith.mulf %784, %774 : vector<16x512xf32>
    %cst_275 = arith.constant -1.74179387 : f32
    %786 = vector.broadcast %cst_275 : f32 to vector<16x512xf32>
    %787 = arith.addf %785, %786 : vector<16x512xf32>
    %788 = arith.sitofp %769 : vector<16x512xi32> to vector<16x512xf32>
    %cst_276 = arith.constant 0.693147182 : f32
    %789 = vector.broadcast %cst_276 : f32 to vector<16x512xf32>
    %790 = arith.mulf %789, %788 : vector<16x512xf32>
    %791 = arith.addf %790, %787 : vector<16x512xf32>
    %792 = arith.subf %10, %791 : vector<16x512xf32>
    %cst_277 = arith.constant dense<0xFF800000> : vector<16xf32>
    %793 = vector.multi_reduction <maximumf>, %792, %cst_277 [1] : vector<16x512xf32> to vector<16xf32>
    %794 = vector.shape_cast %793 : vector<16xf32> to vector<16x1xf32>
    %795 = vector.broadcast %794 : vector<16x1xf32> to vector<16x512xf32>
    %796 = arith.cmpf oeq, %792, %795 : vector<16x512xf32>
    %c2147483647_i32_278 = arith.constant 2147483647 : i32
    %797 = vector.broadcast %c2147483647_i32_278 : i32 to vector<16x512xi32>
    %798 = arith.select %796, %14, %797 : vector<16x512xi1>, vector<16x512xi32>
    %cst_279 = arith.constant dense<2147483647> : vector<16xi32>
    %799 = vector.multi_reduction <minsi>, %798, %cst_279 [1] : vector<16x512xi32> to vector<16xi32>
    %800 = vector.shape_cast %799 : vector<16xi32> to vector<16x1xi32>
    %c6_i32_280 = arith.constant 6 : i32
    %801 = vector.broadcast %c6_i32_280 : i32 to vector<16x10xi32>
    %802 = arith.cmpi eq, %27, %801 : vector<16x10xi32>
    %803 = vector.broadcast %794 : vector<16x1xf32> to vector<16x10xf32>
    %804 = arith.cmpf ogt, %803, %696 : vector<16x10xf32>
    %805 = arith.andi %802, %804 : vector<16x10xi1>
    %806 = vector.shape_cast %794 : vector<16x1xf32> to vector<16x1xf32>
    %807 = vector.broadcast %806 : vector<16x1xf32> to vector<16x10xf32>
    %808 = arith.select %805, %807, %696 : vector<16x10xi1>, vector<16x10xf32>
    %809 = vector.shape_cast %800 : vector<16x1xi32> to vector<16x1xi32>
    %810 = vector.broadcast %809 : vector<16x1xi32> to vector<16x10xi32>
    %811 = arith.select %805, %810, %699 : vector<16x10xi1>, vector<16x10xi32>
    %c7_i32 = arith.constant 7 : i32
    %812 = vector.broadcast %c7_i32 : i32 to vector<16x512xi32>
    %813 = arith.addi %24, %812 : vector<16x512xi32>
    %c16_i32_281 = arith.constant 16 : i32
    %814 = vector.broadcast %c16_i32_281 : i32 to vector<16x512xi32>
    %815 = arith.shrsi %813, %814 : vector<16x512xi32>
    %c65535_i32_282 = arith.constant 65535 : i32
    %816 = vector.broadcast %c65535_i32_282 : i32 to vector<16x512xi32>
    %817 = arith.andi %815, %816 : vector<16x512xi32>
    %818 = arith.xori %813, %817 : vector<16x512xi32>
    %c-2048144789_i32_283 = arith.constant -2048144789 : i32
    %819 = vector.broadcast %c-2048144789_i32_283 : i32 to vector<16x512xi32>
    %820 = arith.muli %818, %819 : vector<16x512xi32>
    %c13_i32_284 = arith.constant 13 : i32
    %821 = vector.broadcast %c13_i32_284 : i32 to vector<16x512xi32>
    %822 = arith.shrsi %820, %821 : vector<16x512xi32>
    %c524287_i32_285 = arith.constant 524287 : i32
    %823 = vector.broadcast %c524287_i32_285 : i32 to vector<16x512xi32>
    %824 = arith.andi %822, %823 : vector<16x512xi32>
    %825 = arith.xori %820, %824 : vector<16x512xi32>
    %c-1028477387_i32_286 = arith.constant -1028477387 : i32
    %826 = vector.broadcast %c-1028477387_i32_286 : i32 to vector<16x512xi32>
    %827 = arith.muli %825, %826 : vector<16x512xi32>
    %c16_i32_287 = arith.constant 16 : i32
    %828 = vector.broadcast %c16_i32_287 : i32 to vector<16x512xi32>
    %829 = arith.shrsi %827, %828 : vector<16x512xi32>
    %c65535_i32_288 = arith.constant 65535 : i32
    %830 = vector.broadcast %c65535_i32_288 : i32 to vector<16x512xi32>
    %831 = arith.andi %829, %830 : vector<16x512xi32>
    %832 = arith.xori %827, %831 : vector<16x512xi32>
    %c8388607_i32_289 = arith.constant 8388607 : i32
    %833 = vector.broadcast %c8388607_i32_289 : i32 to vector<16x512xi32>
    %834 = arith.andi %832, %833 : vector<16x512xi32>
    %c1065353216_i32_290 = arith.constant 1065353216 : i32
    %835 = vector.broadcast %c1065353216_i32_290 : i32 to vector<16x512xi32>
    %836 = arith.ori %834, %835 : vector<16x512xi32>
    %837 = tpu.bitcast %836 : vector<16x512xi32> -> vector<16x512xf32>
    %cst_291 = arith.constant 1.000000e+00 : f32
    %838 = vector.broadcast %cst_291 : f32 to vector<16x512xf32>
    %839 = arith.subf %837, %838 : vector<16x512xf32>
    %cst_292 = arith.constant 5.96046448E-8 : f32
    %840 = vector.broadcast %cst_292 : f32 to vector<16x512xf32>
    %841 = arith.addf %839, %840 : vector<16x512xf32>
    %842 = tpu.bitcast %841 : vector<16x512xf32> -> vector<16x512xi32>
    %c23_i32_293 = arith.constant 23 : i32
    %843 = vector.broadcast %c23_i32_293 : i32 to vector<16x512xi32>
    %844 = arith.shrsi %842, %843 : vector<16x512xi32>
    %c255_i32_294 = arith.constant 255 : i32
    %845 = vector.broadcast %c255_i32_294 : i32 to vector<16x512xi32>
    %846 = arith.andi %844, %845 : vector<16x512xi32>
    %c127_i32_295 = arith.constant 127 : i32
    %847 = vector.broadcast %c127_i32_295 : i32 to vector<16x512xi32>
    %848 = arith.subi %846, %847 : vector<16x512xi32>
    %c8388607_i32_296 = arith.constant 8388607 : i32
    %849 = vector.broadcast %c8388607_i32_296 : i32 to vector<16x512xi32>
    %850 = arith.andi %842, %849 : vector<16x512xi32>
    %c1065353216_i32_297 = arith.constant 1065353216 : i32
    %851 = vector.broadcast %c1065353216_i32_297 : i32 to vector<16x512xi32>
    %852 = arith.ori %850, %851 : vector<16x512xi32>
    %853 = tpu.bitcast %852 : vector<16x512xi32> -> vector<16x512xf32>
    %cst_298 = arith.constant -0.0565708503 : f32
    %854 = vector.broadcast %cst_298 : f32 to vector<16x512xf32>
    %855 = arith.mulf %854, %853 : vector<16x512xf32>
    %cst_299 = arith.constant 0.447179556 : f32
    %856 = vector.broadcast %cst_299 : f32 to vector<16x512xf32>
    %857 = arith.addf %855, %856 : vector<16x512xf32>
    %858 = arith.mulf %857, %853 : vector<16x512xf32>
    %cst_300 = arith.constant -1.46995676 : f32
    %859 = vector.broadcast %cst_300 : f32 to vector<16x512xf32>
    %860 = arith.addf %858, %859 : vector<16x512xf32>
    %861 = arith.mulf %860, %853 : vector<16x512xf32>
    %cst_301 = arith.constant 2.82120252 : f32
    %862 = vector.broadcast %cst_301 : f32 to vector<16x512xf32>
    %863 = arith.addf %861, %862 : vector<16x512xf32>
    %864 = arith.mulf %863, %853 : vector<16x512xf32>
    %cst_302 = arith.constant -1.74179387 : f32
    %865 = vector.broadcast %cst_302 : f32 to vector<16x512xf32>
    %866 = arith.addf %864, %865 : vector<16x512xf32>
    %867 = arith.sitofp %848 : vector<16x512xi32> to vector<16x512xf32>
    %cst_303 = arith.constant 0.693147182 : f32
    %868 = vector.broadcast %cst_303 : f32 to vector<16x512xf32>
    %869 = arith.mulf %868, %867 : vector<16x512xf32>
    %870 = arith.addf %869, %866 : vector<16x512xf32>
    %cst_304 = arith.constant 0.000000e+00 : f32
    %871 = vector.broadcast %cst_304 : f32 to vector<16x512xf32>
    %872 = arith.subf %871, %870 : vector<16x512xf32>
    %cst_305 = arith.constant 1.000000e-10 : f32
    %873 = vector.broadcast %cst_305 : f32 to vector<16x512xf32>
    %874 = arith.maximumf %872, %873 : vector<16x512xf32>
    %875 = tpu.bitcast %874 : vector<16x512xf32> -> vector<16x512xi32>
    %c23_i32_306 = arith.constant 23 : i32
    %876 = vector.broadcast %c23_i32_306 : i32 to vector<16x512xi32>
    %877 = arith.shrsi %875, %876 : vector<16x512xi32>
    %c255_i32_307 = arith.constant 255 : i32
    %878 = vector.broadcast %c255_i32_307 : i32 to vector<16x512xi32>
    %879 = arith.andi %877, %878 : vector<16x512xi32>
    %c127_i32_308 = arith.constant 127 : i32
    %880 = vector.broadcast %c127_i32_308 : i32 to vector<16x512xi32>
    %881 = arith.subi %879, %880 : vector<16x512xi32>
    %c8388607_i32_309 = arith.constant 8388607 : i32
    %882 = vector.broadcast %c8388607_i32_309 : i32 to vector<16x512xi32>
    %883 = arith.andi %875, %882 : vector<16x512xi32>
    %c1065353216_i32_310 = arith.constant 1065353216 : i32
    %884 = vector.broadcast %c1065353216_i32_310 : i32 to vector<16x512xi32>
    %885 = arith.ori %883, %884 : vector<16x512xi32>
    %886 = tpu.bitcast %885 : vector<16x512xi32> -> vector<16x512xf32>
    %cst_311 = arith.constant -0.0565708503 : f32
    %887 = vector.broadcast %cst_311 : f32 to vector<16x512xf32>
    %888 = arith.mulf %887, %886 : vector<16x512xf32>
    %cst_312 = arith.constant 0.447179556 : f32
    %889 = vector.broadcast %cst_312 : f32 to vector<16x512xf32>
    %890 = arith.addf %888, %889 : vector<16x512xf32>
    %891 = arith.mulf %890, %886 : vector<16x512xf32>
    %cst_313 = arith.constant -1.46995676 : f32
    %892 = vector.broadcast %cst_313 : f32 to vector<16x512xf32>
    %893 = arith.addf %891, %892 : vector<16x512xf32>
    %894 = arith.mulf %893, %886 : vector<16x512xf32>
    %cst_314 = arith.constant 2.82120252 : f32
    %895 = vector.broadcast %cst_314 : f32 to vector<16x512xf32>
    %896 = arith.addf %894, %895 : vector<16x512xf32>
    %897 = arith.mulf %896, %886 : vector<16x512xf32>
    %cst_315 = arith.constant -1.74179387 : f32
    %898 = vector.broadcast %cst_315 : f32 to vector<16x512xf32>
    %899 = arith.addf %897, %898 : vector<16x512xf32>
    %900 = arith.sitofp %881 : vector<16x512xi32> to vector<16x512xf32>
    %cst_316 = arith.constant 0.693147182 : f32
    %901 = vector.broadcast %cst_316 : f32 to vector<16x512xf32>
    %902 = arith.mulf %901, %900 : vector<16x512xf32>
    %903 = arith.addf %902, %899 : vector<16x512xf32>
    %904 = arith.subf %10, %903 : vector<16x512xf32>
    %cst_317 = arith.constant dense<0xFF800000> : vector<16xf32>
    %905 = vector.multi_reduction <maximumf>, %904, %cst_317 [1] : vector<16x512xf32> to vector<16xf32>
    %906 = vector.shape_cast %905 : vector<16xf32> to vector<16x1xf32>
    %907 = vector.broadcast %906 : vector<16x1xf32> to vector<16x512xf32>
    %908 = arith.cmpf oeq, %904, %907 : vector<16x512xf32>
    %c2147483647_i32_318 = arith.constant 2147483647 : i32
    %909 = vector.broadcast %c2147483647_i32_318 : i32 to vector<16x512xi32>
    %910 = arith.select %908, %14, %909 : vector<16x512xi1>, vector<16x512xi32>
    %cst_319 = arith.constant dense<2147483647> : vector<16xi32>
    %911 = vector.multi_reduction <minsi>, %910, %cst_319 [1] : vector<16x512xi32> to vector<16xi32>
    %912 = vector.shape_cast %911 : vector<16xi32> to vector<16x1xi32>
    %c7_i32_320 = arith.constant 7 : i32
    %913 = vector.broadcast %c7_i32_320 : i32 to vector<16x10xi32>
    %914 = arith.cmpi eq, %27, %913 : vector<16x10xi32>
    %915 = vector.broadcast %906 : vector<16x1xf32> to vector<16x10xf32>
    %916 = arith.cmpf ogt, %915, %808 : vector<16x10xf32>
    %917 = arith.andi %914, %916 : vector<16x10xi1>
    %918 = vector.shape_cast %906 : vector<16x1xf32> to vector<16x1xf32>
    %919 = vector.broadcast %918 : vector<16x1xf32> to vector<16x10xf32>
    %920 = arith.select %917, %919, %808 : vector<16x10xi1>, vector<16x10xf32>
    %921 = vector.shape_cast %912 : vector<16x1xi32> to vector<16x1xi32>
    %922 = vector.broadcast %921 : vector<16x1xi32> to vector<16x10xi32>
    %923 = arith.select %917, %922, %811 : vector<16x10xi1>, vector<16x10xi32>
    %c8_i32 = arith.constant 8 : i32
    %924 = vector.broadcast %c8_i32 : i32 to vector<16x512xi32>
    %925 = arith.addi %24, %924 : vector<16x512xi32>
    %c16_i32_321 = arith.constant 16 : i32
    %926 = vector.broadcast %c16_i32_321 : i32 to vector<16x512xi32>
    %927 = arith.shrsi %925, %926 : vector<16x512xi32>
    %c65535_i32_322 = arith.constant 65535 : i32
    %928 = vector.broadcast %c65535_i32_322 : i32 to vector<16x512xi32>
    %929 = arith.andi %927, %928 : vector<16x512xi32>
    %930 = arith.xori %925, %929 : vector<16x512xi32>
    %c-2048144789_i32_323 = arith.constant -2048144789 : i32
    %931 = vector.broadcast %c-2048144789_i32_323 : i32 to vector<16x512xi32>
    %932 = arith.muli %930, %931 : vector<16x512xi32>
    %c13_i32_324 = arith.constant 13 : i32
    %933 = vector.broadcast %c13_i32_324 : i32 to vector<16x512xi32>
    %934 = arith.shrsi %932, %933 : vector<16x512xi32>
    %c524287_i32_325 = arith.constant 524287 : i32
    %935 = vector.broadcast %c524287_i32_325 : i32 to vector<16x512xi32>
    %936 = arith.andi %934, %935 : vector<16x512xi32>
    %937 = arith.xori %932, %936 : vector<16x512xi32>
    %c-1028477387_i32_326 = arith.constant -1028477387 : i32
    %938 = vector.broadcast %c-1028477387_i32_326 : i32 to vector<16x512xi32>
    %939 = arith.muli %937, %938 : vector<16x512xi32>
    %c16_i32_327 = arith.constant 16 : i32
    %940 = vector.broadcast %c16_i32_327 : i32 to vector<16x512xi32>
    %941 = arith.shrsi %939, %940 : vector<16x512xi32>
    %c65535_i32_328 = arith.constant 65535 : i32
    %942 = vector.broadcast %c65535_i32_328 : i32 to vector<16x512xi32>
    %943 = arith.andi %941, %942 : vector<16x512xi32>
    %944 = arith.xori %939, %943 : vector<16x512xi32>
    %c8388607_i32_329 = arith.constant 8388607 : i32
    %945 = vector.broadcast %c8388607_i32_329 : i32 to vector<16x512xi32>
    %946 = arith.andi %944, %945 : vector<16x512xi32>
    %c1065353216_i32_330 = arith.constant 1065353216 : i32
    %947 = vector.broadcast %c1065353216_i32_330 : i32 to vector<16x512xi32>
    %948 = arith.ori %946, %947 : vector<16x512xi32>
    %949 = tpu.bitcast %948 : vector<16x512xi32> -> vector<16x512xf32>
    %cst_331 = arith.constant 1.000000e+00 : f32
    %950 = vector.broadcast %cst_331 : f32 to vector<16x512xf32>
    %951 = arith.subf %949, %950 : vector<16x512xf32>
    %cst_332 = arith.constant 5.96046448E-8 : f32
    %952 = vector.broadcast %cst_332 : f32 to vector<16x512xf32>
    %953 = arith.addf %951, %952 : vector<16x512xf32>
    %954 = tpu.bitcast %953 : vector<16x512xf32> -> vector<16x512xi32>
    %c23_i32_333 = arith.constant 23 : i32
    %955 = vector.broadcast %c23_i32_333 : i32 to vector<16x512xi32>
    %956 = arith.shrsi %954, %955 : vector<16x512xi32>
    %c255_i32_334 = arith.constant 255 : i32
    %957 = vector.broadcast %c255_i32_334 : i32 to vector<16x512xi32>
    %958 = arith.andi %956, %957 : vector<16x512xi32>
    %c127_i32_335 = arith.constant 127 : i32
    %959 = vector.broadcast %c127_i32_335 : i32 to vector<16x512xi32>
    %960 = arith.subi %958, %959 : vector<16x512xi32>
    %c8388607_i32_336 = arith.constant 8388607 : i32
    %961 = vector.broadcast %c8388607_i32_336 : i32 to vector<16x512xi32>
    %962 = arith.andi %954, %961 : vector<16x512xi32>
    %c1065353216_i32_337 = arith.constant 1065353216 : i32
    %963 = vector.broadcast %c1065353216_i32_337 : i32 to vector<16x512xi32>
    %964 = arith.ori %962, %963 : vector<16x512xi32>
    %965 = tpu.bitcast %964 : vector<16x512xi32> -> vector<16x512xf32>
    %cst_338 = arith.constant -0.0565708503 : f32
    %966 = vector.broadcast %cst_338 : f32 to vector<16x512xf32>
    %967 = arith.mulf %966, %965 : vector<16x512xf32>
    %cst_339 = arith.constant 0.447179556 : f32
    %968 = vector.broadcast %cst_339 : f32 to vector<16x512xf32>
    %969 = arith.addf %967, %968 : vector<16x512xf32>
    %970 = arith.mulf %969, %965 : vector<16x512xf32>
    %cst_340 = arith.constant -1.46995676 : f32
    %971 = vector.broadcast %cst_340 : f32 to vector<16x512xf32>
    %972 = arith.addf %970, %971 : vector<16x512xf32>
    %973 = arith.mulf %972, %965 : vector<16x512xf32>
    %cst_341 = arith.constant 2.82120252 : f32
    %974 = vector.broadcast %cst_341 : f32 to vector<16x512xf32>
    %975 = arith.addf %973, %974 : vector<16x512xf32>
    %976 = arith.mulf %975, %965 : vector<16x512xf32>
    %cst_342 = arith.constant -1.74179387 : f32
    %977 = vector.broadcast %cst_342 : f32 to vector<16x512xf32>
    %978 = arith.addf %976, %977 : vector<16x512xf32>
    %979 = arith.sitofp %960 : vector<16x512xi32> to vector<16x512xf32>
    %cst_343 = arith.constant 0.693147182 : f32
    %980 = vector.broadcast %cst_343 : f32 to vector<16x512xf32>
    %981 = arith.mulf %980, %979 : vector<16x512xf32>
    %982 = arith.addf %981, %978 : vector<16x512xf32>
    %cst_344 = arith.constant 0.000000e+00 : f32
    %983 = vector.broadcast %cst_344 : f32 to vector<16x512xf32>
    %984 = arith.subf %983, %982 : vector<16x512xf32>
    %cst_345 = arith.constant 1.000000e-10 : f32
    %985 = vector.broadcast %cst_345 : f32 to vector<16x512xf32>
    %986 = arith.maximumf %984, %985 : vector<16x512xf32>
    %987 = tpu.bitcast %986 : vector<16x512xf32> -> vector<16x512xi32>
    %c23_i32_346 = arith.constant 23 : i32
    %988 = vector.broadcast %c23_i32_346 : i32 to vector<16x512xi32>
    %989 = arith.shrsi %987, %988 : vector<16x512xi32>
    %c255_i32_347 = arith.constant 255 : i32
    %990 = vector.broadcast %c255_i32_347 : i32 to vector<16x512xi32>
    %991 = arith.andi %989, %990 : vector<16x512xi32>
    %c127_i32_348 = arith.constant 127 : i32
    %992 = vector.broadcast %c127_i32_348 : i32 to vector<16x512xi32>
    %993 = arith.subi %991, %992 : vector<16x512xi32>
    %c8388607_i32_349 = arith.constant 8388607 : i32
    %994 = vector.broadcast %c8388607_i32_349 : i32 to vector<16x512xi32>
    %995 = arith.andi %987, %994 : vector<16x512xi32>
    %c1065353216_i32_350 = arith.constant 1065353216 : i32
    %996 = vector.broadcast %c1065353216_i32_350 : i32 to vector<16x512xi32>
    %997 = arith.ori %995, %996 : vector<16x512xi32>
    %998 = tpu.bitcast %997 : vector<16x512xi32> -> vector<16x512xf32>
    %cst_351 = arith.constant -0.0565708503 : f32
    %999 = vector.broadcast %cst_351 : f32 to vector<16x512xf32>
    %1000 = arith.mulf %999, %998 : vector<16x512xf32>
    %cst_352 = arith.constant 0.447179556 : f32
    %1001 = vector.broadcast %cst_352 : f32 to vector<16x512xf32>
    %1002 = arith.addf %1000, %1001 : vector<16x512xf32>
    %1003 = arith.mulf %1002, %998 : vector<16x512xf32>
    %cst_353 = arith.constant -1.46995676 : f32
    %1004 = vector.broadcast %cst_353 : f32 to vector<16x512xf32>
    %1005 = arith.addf %1003, %1004 : vector<16x512xf32>
    %1006 = arith.mulf %1005, %998 : vector<16x512xf32>
    %cst_354 = arith.constant 2.82120252 : f32
    %1007 = vector.broadcast %cst_354 : f32 to vector<16x512xf32>
    %1008 = arith.addf %1006, %1007 : vector<16x512xf32>
    %1009 = arith.mulf %1008, %998 : vector<16x512xf32>
    %cst_355 = arith.constant -1.74179387 : f32
    %1010 = vector.broadcast %cst_355 : f32 to vector<16x512xf32>
    %1011 = arith.addf %1009, %1010 : vector<16x512xf32>
    %1012 = arith.sitofp %993 : vector<16x512xi32> to vector<16x512xf32>
    %cst_356 = arith.constant 0.693147182 : f32
    %1013 = vector.broadcast %cst_356 : f32 to vector<16x512xf32>
    %1014 = arith.mulf %1013, %1012 : vector<16x512xf32>
    %1015 = arith.addf %1014, %1011 : vector<16x512xf32>
    %1016 = arith.subf %10, %1015 : vector<16x512xf32>
    %cst_357 = arith.constant dense<0xFF800000> : vector<16xf32>
    %1017 = vector.multi_reduction <maximumf>, %1016, %cst_357 [1] : vector<16x512xf32> to vector<16xf32>
    %1018 = vector.shape_cast %1017 : vector<16xf32> to vector<16x1xf32>
    %1019 = vector.broadcast %1018 : vector<16x1xf32> to vector<16x512xf32>
    %1020 = arith.cmpf oeq, %1016, %1019 : vector<16x512xf32>
    %c2147483647_i32_358 = arith.constant 2147483647 : i32
    %1021 = vector.broadcast %c2147483647_i32_358 : i32 to vector<16x512xi32>
    %1022 = arith.select %1020, %14, %1021 : vector<16x512xi1>, vector<16x512xi32>
    %cst_359 = arith.constant dense<2147483647> : vector<16xi32>
    %1023 = vector.multi_reduction <minsi>, %1022, %cst_359 [1] : vector<16x512xi32> to vector<16xi32>
    %1024 = vector.shape_cast %1023 : vector<16xi32> to vector<16x1xi32>
    %c8_i32_360 = arith.constant 8 : i32
    %1025 = vector.broadcast %c8_i32_360 : i32 to vector<16x10xi32>
    %1026 = arith.cmpi eq, %27, %1025 : vector<16x10xi32>
    %1027 = vector.broadcast %1018 : vector<16x1xf32> to vector<16x10xf32>
    %1028 = arith.cmpf ogt, %1027, %920 : vector<16x10xf32>
    %1029 = arith.andi %1026, %1028 : vector<16x10xi1>
    %1030 = vector.shape_cast %1018 : vector<16x1xf32> to vector<16x1xf32>
    %1031 = vector.broadcast %1030 : vector<16x1xf32> to vector<16x10xf32>
    %1032 = arith.select %1029, %1031, %920 : vector<16x10xi1>, vector<16x10xf32>
    %1033 = vector.shape_cast %1024 : vector<16x1xi32> to vector<16x1xi32>
    %1034 = vector.broadcast %1033 : vector<16x1xi32> to vector<16x10xi32>
    %1035 = arith.select %1029, %1034, %923 : vector<16x10xi1>, vector<16x10xi32>
    %c9_i32 = arith.constant 9 : i32
    %1036 = vector.broadcast %c9_i32 : i32 to vector<16x512xi32>
    %1037 = arith.addi %24, %1036 : vector<16x512xi32>
    %c16_i32_361 = arith.constant 16 : i32
    %1038 = vector.broadcast %c16_i32_361 : i32 to vector<16x512xi32>
    %1039 = arith.shrsi %1037, %1038 : vector<16x512xi32>
    %c65535_i32_362 = arith.constant 65535 : i32
    %1040 = vector.broadcast %c65535_i32_362 : i32 to vector<16x512xi32>
    %1041 = arith.andi %1039, %1040 : vector<16x512xi32>
    %1042 = arith.xori %1037, %1041 : vector<16x512xi32>
    %c-2048144789_i32_363 = arith.constant -2048144789 : i32
    %1043 = vector.broadcast %c-2048144789_i32_363 : i32 to vector<16x512xi32>
    %1044 = arith.muli %1042, %1043 : vector<16x512xi32>
    %c13_i32_364 = arith.constant 13 : i32
    %1045 = vector.broadcast %c13_i32_364 : i32 to vector<16x512xi32>
    %1046 = arith.shrsi %1044, %1045 : vector<16x512xi32>
    %c524287_i32_365 = arith.constant 524287 : i32
    %1047 = vector.broadcast %c524287_i32_365 : i32 to vector<16x512xi32>
    %1048 = arith.andi %1046, %1047 : vector<16x512xi32>
    %1049 = arith.xori %1044, %1048 : vector<16x512xi32>
    %c-1028477387_i32_366 = arith.constant -1028477387 : i32
    %1050 = vector.broadcast %c-1028477387_i32_366 : i32 to vector<16x512xi32>
    %1051 = arith.muli %1049, %1050 : vector<16x512xi32>
    %c16_i32_367 = arith.constant 16 : i32
    %1052 = vector.broadcast %c16_i32_367 : i32 to vector<16x512xi32>
    %1053 = arith.shrsi %1051, %1052 : vector<16x512xi32>
    %c65535_i32_368 = arith.constant 65535 : i32
    %1054 = vector.broadcast %c65535_i32_368 : i32 to vector<16x512xi32>
    %1055 = arith.andi %1053, %1054 : vector<16x512xi32>
    %1056 = arith.xori %1051, %1055 : vector<16x512xi32>
    %c8388607_i32_369 = arith.constant 8388607 : i32
    %1057 = vector.broadcast %c8388607_i32_369 : i32 to vector<16x512xi32>
    %1058 = arith.andi %1056, %1057 : vector<16x512xi32>
    %c1065353216_i32_370 = arith.constant 1065353216 : i32
    %1059 = vector.broadcast %c1065353216_i32_370 : i32 to vector<16x512xi32>
    %1060 = arith.ori %1058, %1059 : vector<16x512xi32>
    %1061 = tpu.bitcast %1060 : vector<16x512xi32> -> vector<16x512xf32>
    %cst_371 = arith.constant 1.000000e+00 : f32
    %1062 = vector.broadcast %cst_371 : f32 to vector<16x512xf32>
    %1063 = arith.subf %1061, %1062 : vector<16x512xf32>
    %cst_372 = arith.constant 5.96046448E-8 : f32
    %1064 = vector.broadcast %cst_372 : f32 to vector<16x512xf32>
    %1065 = arith.addf %1063, %1064 : vector<16x512xf32>
    %1066 = tpu.bitcast %1065 : vector<16x512xf32> -> vector<16x512xi32>
    %c23_i32_373 = arith.constant 23 : i32
    %1067 = vector.broadcast %c23_i32_373 : i32 to vector<16x512xi32>
    %1068 = arith.shrsi %1066, %1067 : vector<16x512xi32>
    %c255_i32_374 = arith.constant 255 : i32
    %1069 = vector.broadcast %c255_i32_374 : i32 to vector<16x512xi32>
    %1070 = arith.andi %1068, %1069 : vector<16x512xi32>
    %c127_i32_375 = arith.constant 127 : i32
    %1071 = vector.broadcast %c127_i32_375 : i32 to vector<16x512xi32>
    %1072 = arith.subi %1070, %1071 : vector<16x512xi32>
    %c8388607_i32_376 = arith.constant 8388607 : i32
    %1073 = vector.broadcast %c8388607_i32_376 : i32 to vector<16x512xi32>
    %1074 = arith.andi %1066, %1073 : vector<16x512xi32>
    %c1065353216_i32_377 = arith.constant 1065353216 : i32
    %1075 = vector.broadcast %c1065353216_i32_377 : i32 to vector<16x512xi32>
    %1076 = arith.ori %1074, %1075 : vector<16x512xi32>
    %1077 = tpu.bitcast %1076 : vector<16x512xi32> -> vector<16x512xf32>
    %cst_378 = arith.constant -0.0565708503 : f32
    %1078 = vector.broadcast %cst_378 : f32 to vector<16x512xf32>
    %1079 = arith.mulf %1078, %1077 : vector<16x512xf32>
    %cst_379 = arith.constant 0.447179556 : f32
    %1080 = vector.broadcast %cst_379 : f32 to vector<16x512xf32>
    %1081 = arith.addf %1079, %1080 : vector<16x512xf32>
    %1082 = arith.mulf %1081, %1077 : vector<16x512xf32>
    %cst_380 = arith.constant -1.46995676 : f32
    %1083 = vector.broadcast %cst_380 : f32 to vector<16x512xf32>
    %1084 = arith.addf %1082, %1083 : vector<16x512xf32>
    %1085 = arith.mulf %1084, %1077 : vector<16x512xf32>
    %cst_381 = arith.constant 2.82120252 : f32
    %1086 = vector.broadcast %cst_381 : f32 to vector<16x512xf32>
    %1087 = arith.addf %1085, %1086 : vector<16x512xf32>
    %1088 = arith.mulf %1087, %1077 : vector<16x512xf32>
    %cst_382 = arith.constant -1.74179387 : f32
    %1089 = vector.broadcast %cst_382 : f32 to vector<16x512xf32>
    %1090 = arith.addf %1088, %1089 : vector<16x512xf32>
    %1091 = arith.sitofp %1072 : vector<16x512xi32> to vector<16x512xf32>
    %cst_383 = arith.constant 0.693147182 : f32
    %1092 = vector.broadcast %cst_383 : f32 to vector<16x512xf32>
    %1093 = arith.mulf %1092, %1091 : vector<16x512xf32>
    %1094 = arith.addf %1093, %1090 : vector<16x512xf32>
    %cst_384 = arith.constant 0.000000e+00 : f32
    %1095 = vector.broadcast %cst_384 : f32 to vector<16x512xf32>
    %1096 = arith.subf %1095, %1094 : vector<16x512xf32>
    %cst_385 = arith.constant 1.000000e-10 : f32
    %1097 = vector.broadcast %cst_385 : f32 to vector<16x512xf32>
    %1098 = arith.maximumf %1096, %1097 : vector<16x512xf32>
    %1099 = tpu.bitcast %1098 : vector<16x512xf32> -> vector<16x512xi32>
    %c23_i32_386 = arith.constant 23 : i32
    %1100 = vector.broadcast %c23_i32_386 : i32 to vector<16x512xi32>
    %1101 = arith.shrsi %1099, %1100 : vector<16x512xi32>
    %c255_i32_387 = arith.constant 255 : i32
    %1102 = vector.broadcast %c255_i32_387 : i32 to vector<16x512xi32>
    %1103 = arith.andi %1101, %1102 : vector<16x512xi32>
    %c127_i32_388 = arith.constant 127 : i32
    %1104 = vector.broadcast %c127_i32_388 : i32 to vector<16x512xi32>
    %1105 = arith.subi %1103, %1104 : vector<16x512xi32>
    %c8388607_i32_389 = arith.constant 8388607 : i32
    %1106 = vector.broadcast %c8388607_i32_389 : i32 to vector<16x512xi32>
    %1107 = arith.andi %1099, %1106 : vector<16x512xi32>
    %c1065353216_i32_390 = arith.constant 1065353216 : i32
    %1108 = vector.broadcast %c1065353216_i32_390 : i32 to vector<16x512xi32>
    %1109 = arith.ori %1107, %1108 : vector<16x512xi32>
    %1110 = tpu.bitcast %1109 : vector<16x512xi32> -> vector<16x512xf32>
    %cst_391 = arith.constant -0.0565708503 : f32
    %1111 = vector.broadcast %cst_391 : f32 to vector<16x512xf32>
    %1112 = arith.mulf %1111, %1110 : vector<16x512xf32>
    %cst_392 = arith.constant 0.447179556 : f32
    %1113 = vector.broadcast %cst_392 : f32 to vector<16x512xf32>
    %1114 = arith.addf %1112, %1113 : vector<16x512xf32>
    %1115 = arith.mulf %1114, %1110 : vector<16x512xf32>
    %cst_393 = arith.constant -1.46995676 : f32
    %1116 = vector.broadcast %cst_393 : f32 to vector<16x512xf32>
    %1117 = arith.addf %1115, %1116 : vector<16x512xf32>
    %1118 = arith.mulf %1117, %1110 : vector<16x512xf32>
    %cst_394 = arith.constant 2.82120252 : f32
    %1119 = vector.broadcast %cst_394 : f32 to vector<16x512xf32>
    %1120 = arith.addf %1118, %1119 : vector<16x512xf32>
    %1121 = arith.mulf %1120, %1110 : vector<16x512xf32>
    %cst_395 = arith.constant -1.74179387 : f32
    %1122 = vector.broadcast %cst_395 : f32 to vector<16x512xf32>
    %1123 = arith.addf %1121, %1122 : vector<16x512xf32>
    %1124 = arith.sitofp %1105 : vector<16x512xi32> to vector<16x512xf32>
    %cst_396 = arith.constant 0.693147182 : f32
    %1125 = vector.broadcast %cst_396 : f32 to vector<16x512xf32>
    %1126 = arith.mulf %1125, %1124 : vector<16x512xf32>
    %1127 = arith.addf %1126, %1123 : vector<16x512xf32>
    %1128 = arith.subf %10, %1127 : vector<16x512xf32>
    %cst_397 = arith.constant dense<0xFF800000> : vector<16xf32>
    %1129 = vector.multi_reduction <maximumf>, %1128, %cst_397 [1] : vector<16x512xf32> to vector<16xf32>
    %1130 = vector.shape_cast %1129 : vector<16xf32> to vector<16x1xf32>
    %1131 = vector.broadcast %1130 : vector<16x1xf32> to vector<16x512xf32>
    %1132 = arith.cmpf oeq, %1128, %1131 : vector<16x512xf32>
    %c2147483647_i32_398 = arith.constant 2147483647 : i32
    %1133 = vector.broadcast %c2147483647_i32_398 : i32 to vector<16x512xi32>
    %1134 = arith.select %1132, %14, %1133 : vector<16x512xi1>, vector<16x512xi32>
    %cst_399 = arith.constant dense<2147483647> : vector<16xi32>
    %1135 = vector.multi_reduction <minsi>, %1134, %cst_399 [1] : vector<16x512xi32> to vector<16xi32>
    %1136 = vector.shape_cast %1135 : vector<16xi32> to vector<16x1xi32>
    %c9_i32_400 = arith.constant 9 : i32
    %1137 = vector.broadcast %c9_i32_400 : i32 to vector<16x10xi32>
    %1138 = arith.cmpi eq, %27, %1137 : vector<16x10xi32>
    %1139 = vector.broadcast %1130 : vector<16x1xf32> to vector<16x10xf32>
    %1140 = arith.cmpf ogt, %1139, %1032 : vector<16x10xf32>
    %1141 = arith.andi %1138, %1140 : vector<16x10xi1>
    %1142 = vector.shape_cast %1130 : vector<16x1xf32> to vector<16x1xf32>
    %1143 = vector.broadcast %1142 : vector<16x1xf32> to vector<16x10xf32>
    %1144 = arith.select %1141, %1143, %1032 : vector<16x10xi1>, vector<16x10xf32>
    %1145 = vector.shape_cast %1136 : vector<16x1xi32> to vector<16x1xi32>
    %1146 = vector.broadcast %1145 : vector<16x1xi32> to vector<16x10xi32>
    %1147 = arith.select %1141, %1146, %1035 : vector<16x10xi1>, vector<16x10xi32>
    %c0_401 = arith.constant 0 : index
    %c0_402 = arith.constant 0 : index
    %1148 = vector.load %arg8[%c0_401, %c0_402] : memref<16x10xf32, #tpu.memory_space<vmem>>, vector<16x10xf32>
    tpu.vector_store %arg8[%c0_401, %c0_402], %1144 {strides = array<i32>} : memref<16x10xf32, #tpu.memory_space<vmem>>, vector<16x10xf32>,
    %c0_403 = arith.constant 0 : index
    %c0_404 = arith.constant 0 : index
    %1149 = vector.load %arg9[%c0_403, %c0_404] : memref<16x10xi32, #tpu.memory_space<vmem>>, vector<16x10xi32>
    tpu.vector_store %arg9[%c0_403, %c0_404], %1147 {strides = array<i32>} : memref<16x10xi32, #tpu.memory_space<vmem>>, vector<16x10xi32>,
    %c0_i32_405 = arith.constant 0 : i32
    %1150 = arith.cmpi eq, %arg1, %c0_i32_405 : i32
    %1151 = arith.extui %1150 : i1 to i32
    %c0_i32_406 = arith.constant 0 : i32
    %1152 = arith.cmpi ne, %1151, %c0_i32_406 : i32
    scf.if %1152 {
      %c0_407 = arith.constant 0 : index
      %c0_408 = arith.constant 0 : index
      %1153 = vector.load %arg8[%c0_407, %c0_408] : memref<16x10xf32, #tpu.memory_space<vmem>>, vector<16x10xf32>
      %c0_409 = arith.constant 0 : index
      %c0_410 = arith.constant 0 : index
      %c0_411 = arith.constant 0 : index
      %1154 = vector.load %arg6[%c0_409, %c0_410, %c0_411] : memref<1x16x10xf32, #tpu.memory_space<vmem>>, vector<1x16x10xf32>
      %1155 = vector.shape_cast %1154 : vector<1x16x10xf32> to vector<16x10xf32>
      %1156 = vector.shape_cast %1153 : vector<16x10xf32> to vector<1x16x10xf32>
      tpu.vector_store %arg6[%c0_409, %c0_410, %c0_411], %1156 {strides = array<i32>} : memref<1x16x10xf32, #tpu.memory_space<vmem>>, vector<1x16x10xf32>,
      %c0_412 = arith.constant 0 : index
      %c0_413 = arith.constant 0 : index
      %1157 = vector.load %arg9[%c0_412, %c0_413] : memref<16x10xi32, #tpu.memory_space<vmem>>, vector<16x10xi32>
      %c0_414 = arith.constant 0 : index
      %c0_415 = arith.constant 0 : index
      %c0_416 = arith.constant 0 : index
      %1158 = vector.load %arg7[%c0_414, %c0_415, %c0_416] : memref<1x16x10xi32, #tpu.memory_space<vmem>>, vector<1x16x10xi32>
      %1159 = vector.shape_cast %1158 : vector<1x16x10xi32> to vector<16x10xi32>
      %1160 = vector.shape_cast %1157 : vector<16x10xi32> to vector<1x16x10xi32>
      tpu.vector_store %arg7[%c0_414, %c0_415, %c0_416], %1160 {strides = array<i32>} : memref<1x16x10xi32, #tpu.memory_space<vmem>>, vector<1x16x10xi32>,
    } else {
    }
    return
  }
  func.func @transform_0(%arg0: i32, %arg1: i32, %arg2: memref<1xi32, #tpu.memory_space<smem>>) -> (i32, i32) {
    %c0_i32 = arith.constant 0 : i32
    %c0_i32_0 = arith.constant 0 : i32
    %c0_i32_1 = arith.constant 0 : i32
    return %c0_i32, %c0_i32_0 : i32, i32
  }
  func.func @transform_1(%arg0: i32, %arg1: i32, %arg2: memref<1xi32, #tpu.memory_space<smem>>) -> (i32, i32) {
    %c1_i32 = arith.constant 1 : i32
    %0 = arith.muli %arg0, %c1_i32 : i32
    %1 = arith.addi %0, %arg1 : i32
    %c0_i32 = arith.constant 0 : i32
    %c0_i32_0 = arith.constant 0 : i32
    return %c0_i32, %1 : i32, i32
  }
  func.func @transform_2(%arg0: i32, %arg1: i32, %arg2: memref<1xi32, #tpu.memory_space<smem>>) -> (i32, i32) {
    %c0_i32 = arith.constant 0 : i32
    %c0_i32_0 = arith.constant 0 : i32
    %c0_i32_1 = arith.constant 0 : i32
    return %c0_i32, %c0_i32_0 : i32, i32
  }
  func.func @transform_3(%arg0: i32, %arg1: i32, %arg2: memref<1xi32, #tpu.memory_space<smem>>) -> (i32, i32, i32) {
    %c0_i32 = arith.constant 0 : i32
    %c0_i32_0 = arith.constant 0 : i32
    %c0_i32_1 = arith.constant 0 : i32
    return %arg0, %c0_i32, %c0_i32_0 : i32, i32, i32
  }
  func.func @transform_4(%arg0: i32, %arg1: i32, %arg2: memref<1xi32, #tpu.memory_space<smem>>) -> (i32, i32, i32) {
    %c0_i32 = arith.constant 0 : i32
    %c0_i32_0 = arith.constant 0 : i32
    %c0_i32_1 = arith.constant 0 : i32
    return %arg0, %c0_i32, %c0_i32_0 : i32, i32, i32
  }
}

</mosaic_0001>

<bundles_post_ra>
// kernel: tpu_custom_call.1
= control target key start
LH: loop header
LB: loop body
LE: loop exit
PB: predicated region body
PF: predicated region fallthrough
CT: control target
= control target key end

     0   :  { %s8807_s0 = inlined_call_operand.<no memory space> [shape: s32[1], index: 0, kind: input, shape index: {}]   ;;  %s8808_s1 = inlined_call_operand.vmem [shape: bf16[16,256], index: 1, kind: input, shape index: {}]   ;;  %s8809_s2 = inlined_call_operand.hbm [shape: bf16[256,1024], index: 2, kind: input, shape index: {}]   ;;  %s8810_s3 = inlined_call_operand.vmem [shape: f32[16,1], index: 3, kind: input, shape index: {}]   ;;  %s8811_s4 = inlined_call_operand.vmem [shape: f32[2,16,10], index: 4, kind: output, shape index: {0}]   ;;  %s8812_s5 = inlined_call_operand.vmem [shape: s32[2,16,10], index: 5, kind: output, shape index: {1}]  }
   0x1   :  { %11 = sst [smem:[#allocation5]] %s8807_s0 }
   0x2   :  { %12 = vsyncpa [#allocation7], 0 }
   0x3   :  { %14 = vsyncpa [#allocation7 + $0x1], 0  ;;  %s7002_s20 = smov 0   ;;  %s7004_s21 = smov 0  }
   0x4   :  { %s7006_s22 = smov 0   ;;  %s7008_s23 = smov 0  }
   0x5   :  { %s7010_s24 = smov 0   ;;  %s7012_s25 = smov 0  }
   0x6 LB: > { %s6156_s0 = sadd.s32 4294967295, %s6961_s25   ;;  %s32_s26 = sadd.s32 1, %s6957_s24  ;;  %s6961_s25 = sphi %s7012_s25, %s20_s25   ;;  %s6957_s24 = sphi %s7010_s24, %s9145_s24   ;;  %s6953_s23 = sphi %s7008_s23, %s9144_s23   ;;  %s6949_s22 = sphi %s7006_s22, %s9143_s22   ;;  %s6945_s21 = sphi %s7004_s21, %s9142_s21   ;;  %s6941_s20 = sphi %s7002_s20, %s9141_s20  }
   0x7   : > { %p34_p0 = scmp.ge.s32.totalorder %s32_s26, 2  ;;  %s62_s27 = sadd.s32 1, %s6949_s22 }
   0x8   : > { %p69_p1 = scmp.ne.s32.totalorder %s6949_s22, %s6945_s21  ;;  %p70_p2 = scmp.eq.s32.totalorder %s6961_s25, 0 }
   0x9   : > { %s9147_s26 = smov (%p34_p0, %s32_s26), 0  ;;  %p75_p4 = scmp.ne.s32.totalorder %s6945_s21, %s6941_s20 }
   0xa   : > { %p7038_p3 = por %p70_p2, %p69_p1  ;;  %s59_s29 = ssub.s32 %s6957_s24, %s9147_s26 }
   0xb   : > { %p76_p5 = scmp.eq.s32.totalorder %s6156_s0, 0  ;;  %p60_p6 = scmp.eq.s32.totalorder %s59_s29, 0 }
   0xc   : > { %p6727_p8 = scmp.lt.s32.totalorder %s6961_s25, 2  ;;  %s178_s7 = sand.u32 1, %s6949_s22  }
   0xd   : > { %p7045_p7 = por %p76_p5, %p75_p4  ;;  %s6718_s8 = sshll.u32 %s6957_s24, 8 }
   0xe   : > { %s7051_s6 = scalar_select %p60_p6, %s6949_s22, %s62_s27  }
   0xf   : > { %s6160_s9 = sshll.u32 %s178_s7, 9  ;;  %s7058_s12 = scalar_lea.hbm %s8809_s2, %s6718_s8 }
  0x10   : > { %s182_s13 = scalar_lea.vmem [#allocation6], %s6160_s9  ;;  %p7062_p9 = pnand %p6727_p8, %p7038_p3 }
  0x11   : > { %s190_s14 = sshll.u32 %s182_s13, 4  ;;  %s7069_s16 = scalar_lea.sflag [#allocation7], %s178_s7  ;;  %s7066_s14 = int_to_ptr.vmem [resolvable:$true] %s190_s14 }
  0x12   : > { %s6881_s17 = scalar_lea.hbm %s7058_s12, 8192  ;;  %p6883_p12 = pneg %p7062_p9 }
  0x13   : > { %p6882_p11 = scmp.ne.s32.totalorder %s7058_s12, %s6881_s17  ;;  %s6886_s20 = scalar_lea.hbm %s8809_s2, 16384 }
  0x14   : > { %p6887_p1 = scmp.lt.u32.totalorder %s7058_s12, %s8809_s2  ;;  %p6888_p2 = scmp.lt.u32.totalorder %s6886_s20, %s6881_s17 }
  0x15   : > { %p6884_p13 = pnand %p6883_p12, %p6882_p11  ;;  %p6890_p4 = scmp.lt.u32.totalorder %s6881_s17, %s7058_s12 }
  0x16   : > { %p6889_p3 = por %p6888_p2, %p6887_p1 }
  0x17   : > { %p6885_p0 = pneg %p6884_p13 }
  0x18   : > { %p6891_p5 = por %p6890_p4, %p6889_p3 }
  0x1a   : > { %p6892_p6 = pnand %p6891_p5, %p6885_p0 }
  0x1c   : > { %6895 = shalt.err (!%p6892_p6)
}
  0x1d   : > { %s6896_s28 = scalar_lea.vmem %s7066_s14, 8192  ;;  %s6963_s29 = smov [#allocation6]  }
  0x1e   : > { %p6897_p8 = scmp.ne.s32.totalorder %s7066_s14, %s6896_s28  ;;  %s6901_s7 = sshll.u32 %s6963_s29, 4  ;;  %s6902_s7 = int_to_ptr.vmem [resolvable:$false] %s6901_s7 }
  0x1f   : > { %s6903_s8 = scalar_lea.vmem %s6902_s7, 16384  ;;  %p6904_p10 = scmp.lt.s32.totalorder %s7066_s14, %s6902_s7 }
  0x20   : > { %p6899_p11 = pnand %p6897_p8, %p6883_p12  ;;  %p6905_p1 = scmp.lt.s32.totalorder %s6903_s8, %s6896_s28 }
  0x22   : > { %p6900_p13 = pneg %p6899_p11  ;;  %p6906_p2 = por %p6905_p1, %p6904_p10 }
  0x24   : > { %p6907_p3 = pnand %p6906_p2, %p6900_p13 }
  0x26   : > { %6910 = shalt.err (!%p6907_p3)
}
  0x27   : > { %s6964_s9 = smov 512   ;;  %s6965_s10 = smov 256  }
  0x28   : > { %s6966_s11 = smov 16   ;;  %p198_p12 = scmp.lt.s32.totalorder %s6961_s25, 3 }
  0x29   : > { %6726 = dma.hbm_to_vmem [thread:$0]  (!%p7062_p9), %s7058_s12, 8192, %s7066_s14, %s7069_s16, %s6964_s9, %s6965_s10, %s6966_s11  }
  0x2a   : > { %p8923_p0 = scmp.ge.s32.totalorder %s6961_s25, 1 }
  0x2c   : > { %p199_p4 = pnand %p8923_p0, %p198_p12 }
  0x2e   : > { %202 = sbr.rel (%p199_p4) target bundleno = 1614 (0x64e), region = 32 }
  0x35   : > { %s204_s13 = sand.u32 1, %s6945_s21  }
  0x36   : > { %s6164_s17 = sshll.u32 %s204_s13, 9  ;;  %s205_s18 = scalar_lea.sflag [#allocation7], %s204_s13 }
  0x37   : > { %s7101_s19 = scalar_lea.vmem [#allocation6], %s6164_s17 }
  0x38   : > { %6936 = dma.done.wait (%p7045_p7), %s205_s18, 8192  }
  0x39   : > { %6938 = vsyncadd (%p7045_p7), %s205_s18, 4294959104  ;;  %vm8901_vm0 = vcmask 80896   ;;  %v6967_v0 = vmov 0   ;;  %v6782_v1 = vld [vmem:[%s7101_s19 + $0x4] ss:$16 sps:$4 sm:$0xff]   ;;  %v743_v55 = vld [vmem:[%s8810_s3 + $0x8] sm:$0xff] }
  0x3a   : > { %6781 = vset.pattern.permute.xlu0 %v6967_v0  ;;  %258 = vst.msk [vmem:[#allocation3] sm:$0xff] %vm8901_vm0, %v6967_v0  ;;  %259 = vst.msk [vmem:[#allocation3 + $0x8] sm:$0xff] %vm8901_vm0, %v6967_v0  ;;  %v6784_v2 = vld [vmem:[%s7101_s19 + $0xc] ss:$16 sps:$4 sm:$0xff]   ;;  %656 = vmatprep.subr.bf16.mxu0 %v6782_v1  ;;  %v6786_v3 = vld [vmem:[%s7101_s19] ss:$16 sps:$4 sm:$0xff]  }
  0x3b   : > { %v6787_v4 = vld [vmem:[%s7101_s19 + $0x8] ss:$16 sps:$4 sm:$0xff]   ;;  %699 = vmatprep.subr.bf16.mxu1 %v6784_v2  ;;  %v6788_v5 = vld [vmem:[%s7101_s19 + $0x24] ss:$16 sps:$4 sm:$0xff]   ;;  %657 = vmatpush1.bf16.msra.mxu0 %v6786_v3  ;;  %v6790_v6 = vld [vmem:[%s7101_s19 + $0x2c] ss:$16 sps:$4 sm:$0xff]  }
  0x3c   : > { %700 = vmatpush1.bf16.msra.mxu1 %v6787_v4  ;;  %v6792_v7 = vld [vmem:[%s7101_s19 + $0x20] ss:$16 sps:$4 sm:$0xff]   ;;  %658 = vmatprep.subr.bf16.mxu0 %v6788_v5  ;;  %v6793_v8 = vld [vmem:[%s7101_s19 + $0x28] ss:$16 sps:$4 sm:$0xff]   ;;  %v6794_v9 = vld [vmem:[%s7101_s19 + $0x44] ss:$16 sps:$4 sm:$0xff]   ;;  %v762_v5 = vlaneseq }
  0x3d   : > { %701 = vmatprep.subr.bf16.mxu1 %v6790_v6  ;;  %v6796_v10 = vld [vmem:[%s7101_s19 + $0x4c] ss:$16 sps:$4 sm:$0xff]   ;;  %v6798_v11 = vld [vmem:[%s7101_s19 + $0x40] ss:$16 sps:$4 sm:$0xff]   ;;  %v6799_v12 = vld [vmem:[%s7101_s19 + $0x48] ss:$16 sps:$4 sm:$0xff]  }
  0x3e   : > { %v6800_v13 = vld [vmem:[%s7101_s19 + $0x64] ss:$16 sps:$4 sm:$0xff]   ;;  %v6802_v14 = vld [vmem:[%s7101_s19 + $0x6c] ss:$16 sps:$4 sm:$0xff]   ;;  %v6804_v15 = vld [vmem:[%s7101_s19 + $0x60] ss:$16 sps:$4 sm:$0xff]  }
  0x3f   : > { %659 = vmatpush1.bf16.msra.mxu0 %v6792_v7  ;;  %v6805_v16 = vld [vmem:[%s7101_s19 + $0x68] ss:$16 sps:$4 sm:$0xff]   ;;  %v6806_v17 = vld [vmem:[%s7101_s19 + $0x84] ss:$16 sps:$4 sm:$0xff]   ;;  %v6808_v18 = vld [vmem:[%s7101_s19 + $0x8c] ss:$16 sps:$4 sm:$0xff]  }
  0x40   : > { %702 = vmatpush1.bf16.msra.mxu1 %v6793_v8  ;;  %660 = vmatprep.subr.bf16.mxu0 %v6794_v9  ;;  %v6810_v19 = vld [vmem:[%s7101_s19 + $0x80] ss:$16 sps:$4 sm:$0xff]   ;;  %v6811_v20 = vld [vmem:[%s7101_s19 + $0x88] ss:$16 sps:$4 sm:$0xff]   ;;  %v6812_v21 = vld [vmem:[%s7101_s19 + $0xa4] ss:$16 sps:$4 sm:$0xff]  }
  0x41   : > { %703 = vmatprep.subr.bf16.mxu1 %v6796_v10  ;;  %v6814_v22 = vld [vmem:[%s7101_s19 + $0xac] ss:$16 sps:$4 sm:$0xff]   ;;  %v6816_v23 = vld [vmem:[%s7101_s19 + $0xa0] ss:$16 sps:$4 sm:$0xff]   ;;  %v6817_v24 = vld [vmem:[%s7101_s19 + $0xa8] ss:$16 sps:$4 sm:$0xff]  }
  0x42   : > { %v6818_v25 = vld [vmem:[%s7101_s19 + $0xc4] ss:$16 sps:$4 sm:$0xff]   ;;  %v6820_v26 = vld [vmem:[%s7101_s19 + $0xcc] ss:$16 sps:$4 sm:$0xff]   ;;  %v6822_v27 = vld [vmem:[%s7101_s19 + $0xc0] ss:$16 sps:$4 sm:$0xff]  }
  0x43   : > { %661 = vmatpush1.bf16.msra.mxu0 %v6798_v11  ;;  %v6823_v28 = vld [vmem:[%s7101_s19 + $0xc8] ss:$16 sps:$4 sm:$0xff]   ;;  %v6824_v29 = vld [vmem:[%s7101_s19 + $0xe4] ss:$16 sps:$4 sm:$0xff]   ;;  %v6826_v30 = vld [vmem:[%s7101_s19 + $0xec] ss:$16 sps:$4 sm:$0xff]  }
  0x44   : > { %704 = vmatpush1.bf16.msra.mxu1 %v6799_v12  ;;  %662 = vmatprep.subr.bf16.mxu0 %v6800_v13  ;;  %v6828_v31 = vld [vmem:[%s7101_s19 + $0xe0] ss:$16 sps:$4 sm:$0xff]   ;;  %v6829_v32 = vld [vmem:[%s7101_s19 + $0xe8] ss:$16 sps:$4 sm:$0xff]   ;;  %v6830_v33 = vld [vmem:[%s7101_s19 + $0x104] ss:$16 sps:$4 sm:$0xff]  }
  0x45   : > { %705 = vmatprep.subr.bf16.mxu1 %v6802_v14  ;;  %v6832_v34 = vld [vmem:[%s7101_s19 + $0x10c] ss:$16 sps:$4 sm:$0xff]   ;;  %v6834_v35 = vld [vmem:[%s7101_s19 + $0x100] ss:$16 sps:$4 sm:$0xff]   ;;  %v6835_v36 = vld [vmem:[%s7101_s19 + $0x108] ss:$16 sps:$4 sm:$0xff]  }
  0x46   : > { %v6836_v37 = vld [vmem:[%s7101_s19 + $0x124] ss:$16 sps:$4 sm:$0xff]   ;;  %v6838_v38 = vld [vmem:[%s7101_s19 + $0x12c] ss:$16 sps:$4 sm:$0xff]   ;;  %v6840_v39 = vld [vmem:[%s7101_s19 + $0x120] ss:$16 sps:$4 sm:$0xff]  }
  0x47   : > { %663 = vmatpush1.bf16.msra.mxu0 %v6804_v15  ;;  %v6841_v40 = vld [vmem:[%s7101_s19 + $0x128] ss:$16 sps:$4 sm:$0xff]   ;;  %v6842_v41 = vld [vmem:[%s7101_s19 + $0x144] ss:$16 sps:$4 sm:$0xff]   ;;  %v6844_v42 = vld [vmem:[%s7101_s19 + $0x14c] ss:$16 sps:$4 sm:$0xff]  }
  0x48   : > { %706 = vmatpush1.bf16.msra.mxu1 %v6805_v16  ;;  %664 = vmatprep.subr.bf16.mxu0 %v6806_v17  ;;  %v6846_v43 = vld [vmem:[%s7101_s19 + $0x140] ss:$16 sps:$4 sm:$0xff]   ;;  %v6847_v44 = vld [vmem:[%s7101_s19 + $0x148] ss:$16 sps:$4 sm:$0xff]   ;;  %v6848_v45 = vld [vmem:[%s7101_s19 + $0x164] ss:$16 sps:$4 sm:$0xff]  }
  0x49   : > { %707 = vmatprep.subr.bf16.mxu1 %v6808_v18  ;;  %v6850_v46 = vld [vmem:[%s7101_s19 + $0x16c] ss:$16 sps:$4 sm:$0xff]   ;;  %v6852_v48 = vld [vmem:[%s7101_s19 + $0x160] ss:$16 sps:$4 sm:$0xff]   ;;  %v6853_v49 = vld [vmem:[%s7101_s19 + $0x168] ss:$16 sps:$4 sm:$0xff]  }
  0x4a   : > { %v6880_v47 = vld [vmem:[%s8808_s1 + $0x4] ss:$8 sps:$4 sm:$0xff]   ;;  %v6858_v53 = vld [vmem:[%s7101_s19 + $0x180] ss:$16 sps:$4 sm:$0xff]   ;;  %v6859_v54 = vld [vmem:[%s7101_s19 + $0x188] ss:$16 sps:$4 sm:$0xff]  }
  0x4b   : > { %665 = vmatpush1.bf16.msra.mxu0 %v6810_v19  ;;  %v742_v50 = vld [vmem:[%s8810_s3] sm:$0xff]  ;;  %v6856_v52 = vld [vmem:[%s7101_s19 + $0x18c] ss:$16 sps:$4 sm:$0xff]   ;;  %688 = vmatprep.mubr.bf16.mxu0 %v6880_v47  ;;  %v6865_v59 = vld [vmem:[%s7101_s19 + $0x1a8] ss:$16 sps:$4 sm:$0xff]   ;;  %v7185_v6 = vand.u32 127, %v762_v5 }
  0x4c   : > { %708 = vmatpush1.bf16.msra.mxu1 %v6811_v20  ;;  %666 = vmatprep.subr.bf16.mxu0 %v6812_v21  ;;  %v6854_v51 = vld [vmem:[%s7101_s19 + $0x184] ss:$16 sps:$4 sm:$0xff]   ;;  %v6862_v57 = vld [vmem:[%s7101_s19 + $0x1ac] ss:$16 sps:$4 sm:$0xff]   ;;  %v6864_v58 = vld [vmem:[%s7101_s19 + $0x1a0] ss:$16 sps:$4 sm:$0xff]  }
  0x4d   : > { %709 = vmatprep.subr.bf16.mxu1 %v6814_v22  ;;  %731 = vmatprep.mubr.bf16.mxu1 %v6880_v47  ;;  %v6860_v56 = vld [vmem:[%s7101_s19 + $0x1a4] ss:$16 sps:$4 sm:$0xff]   ;;  %v6868_v61 = vld [vmem:[%s7101_s19 + $0x1cc] ss:$16 sps:$4 sm:$0xff]   ;;  %v6870_v62 = vld [vmem:[%s7101_s19 + $0x1c0] ss:$16 sps:$4 sm:$0xff]  }
  0x4e   : > { %746 = vperm.xlu0 %6781, %v742_v50   ;;  %v6866_v60 = vld [vmem:[%s7101_s19 + $0x1c4] ss:$16 sps:$4 sm:$0xff]   ;;  %v6871_v63 = vld [vmem:[%s7101_s19 + $0x1c8] ss:$16 sps:$4 sm:$0xff]   ;;  %v6874_v1 = vld [vmem:[%s7101_s19 + $0x1ec] ss:$16 sps:$4 sm:$0xff]  }
  0x4f   : > { %667 = vmatpush1.bf16.msra.mxu0 %v6816_v23  ;;  %v6872_v0 = vld [vmem:[%s7101_s19 + $0x1e4] ss:$16 sps:$4 sm:$0xff]   ;;  %v6876_v2 = vld [vmem:[%s7101_s19 + $0x1e0] ss:$16 sps:$4 sm:$0xff]   ;;  %v6877_v3 = vld [vmem:[%s7101_s19 + $0x1e8] ss:$16 sps:$4 sm:$0xff]  }
  0x50   : > { %710 = vmatpush1.bf16.msra.mxu1 %v6817_v24  ;;  %668 = vmatprep.subr.bf16.mxu0 %v6818_v25  ;;  %v6878_v4 = vld [vmem:[%s8808_s1] ss:$8 sps:$4 sm:$0xff]   ;;  %8924 = vst [vmem:[#allocation9_spill] sm:$0xff] %v7185_v6  ;;  %s794_s28 = sld [smem:[#allocation5]]  ;;  %v765_v7 = vadd.s32 256, %v7185_v6  ;;  %s6235_s29 = sshll.u32 %s6953_s23, 9 }
  0x51   : > { %711 = vmatprep.subr.bf16.mxu1 %v6820_v26  ;;  %v774_v8 = vshrl.u32 %v762_v5, 7  ;;  %v764_v9 = vadd.s32 128, %v7185_v6  ;;  %v766_v10 = vadd.s32 384, %v7185_v6  ;;  %v768_v11 = vstv %s6235_s29  ;;  %p240_p7 = scmp.lt.s32.totalorder %s6953_s23, 1 }
  0x52   : > { %751 = vperm.xlu0 %6781, %v743_v55   ;;  %v7192_v12 = vadd.s32 %v768_v11, %v7185_v6  ;;  %v7194_v13 = vadd.s32 %v768_v11, %v765_v7 }
  0x53   : > { %669 = vmatpush1.bf16.msra.mxu0 %v6822_v27  ;;  %v776_v14 = vmul.u32 1024, %v774_v8  ;;  %v7196_v15 = vadd.s32 %v768_v11, %v764_v9  ;;  %v7198_v16 = vadd.s32 %v768_v11, %v766_v10  ;;  %s9149_s23 = smov (!%p240_p7, %s6953_s23), 1 }
  0x54   : > { %712 = vmatpush1.bf16.msra.mxu1 %v6823_v28  ;;  %670 = vmatprep.subr.bf16.mxu0 %v6824_v29  ;;  %8925 = vst [vmem:[#allocation10_spill] sm:$0xff] %v7194_v13  ;;  %s6719_s8 = sshll.u32 %s9149_s23, 4 }
  0x55   : > { %713 = vmatprep.subr.bf16.mxu1 %v6826_v30  ;;  %8926 = vst [vmem:[#allocation11_spill] sm:$0xff] %v7196_v15  ;;  %8927 = vst [vmem:[#allocation12_spill] sm:$0xff] %v7198_v16  ;;  %v778_v17 = vadd.s32 %v776_v14, %v7192_v12  ;;  %v780_v18 = vadd.s32 %v776_v14, %v7194_v13  ;;  %v779_v19 = vadd.s32 %v776_v14, %v7196_v15  ;;  %s8550_s11 = scalar_lea.vmem %s8811_s4, %s6719_s8  ;;  %s249_s18 = scalar_lea.vmem %s8812_s5, %s6719_s8 }
  0x56   : > { %v781_v20 = vadd.s32 %v776_v14, %v7198_v16  ;;  %s795_s7 = smul.u32 2654435769, %s794_s28 }
  0x57   : > { %671 = vmatpush1.bf16.msra.mxu0 %v6828_v31  ;;  %v786_v21 = vmul.u32 10, %v778_v17  ;;  %v788_v22 = vmul.u32 10, %v780_v18 }
  0x58   : > { %714 = vmatpush1.bf16.msra.mxu1 %v6829_v32  ;;  %672 = vmatprep.subr.bf16.mxu0 %v6830_v33  ;;  %v787_v23 = vmul.u32 10, %v779_v19  ;;  %v789_v24 = vmul.u32 10, %v781_v20  ;;  %v7204_v25 = vstv %s795_s7 }
  0x59   : > { %715 = vmatprep.subr.bf16.mxu1 %v6832_v34  ;;  %v7207_v26 = vadd.s32 %v7204_v25, %v786_v21  ;;  %v7210_v27 = vadd.s32 %v7204_v25, %v788_v22 }
  0x5a   : > { %v7213_v28 = vadd.s32 %v7204_v25, %v787_v23  ;;  %v7216_v29 = vadd.s32 %v7204_v25, %v789_v24 }
  0x5b   : > { %673 = vmatpush1.bf16.msra.mxu0 %v6834_v35  ;;  %v1324_v30 = vadd.s32 1, %v7207_v26  ;;  %v1326_v31 = vadd.s32 1, %v7210_v27 }
  0x5c   : > { %716 = vmatpush1.bf16.msra.mxu1 %v6835_v36  ;;  %674 = vmatprep.subr.bf16.mxu0 %v6836_v37  ;;  %v1325_v32 = vadd.s32 1, %v7213_v28  ;;  %v1327_v33 = vadd.s32 1, %v7216_v29  ;;  %v6236_v36 = vshrl.u32 %v7207_v26, 16  ;;  %v6238_v37 = vshrl.u32 %v7210_v27, 16 }
  0x5d   : > { %717 = vmatprep.subr.bf16.mxu1 %v6838_v38  ;;  %v6284_v34 = vshrl.u32 %v1324_v30, 16  ;;  %v6286_v35 = vshrl.u32 %v1326_v31, 16 }
  0x5e   : > { %v6285_v38 = vshrl.u32 %v1325_v32, 16 }
  0x5f   : > { %675 = vmatpush1.bf16.msra.mxu0 %v6840_v39  ;;  %v6287_v39 = vshrl.u32 %v1327_v33, 16 }
  0x60   : > { %718 = vmatpush1.bf16.msra.mxu1 %v6841_v40  ;;  %676 = vmatprep.subr.bf16.mxu0 %v6842_v41  ;;  %v6237_v40 = vshrl.u32 %v7213_v28, 16  ;;  %v6239_v41 = vshrl.u32 %v7216_v29, 16 }
  0x61   : > { %719 = vmatprep.subr.bf16.mxu1 %v6844_v42  ;;  %v1348_v42 = vxor.u32 %v6284_v34, %v1324_v30  ;;  %v1351_v47 = vxor.u32 %v6287_v39, %v1327_v33 }
  0x63   : > { %677 = vmatpush1.bf16.msra.mxu0 %v6846_v43  ;;  %v1350_v43 = vxor.u32 %v6286_v35, %v1326_v31  ;;  %v1356_v50 = vmul.u32 2246822507, %v1348_v42 }
  0x64   : > { %720 = vmatpush1.bf16.msra.mxu1 %v6847_v44  ;;  %678 = vmatprep.subr.bf16.mxu0 %v6848_v45  ;;  %v825_v44 = vxor.u32 %v6236_v36, %v7207_v26  ;;  %v827_v45 = vxor.u32 %v6238_v37, %v7210_v27 }
  0x65   : > { %721 = vmatprep.subr.bf16.mxu1 %v6850_v46  ;;  %v1349_v46 = vxor.u32 %v6285_v38, %v1325_v32  ;;  %v6292_v55 = vshrl.u32 %v1356_v50, 13 }
  0x67   : > { %679 = vmatpush1.bf16.msra.mxu0 %v6852_v48  ;;  %v826_v48 = vxor.u32 %v6237_v40, %v7213_v28 }
  0x68   : > { %722 = vmatpush1.bf16.msra.mxu1 %v6853_v49  ;;  %680 = vmatprep.subr.bf16.mxu0 %v6854_v51  ;;  %v828_v49 = vxor.u32 %v6239_v41, %v7216_v29  ;;  %v1358_v51 = vmul.u32 2246822507, %v1350_v43 }
  0x69   : > { %723 = vmatprep.subr.bf16.mxu1 %v6856_v52  ;;  %v1357_v52 = vmul.u32 2246822507, %v1349_v46 }
  0x6b   : > { %681 = vmatpush1.bf16.msra.mxu0 %v6858_v53  ;;  %v1359_v53 = vmul.u32 2246822507, %v1351_v47 }
  0x6c   : > { %724 = vmatpush1.bf16.msra.mxu1 %v6859_v54  ;;  %682 = vmatprep.subr.bf16.mxu0 %v6860_v56  ;;  %v7230_v54 = vadd.s32 8, %v774_v8  ;;  %v6294_v56 = vshrl.u32 %v1358_v51, 13 }
  0x6d   : > { %725 = vmatprep.subr.bf16.mxu1 %v6862_v57  ;;  %v833_v57 = vmul.u32 2246822507, %v825_v44 }
  0x6f   : > { %683 = vmatpush1.bf16.msra.mxu0 %v6864_v58  ;;  %v834_v58 = vmul.u32 2246822507, %v826_v48 }
  0x70   : > { %726 = vmatpush1.bf16.msra.mxu1 %v6865_v59  ;;  %684 = vmatprep.subr.bf16.mxu0 %v6866_v60  ;;  %v6293_v59 = vshrl.u32 %v1357_v52, 13  ;;  %v6295_v60 = vshrl.u32 %v1359_v53, 13 }
  0x71   : > { %727 = vmatprep.subr.bf16.mxu1 %v6868_v61  ;;  %v835_v61 = vmul.u32 2246822507, %v827_v45 }
  0x73   : > { %685 = vmatpush1.bf16.msra.mxu0 %v6870_v62  ;;  %v836_v62 = vmul.u32 2246822507, %v828_v49  ;;  %v6246_v5 = vshrl.u32 %v835_v61, 13 }
  0x74   : > { %728 = vmatpush1.bf16.msra.mxu1 %v6871_v63  ;;  %686 = vmatprep.subr.bf16.mxu0 %v6872_v0  ;;  %v1380_v63 = vxor.u32 %v6292_v55, %v1356_v50  ;;  %v1382_v0 = vxor.u32 %v6294_v56, %v1358_v51 }
  0x75   : > { %729 = vmatprep.subr.bf16.mxu1 %v6874_v1  ;;  %v6244_v1 = vshrl.u32 %v833_v57, 13  ;;  %v6247_v7 = vshrl.u32 %v836_v62, 13  ;;  %v859_v18 = vxor.u32 %v6246_v5, %v835_v61 }
  0x76   : > { %v1388_v9 = vmul.u32 3266489909, %v1380_v63  ;;  %v1390_v10 = vmul.u32 3266489909, %v1382_v0 }
  0x77   : > { %687 = vmatpush1.bf16.msra.mxu0 %v6876_v2  ;;  %v6245_v2 = vshrl.u32 %v834_v58, 13  ;;  %v857_v8 = vxor.u32 %v6244_v1, %v833_v57  ;;  %v860_v19 = vxor.u32 %v6247_v7, %v836_v62  ;;  %v867_v31 = vmul.u32 3266489909, %v859_v18 }
  0x78   : > { %730 = vmatpush1.bf16.msra.mxu1 %v6877_v3  ;;  %v1381_v3 = vxor.u32 %v6293_v59, %v1357_v52  ;;  %v6300_v20 = vshrl.u32 %v1388_v9, 16  ;;  %v6302_v21 = vshrl.u32 %v1390_v10, 16 }
  0x79   : > { %v858_v11 = vxor.u32 %v6245_v2, %v834_v58  ;;  %v865_v22 = vmul.u32 3266489909, %v857_v8  ;;  %v868_v32 = vmul.u32 3266489909, %v860_v19  ;;  %v6254_v39 = vshrl.u32 %v867_v31, 16 }
  0x7a   : > { %689 = vmatmul.mubr.bf16.vlgmr.msra.gmra.mrb[0].mxu0 %v6878_v4  ;;  %v1389_v14 = vmul.u32 3266489909, %v1381_v3  ;;  %v1412_v33 = vxor.u32 %v6300_v20, %v1388_v9  ;;  %v1414_v34 = vxor.u32 %v6302_v21, %v1390_v10 }
  0x7b   : > { %732 = vmatmul.mubr.bf16.vlgmr.msra.gmra.mrb[0].mxu1 %v6878_v4  ;;  %v1383_v4 = vxor.u32 %v6295_v60, %v1359_v53  ;;  %v866_v23 = vmul.u32 3266489909, %v858_v11  ;;  %v6252_v35 = vshrl.u32 %v865_v22, 16  ;;  %v6255_v40 = vshrl.u32 %v868_v32, 16 }
  0x7c   : > { %v6301_v24 = vshrl.u32 %v1389_v14, 16  ;;  %v1420_v41 = vand.u32 8388607, %v1412_v33  ;;  %v1422_v42 = vand.u32 8388607, %v1414_v34  ;;  %v891_v47 = vxor.u32 %v6254_v39, %v867_v31 }
  0x7d   : > { %v1391_v17 = vmul.u32 3266489909, %v1383_v4  ;;  %v6253_v36 = vshrl.u32 %v866_v23, 16  ;;  %v889_v43 = vxor.u32 %v6252_v35, %v865_v22  ;;  %v892_v48 = vxor.u32 %v6255_v40, %v868_v32 }
  0x7e   : > { %v1413_v37 = vxor.u32 %v6301_v24, %v1389_v14  ;;  %v1428_v49 = vor.u32 1065353216, %v1420_v41  ;;  %v1430_v50 = vor.u32 1065353216, %v1422_v42  ;;  %v899_v56 = vand.u32 8388607, %v891_v47 }
  0x7f   : > { %v6303_v30 = vshrl.u32 %v1391_v17, 16  ;;  %v890_v44 = vxor.u32 %v6253_v36, %v866_v23  ;;  %v897_v51 = vand.u32 8388607, %v889_v43  ;;  %v900_v57 = vand.u32 8388607, %v892_v48 }
  0x80   : > { %v1421_v45 = vand.u32 8388607, %v1413_v37  ;;  %v6308_v58 = vadd.f32 -1.0, %v1428_v49  ;;  %v6310_v59 = vadd.f32 -1.0, %v1430_v50  ;;  %v907_v0 = vor.u32 1065353216, %v899_v56 }
  0x81   : > { %v1415_v38 = vxor.u32 %v6303_v30, %v1391_v17  ;;  %v898_v52 = vand.u32 8388607, %v890_v44  ;;  %v905_v60 = vor.u32 1065353216, %v897_v51  ;;  %v908_v1 = vor.u32 1065353216, %v900_v57 }
  0x82   : > { %v1429_v53 = vor.u32 1065353216, %v1421_v45  ;;  %v1452_v2 = vadd.f32 5.9604645e-08, %v6308_v58  ;;  %v1454_v3 = vadd.f32 5.9604645e-08, %v6310_v59  ;;  %v6262_v10 = vadd.f32 -1.0, %v907_v0 }
  0x83   : > { %v1423_v46 = vand.u32 8388607, %v1415_v38  ;;  %v906_v61 = vor.u32 1065353216, %v898_v52  ;;  %v6260_v4 = vadd.f32 -1.0, %v905_v60  ;;  %v6263_v8 = vadd.f32 -1.0, %v908_v1 }
  0x84   : > { %v6309_v62 = vadd.f32 -1.0, %v1429_v53  ;;  %v1492_v11 = vand.u32 8388607, %v1452_v2  ;;  %v1494_v14 = vand.u32 8388607, %v1454_v3  ;;  %v7236_v21 = vadd.f32 5.9604645e-08, %v6262_v10 }
  0x85   : > { %v1431_v55 = vor.u32 1065353216, %v1423_v46  ;;  %v6261_v5 = vadd.f32 -1.0, %v906_v61  ;;  %v7232_v17 = vadd.f32 5.9604645e-08, %v6260_v4  ;;  %v7238_v22 = vadd.f32 5.9604645e-08, %v6263_v8 }
  0x86   : > { %v1453_v7 = vadd.f32 5.9604645e-08, %v6309_v62  ;;  %v1500_v23 = vor.u32 1065353216, %v1492_v11  ;;  %v1502_v24 = vor.u32 1065353216, %v1494_v14  ;;  %v971_v34 = vand.u32 8388607, %v7236_v21 }
  0x87   : > { %v6311_v63 = vadd.f32 -1.0, %v1431_v55  ;;  %v7234_v18 = vadd.f32 5.9604645e-08, %v6261_v5  ;;  %v969_v30 = vand.u32 8388607, %v7232_v17  ;;  %v972_v35 = vand.u32 8388607, %v7238_v22 }
  0x88   : > { %v1493_v19 = vand.u32 8388607, %v1453_v7  ;;  %v1516_v36 = vmul.f32 -0.05657085, %v1500_v23  ;;  %v1518_v37 = vmul.f32 -0.05657085, %v1502_v24 }
  0x89   : > { %v1455_v9 = vadd.f32 5.9604645e-08, %v6311_v63  ;;  %v970_v31 = vand.u32 8388607, %v7234_v18  ;;  %v7244_v38 = vor.u32 1065353216, %v969_v30  ;;  %v7249_v42 = vmul.u32 1024, %v7230_v54 }
  0x8a   : > { %v1501_v32 = vor.u32 1065353216, %v1493_v19  ;;  %v1524_v43 = vadd.f32 0.44717956, %v1516_v36  ;;  %v1526_v44 = vadd.f32 0.44717956, %v1518_v37  ;;  %v7253_v48 = vadd.s32 2, %v7207_v26 }
  0x8b   : > { %v1495_v20 = vand.u32 8388607, %v1455_v9  ;;  %v7246_v41 = vor.u32 1065353216, %v970_v31  ;;  %v993_v45 = vmul.f32 -0.05657085, %v7244_v38  ;;  %v7256_v49 = vadd.s32 2, %v7213_v28 }
  0x8c   : > { %v1517_v39 = vmul.f32 -0.05657085, %v1501_v32  ;;  %v1532_v50 = vmul.f32 %v1524_v43, %v1500_v23  ;;  %v1534_v51 = vmul.f32 %v1526_v44, %v1502_v24  ;;  %v7258_v52 = vor.u32 1065353216, %v971_v34 }
  0x8d   : > { %v1503_v33 = vor.u32 1065353216, %v1495_v20  ;;  %v7260_v53 = vor.u32 1065353216, %v972_v35  ;;  %v994_v56 = vmul.f32 -0.05657085, %v7246_v41  ;;  %v1001_v57 = vadd.f32 0.44717956, %v993_v45 }
  0x8e   : > { %v1525_v46 = vadd.f32 0.44717956, %v1517_v39  ;;  %v1468_v58 = vshra.s32 %v1452_v2, 23  ;;  %v1470_v59 = vshra.s32 %v1454_v3, 23  ;;  %v1540_v60 = vadd.f32 -1.4699568, %v1532_v50 }
  0x8f   : > { %v1519_v40 = vmul.f32 -0.05657085, %v1503_v33  ;;  %v1542_v61 = vadd.f32 -1.4699568, %v1534_v51  ;;  %v1469_v62 = vshra.s32 %v1453_v7, 23  ;;  %v1471_v63 = vshra.s32 %v1455_v9, 23 }
  0x90   : > { %v1533_v54 = vmul.f32 %v1525_v46, %v1501_v32  ;;  %v1476_v4 = vand.u32 255, %v1468_v58  ;;  %v1478_v5 = vand.u32 255, %v1470_v59  ;;  %v1548_v10 = vmul.f32 %v1540_v60, %v1500_v23 }
  0x91   : > { %v1527_v47 = vadd.f32 0.44717956, %v1519_v40  ;;  %v1550_v8 = vmul.f32 %v1542_v61, %v1502_v24  ;;  %v1477_v11 = vand.u32 255, %v1469_v62  ;;  %v1479_v14 = vand.u32 255, %v1471_v63 }
  0x92   : > { %v1541_v0 = vadd.f32 -1.4699568, %v1533_v54  ;;  %v6316_v30 = vadd.s32 4294967169, %v1476_v4  ;;  %v6318_v31 = vadd.s32 4294967169, %v1478_v5  ;;  %v1556_v34 = vadd.f32 2.8212025, %v1548_v10 }
  0x93   : > { %v1535_v55 = vmul.f32 %v1527_v47, %v1503_v33  ;;  %v1558_v35 = vadd.f32 2.8212025, %v1550_v8  ;;  %v6317_v2 = vadd.s32 4294967169, %v1477_v11  ;;  %v6319_v3 = vadd.s32 4294967169, %v1479_v14 }
  0x94   : > { %v1549_v19 = vmul.f32 %v1541_v0, %v1501_v32  ;;  %v1564_v7 = vmul.f32 %v1556_v34, %v1500_v23  ;;  %v1580_v39 = vcvt.s32.f32 %v6316_v30  ;;  %v1582_v40 = vcvt.s32.f32 %v6318_v31 }
  0x95   : > { %v1543_v1 = vadd.f32 -1.4699568, %v1535_v55  ;;  %v1566_v9 = vmul.f32 %v1558_v35, %v1502_v24  ;;  %v1581_v45 = vcvt.s32.f32 %v6317_v2  ;;  %v1583_v46 = vcvt.s32.f32 %v6319_v3 }
  0x96   : > { %v1557_v36 = vadd.f32 2.8212025, %v1549_v19  ;;  %v1572_v47 = vadd.f32 -1.7417939, %v1564_v7  ;;  %v1588_v51 = vmul.f32 0.6931472, %v1580_v39  ;;  %v7265_v54 = vadd.s32 %v7249_v42, %v7192_v12 }
  0x97   : > { %v1551_v20 = vmul.f32 %v1543_v1, %v1503_v33  ;;  %v1574_v50 = vadd.f32 -1.7417939, %v1566_v9  ;;  %v1589_v59 = vmul.f32 0.6931472, %v1581_v45  ;;  %v7269_v23 = vadd.s32 %v7249_v42, %v7194_v13 }
  0x98   : > { %v1565_v43 = vmul.f32 %v1557_v36, %v1501_v32  ;;  %v1590_v24 = vmul.f32 0.6931472, %v1582_v40  ;;  %v1591_v60 = vmul.f32 0.6931472, %v1583_v46  ;;  %v1596_v32 = vadd.f32 %v1588_v51, %v1572_v47 }
  0x99   : > { %v1559_v37 = vadd.f32 2.8212025, %v1551_v20  ;;  %v945_v62 = vshra.s32 %v7232_v17, 23  ;;  %v946_v63 = vshra.s32 %v7234_v18, 23  ;;  %v7277_v0 = vadd.s32 2, %v7216_v29 }
  0x9a   : > { %v1573_v55 = vadd.f32 -1.7417939, %v1565_v43  ;;  %v1598_v1 = vadd.f32 %v1590_v24, %v1574_v50  ;;  %v1604_v5 = vsub.f32 0.0, %v1596_v32  ;;  %v1002_v10 = vadd.f32 0.44717956, %v994_v56 }
  0x9b   : > { %v1567_v44 = vmul.f32 %v1559_v37, %v1503_v33  ;;  %v7272_v33 = vadd.s32 2, %v7210_v27  ;;  %v995_v11 = vmul.f32 -0.05657085, %v7258_v52  ;;  %v996_v14 = vmul.f32 -0.05657085, %v7260_v53 }
  0x9c   : > { %v1597_v61 = vadd.f32 %v1589_v59, %v1573_v55  ;;  %v1009_v19 = vmul.f32 %v1001_v57, %v7244_v38  ;;  %v1606_v20 = vsub.f32 0.0, %v1598_v1  ;;  %v1612_v31 = vmax.f32 %v1604_v5, 1e-10 }
  0x9d   : > { %v1575_v58 = vadd.f32 -1.7417939, %v1567_v44  ;;  %v947_v17 = vshra.s32 %v7236_v21, 23  ;;  %v948_v34 = vshra.s32 %v7238_v22, 23  ;;  %v953_v35 = vand.u32 255, %v945_v62 }
  0x9e   : > { %v1605_v8 = vsub.f32 0.0, %v1597_v61  ;;  %v954_v2 = vand.u32 255, %v946_v63  ;;  %v1614_v3 = vmax.f32 %v1606_v20, 1e-10  ;;  %v1652_v56 = vand.u32 8388607, %v1612_v31 }
  0x9f   : > { %v1599_v4 = vadd.f32 %v1591_v60, %v1575_v58  ;;  %v1010_v37 = vmul.f32 %v1002_v10, %v7246_v41  ;;  %v1003_v9 = vadd.f32 0.44717956, %v995_v11  ;;  %v1004_v39 = vadd.f32 0.44717956, %v996_v14 }
  0xa0   : > { %v1613_v18 = vmax.f32 %v1605_v8, 1e-10  ;;  %v7287_v57 = vadd.s32 %v7249_v42, %v7196_v15  ;;  %v1654_v40 = vand.u32 8388607, %v1614_v3  ;;  %v1660_v21 = vor.u32 1065353216, %v1652_v56 }
  0xa1   : > { %v1607_v30 = vsub.f32 0.0, %v1599_v4  ;;  %v955_v44 = vand.u32 255, %v947_v17  ;;  %v1011_v22 = vmul.f32 %v1003_v9, %v7258_v52  ;;  %v1012_v46 = vmul.f32 %v1004_v39, %v7260_v53 }
  0xa2   : > { %v1653_v7 = vand.u32 8388607, %v1613_v18  ;;  %v1017_v47 = vadd.f32 -1.4699568, %v1009_v19  ;;  %v7291_v50 = vor.u32 1065353216, %v1654_v40  ;;  %v7300_v1 = vadd.s32 %v7249_v42, %v7198_v16 }
  0xa3   : > { %v1615_v36 = vmax.f32 %v1607_v30, 1e-10  ;;  %v1676_v55 = vmul.f32 -0.05657085, %v1660_v21  ;;  %v1018_v58 = vadd.f32 -1.4699568, %v1010_v37 }
  0xa4   : > { %v1661_v45 = vor.u32 1065353216, %v1653_v7  ;;  %v1019_v24 = vadd.f32 -1.4699568, %v1011_v22  ;;  %v1020_v60 = vadd.f32 -1.4699568, %v1012_v46  ;;  %v1025_v32 = vmul.f32 %v1017_v47, %v7244_v38 }
  0xa5   : > { %v1655_v43 = vand.u32 8388607, %v1615_v36  ;;  %v1678_v61 = vmul.f32 -0.05657085, %v7291_v50  ;;  %v1684_v63 = vadd.f32 0.44717956, %v1676_v55  ;;  %v1026_v20 = vmul.f32 %v1018_v58, %v7246_v41 }
  0xa6   : > { %v1677_v59 = vmul.f32 -0.05657085, %v1661_v45  ;;  %v956_v5 = vand.u32 255, %v948_v34  ;;  %v7302_v10 = vadd.s32 4294967169, %v953_v35  ;;  %v7304_v8 = vadd.s32 4294967169, %v954_v2 }
  0xa7   : > { %v7293_v51 = vor.u32 1065353216, %v1655_v43  ;;  %v1686_v11 = vadd.f32 0.44717956, %v1678_v61  ;;  %v1692_v19 = vmul.f32 %v1684_v63, %v1660_v21  ;;  %v1027_v17 = vmul.f32 %v1019_v24, %v7258_v52 }
  0xa8   : > { %v1685_v4 = vadd.f32 0.44717956, %v1677_v59  ;;  %v1028_v56 = vmul.f32 %v1020_v60, %v7260_v53  ;;  %v1033_v37 = vadd.f32 2.8212025, %v1025_v32  ;;  %v1628_v7 = vshra.s32 %v1612_v31, 23 }
  0xa9   : > { %v1679_v62 = vmul.f32 -0.05657085, %v7293_v51  ;;  %v1630_v42 = vshra.s32 %v1614_v3, 23  ;;  %v1694_v9 = vmul.f32 %v1686_v11, %v7291_v50  ;;  %v1629_v35 = vshra.s32 %v1613_v18, 23 }
  0xaa   : > { %v1693_v30 = vmul.f32 %v1685_v4, %v1661_v45  ;;  %v1631_v2 = vshra.s32 %v1615_v36, 23  ;;  %v1700_v39 = vadd.f32 -1.4699568, %v1692_v19  ;;  %v1636_v43 = vand.u32 255, %v1628_v7 }
  0xab   : > { %v1687_v14 = vadd.f32 0.44717956, %v1679_v62  ;;  %v1638_v22 = vand.u32 255, %v1630_v42  ;;  %v1702_v46 = vadd.f32 -1.4699568, %v1694_v9  ;;  %v1637_v55 = vand.u32 255, %v1629_v35 }
  0xac   : > { %v1701_v40 = vadd.f32 -1.4699568, %v1693_v30  ;;  %v1708_v58 = vmul.f32 %v1700_v39, %v1660_v21  ;;  %v1034_v24 = vadd.f32 2.8212025, %v1026_v20  ;;  %v6324_v60 = vadd.s32 4294967169, %v1636_v43 }
  0xad   : > { %v1695_v34 = vmul.f32 %v1687_v14, %v7293_v51  ;;  %v6326_v32 = vadd.s32 4294967169, %v1638_v22  ;;  %v1710_v31 = vmul.f32 %v1702_v46, %v7291_v50  ;;  %v1639_v61 = vand.u32 255, %v1631_v2 }
  0xae   : > { %v1709_v59 = vmul.f32 %v1701_v40, %v1661_v45  ;;  %v1716_v62 = vadd.f32 2.8212025, %v1708_v58  ;;  %v6270_v36 = vadd.s32 4294967169, %v955_v44  ;;  %v6325_v63 = vadd.s32 4294967169, %v1637_v55 }
  0xaf   : > { %v1703_v47 = vadd.f32 -1.4699568, %v1695_v34  ;;  %v1718_v4 = vadd.f32 2.8212025, %v1710_v31  ;;  %v1740_v11 = vcvt.s32.f32 %v6324_v60  ;;  %v1035_v14 = vadd.f32 2.8212025, %v1027_v17 }
  0xb0   : > { %v1717_v18 = vadd.f32 2.8212025, %v1709_v59  ;;  %v1724_v19 = vmul.f32 %v1716_v62, %v1660_v21  ;;  %v1742_v30 = vcvt.s32.f32 %v6326_v32  ;;  %v1036_v7 = vadd.f32 2.8212025, %v1028_v56 }
  0xb1   : > { %v1711_v3 = vmul.f32 %v1703_v47, %v7293_v51  ;;  %v1041_v42 = vmul.f32 %v1033_v37, %v7244_v38  ;;  %v6271_v34 = vadd.s32 4294967169, %v956_v5  ;;  %v1057_v35 = vcvt.s32.f32 %v7302_v10 }
  0xb2   : > { %v1725_v9 = vmul.f32 %v1717_v18, %v1661_v45  ;;  %v6327_v39 = vadd.s32 4294967169, %v1639_v61  ;;  %v1042_v2 = vmul.f32 %v1034_v24, %v7246_v41  ;;  %v1058_v40 = vcvt.s32.f32 %v7304_v8 }
  0xb3   : > { %v1719_v20 = vadd.f32 2.8212025, %v1711_v3  ;;  %v1059_v44 = vcvt.s32.f32 %v6270_v36  ;;  %v1726_v43 = vmul.f32 %v1718_v4, %v7291_v50  ;;  %v1741_v22 = vcvt.s32.f32 %v6325_v63 }
  0xb4   : > { %v1748_v17 = vmul.f32 0.6931472, %v1740_v11  ;;  %v1043_v21 = vmul.f32 %v1035_v14, %v7258_v52  ;;  %v1732_v56 = vadd.f32 -1.7417939, %v1724_v19  ;;  %v1750_v46 = vmul.f32 0.6931472, %v1742_v30 }
  0xb5   : > { %v1044_v38 = vmul.f32 %v1036_v7, %v7260_v53  ;;  %v1049_v45 = vadd.f32 -1.7417939, %v1041_v42  ;;  %v1727_v5 = vmul.f32 %v1719_v20, %v7293_v51  ;;  %v1733_v10 = vadd.f32 -1.7417939, %v1725_v9 }
  0xb6   : > { %v1050_v37 = vadd.f32 -1.7417939, %v1042_v2  ;;  %v1051_v47 = vadd.f32 -1.7417939, %v1043_v21  ;;  %v1060_v55 = vcvt.s32.f32 %v6271_v34  ;;  %v1065_v8 = vmul.f32 0.6931472, %v1057_v35 }
  0xb7   : > { %v1052_v41 = vadd.f32 -1.7417939, %v1044_v38  ;;  %v1066_v58 = vmul.f32 0.6931472, %v1058_v40  ;;  %v1734_v59 = vadd.f32 -1.7417939, %v1726_v43  ;;  %v1743_v50 = vcvt.s32.f32 %v6327_v39 }
  0xb8   : > { %v1749_v24 = vmul.f32 0.6931472, %v1741_v22  ;;  %v1067_v60 = vmul.f32 0.6931472, %v1059_v44  ;;  %v1068_v32 = vmul.f32 0.6931472, %v1060_v55  ;;  %v1073_v52 = vadd.f32 %v1065_v8, %v1049_v45 }
  0xb9   : > { %v1074_v31 = vadd.f32 %v1066_v58, %v1050_v37  ;;  %v6332_v3 = vshrl.u32 %v7253_v48, 16  ;;  %v6333_v61 = vshrl.u32 %v7256_v49, 16  ;;  %v6334_v51 = vshrl.u32 %v7272_v33, 16 }
  0xba   : > { %v1075_v53 = vadd.f32 %v1067_v60, %v1051_v47  ;;  %v6335_v62 = vshrl.u32 %v7277_v0, 16  ;;  %v7325_v18 = vadd.f32 -1.7417939, %v1727_v5  ;;  %v1076_v36 = vadd.f32 %v1068_v32, %v1052_v41 }
  0xbb   : > { %v1081_v63 = vsub.f32 0.0, %v1073_v52  ;;  %v1082_v4 = vsub.f32 0.0, %v1074_v31  ;;  %v7327_v11 = vmul.f32 0.6931472, %v1743_v50  ;;  %v7329_v14 = vadd.f32 %v1748_v17, %v1732_v56 }
  0xbc   : > { %v7331_v19 = vadd.f32 %v1749_v24, %v1733_v10  ;;  %v1083_v30 = vsub.f32 0.0, %v1075_v53  ;;  %v1084_v7 = vsub.f32 0.0, %v1076_v36  ;;  %v1871_v9 = vxor.u32 %v6332_v3, %v7253_v48 }
  0xbd   : > { %v1089_v42 = vmax.f32 %v1081_v63, 1e-10  ;;  %v1090_v20 = vmax.f32 %v1082_v4, 1e-10  ;;  %v1872_v35 = vxor.u32 %v6333_v61, %v7256_v49  ;;  %v1873_v39 = vxor.u32 %v6334_v51, %v7272_v33 }
  0xbe   : > { %v1091_v34 = vmax.f32 %v1083_v30, 1e-10  ;;  %v1874_v2 = vxor.u32 %v6335_v62, %v7277_v0  ;;  %v1092_v40 = vmax.f32 %v1084_v7, 1e-10  ;;  %v7337_v17 = vadd.f32 %v1750_v46, %v1734_v59 }
  0xbf   : > { %v1105_v44 = vshra.s32 %v1089_v42, 23  ;;  %v1106_v43 = vshra.s32 %v1090_v20, 23  ;;  %v1129_v22 = vand.u32 8388607, %v1089_v42  ;;  %v1130_v56 = vand.u32 8388607, %v1090_v20 }
  0xc0   : > { %v1107_v21 = vshra.s32 %v1091_v34, 23  ;;  %v1131_v38 = vand.u32 8388607, %v1091_v34  ;;  %v1108_v45 = vshra.s32 %v1092_v40, 23  ;;  %v1132_v10 = vand.u32 8388607, %v1092_v40 }
  0xc1   : > { %v1113_v5 = vand.u32 255, %v1105_v44  ;;  %v1879_v48 = vmul.u32 2246822507, %v1871_v9  ;;  %v1137_v37 = vor.u32 1065353216, %v1129_v22  ;;  %v1138_v47 = vor.u32 1065353216, %v1130_v56 }
  0xc2   : > { %v7339_v49 = vor.u32 1065353216, %v1131_v38  ;;  %v1880_v33 = vmul.u32 2246822507, %v1872_v35  ;;  %v1114_v41 = vand.u32 255, %v1106_v43  ;;  %v7341_v0 = vor.u32 1065353216, %v1132_v10 }
  0xc3   : > { %v1881_v55 = vmul.u32 2246822507, %v1873_v39  ;;  %v1882_v8 = vmul.u32 2246822507, %v1874_v2  ;;  %v1115_v58 = vand.u32 255, %v1107_v21  ;;  %v1116_v46 = vand.u32 255, %v1108_v45 }
  0xc4   : > { %v1153_v59 = vmul.f32 -0.05657085, %v1137_v37  ;;  %v1154_v50 = vmul.f32 -0.05657085, %v1138_v47  ;;  %v6276_v24 = vadd.s32 4294967169, %v1113_v5  ;;  %v7346_v52 = vadd.s32 3, %v7207_v26 }
  0xc5   : > { %v1155_v60 = vmul.f32 -0.05657085, %v7339_v49  ;;  %v1156_v32 = vmul.f32 -0.05657085, %v7341_v0  ;;  %v6340_v53 = vshrl.u32 %v1879_v48, 13  ;;  %v790_v61 = vmul.u32 10, %v7265_v54 }
  0xc6   : > { %v1161_v31 = vadd.f32 0.44717956, %v1153_v59  ;;  %v1162_v3 = vadd.f32 0.44717956, %v1154_v50  ;;  %v6277_v51 = vadd.s32 4294967169, %v1114_v41  ;;  %v6341_v63 = vshrl.u32 %v1880_v33, 13 }
  0xc7   : > { %v1163_v62 = vadd.f32 0.44717956, %v1155_v60  ;;  %v1164_v36 = vadd.f32 0.44717956, %v1156_v32  ;;  %v6278_v4 = vadd.s32 4294967169, %v1115_v58  ;;  %v6279_v30 = vadd.s32 4294967169, %v1116_v46 }
  0xc8   : > { %v1169_v7 = vmul.f32 %v1161_v31, %v1137_v37  ;;  %v1170_v42 = vmul.f32 %v1162_v3, %v1138_v47  ;;  %v1217_v34 = vcvt.s32.f32 %v6276_v24  ;;  %v6342_v35 = vshrl.u32 %v1881_v55, 13 }
  0xc9   : > { %v1171_v20 = vmul.f32 %v1163_v62, %v7339_v49  ;;  %v1172_v9 = vmul.f32 %v1164_v36, %v7341_v0  ;;  %v6343_v40 = vshrl.u32 %v1882_v8, 13  ;;  %v1903_v44 = vxor.u32 %v6340_v53, %v1879_v48 }
  0xca   : > { %v1177_v39 = vadd.f32 -1.4699568, %v1169_v7  ;;  %v1178_v2 = vadd.f32 -1.4699568, %v1170_v42  ;;  %v1904_v22 = vxor.u32 %v6341_v63, %v1880_v33  ;;  %v1905_v21 = vxor.u32 %v6342_v35, %v1881_v55 }
  0xcb   : > { %v1179_v43 = vadd.f32 -1.4699568, %v1171_v20  ;;  %v1180_v54 = vadd.f32 -1.4699568, %v1172_v9  ;;  %v1906_v45 = vxor.u32 %v6343_v40, %v1882_v8  ;;  %v1911_v5 = vmul.u32 3266489909, %v1903_v44 }
  0xcc   : > { %v1185_v56 = vmul.f32 %v1177_v39, %v1137_v37  ;;  %v1186_v38 = vmul.f32 %v1178_v2, %v1138_v47  ;;  %v1218_v41 = vcvt.s32.f32 %v6277_v51  ;;  %v1912_v58 = vmul.u32 3266489909, %v1904_v22 }
  0xcd   : > { %v1187_v10 = vmul.f32 %v1179_v43, %v7339_v49  ;;  %v1913_v46 = vmul.u32 3266489909, %v1905_v21  ;;  %v1219_v24 = vcvt.s32.f32 %v6278_v4  ;;  %v1914_v60 = vmul.u32 3266489909, %v1906_v45 }
  0xce   : > { %v1193_v59 = vadd.f32 2.8212025, %v1185_v56  ;;  %v1194_v50 = vadd.f32 2.8212025, %v1186_v38  ;;  %v1188_v32 = vmul.f32 %v1180_v54, %v7341_v0  ;;  %v1220_v48 = vcvt.s32.f32 %v6279_v30 }
  0xcf   : > { %v6348_v31 = vshrl.u32 %v1911_v5, 16  ;;  %v6349_v3 = vshrl.u32 %v1912_v58, 16  ;;  %v7353_v55 = vmul.f32 0.6931472, %v1217_v34  ;;  %v6350_v53 = vshrl.u32 %v1913_v46, 16 }
  0xd0   : > { %v1201_v33 = vmul.f32 %v1193_v59, %v1137_v37  ;;  %v6351_v8 = vshrl.u32 %v1914_v60, 16  ;;  %v1195_v62 = vadd.f32 2.8212025, %v1187_v10  ;;  %v1202_v36 = vmul.f32 %v1194_v50, %v1138_v47 }
  0xd1   : > { %v1935_v63 = vxor.u32 %v6348_v31, %v1911_v5  ;;  %v1936_v51 = vxor.u32 %v6349_v3, %v1912_v58  ;;  %v7355_v7 = vmul.f32 0.6931472, %v1218_v41  ;;  %v7357_v42 = vmul.f32 0.6931472, %v1219_v24 }
  0xd2   : > { %v1937_v4 = vxor.u32 %v6350_v53, %v1913_v46  ;;  %v1938_v20 = vxor.u32 %v6351_v8, %v1914_v60  ;;  %v7359_v9 = vadd.f32 2.8212025, %v1188_v32  ;;  %v7361_v30 = vmul.f32 0.6931472, %v1220_v48 }
  0xd3   : > { %v1943_v35 = vand.u32 8388607, %v1935_v63  ;;  %v7364_v37 = vadd.s32 %v7204_v25, %v790_v61  ;;  %v7368_v34 = vadd.f32 %v7327_v11, %v7325_v18  ;;  %v7370_v47 = vadd.f32 -1.7417939, %v1201_v33 }
  0xd4   : > { %v1944_v39 = vand.u32 8388607, %v1936_v51  ;;  %v1945_v2 = vand.u32 8388607, %v1937_v4  ;;  %v7373_v40 = vmul.f32 %v1195_v62, %v7339_v49  ;;  %v7375_v44 = vadd.f32 -1.7417939, %v1202_v36 }
  0xd5   : > { %v1946_v43 = vand.u32 8388607, %v1938_v20  ;;  %v1951_v54 = vor.u32 1065353216, %v1943_v35  ;;  %v791_v61 = vmul.u32 10, %v7287_v57  ;;  %v792_v56 = vmul.u32 10, %v7269_v23 }
  0xd6   : > { %v1952_v22 = vor.u32 1065353216, %v1944_v39  ;;  %v1953_v21 = vor.u32 1065353216, %v1945_v2  ;;  %v793_v11 = vmul.u32 10, %v7300_v1  ;;  %v7381_v45 = vadd.s32 5, %v7364_v37 }
  0xd7   : > { %v1954_v38 = vor.u32 1065353216, %v1946_v43  ;;  %v6356_v18 = vadd.f32 -1.0, %v1951_v54  ;;  %v7384_v10 = vadd.s32 %v7204_v25, %v791_v61  ;;  %v7387_v41 = vadd.s32 %v7204_v25, %v792_v56 }
  0xd8   : > { %v6357_v5 = vadd.f32 -1.0, %v1952_v22  ;;  %v6358_v49 = vadd.f32 -1.0, %v1953_v21  ;;  %v7390_v57 = vadd.s32 %v7204_v25, %v793_v11  ;;  %v6480_v23 = vshrl.u32 %v7381_v45, 16 }
  0xd9   : > { %v6359_v58 = vadd.f32 -1.0, %v1954_v38  ;;  %v1975_v46 = vadd.f32 5.9604645e-08, %v6356_v18  ;;  %v3421_v50 = vadd.s32 5, %v7384_v10  ;;  %v3422_v24 = vadd.s32 5, %v7387_v41 }
  0xda   : > { %v1976_v59 = vadd.f32 5.9604645e-08, %v6357_v5  ;;  %v1977_v1 = vadd.f32 5.9604645e-08, %v6358_v49  ;;  %v3423_v31 = vadd.s32 5, %v7390_v57 }
  0xdb   : > { %v1978_v60 = vadd.f32 5.9604645e-08, %v6359_v58  ;;  %v1991_v32 = vshra.s32 %v1975_v46, 23  ;;  %v2015_v48 = vand.u32 8388607, %v1975_v46 }
  0xdc   : > { %v1992_v3 = vshra.s32 %v1976_v59, 23  ;;  %v1993_v33 = vshra.s32 %v1977_v1, 23  ;;  %v2016_v53 = vand.u32 8388607, %v1976_v59  ;;  %v2017_v8 = vand.u32 8388607, %v1977_v1 }
  0xdd   : > { %v1994_v62 = vshra.s32 %v1978_v60, 23  ;;  %v1999_v25 = vand.u32 255, %v1991_v32  ;;  %v2018_v36 = vand.u32 8388607, %v1978_v60  ;;  %v2023_v63 = vor.u32 1065353216, %v2015_v48 }
  0xde   : > { %v2000_v51 = vand.u32 255, %v1992_v3  ;;  %v2001_v4 = vand.u32 255, %v1993_v33  ;;  %v2024_v20 = vor.u32 1065353216, %v2016_v53  ;;  %v2025_v35 = vor.u32 1065353216, %v2017_v8 }
  0xdf   : > { %v2002_v39 = vand.u32 255, %v1994_v62  ;;  %v6364_v2 = vadd.s32 4294967169, %v1999_v25  ;;  %v2026_v43 = vor.u32 1065353216, %v2018_v36  ;;  %v2039_v54 = vmul.f32 -0.05657085, %v2023_v63 }
  0xe0   : > { %v6365_v22 = vadd.s32 4294967169, %v2000_v51  ;;  %v6366_v21 = vadd.s32 4294967169, %v2001_v4  ;;  %v2040_v61 = vmul.f32 -0.05657085, %v2024_v20  ;;  %v2041_v56 = vmul.f32 -0.05657085, %v2025_v35 }
  0xe1   : > { %v6367_v38 = vadd.s32 4294967169, %v2002_v39  ;;  %v2042_v18 = vmul.f32 -0.05657085, %v2026_v43  ;;  %v2047_v11 = vadd.f32 0.44717956, %v2039_v54  ;;  %v2103_v5 = vcvt.s32.f32 %v6364_v2 }
  0xe2   : > { %v2048_v49 = vadd.f32 0.44717956, %v2040_v61  ;;  %v2049_v58 = vadd.f32 0.44717956, %v2041_v56  ;;  %v2104_v46 = vcvt.s32.f32 %v6365_v22  ;;  %v2105_v59 = vcvt.s32.f32 %v6366_v21 }
  0xe3   : > { %v2050_v1 = vadd.f32 0.44717956, %v2042_v18  ;;  %v2055_v60 = vmul.f32 %v2047_v11, %v2023_v63  ;;  %v2106_v32 = vcvt.s32.f32 %v6367_v38  ;;  %v2111_v48 = vmul.f32 0.6931472, %v2103_v5 }
  0xe4   : > { %v2056_v3 = vmul.f32 %v2048_v49, %v2024_v20  ;;  %v2057_v33 = vmul.f32 %v2049_v58, %v2025_v35  ;;  %v2112_v53 = vmul.f32 0.6931472, %v2104_v46  ;;  %v2113_v8 = vmul.f32 0.6931472, %v2105_v59 }
  0xe5   : > { %v2058_v62 = vmul.f32 %v2050_v1, %v2026_v43  ;;  %v2063_v25 = vadd.f32 -1.4699568, %v2055_v60  ;;  %v2114_v36 = vmul.f32 0.6931472, %v2106_v32  ;;  %v6481_v51 = vshrl.u32 %v3421_v50, 16 }
  0xe6   : > { %v2064_v4 = vadd.f32 -1.4699568, %v2056_v3  ;;  %v2065_v39 = vadd.f32 -1.4699568, %v2057_v33  ;;  %v6482_v54 = vshrl.u32 %v3422_v24, 16  ;;  %v6483_v2 = vshrl.u32 %v3423_v31, 16 }
  0xe7   : > { %v2066_v61 = vadd.f32 -1.4699568, %v2058_v62  ;;  %v2071_v56 = vmul.f32 %v2063_v25, %v2023_v63  ;;  %v3444_v22 = vxor.u32 %v6480_v23, %v7381_v45  ;;  %v3445_v21 = vxor.u32 %v6481_v51, %v3421_v50 }
  0xe8   : > { %v2072_v18 = vmul.f32 %v2064_v4, %v2024_v20  ;;  %v2073_v38 = vmul.f32 %v2065_v39, %v2025_v35  ;;  %v3446_v11 = vxor.u32 %v6482_v54, %v3422_v24  ;;  %v3447_v5 = vxor.u32 %v6483_v2, %v3423_v31 }
  0xe9   : > { %v2074_v49 = vmul.f32 %v2066_v61, %v2026_v43  ;;  %v2079_v58 = vadd.f32 2.8212025, %v2071_v56  ;;  %v3452_v46 = vmul.u32 2246822507, %v3444_v22  ;;  %v3453_v59 = vmul.u32 2246822507, %v3445_v21 }
  0xea   : > { %v1204_v1 = vmul.f32 %v7359_v9, %v7341_v0  ;;  %v2080_v60 = vadd.f32 2.8212025, %v2072_v18  ;;  %v2081_v32 = vadd.f32 2.8212025, %v2073_v38  ;;  %v3454_v3 = vmul.u32 2246822507, %v3446_v11 }
  0xeb   : > { %v2082_v33 = vadd.f32 2.8212025, %v2074_v49  ;;  %v2087_v62 = vmul.f32 %v2079_v58, %v2023_v63  ;;  %v3455_v25 = vmul.u32 2246822507, %v3447_v5  ;;  %v6488_v6 = vshrl.u32 %v3452_v46, 13 }
  0xec   : > { %v2088_v45 = vmul.f32 %v2080_v60, %v2024_v20  ;;  %v2089_v23 = vmul.f32 %v2081_v32, %v2025_v35  ;;  %v6489_v50 = vshrl.u32 %v3453_v59, 13  ;;  %v6490_v51 = vshrl.u32 %v3454_v3, 13 }
  0xed   : > { %v2090_v24 = vmul.f32 %v2082_v33, %v2026_v43  ;;  %v2095_v31 = vadd.f32 -1.7417939, %v2087_v62  ;;  %v6491_v4 = vshrl.u32 %v3455_v25, 13  ;;  %v3476_v39 = vxor.u32 %v6488_v6, %v3452_v46 }
  0xee   : > { %v2096_v54 = vadd.f32 -1.7417939, %v2088_v45  ;;  %v2097_v2 = vadd.f32 -1.7417939, %v2089_v23  ;;  %v3477_v61 = vxor.u32 %v6489_v50, %v3453_v59  ;;  %v3478_v56 = vxor.u32 %v6490_v51, %v3454_v3 }
  0xef   : > { %v1211_v0 = vadd.f32 -1.7417939, %v7373_v40  ;;  %v2098_v9 = vadd.f32 -1.7417939, %v2090_v24  ;;  %v2119_v22 = vadd.f32 %v2111_v48, %v2095_v31  ;;  %v3479_v21 = vxor.u32 %v6491_v4, %v3455_v25 }
  0xf0   : > { %v2120_v63 = vadd.f32 %v2112_v53, %v2096_v54  ;;  %v2121_v18 = vadd.f32 %v2113_v8, %v2097_v2  ;;  %v3484_v38 = vmul.u32 3266489909, %v3476_v39  ;;  %v3485_v20 = vmul.u32 3266489909, %v3477_v61 }
  0xf1   : > { %v7400_v35 = vadd.f32 -1.7417939, %v1204_v1  ;;  %v2122_v11 = vadd.f32 %v2114_v36, %v2098_v9  ;;  %v2127_v43 = vsub.f32 0.0, %v2119_v22  ;;  %v3486_v5 = vmul.u32 3266489909, %v3478_v56 }
  0xf2   : > { %v7404_v6 = vadd.f32 %v7353_v55, %v7370_v47  ;;  %v7408_v49 = vadd.f32 %v7355_v7, %v7375_v44  ;;  %v2128_v40 = vsub.f32 0.0, %v2120_v63  ;;  %v2129_v48 = vsub.f32 0.0, %v2121_v18 }
  0xf3   : > { %v7411_v53 = vadd.f32 %v7357_v42, %v1211_v0  ;;  %v2130_v8 = vsub.f32 0.0, %v2122_v11  ;;  %v2135_v58 = vmax.f32 %v2127_v43, 1e-10  ;;  %v3487_v46 = vmul.u32 3266489909, %v3479_v21 }
  0xf4   : > { %v2136_v59 = vmax.f32 %v2128_v40, 1e-10  ;;  %v2137_v36 = vmax.f32 %v2129_v48, 1e-10  ;;  %v6496_v1 = vshrl.u32 %v3484_v38, 16  ;;  %v6497_v60 = vshrl.u32 %v3485_v20, 16 }
  0xf5   : > { %v2138_v32 = vmax.f32 %v2130_v8, 1e-10  ;;  %v2151_v3 = vshra.s32 %v2135_v58, 23  ;;  %v2175_v55 = vand.u32 8388607, %v2135_v58  ;;  %v6498_v47 = vshrl.u32 %v3486_v5, 16 }
  0xf6   : > { %v2152_v33 = vshra.s32 %v2136_v59, 23  ;;  %v2153_v62 = vshra.s32 %v2137_v36, 23  ;;  %v2176_v7 = vand.u32 8388607, %v2136_v59  ;;  %v2177_v44 = vand.u32 8388607, %v2137_v36 }
  0xf7   : > { %v2154_v25 = vshra.s32 %v2138_v32, 23  ;;  %v2159_v45 = vand.u32 255, %v2151_v3  ;;  %v2178_v23 = vand.u32 8388607, %v2138_v32  ;;  %v2183_v42 = vor.u32 1065353216, %v2175_v55 }
  0xf8   : > { %v2160_v50 = vand.u32 255, %v2152_v33  ;;  %v2161_v51 = vand.u32 255, %v2153_v62  ;;  %v2184_v24 = vor.u32 1065353216, %v2176_v7  ;;  %v2185_v31 = vor.u32 1065353216, %v2177_v44 }
  0xf9   : > { %v2162_v4 = vand.u32 255, %v2154_v25  ;;  %v2186_v39 = vor.u32 1065353216, %v2178_v23  ;;  %v2199_v54 = vmul.f32 -0.05657085, %v2183_v42  ;;  %v6499_v2 = vshrl.u32 %v3487_v46, 16 }
  0xfa   : > { %v6372_v61 = vadd.s32 4294967169, %v2159_v45  ;;  %v6373_v56 = vadd.s32 4294967169, %v2160_v50  ;;  %v2200_v0 = vmul.f32 -0.05657085, %v2184_v24  ;;  %v2201_v9 = vmul.f32 -0.05657085, %v2185_v31 }
  0xfb   : > { %v6374_v22 = vadd.s32 4294967169, %v2161_v51  ;;  %v2202_v21 = vmul.f32 -0.05657085, %v2186_v39  ;;  %v2207_v63 = vadd.f32 0.44717956, %v2199_v54  ;;  %v3508_v18 = vxor.u32 %v6496_v1, %v3484_v38 }
  0xfc   : > { %v6375_v11 = vadd.s32 4294967169, %v2162_v4  ;;  %v2208_v43 = vadd.f32 0.44717956, %v2200_v0  ;;  %v2209_v40 = vadd.f32 0.44717956, %v2201_v9  ;;  %v3509_v48 = vxor.u32 %v6497_v60, %v3485_v20 }
  0xfd   : > { %v2210_v8 = vadd.f32 0.44717956, %v2202_v21  ;;  %v2215_v58 = vmul.f32 %v2207_v63, %v2183_v42  ;;  %v3510_v59 = vxor.u32 %v6498_v47, %v3486_v5  ;;  %v3511_v36 = vxor.u32 %v6499_v2, %v3487_v46 }
  0xfe   : > { %v2216_v32 = vmul.f32 %v2208_v43, %v2184_v24  ;;  %v2217_v3 = vmul.f32 %v2209_v40, %v2185_v31  ;;  %v2263_v55 = vcvt.s32.f32 %v6372_v61  ;;  %v2264_v33 = vcvt.s32.f32 %v6373_v56 }
  0xff   : > { %v2218_v62 = vmul.f32 %v2210_v8, %v2186_v39  ;;  %v2223_v7 = vadd.f32 -1.4699568, %v2215_v58  ;;  %v2265_v44 = vcvt.s32.f32 %v6374_v22  ;;  %v3516_v25 = vand.u32 8388607, %v3508_v18 }
 0x100   : > { %v2224_v45 = vadd.f32 -1.4699568, %v2216_v32  ;;  %v2225_v23 = vadd.f32 -1.4699568, %v2217_v3  ;;  %v2266_v50 = vcvt.s32.f32 %v6375_v11  ;;  %v3517_v38 = vand.u32 8388607, %v3509_v48 }
 0x101   : > { %v2226_v1 = vadd.f32 -1.4699568, %v2218_v62  ;;  %v2231_v51 = vmul.f32 %v2223_v7, %v2183_v42  ;;  %v3518_v4 = vand.u32 8388607, %v3510_v59  ;;  %v3519_v20 = vand.u32 8388607, %v3511_v36 }
 0x102   : > { %v2232_v60 = vmul.f32 %v2224_v45, %v2184_v24  ;;  %v2233_v54 = vmul.f32 %v2225_v23, %v2185_v31  ;;  %v3524_v5 = vor.u32 1065353216, %v3516_v25  ;;  %v3525_v46 = vor.u32 1065353216, %v3517_v38 }
 0x103   : > { %v2234_v47 = vmul.f32 %v2226_v1, %v2186_v39  ;;  %v2239_v2 = vadd.f32 2.8212025, %v2231_v51  ;;  %v3526_v61 = vor.u32 1065353216, %v3518_v4  ;;  %v3527_v56 = vor.u32 1065353216, %v3519_v20 }
 0x104   : > { %v2240_v0 = vadd.f32 2.8212025, %v2232_v60  ;;  %v2241_v9 = vadd.f32 2.8212025, %v2233_v54  ;;  %v6504_v22 = vadd.f32 -1.0, %v3524_v5  ;;  %v6505_v21 = vadd.f32 -1.0, %v3525_v46 }
 0x105   : > { %v2242_v63 = vadd.f32 2.8212025, %v2234_v47  ;;  %v2247_v18 = vmul.f32 %v2239_v2, %v2183_v42  ;;  %v6506_v11 = vadd.f32 -1.0, %v3526_v61  ;;  %v6507_v43 = vadd.f32 -1.0, %v3527_v56 }
 0x106   : > { %v2248_v40 = vmul.f32 %v2240_v0, %v2184_v24  ;;  %v2249_v48 = vmul.f32 %v2241_v9, %v2185_v31  ;;  %v3548_v8 = vadd.f32 5.9604645e-08, %v6504_v22  ;;  %v3549_v58 = vadd.f32 5.9604645e-08, %v6505_v21 }
 0x107   : > { %v2250_v59 = vmul.f32 %v2242_v63, %v2186_v39  ;;  %v2271_v36 = vmul.f32 0.6931472, %v2263_v55  ;;  %v3550_v32 = vadd.f32 5.9604645e-08, %v6506_v11  ;;  %v3551_v3 = vadd.f32 5.9604645e-08, %v6507_v43 }
 0x108   : > { %v2272_v62 = vmul.f32 0.6931472, %v2264_v33  ;;  %v7413_v7 = vmul.f32 0.6931472, %v2265_v44  ;;  %v3564_v25 = vshra.s32 %v3548_v8, 23  ;;  %v3565_v45 = vshra.s32 %v3549_v58, 23 }
 0x109   : > { %v2255_v23 = vadd.f32 -1.7417939, %v2247_v18  ;;  %v7415_v38 = vmul.f32 0.6931472, %v2266_v50  ;;  %v3566_v1 = vshra.s32 %v3550_v32, 23  ;;  %v3567_v42 = vshra.s32 %v3551_v3, 23 }
 0x10a   : > { %v2256_v51 = vadd.f32 -1.7417939, %v2248_v40  ;;  %v7417_v4 = vadd.f32 -1.7417939, %v2249_v48  ;;  %v3572_v24 = vand.u32 255, %v3564_v25  ;;  %v3573_v31 = vand.u32 255, %v3565_v45 }
 0x10b   : > { %v7419_v20 = vadd.f32 -1.7417939, %v2250_v59  ;;  %v3574_v39 = vand.u32 255, %v3566_v1  ;;  %v3575_v55 = vand.u32 255, %v3567_v42  ;;  %v3588_v60 = vand.u32 8388607, %v3548_v8 }
 0x10c   : > { %v6512_v33 = vadd.s32 4294967169, %v3572_v24  ;;  %v6513_v44 = vadd.s32 4294967169, %v3573_v31  ;;  %v3589_v54 = vand.u32 8388607, %v3549_v58  ;;  %v3590_v5 = vand.u32 8388607, %v3550_v32 }
 0x10d   : > { %v6514_v46 = vadd.s32 4294967169, %v3574_v39  ;;  %v6515_v47 = vadd.s32 4294967169, %v3575_v55  ;;  %v3591_v50 = vand.u32 8388607, %v3551_v3  ;;  %v3596_v2 = vor.u32 1065353216, %v3588_v60 }
 0x10e   : > { %v3597_v61 = vor.u32 1065353216, %v3589_v54  ;;  %v3598_v56 = vor.u32 1065353216, %v3590_v5  ;;  %v3676_v0 = vcvt.s32.f32 %v6512_v33  ;;  %v3677_v9 = vcvt.s32.f32 %v6513_v44 }
 0x10f   : > { %v3599_v22 = vor.u32 1065353216, %v3591_v50  ;;  %v3612_v21 = vmul.f32 -0.05657085, %v3596_v2  ;;  %v3678_v63 = vcvt.s32.f32 %v6514_v46  ;;  %v3679_v18 = vcvt.s32.f32 %v6515_v47 }
 0x110   : > { %v7423_v11 = vadd.f32 %v7361_v30, %v7400_v35  ;;  %v3613_v43 = vmul.f32 -0.05657085, %v3597_v61  ;;  %v3614_v40 = vmul.f32 -0.05657085, %v3598_v56  ;;  %v3684_v48 = vmul.f32 0.6931472, %v3676_v0 }
 0x111   : > { %v7425_v8 = vadd.f32 %v2271_v36, %v2255_v23  ;;  %v3615_v58 = vmul.f32 -0.05657085, %v3599_v22  ;;  %v3620_v59 = vadd.f32 0.44717956, %v3612_v21  ;;  %v3685_v32 = vmul.f32 0.6931472, %v3677_v9 }
 0x112   : > { %v7427_v3 = vadd.f32 %v2272_v62, %v2256_v51  ;;  %v3621_v25 = vadd.f32 0.44717956, %v3613_v43  ;;  %v3622_v45 = vadd.f32 0.44717956, %v3614_v40  ;;  %v3686_v1 = vmul.f32 0.6931472, %v3678_v63 }
 0x113   : > { %v3623_v42 = vadd.f32 0.44717956, %v3615_v58  ;;  %v3628_v24 = vmul.f32 %v3620_v59, %v3596_v2  ;;  %v3687_v31 = vmul.f32 0.6931472, %v3679_v18  ;;  %v2371_v39 = vadd.s32 3, %v7213_v28 }
 0x114   : > { %v3629_v30 = vmul.f32 %v3621_v25, %v3597_v61  ;;  %v3630_v35 = vmul.f32 %v3622_v45, %v3598_v56  ;;  %v2372_v55 = vadd.s32 3, %v7210_v27  ;;  %v2373_v36 = vadd.s32 3, %v7216_v29 }
 0x115   : > { %v3631_v23 = vmul.f32 %v3623_v42, %v3599_v22  ;;  %v3636_v60 = vadd.f32 -1.4699568, %v3628_v24  ;;  %v6380_v33 = vshrl.u32 %v7346_v52, 16  ;;  %v6381_v62 = vshrl.u32 %v2371_v39, 16 }
 0x116   : > { %v3637_v51 = vadd.f32 -1.4699568, %v3629_v30  ;;  %v3638_v44 = vadd.f32 -1.4699568, %v3630_v35  ;;  %v6382_v54 = vshrl.u32 %v2372_v55, 16  ;;  %v6383_v5 = vshrl.u32 %v2373_v36, 16 }
 0x117   : > { %v3639_v46 = vadd.f32 -1.4699568, %v3631_v23  ;;  %v3644_v47 = vmul.f32 %v3636_v60, %v3596_v2  ;;  %v2394_v50 = vxor.u32 %v6380_v33, %v7346_v52  ;;  %v2395_v0 = vxor.u32 %v6381_v62, %v2371_v39 }
 0x118   : > { %v3645_v9 = vmul.f32 %v3637_v51, %v3597_v61  ;;  %v3646_v21 = vmul.f32 %v3638_v44, %v3598_v56  ;;  %v2396_v63 = vxor.u32 %v6382_v54, %v2372_v55  ;;  %v2397_v18 = vxor.u32 %v6383_v5, %v2373_v36 }
 0x119   : > { %v3647_v43 = vmul.f32 %v3639_v46, %v3599_v22  ;;  %v3652_v40 = vadd.f32 2.8212025, %v3644_v47  ;;  %v2402_v58 = vmul.u32 2246822507, %v2394_v50  ;;  %v2403_v59 = vmul.u32 2246822507, %v2395_v0 }
 0x11a   : > { %v7436_v25 = vadd.f32 %v7413_v7, %v7417_v4  ;;  %v3653_v45 = vadd.f32 2.8212025, %v3645_v9  ;;  %v3654_v42 = vadd.f32 2.8212025, %v3646_v21  ;;  %v2404_v24 = vmul.u32 2246822507, %v2396_v63 }
 0x11b   : > { %v3655_v30 = vadd.f32 2.8212025, %v3647_v43  ;;  %v3660_v35 = vmul.f32 %v3652_v40, %v3596_v2  ;;  %v2405_v23 = vmul.u32 2246822507, %v2397_v18  ;;  %v6388_v52 = vshrl.u32 %v2402_v58, 13 }
 0x11c   : > { %v3661_v39 = vmul.f32 %v3653_v45, %v3597_v61  ;;  %v3662_v60 = vmul.f32 %v3654_v42, %v3598_v56  ;;  %v6389_v33 = vshrl.u32 %v2403_v59, 13  ;;  %v6390_v55 = vshrl.u32 %v2404_v24, 13 }
 0x11d   : > { %v3663_v36 = vmul.f32 %v3655_v30, %v3599_v22  ;;  %v3668_v62 = vadd.f32 -1.7417939, %v3660_v35  ;;  %v6391_v51 = vshrl.u32 %v2405_v23, 13  ;;  %v2426_v44 = vxor.u32 %v6388_v52, %v2402_v58 }
 0x11e   : > { %v3669_v54 = vadd.f32 -1.7417939, %v3661_v39  ;;  %v3670_v5 = vadd.f32 -1.7417939, %v3662_v60  ;;  %v2427_v46 = vxor.u32 %v6389_v33, %v2403_v59  ;;  %v2428_v7 = vxor.u32 %v6390_v55, %v2404_v24 }
 0x11f   : > { %v3671_v4 = vadd.f32 -1.7417939, %v3663_v36  ;;  %v3692_v47 = vadd.f32 %v3684_v48, %v3668_v62  ;;  %v2429_v50 = vxor.u32 %v6391_v51, %v2405_v23  ;;  %v2434_v0 = vmul.u32 3266489909, %v2426_v44 }
 0x120   : > { %v3693_v9 = vadd.f32 %v3685_v32, %v3669_v54  ;;  %v3694_v2 = vadd.f32 %v3686_v1, %v3670_v5  ;;  %v2435_v21 = vmul.u32 3266489909, %v2427_v46  ;;  %v2436_v63 = vmul.u32 3266489909, %v2428_v7 }
 0x121   : > { %v3695_v61 = vadd.f32 %v3687_v31, %v3671_v4  ;;  %v3700_v56 = vsub.f32 0.0, %v3692_v47  ;;  %v2437_v18 = vmul.u32 3266489909, %v2429_v50  ;;  %v6396_v43 = vshrl.u32 %v2434_v0, 16 }
 0x122   : > { %v3701_v22 = vsub.f32 0.0, %v3693_v9  ;;  %v3702_v40 = vsub.f32 0.0, %v3694_v2  ;;  %v6397_v45 = vshrl.u32 %v2435_v21, 16  ;;  %v6398_v58 = vshrl.u32 %v2436_v63, 16 }
 0x123   : > { %v3703_v42 = vsub.f32 0.0, %v3695_v61  ;;  %v3708_v30 = vmax.f32 %v3700_v56, 1e-10  ;;  %v6399_v59 = vshrl.u32 %v2437_v18, 16  ;;  %v2458_v24 = vxor.u32 %v6396_v43, %v2434_v0 }
 0x124   : > { %v3709_v35 = vmax.f32 %v3701_v22, 1e-10  ;;  %v3710_v48 = vmax.f32 %v3702_v40, 1e-10  ;;  %v2459_v23 = vxor.u32 %v6397_v45, %v2435_v21  ;;  %v7438_v52 = vxor.u32 %v6398_v58, %v2436_v63  ;;  %v747_v40 = vpop.permute.xlu0 %746 }
 0x125   : > { %v3711_v32 = vmax.f32 %v3703_v42, 1e-10  ;;  %v3724_v1 = vshra.s32 %v3708_v30, 23  ;;  %v3748_v39 = vand.u32 8388607, %v3708_v30  ;;  %v2461_v31 = vxor.u32 %v6399_v59, %v2437_v18 }
 0x126   : > { %v3725_v60 = vshra.s32 %v3709_v35, 23  ;;  %v3726_v33 = vshra.s32 %v3710_v48, 23  ;;  %v3749_v55 = vand.u32 8388607, %v3709_v35  ;;  %v3750_v36 = vand.u32 8388607, %v3710_v48 }
 0x127   : > { %v3727_v62 = vshra.s32 %v3711_v32, 23  ;;  %v3732_v51 = vand.u32 255, %v3724_v1  ;;  %v3751_v44 = vand.u32 8388607, %v3711_v32  ;;  %v7440_v54 = vor.u32 1065353216, %v3748_v39 }
 0x128   : > { %v3733_v5 = vand.u32 255, %v3725_v60  ;;  %v3734_v46 = vand.u32 255, %v3726_v33  ;;  %v7442_v7 = vor.u32 1065353216, %v3749_v55  ;;  %v7444_v4 = vor.u32 1065353216, %v3750_v36 }
 0x129   : > { %v3735_v47 = vand.u32 255, %v3727_v62  ;;  %v6520_v50 = vadd.s32 4294967169, %v3732_v51  ;;  %v7446_v0 = vor.u32 1065353216, %v3751_v44  ;;  %v3772_v9 = vmul.f32 -0.05657085, %v7440_v54 }
 0x12a   : > { %v6521_v2 = vadd.s32 4294967169, %v3733_v5  ;;  %v6522_v21 = vadd.s32 4294967169, %v3734_v46  ;;  %v3773_v63 = vmul.f32 -0.05657085, %v7442_v7  ;;  %v3774_v61 = vmul.f32 -0.05657085, %v7444_v4 }
 0x12b   : > { %v6523_v56 = vadd.s32 4294967169, %v3735_v47  ;;  %v3775_v18 = vmul.f32 -0.05657085, %v7446_v0  ;;  %v3780_v43 = vadd.f32 0.44717956, %v3772_v9  ;;  %v3836_v22 = vcvt.s32.f32 %v6520_v50 }
 0x12c   : > { %v3781_v45 = vadd.f32 0.44717956, %v3773_v63  ;;  %v3782_v58 = vadd.f32 0.44717956, %v3774_v61  ;;  %v3837_v42 = vcvt.s32.f32 %v6521_v2  ;;  %v3838_v30 = vcvt.s32.f32 %v6522_v21  ;;  %v752_v63 = vpop.permute.xlu0 %751 }
 0x12d   : > { %v3783_v59 = vadd.f32 0.44717956, %v3775_v18  ;;  %v3788_v35 = vmul.f32 %v3780_v43, %v7440_v54  ;;  %v3839_v48 = vcvt.s32.f32 %v6523_v56  ;;  %v7453_v32 = vmul.f32 0.6931472, %v3836_v22 }
 0x12e   : > { %v3789_v1 = vmul.f32 %v3781_v45, %v7442_v7  ;;  %v3790_v39 = vmul.f32 %v3782_v58, %v7444_v4  ;;  %v7457_v60 = vmul.f32 0.6931472, %v3837_v42  ;;  %v7459_v33 = vmul.f32 0.6931472, %v3838_v30 }
 0x12f   : > { %v3791_v55 = vmul.f32 %v3783_v59, %v7446_v0  ;;  %v3796_v36 = vadd.f32 -1.4699568, %v3788_v35  ;;  %v7462_v62 = vmul.f32 0.6931472, %v3839_v48  ;;  %v2466_v51 = vand.u32 8388607, %v2458_v24 }
 0x130   : > { %v2282_v44 = vadd.f32 %v7415_v38, %v7419_v20  ;;  %v3797_v5 = vadd.f32 -1.4699568, %v3789_v1  ;;  %v3798_v46 = vadd.f32 -1.4699568, %v3790_v39  ;;  %v2467_v47 = vand.u32 8388607, %v2459_v23 }
 0x131   : > { %v3799_v50 = vadd.f32 -1.4699568, %v3791_v55  ;;  %v3804_v9 = vmul.f32 %v3796_v36, %v7440_v54  ;;  %v2468_v2 = vand.u32 8388607, %v7438_v52  ;;  %v2469_v21 = vand.u32 8388607, %v2461_v31 }
 0x132   : > { %v3805_v61 = vmul.f32 %v3797_v5, %v7442_v7  ;;  %v3806_v56 = vmul.f32 %v3798_v46, %v7444_v4  ;;  %v2474_v18 = vor.u32 1065353216, %v2466_v51  ;;  %v2475_v43 = vor.u32 1065353216, %v2467_v47 }
 0x133   : > { %v3807_v38 = vmul.f32 %v3799_v50, %v7446_v0  ;;  %v3812_v20 = vadd.f32 2.8212025, %v3804_v9  ;;  %v2476_v45 = vor.u32 1065353216, %v2468_v2  ;;  %v2477_v23 = vor.u32 1065353216, %v2469_v21 }
 0x134   : > { %v3813_v30 = vadd.f32 2.8212025, %v3805_v61  ;;  %v3814_v59 = vadd.f32 2.8212025, %v3806_v56 }
 0x135   : > { %v3815_v55 = vadd.f32 2.8212025, %v3807_v38  ;;  %v3820_v36 = vmul.f32 %v3812_v20, %v7440_v54 }
 0x136   : > { %v3822_v38 = vmul.f32 %v3814_v59, %v7444_v4  ;;  %v6405_v59 = vadd.f32 -1.0, %v2475_v43 }
 0x14d   : > { %v690_v24 = vpop.f32.mrb[0].mxu0 }
 0x14e   : > { %v733_v22 = vpop.f32.mrb[0].mxu1  ;;  %v7471_v58 = vmul.f32 %v747_v40, %v690_v24  ;;  %v692_v52 = vpop.f32.mrb[1].mxu0 }
 0x14f   : > { %v7473_v42 = vmul.f32 %v747_v40, %v733_v22  ;;  %v735_v31 = vpop.f32.mrb[1].mxu1  ;;  %v7475_v35 = vmul.f32 %v747_v40, %v692_v52  ;;  %v694_v1 = vpop.f32.mrb[2].mxu0  ;;  %v3828_v52 = vadd.f32 -1.7417939, %v3820_v36 }
 0x150   : > { %v7477_v48 = vmul.f32 %v747_v40, %v735_v31  ;;  %v737_v39 = vpop.f32.mrb[2].mxu1  ;;  %v7480_v51 = vmul.f32 %v752_v63, %v694_v1  ;;  %v696_v46 = vpop.f32.mrb[3].mxu0  ;;  %v7486_v50 = vsub.f32 %v7471_v58, %v7329_v14  ;;  %v7508_v61 = vsub.f32 %v7471_v58, %v7404_v6 }
 0x151   : > { %v7482_v5 = vmul.f32 %v752_v63, %v737_v39  ;;  %v739_v47 = vpop.f32.mrb[3].mxu1  ;;  %v7490_v9 = vsub.f32 %v7473_v42, %v7337_v17  ;;  %v7492_v40 = vmul.f32 %v752_v63, %v696_v46  ;;  %v7498_v54 = vsub.f32 %v7475_v35, %v7331_v19 }
 0x152   : > { %v7494_v2 = vmul.f32 %v752_v63, %v739_v47  ;;  %v7502_v21 = vsub.f32 %v7477_v48, %v7368_v34  ;;  %v7512_v17 = vsub.f32 %v7475_v35, %v7408_v49  ;;  %v7516_v63 = vsub.f32 %v7473_v42, %v7411_v53 }
 0x153   : > { %v1772_v14 = vmax.f32 %v7486_v50, %v7490_v9  ;;  %v7522_v34 = vsub.f32 %v7477_v48, %v7423_v11  ;;  %v7526_v56 = vsub.f32 %v7471_v58, %v7425_v8  ;;  %v7530_v6 = vsub.f32 %v7475_v35, %v7427_v3 }
 0x154   : > { %8928 = vst [vmem:[#allocation13_spill] sm:$0xff] %v7502_v21  ;;  %v1773_v19 = vmax.f32 %v7498_v54, %v7502_v21  ;;  %v1249_v49 = vmax.f32 %v7508_v61, %v7516_v63  ;;  %v7536_v53 = vsub.f32 %v7473_v42, %v7436_v25  ;;  %v7539_v24 = vsub.f32 %v7477_v48, %v2282_v44 }
 0x155   : > { %8929 = vst [vmem:[#allocation14_spill] sm:$0xff] %v7526_v56  ;;  %8930 = vst [vmem:[#allocation15_spill] sm:$0xff] %v7530_v6  ;;  %v3821_v11 = vmul.f32 %v3813_v30, %v7442_v7  ;;  %v1250_v8 = vmax.f32 %v7512_v17, %v7522_v34  ;;  %v3823_v3 = vmul.f32 %v3815_v55, %v7446_v0  ;;  %v3830_v1 = vadd.f32 -1.7417939, %v3822_v38 }
 0x156   : > { %8931 = vst [vmem:[#allocation16_spill] sm:$0xff] %v7536_v53  ;;  %8932 = vst [vmem:[#allocation17_spill] sm:$0xff] %v7539_v24  ;;  %v1774_v22 = vmax.f32 %v1772_v14, %v1773_v19  ;;  %v2295_v20 = vmax.f32 %v7526_v56, %v7536_v53  ;;  %v2296_v25 = vmax.f32 %v7530_v6, %v7539_v24  ;;  %v6404_v30 = vadd.f32 -1.0, %v2474_v18 }
 0x157   : > { %v3829_v31 = vadd.f32 -1.7417939, %v3821_v11  ;;  %v1251_v44 = vmax.f32 %v1249_v49, %v1250_v8  ;;  %v3831_v7 = vadd.f32 -1.7417939, %v3823_v3  ;;  %v3852_v46 = vadd.f32 %v7453_v32, %v3828_v52 }
 0x158   : > { %1775 = vmax.xlane.f32.xlu0 %v1774_v22  ;;  %v2297_v39 = vmax.f32 %v2295_v20, %v2296_v25  ;;  %v3854_v0 = vadd.f32 %v7459_v33, %v3830_v1  ;;  %v6406_v47 = vadd.f32 -1.0, %v2476_v45  ;;  %v6407_v14 = vadd.f32 -1.0, %v2477_v23 }
 0x159   : > { %v3853_v4 = vadd.f32 %v7457_v60, %v3829_v31  ;;  %1252 = vmax.xlane.f32.xlu1 %v1251_v44  ;;  %v3855_v55 = vadd.f32 %v7462_v62, %v3831_v7  ;;  %v7555_v36 = vsub.f32 %v7480_v51, %v3852_v46  ;;  %v2498_v18 = vadd.f32 5.9604645e-08, %v6404_v30 }
 0x15a   : > { %v2499_v49 = vadd.f32 5.9604645e-08, %v6405_v59  ;;  %v7561_v32 = vsub.f32 %v7482_v5, %v3854_v0  ;;  %v2500_v43 = vadd.f32 5.9604645e-08, %v6406_v47  ;;  %v2501_v33 = vadd.f32 5.9604645e-08, %v6407_v14 }
 0x15b   : > { %8933 = vst [vmem:[#allocation18_spill] sm:$0xff] %v7555_v36  ;;  %v7558_v19 = vsub.f32 %v7492_v40, %v3853_v4  ;;  %v7564_v60 = vsub.f32 %v7494_v2, %v3855_v55  ;;  %v2514_v11 = vshra.s32 %v2498_v18, 23  ;;  %v2538_v45 = vand.u32 8388607, %v2498_v18 }
 0x15c   : > { %8935 = vst [vmem:[#allocation20_spill] sm:$0xff] %v7561_v32  ;;  %v2515_v62 = vshra.s32 %v2499_v49, 23  ;;  %v2539_v23 = vand.u32 8388607, %v2499_v49  ;;  %v3869_v22 = vmax.f32 %v7555_v36, %v7561_v32  ;;  %v2516_v38 = vshra.s32 %v2500_v43, 23 }
 0x15d   : > { %8934 = vst [vmem:[#allocation19_spill] sm:$0xff] %v7558_v19  ;;  %8936 = vst [vmem:[#allocation21_spill] sm:$0xff] %v7564_v60  ;;  %2298 = vmax.xlane.f32.xlu1 %v2297_v39  ;;  %v3870_v8 = vmax.f32 %v7558_v19, %v7564_v60  ;;  %v2517_v3 = vshra.s32 %v2501_v33, 23  ;;  %v2522_v20 = vand.u32 255, %v2514_v11  ;;  %v2540_v52 = vand.u32 8388607, %v2500_v43 }
 0x15e   : > { %v2523_v25 = vand.u32 255, %v2515_v62  ;;  %v2541_v31 = vand.u32 8388607, %v2501_v33  ;;  %v2524_v1 = vand.u32 255, %v2516_v38  ;;  %v2546_v30 = vor.u32 1065353216, %v2538_v45 }
 0x15f   : > { %v3871_v44 = vmax.f32 %v3869_v22, %v3870_v8  ;;  %v2525_v7 = vand.u32 255, %v2517_v3  ;;  %v6412_v46 = vadd.s32 4294967169, %v2522_v20  ;;  %v2547_v59 = vor.u32 1065353216, %v2539_v23 }
 0x160   : > { %v6413_v4 = vadd.s32 4294967169, %v2523_v25  ;;  %v2548_v39 = vor.u32 1065353216, %v2540_v52  ;;  %v6414_v0 = vadd.s32 4294967169, %v2524_v1  ;;  %v2549_v47 = vor.u32 1065353216, %v2541_v31 }
 0x161   : > { %3872 = vmax.xlane.f32.xlu0 %v3871_v44  ;;  %v6415_v55 = vadd.s32 4294967169, %v2525_v7  ;;  %v2562_v14 = vmul.f32 -0.05657085, %v2546_v30  ;;  %v2563_v18 = vmul.f32 -0.05657085, %v2547_v59  ;;  %v2626_v60 = vcvt.s32.f32 %v6412_v46 }
 0x162   : > { %v2564_v49 = vmul.f32 -0.05657085, %v2548_v39  ;;  %v2627_v11 = vcvt.s32.f32 %v6413_v4  ;;  %v2565_v62 = vmul.f32 -0.05657085, %v2549_v47  ;;  %v2628_v33 = vcvt.s32.f32 %v6414_v0 }
 0x163   : > { %v2570_v43 = vadd.f32 0.44717956, %v2562_v14  ;;  %v2629_v22 = vcvt.s32.f32 %v6415_v55  ;;  %v2571_v8 = vadd.f32 0.44717956, %v2563_v18  ;;  %v2634_v45 = vmul.f32 0.6931472, %v2626_v60 }
 0x164   : > { %v2572_v38 = vadd.f32 0.44717956, %v2564_v49  ;;  %v2573_v3 = vadd.f32 0.44717956, %v2565_v62  ;;  %v2635_v23 = vmul.f32 0.6931472, %v2627_v11 }
 0x165   : > { %v2578_v20 = vmul.f32 %v2570_v43, %v2546_v30  ;;  %v2636_v25 = vmul.f32 0.6931472, %v2628_v33  ;;  %v2579_v52 = vmul.f32 %v2571_v8, %v2547_v59  ;;  %v2637_v1 = vmul.f32 0.6931472, %v2629_v22 }
 0x166   : > { %v2580_v44 = vmul.f32 %v2572_v38, %v2548_v39  ;;  %v3943_v31 = vadd.s32 6, %v7364_v37  ;;  %v2581_v7 = vmul.f32 %v2573_v3, %v2549_v47  ;;  %v3944_v46 = vadd.s32 6, %v7384_v10 }
 0x167   : > { %v2586_v19 = vadd.f32 -1.4699568, %v2578_v20  ;;  %v3945_v4 = vadd.s32 6, %v7387_v41  ;;  %v2587_v0 = vadd.f32 -1.4699568, %v2579_v52  ;;  %v3946_v14 = vadd.s32 6, %v7390_v57 }
 0x168   : > { %v2588_v55 = vadd.f32 -1.4699568, %v2580_v44  ;;  %v6528_v60 = vshrl.u32 %v3943_v31, 16  ;;  %v2589_v18 = vadd.f32 -1.4699568, %v2581_v7  ;;  %v6529_v11 = vshrl.u32 %v3944_v46, 16 }
 0x169   : > { %v2594_v49 = vmul.f32 %v2586_v19, %v2546_v30  ;;  %v6530_v62 = vshrl.u32 %v3945_v4, 16  ;;  %v2595_v43 = vmul.f32 %v2587_v0, %v2547_v59  ;;  %v6531_v22 = vshrl.u32 %v3946_v14, 16 }
 0x16a   : > { %v2596_v33 = vmul.f32 %v2588_v55, %v2548_v39  ;;  %v3967_v8 = vxor.u32 %v6528_v60, %v3943_v31  ;;  %v2597_v38 = vmul.f32 %v2589_v18, %v2549_v47  ;;  %v3968_v20 = vxor.u32 %v6529_v11, %v3944_v46 }
 0x16b   : > { %v2602_v3 = vadd.f32 2.8212025, %v2594_v49  ;;  %v3969_v32 = vxor.u32 %v6530_v62, %v3945_v4  ;;  %v2603_v36 = vadd.f32 2.8212025, %v2595_v43  ;;  %v3970_v53 = vxor.u32 %v6531_v22, %v3946_v14 }
 0x16c   : > { %v2604_v24 = vadd.f32 2.8212025, %v2596_v33  ;;  %v3975_v52 = vmul.u32 2246822507, %v3967_v8  ;;  %v2605_v44 = vadd.f32 2.8212025, %v2597_v38 }
 0x16d   : > { %v2610_v6 = vmul.f32 %v2602_v3, %v2546_v30  ;;  %v3976_v16 = vmul.u32 2246822507, %v3968_v20  ;;  %v3977_v56 = vmul.u32 2246822507, %v3969_v32  ;;  %v2611_v7 = vmul.f32 %v2603_v36, %v2547_v59 }
 0x16e   : > { %v2612_v19 = vmul.f32 %v2604_v24, %v2548_v39  ;;  %v3978_v13 = vmul.u32 2246822507, %v3970_v53  ;;  %v6536_v15 = vshrl.u32 %v3975_v52, 13  ;;  %v2613_v0 = vmul.f32 %v2605_v44, %v2549_v47 }
 0x16f   : > { %v2618_v55 = vadd.f32 -1.7417939, %v2610_v6  ;;  %v6537_v21 = vshrl.u32 %v3976_v16, 13  ;;  %v6538_v31 = vshrl.u32 %v3977_v56, 13  ;;  %v2619_v60 = vadd.f32 -1.7417939, %v2611_v7 }
 0x170   : > { %v2620_v18 = vadd.f32 -1.7417939, %v2612_v19  ;;  %v6539_v46 = vshrl.u32 %v3978_v13, 13  ;;  %v3999_v4 = vxor.u32 %v6536_v15, %v3975_v52  ;;  %v2621_v49 = vadd.f32 -1.7417939, %v2613_v0 }
 0x171   : > { %v2642_v11 = vadd.f32 %v2634_v45, %v2618_v55  ;;  %v4000_v14 = vxor.u32 %v6537_v21, %v3976_v16  ;;  %v7574_v62 = vxor.u32 %v6538_v31, %v3977_v56  ;;  %v2643_v30 = vadd.f32 %v2635_v23, %v2619_v60 }
 0x172   : > { %v2644_v43 = vadd.f32 %v2636_v25, %v2620_v18  ;;  %v7576_v32 = vxor.u32 %v6539_v46, %v3978_v13  ;;  %v4007_v24 = vmul.u32 3266489909, %v3999_v4  ;;  %v2645_v53 = vadd.f32 %v2637_v1, %v2621_v49 }
 0x173   : > { %v2650_v36 = vsub.f32 0.0, %v2642_v11  ;;  %v4008_v59 = vmul.u32 3266489909, %v4000_v14  ;;  %v4009_v6 = vmul.u32 3266489909, %v7574_v62  ;;  %v2651_v39 = vsub.f32 0.0, %v2643_v30 }
 0x174   : > { %v2652_v47 = vsub.f32 0.0, %v2644_v43  ;;  %v4010_v33 = vmul.u32 3266489909, %v7576_v32  ;;  %v6544_v15 = vshrl.u32 %v4007_v24, 16  ;;  %v2653_v22 = vsub.f32 0.0, %v2645_v53 }
 0x175   : > { %v2658_v45 = vmax.f32 %v2650_v36, 1e-10  ;;  %v6545_v16 = vshrl.u32 %v4008_v59, 16  ;;  %v6546_v21 = vshrl.u32 %v4009_v6, 16  ;;  %v2659_v56 = vmax.f32 %v2651_v39, 1e-10 }
 0x176   : > { %v2660_v23 = vmax.f32 %v2652_v47, 1e-10  ;;  %v6547_v25 = vshrl.u32 %v4010_v33, 16  ;;  %v4031_v13 = vxor.u32 %v6544_v15, %v4007_v24  ;;  %v2661_v8 = vmax.f32 %v2653_v22, 1e-10 }
 0x177   : > { %v2674_v38 = vshra.s32 %v2658_v45, 23  ;;  %v2698_v1 = vand.u32 8388607, %v2658_v45  ;;  %v4032_v3 = vxor.u32 %v6545_v16, %v4008_v59  ;;  %v2675_v20 = vshra.s32 %v2659_v56, 23 }
 0x178   : > { %v2676_v52 = vshra.s32 %v2660_v23, 23  ;;  %v2699_v44 = vand.u32 8388607, %v2659_v56  ;;  %v2700_v7 = vand.u32 8388607, %v2660_v23  ;;  %v2677_v19 = vshra.s32 %v2661_v8, 23 }
 0x179   : > { %v2682_v0 = vand.u32 255, %v2674_v38  ;;  %v2701_v55 = vand.u32 8388607, %v2661_v8  ;;  %v2706_v31 = vor.u32 1065353216, %v2698_v1  ;;  %v2683_v60 = vand.u32 255, %v2675_v20 }
 0x17a   : > { %v2684_v18 = vand.u32 255, %v2676_v52  ;;  %v2707_v46 = vor.u32 1065353216, %v2699_v44  ;;  %v2708_v4 = vor.u32 1065353216, %v2700_v7  ;;  %v2685_v49 = vand.u32 255, %v2677_v19 }
 0x17b   : > { %v6420_v11 = vadd.s32 4294967169, %v2682_v0  ;;  %v2709_v14 = vor.u32 1065353216, %v2701_v55  ;;  %v2722_v62 = vmul.f32 -0.05657085, %v2706_v31  ;;  %v6421_v30 = vadd.s32 4294967169, %v2683_v60 }
 0x17c   : > { %v6422_v43 = vadd.s32 4294967169, %v2684_v18  ;;  %v2723_v32 = vmul.f32 -0.05657085, %v2707_v46  ;;  %v2724_v24 = vmul.f32 -0.05657085, %v2708_v4  ;;  %v6423_v53 = vadd.s32 4294967169, %v2685_v49 }
 0x17d   : > { %v2725_v36 = vmul.f32 -0.05657085, %v2709_v14  ;;  %v2730_v59 = vadd.f32 0.44717956, %v2722_v62  ;;  %v2786_v39 = vcvt.s32.f32 %v6420_v11  ;;  %v2787_v22 = vcvt.s32.f32 %v6421_v30 }
 0x17e   : > { %v2731_v47 = vadd.f32 0.44717956, %v2723_v32  ;;  %v2732_v15 = vadd.f32 0.44717956, %v2724_v24  ;;  %v2788_v45 = vcvt.s32.f32 %v6422_v43  ;;  %v2789_v23 = vcvt.s32.f32 %v6423_v53 }
 0x17f   : > { %v2733_v16 = vadd.f32 0.44717956, %v2725_v36  ;;  %v2738_v56 = vmul.f32 %v2730_v59, %v2706_v31  ;;  %v2794_v8 = vmul.f32 0.6931472, %v2786_v39  ;;  %v2795_v20 = vmul.f32 0.6931472, %v2787_v22 }
 0x180   : > { %v2739_v38 = vmul.f32 %v2731_v47, %v2707_v46  ;;  %v2740_v1 = vmul.f32 %v2732_v15, %v2708_v4  ;;  %v2796_v52 = vmul.f32 0.6931472, %v2788_v45  ;;  %v2797_v19 = vmul.f32 0.6931472, %v2789_v23 }
 0x181   : > { %v2741_v44 = vmul.f32 %v2733_v16, %v2709_v14  ;;  %v2746_v7 = vadd.f32 -1.4699568, %v2738_v56  ;;  %v4033_v0 = vxor.u32 %v6546_v21, %v4009_v6  ;;  %v4034_v18 = vxor.u32 %v6547_v25, %v4010_v33 }
 0x182   : > { %v2747_v55 = vadd.f32 -1.4699568, %v2739_v38  ;;  %v2748_v60 = vadd.f32 -1.4699568, %v2740_v1  ;;  %v4039_v49 = vand.u32 8388607, %v4031_v13 }
 0x183   : > { %v2749_v11 = vadd.f32 -1.4699568, %v2741_v44  ;;  %v2754_v62 = vmul.f32 %v2746_v7, %v2706_v31  ;;  %v4040_v30 = vand.u32 8388607, %v4032_v3  ;;  %v4041_v43 = vand.u32 8388607, %v4033_v0 }
 0x184   : > { %v2755_v32 = vmul.f32 %v2747_v55, %v2707_v46  ;;  %v2756_v24 = vmul.f32 %v2748_v60, %v2708_v4  ;;  %v4042_v53 = vand.u32 8388607, %v4034_v18  ;;  %v4047_v36 = vor.u32 1065353216, %v4039_v49 }
 0x185   : > { %v2757_v59 = vmul.f32 %v2749_v11, %v2709_v14  ;;  %v2762_v39 = vadd.f32 2.8212025, %v2754_v62  ;;  %v4048_v47 = vor.u32 1065353216, %v4040_v30  ;;  %v4049_v15 = vor.u32 1065353216, %v4041_v43 }
 0x186   : > { %v2763_v22 = vadd.f32 2.8212025, %v2755_v32  ;;  %v2764_v45 = vadd.f32 2.8212025, %v2756_v24  ;;  %v4050_v16 = vor.u32 1065353216, %v4042_v53  ;;  %v6552_v6 = vadd.f32 -1.0, %v4047_v36 }
 0x187   : > { %v2765_v21 = vadd.f32 2.8212025, %v2757_v59  ;;  %v2770_v56 = vmul.f32 %v2762_v39, %v2706_v31  ;;  %v6553_v33 = vadd.f32 -1.0, %v4048_v47  ;;  %v6554_v25 = vadd.f32 -1.0, %v4049_v15 }
 0x188   : > { %v2771_v13 = vmul.f32 %v2763_v22, %v2707_v46  ;;  %v2772_v23 = vmul.f32 %v2764_v45, %v2708_v4  ;;  %v6555_v3 = vadd.f32 -1.0, %v4050_v16  ;;  %v4071_v38 = vadd.f32 5.9604645e-08, %v6552_v6 }
 0x189   : > { %v2773_v1 = vmul.f32 %v2765_v21, %v2709_v14  ;;  %v2778_v44 = vadd.f32 -1.7417939, %v2770_v56  ;;  %v4072_v7 = vadd.f32 5.9604645e-08, %v6553_v33  ;;  %v4073_v0 = vadd.f32 5.9604645e-08, %v6554_v25 }
 0x18a   : > { %v2779_v55 = vadd.f32 -1.7417939, %v2771_v13  ;;  %v2780_v60 = vadd.f32 -1.7417939, %v2772_v23  ;;  %v4074_v18 = vadd.f32 5.9604645e-08, %v6555_v3  ;;  %v4087_v49 = vshra.s32 %v4071_v38, 23 }
 0x18b   : > { %v2781_v11 = vadd.f32 -1.7417939, %v2773_v1  ;;  %v2802_v62 = vadd.f32 %v2794_v8, %v2778_v44  ;;  %v4088_v30 = vshra.s32 %v4072_v7, 23  ;;  %v4089_v43 = vshra.s32 %v4073_v0, 23 }
 0x18c   : > { %v2803_v32 = vadd.f32 %v2795_v20, %v2779_v55  ;;  %v2804_v31 = vadd.f32 %v2796_v52, %v2780_v60  ;;  %v4090_v24 = vshra.s32 %v4074_v18, 23  ;;  %v4095_v53 = vand.u32 255, %v4087_v49 }
 0x18d   : > { %v2805_v46 = vadd.f32 %v2797_v19, %v2781_v11  ;;  %v7581_v4 = vsub.f32 %v7471_v58, %v2802_v62  ;;  %v4096_v14 = vand.u32 255, %v4088_v30  ;;  %v4097_v36 = vand.u32 255, %v4089_v43 }
 0x18e   : > { %v7584_v59 = vsub.f32 %v7475_v35, %v2803_v32  ;;  %v7587_v39 = vsub.f32 %v7473_v42, %v2804_v31  ;;  %v4098_v47 = vand.u32 255, %v4090_v24  ;;  %v6560_v8 = vadd.s32 4294967169, %v4095_v53 }
 0x18f   : > { %8937 = vst [vmem:[#allocation22_spill] sm:$0xff] %v7581_v4  ;;  %v7590_v15 = vsub.f32 %v7477_v48, %v2805_v46  ;;  %v6561_v20 = vadd.s32 4294967169, %v4096_v14  ;;  %v6562_v52 = vadd.s32 4294967169, %v4097_v36  ;;  %v4111_v22 = vand.u32 8388607, %v4071_v38 }
 0x190   : > { %8938 = vst [vmem:[#allocation23_spill] sm:$0xff] %v7584_v59  ;;  %8939 = vst [vmem:[#allocation24_spill] sm:$0xff] %v7587_v39  ;;  %v2818_v19 = vmax.f32 %v7581_v4, %v7587_v39  ;;  %v6563_v45 = vadd.s32 4294967169, %v4098_v47  ;;  %v4112_v16 = vand.u32 8388607, %v4072_v7  ;;  %v4199_v25 = vcvt.s32.f32 %v6560_v8 }
 0x191   : > { %8940 = vst [vmem:[#allocation25_spill] sm:$0xff] %v7590_v15  ;;  %v4113_v6 = vand.u32 8388607, %v4073_v0  ;;  %v2819_v21 = vmax.f32 %v7584_v59, %v7590_v15  ;;  %v4114_v56 = vand.u32 8388607, %v4074_v18  ;;  %v4119_v33 = vor.u32 1065353216, %v4111_v22 }
 0x192   : > { %v4120_v13 = vor.u32 1065353216, %v4112_v16  ;;  %v4200_v3 = vcvt.s32.f32 %v6561_v20  ;;  %v4201_v1 = vcvt.s32.f32 %v6562_v52  ;;  %v4202_v38 = vcvt.s32.f32 %v6563_v45 }
 0x193   : > { %v4121_v23 = vor.u32 1065353216, %v4113_v6  ;;  %v2820_v44 = vmax.f32 %v2818_v19, %v2819_v21  ;;  %v4122_v55 = vor.u32 1065353216, %v4114_v56  ;;  %v4135_v60 = vmul.f32 -0.05657085, %v4119_v33 }
 0x194   : > { %v4136_v49 = vmul.f32 -0.05657085, %v4120_v13  ;;  %v4207_v62 = vmul.f32 0.6931472, %v4199_v25  ;;  %v4208_v30 = vmul.f32 0.6931472, %v4200_v3 }
 0x195   : > { %v4137_v11 = vmul.f32 -0.05657085, %v4121_v23  ;;  %2821 = vmax.xlane.f32.xlu1 %v2820_v44  ;;  %v4138_v7 = vmul.f32 -0.05657085, %v4122_v55  ;;  %v4143_v0 = vadd.f32 0.44717956, %v4135_v60 }
 0x196   : > { %v4144_v43 = vadd.f32 0.44717956, %v4136_v49  ;;  %v4209_v18 = vmul.f32 0.6931472, %v4201_v1  ;;  %v4210_v53 = vmul.f32 0.6931472, %v4202_v38 }
 0x197   : > { %v4145_v32 = vadd.f32 0.44717956, %v4137_v11  ;;  %v4146_v31 = vadd.f32 0.44717956, %v4138_v7  ;;  %v4151_v24 = vmul.f32 %v4143_v0, %v4119_v33  ;;  %v2893_v46 = vadd.s32 4, %v7207_v26 }
 0x198   : > { %v4152_v14 = vmul.f32 %v4144_v43, %v4120_v13  ;;  %v2894_v47 = vadd.s32 4, %v7213_v28  ;;  %v2895_v8 = vadd.s32 4, %v7210_v27  ;;  %v2896_v22 = vadd.s32 4, %v7216_v29 }
 0x199   : > { %v4153_v36 = vmul.f32 %v4145_v32, %v4121_v23  ;;  %v4154_v20 = vmul.f32 %v4146_v31, %v4122_v55  ;;  %v4159_v52 = vadd.f32 -1.4699568, %v4151_v24  ;;  %v6428_v19 = vshrl.u32 %v2893_v46, 16 }
 0x19a   : > { %v4160_v45 = vadd.f32 -1.4699568, %v4152_v14  ;;  %v6429_v6 = vshrl.u32 %v2894_v47, 16  ;;  %v6430_v21 = vshrl.u32 %v2895_v8, 16  ;;  %v6431_v3 = vshrl.u32 %v2896_v22, 16 }
 0x19b   : > { %v4161_v16 = vadd.f32 -1.4699568, %v4153_v36  ;;  %v4162_v56 = vadd.f32 -1.4699568, %v4154_v20  ;;  %v4167_v25 = vmul.f32 %v4159_v52, %v4119_v33  ;;  %v2917_v1 = vxor.u32 %v6428_v19, %v2893_v46 }
 0x19c   : > { %v4168_v44 = vmul.f32 %v4160_v45, %v4120_v13  ;;  %v2918_v38 = vxor.u32 %v6429_v6, %v2894_v47  ;;  %v2919_v49 = vxor.u32 %v6430_v21, %v2895_v8  ;;  %v2920_v0 = vxor.u32 %v6431_v3, %v2896_v22 }
 0x19d   : > { %v4169_v60 = vmul.f32 %v4161_v16, %v4121_v23  ;;  %v4170_v11 = vmul.f32 %v4162_v56, %v4122_v55  ;;  %v4175_v7 = vadd.f32 2.8212025, %v4167_v25  ;;  %v2925_v43 = vmul.u32 2246822507, %v2917_v1 }
 0x19e   : > { %v4176_v32 = vadd.f32 2.8212025, %v4168_v44  ;;  %v2926_v24 = vmul.u32 2246822507, %v2918_v38  ;;  %v2927_v36 = vmul.u32 2246822507, %v2919_v49 }
 0x19f   : > { %v4177_v31 = vadd.f32 2.8212025, %v4169_v60  ;;  %v4178_v15 = vadd.f32 2.8212025, %v4170_v11  ;;  %v4183_v14 = vmul.f32 %v4175_v7, %v4119_v33  ;;  %v2928_v39 = vmul.u32 2246822507, %v2920_v0 }
 0x1a0   : > { %v4184_v59 = vmul.f32 %v4176_v32, %v4120_v13  ;;  %v6436_v52 = vshrl.u32 %v2925_v43, 13  ;;  %v6437_v4 = vshrl.u32 %v2926_v24, 13  ;;  %v6438_v45 = vshrl.u32 %v2927_v36, 13 }
 0x1a1   : > { %v4185_v20 = vmul.f32 %v4177_v31, %v4121_v23  ;;  %v4186_v46 = vmul.f32 %v4178_v15, %v4122_v55  ;;  %v4191_v19 = vadd.f32 -1.7417939, %v4183_v14  ;;  %v6439_v47 = vshrl.u32 %v2928_v39, 13 }
 0x1a2   : > { %v4192_v8 = vadd.f32 -1.7417939, %v4184_v59  ;;  %v2949_v6 = vxor.u32 %v6436_v52, %v2925_v43  ;;  %v2950_v22 = vxor.u32 %v6437_v4, %v2926_v24  ;;  %v2951_v25 = vxor.u32 %v6438_v45, %v2927_v36 }
 0x1a3   : > { %v4193_v16 = vadd.f32 -1.7417939, %v4185_v20  ;;  %v4194_v21 = vadd.f32 -1.7417939, %v4186_v46  ;;  %v4215_v56 = vadd.f32 %v4207_v62, %v4191_v19  ;;  %v7600_v3 = vxor.u32 %v6439_v47, %v2928_v39 }
 0x1a4   : > { %v4216_v33 = vadd.f32 %v4208_v30, %v4192_v8  ;;  %v2957_v44 = vmul.u32 3266489909, %v2949_v6  ;;  %v2958_v13 = vmul.u32 3266489909, %v2950_v22 }
 0x1a5   : > { %v4217_v1 = vadd.f32 %v4209_v18, %v4193_v16  ;;  %v4218_v23 = vadd.f32 %v4210_v53, %v4194_v21  ;;  %v4223_v60 = vsub.f32 0.0, %v4215_v56  ;;  %v2959_v38 = vmul.u32 3266489909, %v2951_v25 }
 0x1a6   : > { %v2960_v15 = vmul.u32 3266489909, %v7600_v3  ;;  %v4224_v55 = vsub.f32 0.0, %v4216_v33  ;;  %v6444_v59 = vshrl.u32 %v2957_v44, 16  ;;  %v6445_v11 = vshrl.u32 %v2958_v13, 16 }
 0x1a7   : > { %v4225_v49 = vsub.f32 0.0, %v4217_v1  ;;  %v4226_v7 = vsub.f32 0.0, %v4218_v23  ;;  %v4231_v4 = vmax.f32 %v4223_v60, 1e-10  ;;  %v6446_v0 = vshrl.u32 %v2959_v38, 16 }
 0x1a8   : > { %v6447_v62 = vshrl.u32 %v2960_v15, 16  ;;  %v4232_v43 = vmax.f32 %v4224_v55, 1e-10  ;;  %v2981_v32 = vxor.u32 %v6444_v59, %v2957_v44  ;;  %v2982_v30 = vxor.u32 %v6445_v11, %v2958_v13 }
 0x1a9   : > { %v4233_v39 = vmax.f32 %v4225_v49, 1e-10  ;;  %v4234_v18 = vmax.f32 %v4226_v7, 1e-10  ;;  %v4247_v31 = vshra.s32 %v4231_v4, 23  ;;  %v2983_v53 = vxor.u32 %v6446_v0, %v2959_v38 }
 0x1aa   : > { %v4271_v24 = vand.u32 8388607, %v4231_v4  ;;  %v4248_v14 = vshra.s32 %v4232_v43, 23  ;;  %v4272_v20 = vand.u32 8388607, %v4232_v43 }
 0x1ab   : > { %v4249_v36 = vshra.s32 %v4233_v39, 23  ;;  %v4273_v52 = vand.u32 8388607, %v4233_v39  ;;  %v4250_v46 = vshra.s32 %v4234_v18, 23  ;;  %v4255_v19 = vand.u32 255, %v4247_v31 }
 0x1ac   : > { %v4274_v45 = vand.u32 8388607, %v4234_v18  ;;  %v4279_v47 = vor.u32 1065353216, %v4271_v24  ;;  %v4256_v8 = vand.u32 255, %v4248_v14  ;;  %v4280_v6 = vor.u32 1065353216, %v4272_v20 }
 0x1ad   : > { %v4257_v16 = vand.u32 255, %v4249_v36  ;;  %v4281_v22 = vor.u32 1065353216, %v4273_v52  ;;  %v4258_v21 = vand.u32 255, %v4250_v46  ;;  %v6568_v56 = vadd.s32 4294967169, %v4255_v19 }
 0x1ae   : > { %v4282_v25 = vor.u32 1065353216, %v4274_v45  ;;  %v4295_v3 = vmul.f32 -0.05657085, %v4279_v47  ;;  %v6569_v33 = vadd.s32 4294967169, %v4256_v8  ;;  %v4296_v44 = vmul.f32 -0.05657085, %v4280_v6 }
 0x1af   : > { %v6570_v1 = vadd.s32 4294967169, %v4257_v16  ;;  %v4297_v13 = vmul.f32 -0.05657085, %v4281_v22  ;;  %v6571_v23 = vadd.s32 4294967169, %v4258_v21  ;;  %v4359_v55 = vcvt.s32.f32 %v6568_v56 }
 0x1b0   : > { %v4298_v60 = vmul.f32 -0.05657085, %v4282_v25  ;;  %v4303_v38 = vadd.f32 0.44717956, %v4295_v3  ;;  %v4304_v49 = vadd.f32 0.44717956, %v4296_v44  ;;  %v4360_v11 = vcvt.s32.f32 %v6569_v33 }
 0x1b1   : > { %v4305_v59 = vadd.f32 0.44717956, %v4297_v13  ;;  %v4361_v7 = vcvt.s32.f32 %v6570_v1  ;;  %v4362_v43 = vcvt.s32.f32 %v6571_v23  ;;  %v4367_v39 = vmul.f32 0.6931472, %v4359_v55 }
 0x1b2   : > { %v4306_v4 = vadd.f32 0.44717956, %v4298_v60  ;;  %v4311_v0 = vmul.f32 %v4303_v38, %v4279_v47  ;;  %v4312_v18 = vmul.f32 %v4304_v49, %v4280_v6  ;;  %v4368_v24 = vmul.f32 0.6931472, %v4360_v11 }
 0x1b3   : > { %v4313_v31 = vmul.f32 %v4305_v59, %v4281_v22  ;;  %v4369_v14 = vmul.f32 0.6931472, %v4361_v7  ;;  %v4370_v52 = vmul.f32 0.6931472, %v4362_v43  ;;  %v2984_v46 = vxor.u32 %v6447_v62, %v2960_v15 }
 0x1b4   : > { %v4314_v36 = vmul.f32 %v4306_v4, %v4282_v25  ;;  %v4319_v20 = vadd.f32 -1.4699568, %v4311_v0  ;;  %v4320_v19 = vadd.f32 -1.4699568, %v4312_v18  ;;  %v2989_v8 = vand.u32 8388607, %v2981_v32 }
 0x1b5   : > { %v4321_v45 = vadd.f32 -1.4699568, %v4313_v31  ;;  %v2990_v56 = vand.u32 8388607, %v2982_v30  ;;  %v2991_v3 = vand.u32 8388607, %v2983_v53 }
 0x1b6   : > { %v4322_v16 = vadd.f32 -1.4699568, %v4314_v36  ;;  %v4327_v21 = vmul.f32 %v4319_v20, %v4279_v47  ;;  %v4328_v33 = vmul.f32 %v4320_v19, %v4280_v6  ;;  %v2992_v44 = vand.u32 8388607, %v2984_v46 }
 0x1b7   : > { %v4329_v1 = vmul.f32 %v4321_v45, %v4281_v22  ;;  %v2997_v13 = vor.u32 1065353216, %v2989_v8  ;;  %v2998_v38 = vor.u32 1065353216, %v2990_v56  ;;  %v2999_v55 = vor.u32 1065353216, %v2991_v3 }
 0x1b8   : > { %v4330_v23 = vmul.f32 %v4322_v16, %v4282_v25  ;;  %v4335_v60 = vadd.f32 2.8212025, %v4327_v21  ;;  %v4336_v49 = vadd.f32 2.8212025, %v4328_v33  ;;  %v3000_v11 = vor.u32 1065353216, %v2992_v44 }
 0x1b9   : > { %v4337_v59 = vadd.f32 2.8212025, %v4329_v1  ;;  %v6452_v7 = vadd.f32 -1.0, %v2997_v13  ;;  %v6453_v4 = vadd.f32 -1.0, %v2998_v38  ;;  %v6454_v32 = vadd.f32 -1.0, %v2999_v55 }
 0x1ba   : > { %v4338_v15 = vadd.f32 2.8212025, %v4330_v23  ;;  %v4343_v62 = vmul.f32 %v4335_v60, %v4279_v47  ;;  %v4344_v0 = vmul.f32 %v4336_v49, %v4280_v6  ;;  %v6455_v30 = vadd.f32 -1.0, %v3000_v11 }
 0x1bb   : > { %v4345_v43 = vmul.f32 %v4337_v59, %v4281_v22  ;;  %v3021_v53 = vadd.f32 5.9604645e-08, %v6452_v7  ;;  %v3022_v36 = vadd.f32 5.9604645e-08, %v6453_v4  ;;  %v3023_v20 = vadd.f32 5.9604645e-08, %v6454_v32 }
 0x1bc   : > { %v4346_v18 = vmul.f32 %v4338_v15, %v4282_v25  ;;  %v4351_v31 = vadd.f32 -1.7417939, %v4343_v62  ;;  %v4352_v46 = vadd.f32 -1.7417939, %v4344_v0  ;;  %v3024_v45 = vadd.f32 5.9604645e-08, %v6455_v30 }
 0x1bd   : > { %v4353_v19 = vadd.f32 -1.7417939, %v4345_v43  ;;  %v3037_v8 = vshra.s32 %v3021_v53, 23  ;;  %v3038_v56 = vshra.s32 %v3022_v36, 23  ;;  %v3039_v3 = vshra.s32 %v3023_v20, 23 }
 0x1be   : > { %v4354_v16 = vadd.f32 -1.7417939, %v4346_v18  ;;  %v4375_v21 = vadd.f32 %v4367_v39, %v4351_v31  ;;  %v4376_v33 = vadd.f32 %v4368_v24, %v4352_v46  ;;  %v3040_v1 = vshra.s32 %v3024_v45, 23 }
 0x1bf   : > { %v4377_v47 = vadd.f32 %v4369_v14, %v4353_v19  ;;  %v3045_v44 = vand.u32 255, %v3037_v8  ;;  %v3046_v25 = vand.u32 255, %v3038_v56  ;;  %v3047_v13 = vand.u32 255, %v3039_v3 }
 0x1c0   : > { %v4378_v6 = vadd.f32 %v4370_v52, %v4354_v16  ;;  %v7604_v22 = vsub.f32 %v7480_v51, %v4375_v21  ;;  %v7607_v23 = vsub.f32 %v7492_v40, %v4376_v33  ;;  %v3048_v38 = vand.u32 255, %v3040_v1 }
 0x1c1   : > { %v7610_v60 = vsub.f32 %v7482_v5, %v4377_v47  ;;  %v6460_v39 = vadd.s32 4294967169, %v3045_v44  ;;  %v6461_v24 = vadd.s32 4294967169, %v3046_v25  ;;  %v6462_v14 = vadd.s32 4294967169, %v3047_v13 }
 0x1c2   : > { %8941 = vst [vmem:[#allocation26_spill] sm:$0xff] %v7604_v22  ;;  %8942 = vst [vmem:[#allocation27_spill] sm:$0xff] %v7607_v23  ;;  %v7613_v55 = vsub.f32 %v7494_v2, %v4378_v6  ;;  %v3061_v49 = vand.u32 8388607, %v3021_v53  ;;  %v6463_v59 = vadd.s32 4294967169, %v3048_v38  ;;  %v4466_v6 = vadd.s32 7, %v7364_v37 }
 0x1c3   : > { %8943 = vst [vmem:[#allocation28_spill] sm:$0xff] %v7610_v60  ;;  %v4392_v52 = vmax.f32 %v7604_v22, %v7610_v60  ;;  %v3062_v11 = vand.u32 8388607, %v3022_v36  ;;  %v3063_v7 = vand.u32 8388607, %v3023_v20  ;;  %v3149_v32 = vcvt.s32.f32 %v6460_v39 }
 0x1c4   : > { %8944 = vst [vmem:[#allocation29_spill] sm:$0xff] %v7613_v55  ;;  %v4393_v15 = vmax.f32 %v7607_v23, %v7613_v55  ;;  %v3064_v62 = vand.u32 8388607, %v3024_v45  ;;  %v3069_v4 = vor.u32 1065353216, %v3061_v49  ;;  %v3150_v30 = vcvt.s32.f32 %v6461_v24 }
 0x1c5   : > { %v3070_v0 = vor.u32 1065353216, %v3062_v11  ;;  %v3071_v43 = vor.u32 1065353216, %v3063_v7  ;;  %v3151_v18 = vcvt.s32.f32 %v6462_v14  ;;  %v3152_v53 = vcvt.s32.f32 %v6463_v59 }
 0x1c6   : > { %v4394_v31 = vmax.f32 %v4392_v52, %v4393_v15  ;;  %v3072_v46 = vor.u32 1065353216, %v3064_v62  ;;  %v3085_v19 = vmul.f32 -0.05657085, %v3069_v4  ;;  %v3157_v21 = vmul.f32 0.6931472, %v3149_v32 }
 0x1c7   : > { %v3086_v8 = vmul.f32 -0.05657085, %v3070_v0  ;;  %v3087_v16 = vmul.f32 -0.05657085, %v3071_v43  ;;  %v3158_v56 = vmul.f32 0.6931472, %v3150_v30 }
 0x1c8   : > { %4395 = vmax.xlane.f32.xlu0 %v4394_v31  ;;  %v3088_v36 = vmul.f32 -0.05657085, %v3072_v46  ;;  %v3093_v20 = vadd.f32 0.44717956, %v3085_v19  ;;  %v3159_v45 = vmul.f32 0.6931472, %v3151_v18 }
 0x1c9   : > { %v3094_v3 = vadd.f32 0.44717956, %v3086_v8  ;;  %v3095_v33 = vadd.f32 0.44717956, %v3087_v16  ;;  %v3160_v44 = vmul.f32 0.6931472, %v3152_v53 }
 0x1ca   : > { %v3096_v47 = vadd.f32 0.44717956, %v3088_v36  ;;  %v3101_v1 = vmul.f32 %v3093_v20, %v3069_v4  ;;  %v4467_v38 = vadd.s32 7, %v7384_v10  ;;  %v4468_v39 = vadd.s32 7, %v7387_v41 }
 0x1cb   : > { %v3102_v25 = vmul.f32 %v3094_v3, %v3070_v0  ;;  %v3103_v13 = vmul.f32 %v3095_v33, %v3071_v43  ;;  %v4469_v49 = vadd.s32 7, %v7390_v57  ;;  %v6576_v52 = vshrl.u32 %v4466_v6, 16 }
 0x1cc   : > { %v3104_v24 = vmul.f32 %v3096_v47, %v3072_v46  ;;  %v3109_v14 = vadd.f32 -1.4699568, %v3101_v1  ;;  %v6577_v7 = vshrl.u32 %v4467_v38, 16  ;;  %v6578_v15 = vshrl.u32 %v4468_v39, 16 }
 0x1cd   : > { %v3110_v59 = vadd.f32 -1.4699568, %v3102_v25  ;;  %v3111_v11 = vadd.f32 -1.4699568, %v3103_v13  ;;  %v6579_v30 = vshrl.u32 %v4469_v49, 16  ;;  %v4490_v18 = vxor.u32 %v6576_v52, %v4466_v6 }
 0x1ce   : > { %v3112_v62 = vadd.f32 -1.4699568, %v3104_v24  ;;  %v3117_v32 = vmul.f32 %v3109_v14, %v3069_v4  ;;  %v4491_v53 = vxor.u32 %v6577_v7, %v4467_v38  ;;  %v4492_v8 = vxor.u32 %v6578_v15, %v4468_v39 }
 0x1cf   : > { %v3118_v31 = vmul.f32 %v3110_v59, %v3070_v0  ;;  %v3119_v19 = vmul.f32 %v3111_v11, %v3071_v43  ;;  %v4493_v20 = vxor.u32 %v6579_v30, %v4469_v49  ;;  %v4498_v3 = vmul.u32 2246822507, %v4490_v18 }
 0x1d0   : > { %v3120_v16 = vmul.f32 %v3112_v62, %v3072_v46  ;;  %v3125_v36 = vadd.f32 2.8212025, %v3117_v32  ;;  %v4499_v1 = vmul.u32 2246822507, %v4491_v53  ;;  %v4500_v13 = vmul.u32 2246822507, %v4492_v8 }
 0x1d1   : > { %v3126_v33 = vadd.f32 2.8212025, %v3118_v31  ;;  %v3127_v47 = vadd.f32 2.8212025, %v3119_v19  ;;  %v4501_v23 = vmul.u32 2246822507, %v4493_v20 }
 0x1d2   : > { %v3128_v55 = vadd.f32 2.8212025, %v3120_v16  ;;  %v3133_v25 = vmul.f32 %v3125_v36, %v3069_v4  ;;  %v6584_v14 = vshrl.u32 %v4498_v3, 13  ;;  %v6585_v22 = vshrl.u32 %v4499_v1, 13 }
 0x1d3   : > { %v3134_v60 = vmul.f32 %v3126_v33, %v3070_v0  ;;  %v3135_v24 = vmul.f32 %v3127_v47, %v3071_v43  ;;  %v6586_v59 = vshrl.u32 %v4500_v13, 13  ;;  %v6587_v38 = vshrl.u32 %v4501_v23, 13 }
 0x1d4   : > { %v3136_v6 = vmul.f32 %v3128_v55, %v3072_v46  ;;  %v3141_v52 = vadd.f32 -1.7417939, %v3133_v25  ;;  %v4522_v7 = vxor.u32 %v6584_v14, %v4498_v3  ;;  %v4523_v49 = vxor.u32 %v6585_v22, %v4499_v1 }
 0x1d5   : > { %v3142_v39 = vadd.f32 -1.7417939, %v3134_v60  ;;  %v3143_v11 = vadd.f32 -1.7417939, %v3135_v24  ;;  %v4524_v32 = vxor.u32 %v6586_v59, %v4500_v13  ;;  %v7623_v30 = vxor.u32 %v6587_v38, %v4501_v23 }
 0x1d6   : > { %v3144_v15 = vadd.f32 -1.7417939, %v3136_v6  ;;  %v3165_v62 = vadd.f32 %v3157_v21, %v3141_v52  ;;  %v4530_v31 = vmul.u32 3266489909, %v4522_v7  ;;  %v4531_v0 = vmul.u32 3266489909, %v4523_v49 }
 0x1d7   : > { %v3166_v4 = vadd.f32 %v3158_v56, %v3142_v39  ;;  %v3167_v18 = vadd.f32 %v3159_v45, %v3143_v11  ;;  %v4532_v53 = vmul.u32 3266489909, %v4524_v32  ;;  %v4533_v55 = vmul.u32 3266489909, %v7623_v30 }
 0x1d8   : > { %v3168_v43 = vadd.f32 %v3160_v44, %v3144_v15  ;;  %v3173_v19 = vsub.f32 0.0, %v3165_v62  ;;  %v6592_v60 = vshrl.u32 %v4530_v31, 16  ;;  %v6593_v16 = vshrl.u32 %v4531_v0, 16 }
 0x1d9   : > { %v3174_v46 = vsub.f32 0.0, %v3166_v4  ;;  %v3175_v8 = vsub.f32 0.0, %v3167_v18  ;;  %v6594_v20 = vshrl.u32 %v4532_v53, 16  ;;  %v6595_v21 = vshrl.u32 %v4533_v55, 16 }
 0x1da   : > { %v3176_v36 = vsub.f32 0.0, %v3168_v43  ;;  %v3181_v22 = vmax.f32 %v3173_v19, 1e-10  ;;  %v4554_v33 = vxor.u32 %v6592_v60, %v4530_v31  ;;  %v4555_v56 = vxor.u32 %v6593_v16, %v4531_v0 }
 0x1db   : > { %v3182_v3 = vmax.f32 %v3174_v46, 1e-10  ;;  %v3183_v23 = vmax.f32 %v3175_v8, 1e-10  ;;  %v4556_v44 = vxor.u32 %v6594_v20, %v4532_v53 }
 0x1dc   : > { %v3184_v45 = vmax.f32 %v3176_v36, 1e-10  ;;  %v3197_v47 = vshra.s32 %v3181_v22, 23  ;;  %v3221_v1 = vand.u32 8388607, %v3181_v22 }
 0x1dd   : > { %v3198_v25 = vshra.s32 %v3182_v3, 23  ;;  %v3199_v13 = vshra.s32 %v3183_v23, 23  ;;  %v3222_v24 = vand.u32 8388607, %v3182_v3  ;;  %v3223_v14 = vand.u32 8388607, %v3183_v23 }
 0x1de   : > { %v3200_v6 = vshra.s32 %v3184_v45, 23  ;;  %v3205_v52 = vand.u32 255, %v3197_v47  ;;  %v3224_v59 = vand.u32 8388607, %v3184_v45  ;;  %v3229_v38 = vor.u32 1065353216, %v3221_v1 }
 0x1df   : > { %v3206_v39 = vand.u32 255, %v3198_v25  ;;  %v3207_v11 = vand.u32 255, %v3199_v13  ;;  %v3230_v7 = vor.u32 1065353216, %v3222_v24  ;;  %v3231_v49 = vor.u32 1065353216, %v3223_v14 }
 0x1e0   : > { %v3208_v15 = vand.u32 255, %v3200_v6  ;;  %v6468_v62 = vadd.s32 4294967169, %v3205_v52  ;;  %v3232_v32 = vor.u32 1065353216, %v3224_v59  ;;  %v3245_v30 = vmul.f32 -0.05657085, %v3229_v38 }
 0x1e1   : > { %v6469_v4 = vadd.s32 4294967169, %v3206_v39  ;;  %v6470_v18 = vadd.s32 4294967169, %v3207_v11  ;;  %v3246_v31 = vmul.f32 -0.05657085, %v3230_v7  ;;  %v3247_v0 = vmul.f32 -0.05657085, %v3231_v49 }
 0x1e2   : > { %v6471_v43 = vadd.s32 4294967169, %v3208_v15  ;;  %v3248_v19 = vmul.f32 -0.05657085, %v3232_v32  ;;  %v3253_v53 = vadd.f32 0.44717956, %v3245_v30  ;;  %v3309_v46 = vcvt.s32.f32 %v6468_v62 }
 0x1e3   : > { %v3254_v8 = vadd.f32 0.44717956, %v3246_v31  ;;  %v3255_v60 = vadd.f32 0.44717956, %v3247_v0  ;;  %v3310_v16 = vcvt.s32.f32 %v6469_v4  ;;  %v3311_v36 = vcvt.s32.f32 %v6470_v18 }
 0x1e4   : > { %v3256_v22 = vadd.f32 0.44717956, %v3248_v19  ;;  %v3261_v20 = vmul.f32 %v3253_v53, %v3229_v38  ;;  %v3312_v3 = vcvt.s32.f32 %v6471_v43  ;;  %v3317_v23 = vmul.f32 0.6931472, %v3309_v46 }
 0x1e5   : > { %v3262_v45 = vmul.f32 %v3254_v8, %v3230_v7  ;;  %v3263_v47 = vmul.f32 %v3255_v60, %v3231_v49  ;;  %v3318_v1 = vmul.f32 0.6931472, %v3310_v16  ;;  %v3319_v25 = vmul.f32 0.6931472, %v3311_v36 }
 0x1e6   : > { %v3264_v13 = vmul.f32 %v3256_v22, %v3232_v32  ;;  %v3269_v24 = vadd.f32 -1.4699568, %v3261_v20  ;;  %v3320_v14 = vmul.f32 0.6931472, %v3312_v3  ;;  %v4557_v6 = vxor.u32 %v6595_v21, %v4533_v55 }
 0x1e7   : > { %v3270_v52 = vadd.f32 -1.4699568, %v3262_v45  ;;  %v3271_v59 = vadd.f32 -1.4699568, %v3263_v47  ;;  %v4562_v39 = vand.u32 8388607, %v4554_v33 }
 0x1e8   : > { %v3272_v11 = vadd.f32 -1.4699568, %v3264_v13  ;;  %v3277_v15 = vmul.f32 %v3269_v24, %v3229_v38  ;;  %v4563_v62 = vand.u32 8388607, %v4555_v56  ;;  %v4564_v30 = vand.u32 8388607, %v4556_v44 }
 0x1e9   : > { %v3278_v4 = vmul.f32 %v3270_v52, %v3230_v7  ;;  %v3279_v18 = vmul.f32 %v3271_v59, %v3231_v49  ;;  %v4565_v31 = vand.u32 8388607, %v4557_v6  ;;  %v4570_v0 = vor.u32 1065353216, %v4562_v39 }
 0x1ea   : > { %v3280_v43 = vmul.f32 %v3272_v11, %v3232_v32  ;;  %v3285_v19 = vadd.f32 2.8212025, %v3277_v15  ;;  %v4571_v53 = vor.u32 1065353216, %v4563_v62  ;;  %v4572_v46 = vor.u32 1065353216, %v4564_v30 }
 0x1eb   : > { %v3286_v8 = vadd.f32 2.8212025, %v3278_v4  ;;  %v3287_v60 = vadd.f32 2.8212025, %v3279_v18  ;;  %v4573_v16 = vor.u32 1065353216, %v4565_v31  ;;  %v6600_v36 = vadd.f32 -1.0, %v4570_v0 }
 0x1ec   : > { %v3288_v55 = vadd.f32 2.8212025, %v3280_v43  ;;  %v3293_v21 = vmul.f32 %v3285_v19, %v3229_v38  ;;  %v6601_v22 = vadd.f32 -1.0, %v4571_v53  ;;  %v6602_v33 = vadd.f32 -1.0, %v4572_v46 }
 0x1ed   : > { %v3294_v20 = vmul.f32 %v3286_v8, %v3230_v7  ;;  %v3295_v3 = vmul.f32 %v3287_v60, %v3231_v49  ;;  %v6603_v56 = vadd.f32 -1.0, %v4573_v16  ;;  %v4594_v44 = vadd.f32 5.9604645e-08, %v6600_v36 }
 0x1ee   : > { %v3296_v45 = vmul.f32 %v3288_v55, %v3232_v32  ;;  %v3301_v47 = vadd.f32 -1.7417939, %v3293_v21  ;;  %v4595_v13 = vadd.f32 5.9604645e-08, %v6601_v22  ;;  %v4596_v24 = vadd.f32 5.9604645e-08, %v6602_v33 }
 0x1ef   : > { %v3302_v6 = vadd.f32 -1.7417939, %v3294_v20  ;;  %v3303_v52 = vadd.f32 -1.7417939, %v3295_v3  ;;  %v4597_v59 = vadd.f32 5.9604645e-08, %v6603_v56  ;;  %v4610_v39 = vshra.s32 %v4594_v44, 23 }
 0x1f0   : > { %v3304_v11 = vadd.f32 -1.7417939, %v3296_v45  ;;  %v3325_v15 = vadd.f32 %v3317_v23, %v3301_v47  ;;  %v4611_v62 = vshra.s32 %v4595_v13, 23  ;;  %v4612_v30 = vshra.s32 %v4596_v24, 23 }
 0x1f1   : > { %v3326_v4 = vadd.f32 %v3318_v1, %v3302_v6  ;;  %v3327_v38 = vadd.f32 %v3319_v25, %v3303_v52  ;;  %v4613_v18 = vshra.s32 %v4597_v59, 23  ;;  %v4618_v31 = vand.u32 255, %v4610_v39 }
 0x1f2   : > { %v3328_v7 = vadd.f32 %v3320_v14, %v3304_v11  ;;  %v7627_v49 = vsub.f32 %v7471_v58, %v3325_v15  ;;  %v4619_v32 = vand.u32 255, %v4611_v62  ;;  %v4620_v0 = vand.u32 255, %v4612_v30 }
 0x1f3   : > { %v7630_v43 = vsub.f32 %v7475_v35, %v3326_v4  ;;  %v7633_v19 = vsub.f32 %v7473_v42, %v3327_v38  ;;  %v4621_v53 = vand.u32 255, %v4613_v18  ;;  %v6608_v23 = vadd.s32 4294967169, %v4618_v31 }
 0x1f4   : > { %8945 = vst [vmem:[#allocation30_spill] sm:$0xff] %v7627_v49  ;;  %v7636_v46 = vsub.f32 %v7477_v48, %v3328_v7  ;;  %v6609_v1 = vadd.s32 4294967169, %v4619_v32  ;;  %v6610_v25 = vadd.s32 4294967169, %v4620_v0  ;;  %v4634_v8 = vand.u32 8388607, %v4594_v44 }
 0x1f5   : > { %8946 = vst [vmem:[#allocation31_spill] sm:$0xff] %v7630_v43  ;;  %8947 = vst [vmem:[#allocation32_spill] sm:$0xff] %v7633_v19  ;;  %v3341_v14 = vmax.f32 %v7627_v49, %v7633_v19  ;;  %v6611_v60 = vadd.s32 4294967169, %v4621_v53  ;;  %v4635_v16 = vand.u32 8388607, %v4595_v13  ;;  %v4722_v33 = vcvt.s32.f32 %v6608_v23 }
 0x1f6   : > { %8948 = vst [vmem:[#allocation33_spill] sm:$0xff] %v7636_v46  ;;  %v4636_v36 = vand.u32 8388607, %v4596_v24  ;;  %v3342_v55 = vmax.f32 %v7630_v43, %v7636_v46  ;;  %v4637_v21 = vand.u32 8388607, %v4597_v59  ;;  %v4642_v22 = vor.u32 1065353216, %v4634_v8 }
 0x1f7   : > { %v4643_v20 = vor.u32 1065353216, %v4635_v16  ;;  %v4723_v56 = vcvt.s32.f32 %v6609_v1  ;;  %v4724_v45 = vcvt.s32.f32 %v6610_v25  ;;  %v4725_v44 = vcvt.s32.f32 %v6611_v60 }
 0x1f8   : > { %v4644_v3 = vor.u32 1065353216, %v4636_v36  ;;  %v3343_v47 = vmax.f32 %v3341_v14, %v3342_v55  ;;  %v4645_v6 = vor.u32 1065353216, %v4637_v21  ;;  %v4658_v52 = vmul.f32 -0.05657085, %v4642_v22 }
 0x1f9   : > { %v4659_v39 = vmul.f32 -0.05657085, %v4643_v20  ;;  %v4730_v15 = vmul.f32 0.6931472, %v4722_v33  ;;  %v4731_v62 = vmul.f32 0.6931472, %v4723_v56 }
 0x1fa   : > { %v4660_v11 = vmul.f32 -0.05657085, %v4644_v3  ;;  %3344 = vmax.xlane.f32.xlu1 %v3343_v47  ;;  %v4661_v13 = vmul.f32 -0.05657085, %v4645_v6  ;;  %v4666_v24 = vadd.f32 0.44717956, %v4658_v52 }
 0x1fb   : > { %v4667_v30 = vadd.f32 0.44717956, %v4659_v39  ;;  %v4732_v59 = vmul.f32 0.6931472, %v4724_v45  ;;  %v4733_v31 = vmul.f32 0.6931472, %v4725_v44 }
 0x1fc   : > { %v4668_v4 = vadd.f32 0.44717956, %v4660_v11  ;;  %v4669_v38 = vadd.f32 0.44717956, %v4661_v13  ;;  %v4674_v18 = vmul.f32 %v4666_v24, %v4642_v22  ;;  %v3416_v7 = vadd.s32 5, %v7207_v26 }
 0x1fd   : > { %v4675_v32 = vmul.f32 %v4667_v30, %v4643_v20  ;;  %v3417_v53 = vadd.s32 5, %v7213_v28  ;;  %v3418_v23 = vadd.s32 5, %v7210_v27  ;;  %v3419_v8 = vadd.s32 5, %v7216_v29 }
 0x1fe   : > { %v4676_v0 = vmul.f32 %v4668_v4, %v4644_v3  ;;  %v4677_v1 = vmul.f32 %v4669_v38, %v4645_v6  ;;  %v4682_v25 = vadd.f32 -1.4699568, %v4674_v18  ;;  %v6476_v14 = vshrl.u32 %v3416_v7, 16 }
 0x1ff   : > { %v4683_v60 = vadd.f32 -1.4699568, %v4675_v32  ;;  %v6477_v36 = vshrl.u32 %v3417_v53, 16  ;;  %v6478_v55 = vshrl.u32 %v3418_v23, 16  ;;  %v6479_v56 = vshrl.u32 %v3419_v8, 16 }
 0x200   : > { %v4684_v16 = vadd.f32 -1.4699568, %v4676_v0  ;;  %v4685_v21 = vadd.f32 -1.4699568, %v4677_v1  ;;  %v4690_v33 = vmul.f32 %v4682_v25, %v4642_v22  ;;  %v3440_v45 = vxor.u32 %v6476_v14, %v3416_v7 }
 0x201   : > { %v4691_v47 = vmul.f32 %v4683_v60, %v4643_v20  ;;  %v3441_v44 = vxor.u32 %v6477_v36, %v3417_v53  ;;  %v3442_v39 = vxor.u32 %v6478_v55, %v3418_v23  ;;  %v3443_v24 = vxor.u32 %v6479_v56, %v3419_v8 }
 0x202   : > { %v4692_v52 = vmul.f32 %v4684_v16, %v4644_v3  ;;  %v4693_v11 = vmul.f32 %v4685_v21, %v4645_v6  ;;  %v4698_v13 = vadd.f32 2.8212025, %v4690_v33  ;;  %v3448_v30 = vmul.u32 2246822507, %v3440_v45 }
 0x203   : > { %v4699_v4 = vadd.f32 2.8212025, %v4691_v47  ;;  %v3449_v18 = vmul.u32 2246822507, %v3441_v44  ;;  %v3450_v0 = vmul.u32 2246822507, %v3442_v39 }
 0x204   : > { %v4700_v38 = vadd.f32 2.8212025, %v4692_v52  ;;  %v4701_v46 = vadd.f32 2.8212025, %v4693_v11  ;;  %v4706_v32 = vmul.f32 %v4698_v13, %v4642_v22  ;;  %v3451_v19 = vmul.u32 2246822507, %v3443_v24 }
 0x205   : > { %v4707_v43 = vmul.f32 %v4699_v4, %v4643_v20  ;;  %v6484_v25 = vshrl.u32 %v3448_v30, 13  ;;  %v6485_v49 = vshrl.u32 %v3449_v18, 13  ;;  %v6486_v60 = vshrl.u32 %v3450_v0, 13 }
 0x206   : > { %v4708_v1 = vmul.f32 %v4700_v38, %v4644_v3  ;;  %v4709_v7 = vmul.f32 %v4701_v46, %v4645_v6  ;;  %v4714_v14 = vadd.f32 -1.7417939, %v4706_v32  ;;  %v6487_v53 = vshrl.u32 %v3451_v19, 13 }
 0x207   : > { %v4715_v23 = vadd.f32 -1.7417939, %v4707_v43  ;;  %v3472_v36 = vxor.u32 %v6484_v25, %v3448_v30  ;;  %v3473_v8 = vxor.u32 %v6485_v49, %v3449_v18  ;;  %v3474_v33 = vxor.u32 %v6486_v60, %v3450_v0 }
 0x208   : > { %v4716_v16 = vadd.f32 -1.7417939, %v4708_v1  ;;  %v4717_v55 = vadd.f32 -1.7417939, %v4709_v7  ;;  %v4738_v21 = vadd.f32 %v4730_v15, %v4714_v14  ;;  %v7646_v56 = vxor.u32 %v6487_v53, %v3451_v19 }
 0x209   : > { %v4739_v22 = vadd.f32 %v4731_v62, %v4715_v23  ;;  %v3480_v47 = vmul.u32 3266489909, %v3472_v36  ;;  %v3481_v20 = vmul.u32 3266489909, %v3473_v8 }
 0x20a   : > { %v4740_v45 = vadd.f32 %v4732_v59, %v4716_v16  ;;  %v4741_v3 = vadd.f32 %v4733_v31, %v4717_v55  ;;  %v4746_v52 = vsub.f32 0.0, %v4738_v21  ;;  %v3482_v44 = vmul.u32 3266489909, %v3474_v33 }
 0x20b   : > { %v3483_v46 = vmul.u32 3266489909, %v7646_v56  ;;  %v4747_v6 = vsub.f32 0.0, %v4739_v22  ;;  %v6492_v43 = vshrl.u32 %v3480_v47, 16  ;;  %v6493_v11 = vshrl.u32 %v3481_v20, 16 }
 0x20c   : > { %v4748_v39 = vsub.f32 0.0, %v4740_v45  ;;  %v4749_v13 = vsub.f32 0.0, %v4741_v3  ;;  %v4754_v49 = vmax.f32 %v4746_v52, 1e-10  ;;  %v6494_v24 = vshrl.u32 %v3482_v44, 16 }
 0x20d   : > { %v6495_v15 = vshrl.u32 %v3483_v46, 16  ;;  %v4755_v30 = vmax.f32 %v4747_v6, 1e-10  ;;  %v3504_v4 = vxor.u32 %v6492_v43, %v3480_v47  ;;  %v3505_v62 = vxor.u32 %v6493_v11, %v3481_v20 }
 0x20e   : > { %v4756_v19 = vmax.f32 %v4748_v39, 1e-10  ;;  %v4757_v59 = vmax.f32 %v4749_v13, 1e-10  ;;  %v4770_v38 = vshra.s32 %v4754_v49, 23  ;;  %v3506_v31 = vxor.u32 %v6494_v24, %v3482_v44 }
 0x20f   : > { %v4794_v18 = vand.u32 8388607, %v4754_v49  ;;  %v4771_v32 = vshra.s32 %v4755_v30, 23  ;;  %v4795_v1 = vand.u32 8388607, %v4755_v30 }
 0x210   : > { %v4772_v0 = vshra.s32 %v4756_v19, 23  ;;  %v4796_v25 = vand.u32 8388607, %v4756_v19  ;;  %v4773_v7 = vshra.s32 %v4757_v59, 23  ;;  %v4778_v14 = vand.u32 255, %v4770_v38 }
 0x211   : > { %v4797_v60 = vand.u32 8388607, %v4757_v59  ;;  %v4802_v53 = vor.u32 1065353216, %v4794_v18  ;;  %v4779_v23 = vand.u32 255, %v4771_v32  ;;  %v4803_v36 = vor.u32 1065353216, %v4795_v1 }
 0x212   : > { %v4780_v16 = vand.u32 255, %v4772_v0  ;;  %v4804_v8 = vor.u32 1065353216, %v4796_v25  ;;  %v4781_v55 = vand.u32 255, %v4773_v7  ;;  %v6616_v21 = vadd.s32 4294967169, %v4778_v14 }
 0x213   : > { %v4805_v33 = vor.u32 1065353216, %v4797_v60  ;;  %v4818_v56 = vmul.f32 -0.05657085, %v4802_v53  ;;  %v6617_v22 = vadd.s32 4294967169, %v4779_v23  ;;  %v4819_v47 = vmul.f32 -0.05657085, %v4803_v36 }
 0x214   : > { %v6618_v45 = vadd.s32 4294967169, %v4780_v16  ;;  %v4820_v20 = vmul.f32 -0.05657085, %v4804_v8  ;;  %v6619_v3 = vadd.s32 4294967169, %v4781_v55  ;;  %v4882_v6 = vcvt.s32.f32 %v6616_v21 }
 0x215   : > { %v4821_v52 = vmul.f32 -0.05657085, %v4805_v33  ;;  %v4826_v44 = vadd.f32 0.44717956, %v4818_v56  ;;  %v4827_v39 = vadd.f32 0.44717956, %v4819_v47  ;;  %v4883_v11 = vcvt.s32.f32 %v6617_v22 }
 0x216   : > { %v4828_v43 = vadd.f32 0.44717956, %v4820_v20  ;;  %v4884_v13 = vcvt.s32.f32 %v6618_v45  ;;  %v4885_v30 = vcvt.s32.f32 %v6619_v3  ;;  %v4890_v19 = vmul.f32 0.6931472, %v4882_v6 }
 0x217   : > { %v4829_v49 = vadd.f32 0.44717956, %v4821_v52  ;;  %v4834_v24 = vmul.f32 %v4826_v44, %v4802_v53  ;;  %v4835_v59 = vmul.f32 %v4827_v39, %v4803_v36  ;;  %v4891_v18 = vmul.f32 0.6931472, %v4883_v11 }
 0x218   : > { %v4836_v38 = vmul.f32 %v4828_v43, %v4804_v8  ;;  %v4892_v32 = vmul.f32 0.6931472, %v4884_v13  ;;  %v4893_v25 = vmul.f32 0.6931472, %v4885_v30  ;;  %v3507_v7 = vxor.u32 %v6495_v15, %v3483_v46 }
 0x219   : > { %v4837_v0 = vmul.f32 %v4829_v49, %v4805_v33  ;;  %v4842_v1 = vadd.f32 -1.4699568, %v4834_v24  ;;  %v4843_v14 = vadd.f32 -1.4699568, %v4835_v59  ;;  %v3512_v23 = vand.u32 8388607, %v3504_v4 }
 0x21a   : > { %v4844_v60 = vadd.f32 -1.4699568, %v4836_v38  ;;  %v3513_v21 = vand.u32 8388607, %v3505_v62  ;;  %v3514_v56 = vand.u32 8388607, %v3506_v31 }
 0x21b   : > { %v4845_v16 = vadd.f32 -1.4699568, %v4837_v0  ;;  %v4850_v55 = vmul.f32 %v4842_v1, %v4802_v53  ;;  %v4851_v22 = vmul.f32 %v4843_v14, %v4803_v36  ;;  %v3515_v47 = vand.u32 8388607, %v3507_v7 }
 0x21c   : > { %v4852_v45 = vmul.f32 %v4844_v60, %v4804_v8  ;;  %v3520_v20 = vor.u32 1065353216, %v3512_v23  ;;  %v3521_v44 = vor.u32 1065353216, %v3513_v21  ;;  %v3522_v6 = vor.u32 1065353216, %v3514_v56 }
 0x21d   : > { %v4853_v3 = vmul.f32 %v4845_v16, %v4805_v33  ;;  %v4858_v52 = vadd.f32 2.8212025, %v4850_v55  ;;  %v4859_v39 = vadd.f32 2.8212025, %v4851_v22  ;;  %v3523_v11 = vor.u32 1065353216, %v3515_v47 }
 0x21e   : > { %v4860_v43 = vadd.f32 2.8212025, %v4852_v45  ;;  %v6500_v13 = vadd.f32 -1.0, %v3520_v20  ;;  %v6501_v49 = vadd.f32 -1.0, %v3521_v44  ;;  %v6502_v4 = vadd.f32 -1.0, %v3522_v6 }
 0x21f   : > { %v4861_v46 = vadd.f32 2.8212025, %v4853_v3  ;;  %v4866_v15 = vmul.f32 %v4858_v52, %v4802_v53  ;;  %v4867_v24 = vmul.f32 %v4859_v39, %v4803_v36  ;;  %v6503_v62 = vadd.f32 -1.0, %v3523_v11 }
 0x220   : > { %v4868_v30 = vmul.f32 %v4860_v43, %v4804_v8  ;;  %v3544_v31 = vadd.f32 5.9604645e-08, %v6500_v13  ;;  %v3545_v0 = vadd.f32 5.9604645e-08, %v6501_v49  ;;  %v3546_v1 = vadd.f32 5.9604645e-08, %v6502_v4 }
 0x221   : > { %v4869_v59 = vmul.f32 %v4861_v46, %v4805_v33  ;;  %v4874_v38 = vadd.f32 -1.7417939, %v4866_v15  ;;  %v4875_v7 = vadd.f32 -1.7417939, %v4867_v24  ;;  %v3547_v60 = vadd.f32 5.9604645e-08, %v6503_v62 }
 0x222   : > { %v4876_v14 = vadd.f32 -1.7417939, %v4868_v30  ;;  %v3560_v23 = vshra.s32 %v3544_v31, 23  ;;  %v3561_v21 = vshra.s32 %v3545_v0, 23  ;;  %v3562_v56 = vshra.s32 %v3546_v1, 23 }
 0x223   : > { %v4877_v16 = vadd.f32 -1.7417939, %v4869_v59  ;;  %v4898_v55 = vadd.f32 %v4890_v19, %v4874_v38  ;;  %v4899_v22 = vadd.f32 %v4891_v18, %v4875_v7  ;;  %v3563_v45 = vshra.s32 %v3547_v60, 23 }
 0x224   : > { %v4900_v53 = vadd.f32 %v4892_v32, %v4876_v14  ;;  %v3568_v47 = vand.u32 255, %v3560_v23  ;;  %v3569_v33 = vand.u32 255, %v3561_v21  ;;  %v3570_v20 = vand.u32 255, %v3562_v56 }
 0x225   : > { %v4901_v36 = vadd.f32 %v4893_v25, %v4877_v16  ;;  %v7650_v8 = vsub.f32 %v7480_v51, %v4898_v55  ;;  %v7653_v3 = vsub.f32 %v7492_v40, %v4899_v22  ;;  %v3571_v44 = vand.u32 255, %v3563_v45 }
 0x226   : > { %v7656_v52 = vsub.f32 %v7482_v5, %v4900_v53  ;;  %v6508_v19 = vadd.s32 4294967169, %v3568_v47  ;;  %v6509_v18 = vadd.s32 4294967169, %v3569_v33  ;;  %v6510_v32 = vadd.s32 4294967169, %v3570_v20 }
 0x227   : > { %8949 = vst [vmem:[#allocation34_spill] sm:$0xff] %v7650_v8  ;;  %8950 = vst [vmem:[#allocation35_spill] sm:$0xff] %v7653_v3  ;;  %v7659_v6 = vsub.f32 %v7494_v2, %v4901_v36  ;;  %v3584_v39 = vand.u32 8388607, %v3544_v31  ;;  %v6511_v43 = vadd.s32 4294967169, %v3571_v44  ;;  %v4989_v36 = vadd.s32 8, %v7364_v37 }
 0x228   : > { %8951 = vst [vmem:[#allocation36_spill] sm:$0xff] %v7656_v52  ;;  %v4915_v25 = vmax.f32 %v7650_v8, %v7656_v52  ;;  %v3585_v11 = vand.u32 8388607, %v3545_v0  ;;  %v3586_v13 = vand.u32 8388607, %v3546_v1  ;;  %v3672_v4 = vcvt.s32.f32 %v6508_v19 }
 0x229   : > { %8952 = vst [vmem:[#allocation37_spill] sm:$0xff] %v7659_v6  ;;  %v4916_v46 = vmax.f32 %v7653_v3, %v7659_v6  ;;  %v3587_v15 = vand.u32 8388607, %v3547_v60  ;;  %v3592_v49 = vor.u32 1065353216, %v3584_v39  ;;  %v3673_v62 = vcvt.s32.f32 %v6509_v18 }
 0x22a   : > { %v3593_v24 = vor.u32 1065353216, %v3585_v11  ;;  %v3594_v30 = vor.u32 1065353216, %v3586_v13  ;;  %v3674_v59 = vcvt.s32.f32 %v6510_v32  ;;  %v3675_v31 = vcvt.s32.f32 %v6511_v43 }
 0x22b   : > { %v4917_v38 = vmax.f32 %v4915_v25, %v4916_v46  ;;  %v3595_v7 = vor.u32 1065353216, %v3587_v15  ;;  %v3608_v14 = vmul.f32 -0.05657085, %v3592_v49  ;;  %v3680_v55 = vmul.f32 0.6931472, %v3672_v4 }
 0x22c   : > { %v3609_v23 = vmul.f32 -0.05657085, %v3593_v24  ;;  %v3610_v16 = vmul.f32 -0.05657085, %v3594_v30  ;;  %v3681_v21 = vmul.f32 0.6931472, %v3673_v62 }
 0x22d   : > { %4918 = vmax.xlane.f32.xlu0 %v4917_v38  ;;  %v3611_v0 = vmul.f32 -0.05657085, %v3595_v7  ;;  %v3616_v1 = vadd.f32 0.44717956, %v3608_v14  ;;  %v3682_v60 = vmul.f32 0.6931472, %v3674_v59 }
 0x22e   : > { %v3617_v56 = vadd.f32 0.44717956, %v3609_v23  ;;  %v3618_v22 = vadd.f32 0.44717956, %v3610_v16  ;;  %v3683_v47 = vmul.f32 0.6931472, %v3675_v31 }
 0x22f   : > { %v3619_v53 = vadd.f32 0.44717956, %v3611_v0  ;;  %v3624_v45 = vmul.f32 %v3616_v1, %v3592_v49  ;;  %v4990_v44 = vadd.s32 8, %v7384_v10  ;;  %v4991_v19 = vadd.s32 8, %v7387_v41 }
 0x230   : > { %v3625_v33 = vmul.f32 %v3617_v56, %v3593_v24  ;;  %v3626_v20 = vmul.f32 %v3618_v22, %v3594_v30  ;;  %v4992_v39 = vadd.s32 8, %v7390_v57  ;;  %v6624_v25 = vshrl.u32 %v4989_v36, 16 }
 0x231   : > { %v3627_v18 = vmul.f32 %v3619_v53, %v3595_v7  ;;  %v3632_v32 = vadd.f32 -1.4699568, %v3624_v45  ;;  %v6625_v13 = vshrl.u32 %v4990_v44, 16  ;;  %v6626_v46 = vshrl.u32 %v4991_v19, 16 }
 0x232   : > { %v3633_v43 = vadd.f32 -1.4699568, %v3625_v33  ;;  %v3634_v11 = vadd.f32 -1.4699568, %v3626_v20  ;;  %v6627_v62 = vshrl.u32 %v4992_v39, 16  ;;  %v5013_v59 = vxor.u32 %v6624_v25, %v4989_v36 }
 0x233   : > { %v3635_v15 = vadd.f32 -1.4699568, %v3627_v18  ;;  %v3640_v4 = vmul.f32 %v3632_v32, %v3592_v49  ;;  %v5014_v31 = vxor.u32 %v6625_v13, %v4990_v44  ;;  %v5015_v23 = vxor.u32 %v6626_v46, %v4991_v19 }
 0x234   : > { %v3641_v38 = vmul.f32 %v3633_v43, %v3593_v24  ;;  %v3642_v14 = vmul.f32 %v3634_v11, %v3594_v30  ;;  %v5016_v1 = vxor.u32 %v6627_v62, %v4992_v39  ;;  %v5021_v56 = vmul.u32 2246822507, %v5013_v59 }
 0x235   : > { %v3643_v16 = vmul.f32 %v3635_v15, %v3595_v7  ;;  %v3648_v0 = vadd.f32 2.8212025, %v3640_v4  ;;  %v5022_v45 = vmul.u32 2246822507, %v5014_v31  ;;  %v5023_v20 = vmul.u32 2246822507, %v5015_v23 }
 0x236   : > { %v3649_v22 = vadd.f32 2.8212025, %v3641_v38  ;;  %v3650_v53 = vadd.f32 2.8212025, %v3642_v14  ;;  %v5024_v52 = vmul.u32 2246822507, %v5016_v1 }
 0x237   : > { %v3651_v6 = vadd.f32 2.8212025, %v3643_v16  ;;  %v3656_v33 = vmul.f32 %v3648_v0, %v3592_v49  ;;  %v6632_v32 = vshrl.u32 %v5021_v56, 13  ;;  %v6633_v8 = vshrl.u32 %v5022_v45, 13 }
 0x238   : > { %v3657_v3 = vmul.f32 %v3649_v22, %v3593_v24  ;;  %v3658_v18 = vmul.f32 %v3650_v53, %v3594_v30  ;;  %v6634_v43 = vshrl.u32 %v5023_v20, 13  ;;  %v6635_v44 = vshrl.u32 %v5024_v52, 13 }
 0x239   : > { %v3659_v36 = vmul.f32 %v3651_v6, %v3595_v7  ;;  %v3664_v25 = vadd.f32 -1.7417939, %v3656_v33  ;;  %v5045_v13 = vxor.u32 %v6632_v32, %v5021_v56  ;;  %v5046_v39 = vxor.u32 %v6633_v8, %v5022_v45 }
 0x23a   : > { %v3665_v19 = vadd.f32 -1.7417939, %v3657_v3  ;;  %v3666_v11 = vadd.f32 -1.7417939, %v3658_v18  ;;  %v5047_v4 = vxor.u32 %v6634_v43, %v5023_v20  ;;  %v7669_v62 = vxor.u32 %v6635_v44, %v5024_v52 }
 0x23b   : > { %v3667_v46 = vadd.f32 -1.7417939, %v3659_v36  ;;  %v3688_v15 = vadd.f32 %v3680_v55, %v3664_v25  ;;  %v5053_v38 = vmul.u32 3266489909, %v5045_v13  ;;  %v5054_v24 = vmul.u32 3266489909, %v5046_v39 }
 0x23c   : > { %v3689_v49 = vadd.f32 %v3681_v21, %v3665_v19  ;;  %v3690_v59 = vadd.f32 %v3682_v60, %v3666_v11  ;;  %v5055_v31 = vmul.u32 3266489909, %v5047_v4  ;;  %v5056_v6 = vmul.u32 3266489909, %v7669_v62 }
 0x23d   : > { %v3691_v30 = vadd.f32 %v3683_v47, %v3667_v46  ;;  %v3696_v14 = vsub.f32 0.0, %v3688_v15  ;;  %v6640_v3 = vshrl.u32 %v5053_v38, 16  ;;  %v6641_v16 = vshrl.u32 %v5054_v24, 16 }
 0x23e   : > { %v3697_v7 = vsub.f32 0.0, %v3689_v49  ;;  %v3698_v23 = vsub.f32 0.0, %v3690_v59  ;;  %v6642_v1 = vshrl.u32 %v5055_v31, 16  ;;  %v6643_v55 = vshrl.u32 %v5056_v6, 16 }
 0x23f   : > { %v3699_v0 = vsub.f32 0.0, %v3691_v30  ;;  %v3704_v8 = vmax.f32 %v3696_v14, 1e-10  ;;  %v5077_v22 = vxor.u32 %v6640_v3, %v5053_v38  ;;  %v5078_v21 = vxor.u32 %v6641_v16, %v5054_v24 }
 0x240   : > { %v3705_v56 = vmax.f32 %v3697_v7, 1e-10  ;;  %v3706_v52 = vmax.f32 %v3698_v23, 1e-10  ;;  %v5079_v47 = vxor.u32 %v6642_v1, %v5055_v31 }
 0x241   : > { %v3707_v60 = vmax.f32 %v3699_v0, 1e-10  ;;  %v3720_v53 = vshra.s32 %v3704_v8, 23  ;;  %v3744_v45 = vand.u32 8388607, %v3704_v8 }
 0x242   : > { %v3721_v33 = vshra.s32 %v3705_v56, 23  ;;  %v3722_v20 = vshra.s32 %v3706_v52, 23  ;;  %v3745_v18 = vand.u32 8388607, %v3705_v56  ;;  %v3746_v32 = vand.u32 8388607, %v3706_v52 }
 0x243   : > { %v3723_v36 = vshra.s32 %v3707_v60, 23  ;;  %v3728_v25 = vand.u32 255, %v3720_v53  ;;  %v3747_v43 = vand.u32 8388607, %v3707_v60  ;;  %v3752_v44 = vor.u32 1065353216, %v3744_v45 }
 0x244   : > { %v3729_v19 = vand.u32 255, %v3721_v33  ;;  %v3730_v11 = vand.u32 255, %v3722_v20  ;;  %v3753_v13 = vor.u32 1065353216, %v3745_v18  ;;  %v3754_v39 = vor.u32 1065353216, %v3746_v32 }
 0x245   : > { %v3731_v46 = vand.u32 255, %v3723_v36  ;;  %v6516_v15 = vadd.s32 4294967169, %v3728_v25  ;;  %v3755_v4 = vor.u32 1065353216, %v3747_v43  ;;  %v3768_v62 = vmul.f32 -0.05657085, %v3752_v44 }
 0x246   : > { %v6517_v49 = vadd.s32 4294967169, %v3729_v19  ;;  %v6518_v59 = vadd.s32 4294967169, %v3730_v11  ;;  %v3769_v38 = vmul.f32 -0.05657085, %v3753_v13  ;;  %v3770_v24 = vmul.f32 -0.05657085, %v3754_v39 }
 0x247   : > { %v6519_v30 = vadd.s32 4294967169, %v3731_v46  ;;  %v3771_v14 = vmul.f32 -0.05657085, %v3755_v4  ;;  %v3776_v31 = vadd.f32 0.44717956, %v3768_v62  ;;  %v3832_v7 = vcvt.s32.f32 %v6516_v15 }
 0x248   : > { %v3777_v23 = vadd.f32 0.44717956, %v3769_v38  ;;  %v3778_v3 = vadd.f32 0.44717956, %v3770_v24  ;;  %v3833_v16 = vcvt.s32.f32 %v6517_v49  ;;  %v3834_v0 = vcvt.s32.f32 %v6518_v59 }
 0x249   : > { %v3779_v8 = vadd.f32 0.44717956, %v3771_v14  ;;  %v3784_v1 = vmul.f32 %v3776_v31, %v3752_v44  ;;  %v3835_v56 = vcvt.s32.f32 %v6519_v30  ;;  %v3840_v52 = vmul.f32 0.6931472, %v3832_v7 }
 0x24a   : > { %v3785_v60 = vmul.f32 %v3777_v23, %v3753_v13  ;;  %v3786_v53 = vmul.f32 %v3778_v3, %v3754_v39  ;;  %v3841_v45 = vmul.f32 0.6931472, %v3833_v16  ;;  %v3842_v33 = vmul.f32 0.6931472, %v3834_v0 }
 0x24b   : > { %v3787_v20 = vmul.f32 %v3779_v8, %v3755_v4  ;;  %v3792_v18 = vadd.f32 -1.4699568, %v3784_v1  ;;  %v3843_v32 = vmul.f32 0.6931472, %v3835_v56  ;;  %v5080_v36 = vxor.u32 %v6643_v55, %v5056_v6 }
 0x24c   : > { %v3793_v25 = vadd.f32 -1.4699568, %v3785_v60  ;;  %v3794_v43 = vadd.f32 -1.4699568, %v3786_v53  ;;  %v5085_v19 = vand.u32 8388607, %v5077_v22 }
 0x24d   : > { %v3795_v11 = vadd.f32 -1.4699568, %v3787_v20  ;;  %v3800_v46 = vmul.f32 %v3792_v18, %v3752_v44  ;;  %v5086_v15 = vand.u32 8388607, %v5078_v21  ;;  %v5087_v62 = vand.u32 8388607, %v5079_v47 }
 0x24e   : > { %v3801_v49 = vmul.f32 %v3793_v25, %v3753_v13  ;;  %v3802_v59 = vmul.f32 %v3794_v43, %v3754_v39  ;;  %v5088_v38 = vand.u32 8388607, %v5080_v36  ;;  %v5093_v24 = vor.u32 1065353216, %v5085_v19 }
 0x24f   : > { %v3803_v30 = vmul.f32 %v3795_v11, %v3755_v4  ;;  %v3808_v14 = vadd.f32 2.8212025, %v3800_v46  ;;  %v5094_v31 = vor.u32 1065353216, %v5086_v15  ;;  %v5095_v7 = vor.u32 1065353216, %v5087_v62 }
 0x250   : > { %v3809_v23 = vadd.f32 2.8212025, %v3801_v49  ;;  %v3810_v3 = vadd.f32 2.8212025, %v3802_v59  ;;  %v5096_v16 = vor.u32 1065353216, %v5088_v38  ;;  %v6648_v0 = vadd.f32 -1.0, %v5093_v24 }
 0x251   : > { %v3811_v6 = vadd.f32 2.8212025, %v3803_v30  ;;  %v3816_v55 = vmul.f32 %v3808_v14, %v3752_v44  ;;  %v6649_v8 = vadd.f32 -1.0, %v5094_v31  ;;  %v6650_v22 = vadd.f32 -1.0, %v5095_v7 }
 0x252   : > { %v3817_v1 = vmul.f32 %v3809_v23, %v3753_v13  ;;  %v3818_v56 = vmul.f32 %v3810_v3, %v3754_v39  ;;  %v6651_v21 = vadd.f32 -1.0, %v5096_v16  ;;  %v5117_v47 = vadd.f32 5.9604645e-08, %v6648_v0 }
 0x253   : > { %v3819_v60 = vmul.f32 %v3811_v6, %v3755_v4  ;;  %v3824_v53 = vadd.f32 -1.7417939, %v3816_v55  ;;  %v5118_v20 = vadd.f32 5.9604645e-08, %v6649_v8  ;;  %v5119_v18 = vadd.f32 5.9604645e-08, %v6650_v22 }
 0x254   : > { %v3825_v36 = vadd.f32 -1.7417939, %v3817_v1  ;;  %v3826_v25 = vadd.f32 -1.7417939, %v3818_v56  ;;  %v5120_v43 = vadd.f32 5.9604645e-08, %v6651_v21  ;;  %v5133_v19 = vshra.s32 %v5117_v47, 23 }
 0x255   : > { %v3827_v11 = vadd.f32 -1.7417939, %v3819_v60  ;;  %v3848_v46 = vadd.f32 %v3840_v52, %v3824_v53  ;;  %v5134_v15 = vshra.s32 %v5118_v20, 23  ;;  %v5135_v62 = vshra.s32 %v5119_v18, 23 }
 0x256   : > { %v3849_v49 = vadd.f32 %v3841_v45, %v3825_v36  ;;  %v3850_v44 = vadd.f32 %v3842_v33, %v3826_v25  ;;  %v5136_v59 = vshra.s32 %v5120_v43, 23  ;;  %v5141_v38 = vand.u32 255, %v5133_v19 }
 0x257   : > { %v3851_v13 = vadd.f32 %v3843_v32, %v3827_v11  ;;  %v7673_v39 = vsub.f32 %v7471_v58, %v3848_v46  ;;  %v5142_v4 = vand.u32 255, %v5134_v15  ;;  %v5143_v24 = vand.u32 255, %v5135_v62 }
 0x258   : > { %v7676_v30 = vsub.f32 %v7475_v35, %v3849_v49  ;;  %v7679_v14 = vsub.f32 %v7473_v42, %v3850_v44  ;;  %v5144_v31 = vand.u32 255, %v5136_v59  ;;  %v6656_v52 = vadd.s32 4294967169, %v5141_v38 }
 0x259   : > { %8953 = vst [vmem:[#allocation38_spill] sm:$0xff] %v7673_v39  ;;  %v7682_v7 = vsub.f32 %v7477_v48, %v3851_v13  ;;  %v6657_v45 = vadd.s32 4294967169, %v5142_v4  ;;  %v6658_v33 = vadd.s32 4294967169, %v5143_v24  ;;  %v5157_v23 = vand.u32 8388607, %v5117_v47 }
 0x25a   : > { %8954 = vst [vmem:[#allocation39_spill] sm:$0xff] %v7676_v30  ;;  %8955 = vst [vmem:[#allocation40_spill] sm:$0xff] %v7679_v14  ;;  %v3864_v32 = vmax.f32 %v7673_v39, %v7679_v14  ;;  %v6659_v3 = vadd.s32 4294967169, %v5144_v31  ;;  %v5158_v16 = vand.u32 8388607, %v5118_v20  ;;  %v5245_v22 = vcvt.s32.f32 %v6656_v52 }
 0x25b   : > { %8956 = vst [vmem:[#allocation41_spill] sm:$0xff] %v7682_v7  ;;  %v5159_v0 = vand.u32 8388607, %v5119_v18  ;;  %v3865_v6 = vmax.f32 %v7676_v30, %v7682_v7  ;;  %v5160_v55 = vand.u32 8388607, %v5120_v43  ;;  %v5165_v8 = vor.u32 1065353216, %v5157_v23 }
 0x25c   : > { %v5166_v1 = vor.u32 1065353216, %v5158_v16  ;;  %v5246_v21 = vcvt.s32.f32 %v6657_v45  ;;  %v5247_v60 = vcvt.s32.f32 %v6658_v33  ;;  %v5248_v47 = vcvt.s32.f32 %v6659_v3 }
 0x25d   : > { %v5167_v56 = vor.u32 1065353216, %v5159_v0  ;;  %v3866_v53 = vmax.f32 %v3864_v32, %v3865_v6  ;;  %v5168_v36 = vor.u32 1065353216, %v5160_v55  ;;  %v5181_v25 = vmul.f32 -0.05657085, %v5165_v8 }
 0x25e   : > { %v5182_v19 = vmul.f32 -0.05657085, %v5166_v1  ;;  %v5253_v46 = vmul.f32 0.6931472, %v5245_v22  ;;  %v5254_v15 = vmul.f32 0.6931472, %v5246_v21 }
 0x25f   : > { %v5183_v11 = vmul.f32 -0.05657085, %v5167_v56  ;;  %3867 = vmax.xlane.f32.xlu1 %v3866_v53  ;;  %v5184_v20 = vmul.f32 -0.05657085, %v5168_v36  ;;  %v5189_v18 = vadd.f32 0.44717956, %v5181_v25 }
 0x260   : > { %v5190_v62 = vadd.f32 0.44717956, %v5182_v19  ;;  %v5255_v43 = vmul.f32 0.6931472, %v5247_v60  ;;  %v5256_v38 = vmul.f32 0.6931472, %v5248_v47 }
 0x261   : > { %v5191_v49 = vadd.f32 0.44717956, %v5183_v11  ;;  %v5192_v44 = vadd.f32 0.44717956, %v5184_v20  ;;  %v5197_v59 = vmul.f32 %v5189_v18, %v5165_v8  ;;  %v3939_v13 = vadd.s32 6, %v7207_v26 }
 0x262   : > { %v5198_v4 = vmul.f32 %v5190_v62, %v5166_v1  ;;  %v3940_v31 = vadd.s32 6, %v7213_v28  ;;  %v3941_v52 = vadd.s32 6, %v7210_v27  ;;  %v3942_v23 = vadd.s32 6, %v7216_v29 }
 0x263   : > { %v5199_v24 = vmul.f32 %v5191_v49, %v5167_v56  ;;  %v5200_v45 = vmul.f32 %v5192_v44, %v5168_v36  ;;  %v5205_v33 = vadd.f32 -1.4699568, %v5197_v59  ;;  %v6524_v32 = vshrl.u32 %v3939_v13, 16 }
 0x264   : > { %v5206_v3 = vadd.f32 -1.4699568, %v5198_v4  ;;  %v6525_v0 = vshrl.u32 %v3940_v31, 16  ;;  %v6526_v6 = vshrl.u32 %v3941_v52, 16  ;;  %v6527_v21 = vshrl.u32 %v3942_v23, 16 }
 0x265   : > { %v5207_v16 = vadd.f32 -1.4699568, %v5199_v24  ;;  %v5208_v55 = vadd.f32 -1.4699568, %v5200_v45  ;;  %v5213_v22 = vmul.f32 %v5205_v33, %v5165_v8  ;;  %v3963_v60 = vxor.u32 %v6524_v32, %v3939_v13 }
 0x266   : > { %v5214_v53 = vmul.f32 %v5206_v3, %v5166_v1  ;;  %v3964_v47 = vxor.u32 %v6525_v0, %v3940_v31  ;;  %v3965_v19 = vxor.u32 %v6526_v6, %v3941_v52  ;;  %v3966_v18 = vxor.u32 %v6527_v21, %v3942_v23 }
 0x267   : > { %v5215_v25 = vmul.f32 %v5207_v16, %v5167_v56  ;;  %v5216_v11 = vmul.f32 %v5208_v55, %v5168_v36  ;;  %v5221_v20 = vadd.f32 2.8212025, %v5213_v22  ;;  %v3971_v62 = vmul.u32 2246822507, %v3963_v60 }
 0x268   : > { %v5222_v49 = vadd.f32 2.8212025, %v5214_v53  ;;  %v3972_v59 = vmul.u32 2246822507, %v3964_v47  ;;  %v3973_v24 = vmul.u32 2246822507, %v3965_v19 }
 0x269   : > { %v5223_v44 = vadd.f32 2.8212025, %v5215_v25  ;;  %v5224_v7 = vadd.f32 2.8212025, %v5216_v11  ;;  %v5229_v4 = vmul.f32 %v5221_v20, %v5165_v8  ;;  %v3974_v14 = vmul.u32 2246822507, %v3966_v18 }
 0x26a   : > { %v5230_v30 = vmul.f32 %v5222_v49, %v5166_v1  ;;  %v6532_v33 = vshrl.u32 %v3971_v62, 13  ;;  %v6533_v39 = vshrl.u32 %v3972_v59, 13  ;;  %v6534_v3 = vshrl.u32 %v3973_v24, 13 }
 0x26b   : > { %v5231_v45 = vmul.f32 %v5223_v44, %v5167_v56  ;;  %v5232_v13 = vmul.f32 %v5224_v7, %v5168_v36  ;;  %v5237_v32 = vadd.f32 -1.7417939, %v5229_v4  ;;  %v6535_v31 = vshrl.u32 %v3974_v14, 13 }
 0x26c   : > { %v5238_v52 = vadd.f32 -1.7417939, %v5230_v30  ;;  %v3995_v0 = vxor.u32 %v6532_v33, %v3971_v62  ;;  %v3996_v23 = vxor.u32 %v6533_v39, %v3972_v59  ;;  %v3997_v22 = vxor.u32 %v6534_v3, %v3973_v24 }
 0x26d   : > { %v5239_v16 = vadd.f32 -1.7417939, %v5231_v45  ;;  %v5240_v6 = vadd.f32 -1.7417939, %v5232_v13  ;;  %v5261_v55 = vadd.f32 %v5253_v46, %v5237_v32  ;;  %v7692_v21 = vxor.u32 %v6535_v31, %v3974_v14 }
 0x26e   : > { %v5262_v8 = vadd.f32 %v5254_v15, %v5238_v52  ;;  %v4003_v53 = vmul.u32 3266489909, %v3995_v0  ;;  %v4004_v1 = vmul.u32 3266489909, %v3996_v23 }
 0x26f   : > { %v5263_v60 = vadd.f32 %v5255_v43, %v5239_v16  ;;  %v5264_v56 = vadd.f32 %v5256_v38, %v5240_v6  ;;  %v5269_v25 = vsub.f32 0.0, %v5261_v55  ;;  %v4005_v47 = vmul.u32 3266489909, %v3997_v22 }
 0x270   : > { %v4006_v7 = vmul.u32 3266489909, %v7692_v21  ;;  %v5270_v36 = vsub.f32 0.0, %v5262_v8  ;;  %v6540_v30 = vshrl.u32 %v4003_v53, 16  ;;  %v6541_v11 = vshrl.u32 %v4004_v1, 16 }
 0x271   : > { %v5271_v19 = vsub.f32 0.0, %v5263_v60  ;;  %v5272_v20 = vsub.f32 0.0, %v5264_v56  ;;  %v5277_v39 = vmax.f32 %v5269_v25, 1e-10  ;;  %v6542_v18 = vshrl.u32 %v4005_v47, 16 }
 0x272   : > { %v6543_v46 = vshrl.u32 %v4006_v7, 16  ;;  %v5278_v62 = vmax.f32 %v5270_v36, 1e-10  ;;  %v4027_v49 = vxor.u32 %v6540_v30, %v4003_v53  ;;  %v4028_v15 = vxor.u32 %v6541_v11, %v4004_v1 }
 0x273   : > { %v5279_v14 = vmax.f32 %v5271_v19, 1e-10  ;;  %v5280_v43 = vmax.f32 %v5272_v20, 1e-10  ;;  %v5293_v44 = vshra.s32 %v5277_v39, 23  ;;  %v4029_v38 = vxor.u32 %v6542_v18, %v4005_v47 }
 0x274   : > { %v5317_v59 = vand.u32 8388607, %v5277_v39  ;;  %v5294_v4 = vshra.s32 %v5278_v62, 23  ;;  %v5318_v45 = vand.u32 8388607, %v5278_v62 }
 0x275   : > { %v5295_v24 = vshra.s32 %v5279_v14, 23  ;;  %v5319_v33 = vand.u32 8388607, %v5279_v14  ;;  %v5296_v13 = vshra.s32 %v5280_v43, 23  ;;  %v5301_v32 = vand.u32 255, %v5293_v44 }
 0x276   : > { %v5320_v3 = vand.u32 8388607, %v5280_v43  ;;  %v5325_v31 = vor.u32 1065353216, %v5317_v59  ;;  %v5302_v52 = vand.u32 255, %v5294_v4  ;;  %v5326_v0 = vor.u32 1065353216, %v5318_v45 }
 0x277   : > { %v5303_v16 = vand.u32 255, %v5295_v24  ;;  %v5327_v23 = vor.u32 1065353216, %v5319_v33  ;;  %v5304_v6 = vand.u32 255, %v5296_v13  ;;  %v6664_v55 = vadd.s32 4294967169, %v5301_v32 }
 0x278   : > { %v5328_v22 = vor.u32 1065353216, %v5320_v3  ;;  %v5341_v21 = vmul.f32 -0.05657085, %v5325_v31  ;;  %v6665_v8 = vadd.s32 4294967169, %v5302_v52  ;;  %v5342_v53 = vmul.f32 -0.05657085, %v5326_v0 }
 0x279   : > { %v6666_v60 = vadd.s32 4294967169, %v5303_v16  ;;  %v5343_v1 = vmul.f32 -0.05657085, %v5327_v23  ;;  %v6667_v56 = vadd.s32 4294967169, %v5304_v6  ;;  %v5405_v36 = vcvt.s32.f32 %v6664_v55 }
 0x27a   : > { %v5344_v25 = vmul.f32 -0.05657085, %v5328_v22  ;;  %v5349_v47 = vadd.f32 0.44717956, %v5341_v21  ;;  %v5350_v19 = vadd.f32 0.44717956, %v5342_v53  ;;  %v5406_v11 = vcvt.s32.f32 %v6665_v8 }
 0x27b   : > { %v5351_v30 = vadd.f32 0.44717956, %v5343_v1  ;;  %v5407_v20 = vcvt.s32.f32 %v6666_v60  ;;  %v5408_v62 = vcvt.s32.f32 %v6667_v56  ;;  %v5413_v14 = vmul.f32 0.6931472, %v5405_v36 }
 0x27c   : > { %v5352_v39 = vadd.f32 0.44717956, %v5344_v25  ;;  %v5357_v18 = vmul.f32 %v5349_v47, %v5325_v31  ;;  %v5358_v43 = vmul.f32 %v5350_v19, %v5326_v0  ;;  %v5414_v59 = vmul.f32 0.6931472, %v5406_v11 }
 0x27d   : > { %v5359_v44 = vmul.f32 %v5351_v30, %v5327_v23  ;;  %v5415_v4 = vmul.f32 0.6931472, %v5407_v20  ;;  %v5416_v33 = vmul.f32 0.6931472, %v5408_v62  ;;  %v4030_v13 = vxor.u32 %v6543_v46, %v4006_v7 }
 0x27e   : > { %v5360_v24 = vmul.f32 %v5352_v39, %v5328_v22  ;;  %v5365_v45 = vadd.f32 -1.4699568, %v5357_v18  ;;  %v5366_v32 = vadd.f32 -1.4699568, %v5358_v43  ;;  %v4035_v52 = vand.u32 8388607, %v4027_v49 }
 0x27f   : > { %v5367_v3 = vadd.f32 -1.4699568, %v5359_v44  ;;  %v4036_v55 = vand.u32 8388607, %v4028_v15  ;;  %v4037_v21 = vand.u32 8388607, %v4029_v38 }
 0x280   : > { %v5368_v16 = vadd.f32 -1.4699568, %v5360_v24  ;;  %v5373_v6 = vmul.f32 %v5365_v45, %v5325_v31  ;;  %v5374_v8 = vmul.f32 %v5366_v32, %v5326_v0  ;;  %v4038_v53 = vand.u32 8388607, %v4030_v13 }
 0x281   : > { %v5375_v60 = vmul.f32 %v5367_v3, %v5327_v23  ;;  %v4043_v1 = vor.u32 1065353216, %v4035_v52  ;;  %v4044_v47 = vor.u32 1065353216, %v4036_v55  ;;  %v4045_v36 = vor.u32 1065353216, %v4037_v21 }
 0x282   : > { %v5376_v56 = vmul.f32 %v5368_v16, %v5328_v22  ;;  %v5381_v25 = vadd.f32 2.8212025, %v5373_v6  ;;  %v5382_v19 = vadd.f32 2.8212025, %v5374_v8  ;;  %v4046_v11 = vor.u32 1065353216, %v4038_v53 }
 0x283   : > { %v5383_v30 = vadd.f32 2.8212025, %v5375_v60  ;;  %v6548_v20 = vadd.f32 -1.0, %v4043_v1  ;;  %v6549_v39 = vadd.f32 -1.0, %v4044_v47  ;;  %v6550_v49 = vadd.f32 -1.0, %v4045_v36 }
 0x284   : > { %v5384_v7 = vadd.f32 2.8212025, %v5376_v56  ;;  %v5389_v46 = vmul.f32 %v5381_v25, %v5325_v31  ;;  %v5390_v18 = vmul.f32 %v5382_v19, %v5326_v0  ;;  %v6551_v15 = vadd.f32 -1.0, %v4046_v11 }
 0x285   : > { %v5391_v62 = vmul.f32 %v5383_v30, %v5327_v23  ;;  %v4067_v38 = vadd.f32 5.9604645e-08, %v6548_v20  ;;  %v4068_v24 = vadd.f32 5.9604645e-08, %v6549_v39  ;;  %v4069_v45 = vadd.f32 5.9604645e-08, %v6550_v49 }
 0x286   : > { %v5392_v43 = vmul.f32 %v5384_v7, %v5328_v22  ;;  %v5397_v44 = vadd.f32 -1.7417939, %v5389_v46  ;;  %v5398_v13 = vadd.f32 -1.7417939, %v5390_v18  ;;  %v4070_v3 = vadd.f32 5.9604645e-08, %v6551_v15 }
 0x287   : > { %v5399_v32 = vadd.f32 -1.7417939, %v5391_v62  ;;  %v4083_v52 = vshra.s32 %v4067_v38, 23  ;;  %v4084_v55 = vshra.s32 %v4068_v24, 23  ;;  %v4085_v21 = vshra.s32 %v4069_v45, 23 }
 0x288   : > { %v5400_v16 = vadd.f32 -1.7417939, %v5392_v43  ;;  %v5421_v6 = vadd.f32 %v5413_v14, %v5397_v44  ;;  %v5422_v8 = vadd.f32 %v5414_v59, %v5398_v13  ;;  %v4086_v60 = vshra.s32 %v4070_v3, 23 }
 0x289   : > { %v5423_v31 = vadd.f32 %v5415_v4, %v5399_v32  ;;  %v4091_v53 = vand.u32 255, %v4083_v52  ;;  %v4092_v22 = vand.u32 255, %v4084_v55  ;;  %v4093_v1 = vand.u32 255, %v4085_v21 }
 0x28a   : > { %v5424_v0 = vadd.f32 %v5416_v33, %v5400_v16  ;;  %v7696_v23 = vsub.f32 %v7480_v51, %v5421_v6  ;;  %v7699_v56 = vsub.f32 %v7492_v40, %v5422_v8  ;;  %v4094_v47 = vand.u32 255, %v4086_v60 }
 0x28b   : > { %v7702_v25 = vsub.f32 %v7482_v5, %v5423_v31  ;;  %v6556_v14 = vadd.s32 4294967169, %v4091_v53  ;;  %v6557_v59 = vadd.s32 4294967169, %v4092_v22  ;;  %v6558_v4 = vadd.s32 4294967169, %v4093_v1 }
 0x28c   : > { %8957 = vst [vmem:[#allocation42_spill] sm:$0xff] %v7696_v23  ;;  %8958 = vst [vmem:[#allocation43_spill] sm:$0xff] %v7699_v56  ;;  %v7705_v36 = vsub.f32 %v7494_v2, %v5424_v0  ;;  %v4107_v19 = vand.u32 8388607, %v4067_v38  ;;  %v6559_v30 = vadd.s32 4294967169, %v4094_v47  ;;  %v5512_v0 = vadd.s32 9, %v7364_v37 }
 0x28d   : > { %8959 = vst [vmem:[#allocation44_spill] sm:$0xff] %v7702_v25  ;;  %v5438_v33 = vmax.f32 %v7696_v23, %v7702_v25  ;;  %v4108_v11 = vand.u32 8388607, %v4068_v24  ;;  %v4109_v20 = vand.u32 8388607, %v4069_v45  ;;  %v4195_v49 = vcvt.s32.f32 %v6556_v14 }
 0x28e   : > { %8960 = vst [vmem:[#allocation45_spill] sm:$0xff] %v7705_v36  ;;  %v5439_v7 = vmax.f32 %v7699_v56, %v7705_v36  ;;  %v4110_v46 = vand.u32 8388607, %v4070_v3  ;;  %v4115_v39 = vor.u32 1065353216, %v4107_v19  ;;  %v4196_v15 = vcvt.s32.f32 %v6557_v59 }
 0x28f   : > { %v4116_v18 = vor.u32 1065353216, %v4108_v11  ;;  %v4117_v62 = vor.u32 1065353216, %v4109_v20  ;;  %v4197_v43 = vcvt.s32.f32 %v6558_v4  ;;  %v4198_v38 = vcvt.s32.f32 %v6559_v30 }
 0x290   : > { %v5440_v44 = vmax.f32 %v5438_v33, %v5439_v7  ;;  %v4118_v13 = vor.u32 1065353216, %v4110_v46  ;;  %v4131_v32 = vmul.f32 -0.05657085, %v4115_v39  ;;  %v4203_v6 = vmul.f32 0.6931472, %v4195_v49 }
 0x291   : > { %v4132_v52 = vmul.f32 -0.05657085, %v4116_v18  ;;  %v4133_v16 = vmul.f32 -0.05657085, %v4117_v62  ;;  %v4204_v55 = vmul.f32 0.6931472, %v4196_v15 }
 0x292   : > { %5441 = vmax.xlane.f32.xlu0 %v5440_v44  ;;  %v4134_v24 = vmul.f32 -0.05657085, %v4118_v13  ;;  %v4139_v45 = vadd.f32 0.44717956, %v4131_v32  ;;  %v4205_v3 = vmul.f32 0.6931472, %v4197_v43 }
 0x293   : > { %v4140_v21 = vadd.f32 0.44717956, %v4132_v52  ;;  %v4141_v8 = vadd.f32 0.44717956, %v4133_v16  ;;  %v4206_v53 = vmul.f32 0.6931472, %v4198_v38 }
 0x294   : > { %v4142_v31 = vadd.f32 0.44717956, %v4134_v24  ;;  %v4147_v60 = vmul.f32 %v4139_v45, %v4115_v39  ;;  %v5513_v47 = vadd.s32 9, %v7384_v10  ;;  %v5514_v14 = vadd.s32 9, %v7387_v41 }
 0x295   : > { %v4148_v22 = vmul.f32 %v4140_v21, %v4116_v18  ;;  %v4149_v1 = vmul.f32 %v4141_v8, %v4117_v62  ;;  %v5515_v19 = vadd.s32 9, %v7390_v57  ;;  %v6672_v33 = vshrl.u32 %v5512_v0, 16 }
 0x296   : > { %v4150_v59 = vmul.f32 %v4142_v31, %v4118_v13  ;;  %v4155_v4 = vadd.f32 -1.4699568, %v4147_v60  ;;  %v6673_v20 = vshrl.u32 %v5513_v47, 16  ;;  %v6674_v7 = vshrl.u32 %v5514_v14, 16 }
 0x297   : > { %v4156_v30 = vadd.f32 -1.4699568, %v4148_v22  ;;  %v4157_v11 = vadd.f32 -1.4699568, %v4149_v1  ;;  %v6675_v15 = vshrl.u32 %v5515_v19, 16  ;;  %v5536_v43 = vxor.u32 %v6672_v33, %v5512_v0 }
 0x298   : > { %v4158_v46 = vadd.f32 -1.4699568, %v4150_v59  ;;  %v4163_v49 = vmul.f32 %v4155_v4, %v4115_v39  ;;  %v5537_v38 = vxor.u32 %v6673_v20, %v5513_v47  ;;  %v5538_v52 = vxor.u32 %v6674_v7, %v5514_v14 }
 0x299   : > { %v4164_v44 = vmul.f32 %v4156_v30, %v4116_v18  ;;  %v4165_v32 = vmul.f32 %v4157_v11, %v4117_v62  ;;  %v5539_v45 = vxor.u32 %v6675_v15, %v5515_v19  ;;  %v5544_v21 = vmul.u32 2246822507, %v5536_v43 }
 0x29a   : > { %v4166_v16 = vmul.f32 %v4158_v46, %v4118_v13  ;;  %v4171_v24 = vadd.f32 2.8212025, %v4163_v49  ;;  %v5545_v60 = vmul.u32 2246822507, %v5537_v38  ;;  %v5546_v1 = vmul.u32 2246822507, %v5538_v52 }
 0x29b   : > { %v4172_v8 = vadd.f32 2.8212025, %v4164_v44  ;;  %v4173_v31 = vadd.f32 2.8212025, %v4165_v32  ;;  %v5547_v25 = vmul.u32 2246822507, %v5539_v45 }
 0x29c   : > { %v4174_v36 = vadd.f32 2.8212025, %v4166_v16  ;;  %v4179_v22 = vmul.f32 %v4171_v24, %v4115_v39  ;;  %v6680_v4 = vshrl.u32 %v5544_v21, 13  ;;  %v6681_v23 = vshrl.u32 %v5545_v60, 13 }
 0x29d   : > { %v4180_v56 = vmul.f32 %v4172_v8, %v4116_v18  ;;  %v4181_v59 = vmul.f32 %v4173_v31, %v4117_v62  ;;  %v6682_v30 = vshrl.u32 %v5546_v1, 13  ;;  %v6683_v47 = vshrl.u32 %v5547_v25, 13 }
 0x29e   : > { %v4182_v0 = vmul.f32 %v4174_v36, %v4118_v13  ;;  %v4187_v33 = vadd.f32 -1.7417939, %v4179_v22  ;;  %v5568_v20 = vxor.u32 %v6680_v4, %v5544_v21  ;;  %v5569_v19 = vxor.u32 %v6681_v23, %v5545_v60 }
 0x29f   : > { %v4188_v14 = vadd.f32 -1.7417939, %v4180_v56  ;;  %v4189_v11 = vadd.f32 -1.7417939, %v4181_v59  ;;  %v5570_v49 = vxor.u32 %v6682_v30, %v5546_v1  ;;  %v7715_v15 = vxor.u32 %v6683_v47, %v5547_v25 }
 0x2a0   : > { %v4190_v7 = vadd.f32 -1.7417939, %v4182_v0  ;;  %v4211_v46 = vadd.f32 %v4203_v6, %v4187_v33  ;;  %v5576_v44 = vmul.u32 3266489909, %v5568_v20  ;;  %v5577_v18 = vmul.u32 3266489909, %v5569_v19 }
 0x2a1   : > { %v4212_v39 = vadd.f32 %v4204_v55, %v4188_v14  ;;  %v4213_v43 = vadd.f32 %v4205_v3, %v4189_v11  ;;  %v5578_v38 = vmul.u32 3266489909, %v5570_v49  ;;  %v5579_v36 = vmul.u32 3266489909, %v7715_v15 }
 0x2a2   : > { %v4214_v62 = vadd.f32 %v4206_v53, %v4190_v7  ;;  %v4219_v32 = vsub.f32 0.0, %v4211_v46  ;;  %v6688_v56 = vshrl.u32 %v5576_v44, 16  ;;  %v6689_v16 = vshrl.u32 %v5577_v18, 16 }
 0x2a3   : > { %v4220_v13 = vsub.f32 0.0, %v4212_v39  ;;  %v4221_v52 = vsub.f32 0.0, %v4213_v43  ;;  %v6690_v45 = vshrl.u32 %v5578_v38, 16  ;;  %v6691_v6 = vshrl.u32 %v5579_v36, 16 }
 0x2a4   : > { %v4222_v24 = vsub.f32 0.0, %v4214_v62  ;;  %v4227_v23 = vmax.f32 %v4219_v32, 1e-10  ;;  %v5600_v8 = vxor.u32 %v6688_v56, %v5576_v44  ;;  %v5601_v55 = vxor.u32 %v6689_v16, %v5577_v18 }
 0x2a5   : > { %v4228_v21 = vmax.f32 %v4220_v13, 1e-10  ;;  %v4229_v25 = vmax.f32 %v4221_v52, 1e-10  ;;  %v5602_v53 = vxor.u32 %v6690_v45, %v5578_v38 }
 0x2a6   : > { %v4230_v3 = vmax.f32 %v4222_v24, 1e-10  ;;  %v4243_v31 = vshra.s32 %v4227_v23, 23  ;;  %v4267_v60 = vand.u32 8388607, %v4227_v23 }
 0x2a7   : > { %v4244_v22 = vshra.s32 %v4228_v21, 23  ;;  %v4245_v1 = vshra.s32 %v4229_v25, 23  ;;  %v4268_v59 = vand.u32 8388607, %v4228_v21  ;;  %v4269_v4 = vand.u32 8388607, %v4229_v25 }
 0x2a8   : > { %v4246_v0 = vshra.s32 %v4230_v3, 23  ;;  %v4251_v33 = vand.u32 255, %v4243_v31  ;;  %v4270_v30 = vand.u32 8388607, %v4230_v3  ;;  %v4275_v47 = vor.u32 1065353216, %v4267_v60 }
 0x2a9   : > { %v4252_v14 = vand.u32 255, %v4244_v22  ;;  %v4253_v11 = vand.u32 255, %v4245_v1  ;;  %v4276_v20 = vor.u32 1065353216, %v4268_v59  ;;  %v4277_v19 = vor.u32 1065353216, %v4269_v4 }
 0x2aa   : > { %v4254_v7 = vand.u32 255, %v4246_v0  ;;  %v6564_v46 = vadd.s32 4294967169, %v4251_v33  ;;  %v4278_v49 = vor.u32 1065353216, %v4270_v30  ;;  %v4291_v15 = vmul.f32 -0.05657085, %v4275_v47 }
 0x2ab   : > { %v6565_v39 = vadd.s32 4294967169, %v4252_v14  ;;  %v6566_v43 = vadd.s32 4294967169, %v4253_v11  ;;  %v4292_v44 = vmul.f32 -0.05657085, %v4276_v20  ;;  %v4293_v18 = vmul.f32 -0.05657085, %v4277_v19 }
 0x2ac   : > { %v6567_v62 = vadd.s32 4294967169, %v4254_v7  ;;  %v4294_v32 = vmul.f32 -0.05657085, %v4278_v49  ;;  %v4299_v38 = vadd.f32 0.44717956, %v4291_v15  ;;  %v4355_v13 = vcvt.s32.f32 %v6564_v46 }
 0x2ad   : > { %v4300_v52 = vadd.f32 0.44717956, %v4292_v44  ;;  %v4301_v56 = vadd.f32 0.44717956, %v4293_v18  ;;  %v4356_v16 = vcvt.s32.f32 %v6565_v39  ;;  %v4357_v24 = vcvt.s32.f32 %v6566_v43 }
 0x2ae   : > { %v4302_v23 = vadd.f32 0.44717956, %v4294_v32  ;;  %v4307_v45 = vmul.f32 %v4299_v38, %v4275_v47  ;;  %v4358_v21 = vcvt.s32.f32 %v6567_v62  ;;  %v4363_v25 = vmul.f32 0.6931472, %v4355_v13 }
 0x2af   : > { %v4308_v3 = vmul.f32 %v4300_v52, %v4276_v20  ;;  %v4309_v31 = vmul.f32 %v4301_v56, %v4277_v19  ;;  %v4364_v60 = vmul.f32 0.6931472, %v4356_v16  ;;  %v4365_v22 = vmul.f32 0.6931472, %v4357_v24 }
 0x2b0   : > { %v4310_v1 = vmul.f32 %v4302_v23, %v4278_v49  ;;  %v4315_v59 = vadd.f32 -1.4699568, %v4307_v45  ;;  %v4366_v4 = vmul.f32 0.6931472, %v4358_v21  ;;  %v5603_v0 = vxor.u32 %v6691_v6, %v5579_v36 }
 0x2b1   : > { %v4316_v33 = vadd.f32 -1.4699568, %v4308_v3  ;;  %v4317_v30 = vadd.f32 -1.4699568, %v4309_v31  ;;  %v5608_v14 = vand.u32 8388607, %v5600_v8 }
 0x2b2   : > { %v4318_v11 = vadd.f32 -1.4699568, %v4310_v1  ;;  %v4323_v7 = vmul.f32 %v4315_v59, %v4275_v47  ;;  %v5609_v46 = vand.u32 8388607, %v5601_v55  ;;  %v5610_v15 = vand.u32 8388607, %v5602_v53 }
 0x2b3   : > { %v4324_v39 = vmul.f32 %v4316_v33, %v4276_v20  ;;  %v4325_v43 = vmul.f32 %v4317_v30, %v4277_v19  ;;  %v5611_v44 = vand.u32 8388607, %v5603_v0  ;;  %v5616_v18 = vor.u32 1065353216, %v5608_v14 }
 0x2b4   : > { %v4326_v62 = vmul.f32 %v4318_v11, %v4278_v49  ;;  %v4331_v32 = vadd.f32 2.8212025, %v4323_v7  ;;  %v5617_v38 = vor.u32 1065353216, %v5609_v46  ;;  %v5618_v13 = vor.u32 1065353216, %v5610_v15 }
 0x2b5   : > { %v4332_v52 = vadd.f32 2.8212025, %v4324_v39  ;;  %v4333_v56 = vadd.f32 2.8212025, %v4325_v43  ;;  %v5619_v16 = vor.u32 1065353216, %v5611_v44  ;;  %v6696_v24 = vadd.f32 -1.0, %v5616_v18 }
 0x2b6   : > { %v4334_v36 = vadd.f32 2.8212025, %v4326_v62  ;;  %v4339_v6 = vmul.f32 %v4331_v32, %v4275_v47  ;;  %v6697_v23 = vadd.f32 -1.0, %v5617_v38  ;;  %v6698_v8 = vadd.f32 -1.0, %v5618_v13 }
 0x2b7   : > { %v4340_v45 = vmul.f32 %v4332_v52, %v4276_v20  ;;  %v4341_v21 = vmul.f32 %v4333_v56, %v4277_v19  ;;  %v6699_v55 = vadd.f32 -1.0, %v5619_v16  ;;  %v5640_v53 = vadd.f32 5.9604645e-08, %v6696_v24 }
 0x2b8   : > { %v4342_v3 = vmul.f32 %v4334_v36, %v4278_v49  ;;  %v4347_v31 = vadd.f32 -1.7417939, %v4339_v6  ;;  %v5641_v1 = vadd.f32 5.9604645e-08, %v6697_v23  ;;  %v5642_v59 = vadd.f32 5.9604645e-08, %v6698_v8 }
 0x2b9   : > { %v4348_v0 = vadd.f32 -1.7417939, %v4340_v45  ;;  %v4349_v33 = vadd.f32 -1.7417939, %v4341_v21  ;;  %v5643_v30 = vadd.f32 5.9604645e-08, %v6699_v55  ;;  %v5656_v14 = vshra.s32 %v5640_v53, 23 }
 0x2ba   : > { %v4350_v11 = vadd.f32 -1.7417939, %v4342_v3  ;;  %v4371_v7 = vadd.f32 %v4363_v25, %v4347_v31  ;;  %v5657_v46 = vshra.s32 %v5641_v1, 23  ;;  %v5658_v15 = vshra.s32 %v5642_v59, 23 }
 0x2bb   : > { %v4372_v39 = vadd.f32 %v4364_v60, %v4348_v0  ;;  %v4373_v47 = vadd.f32 %v4365_v22, %v4349_v33  ;;  %v5659_v43 = vshra.s32 %v5643_v30, 23  ;;  %v5664_v44 = vand.u32 255, %v5656_v14 }
 0x2bc   : > { %v4374_v20 = vadd.f32 %v4366_v4, %v4350_v11  ;;  %v7719_v19 = vsub.f32 %v7471_v58, %v4371_v7  ;;  %v5665_v49 = vand.u32 255, %v5657_v46  ;;  %v5666_v18 = vand.u32 255, %v5658_v15 }
 0x2bd   : > { %v7722_v62 = vsub.f32 %v7475_v35, %v4372_v39  ;;  %v7725_v32 = vsub.f32 %v7473_v42, %v4373_v47  ;;  %v5667_v38 = vand.u32 255, %v5659_v43  ;;  %v6704_v25 = vadd.s32 4294967169, %v5664_v44 }
 0x2be   : > { %8961 = vst [vmem:[#allocation46_spill] sm:$0xff] %v7719_v19  ;;  %v7728_v13 = vsub.f32 %v7477_v48, %v4374_v20  ;;  %v6705_v60 = vadd.s32 4294967169, %v5665_v49  ;;  %v6706_v22 = vadd.s32 4294967169, %v5666_v18  ;;  %v5680_v52 = vand.u32 8388607, %v5640_v53 }
 0x2bf   : > { %8962 = vst [vmem:[#allocation47_spill] sm:$0xff] %v7722_v62  ;;  %8963 = vst [vmem:[#allocation48_spill] sm:$0xff] %v7725_v32  ;;  %v4387_v4 = vmax.f32 %v7719_v19, %v7725_v32  ;;  %v6707_v56 = vadd.s32 4294967169, %v5667_v38  ;;  %v5681_v16 = vand.u32 8388607, %v5641_v1  ;;  %v5768_v8 = vcvt.s32.f32 %v6704_v25 }
 0x2c0   : > { %8964 = vst [vmem:[#allocation49_spill] sm:$0xff] %v7728_v13  ;;  %v5682_v24 = vand.u32 8388607, %v5642_v59  ;;  %v4388_v36 = vmax.f32 %v7722_v62, %v7728_v13  ;;  %v5683_v6 = vand.u32 8388607, %v5643_v30  ;;  %v5688_v23 = vor.u32 1065353216, %v5680_v52 }
 0x2c1   : > { %v5689_v45 = vor.u32 1065353216, %v5681_v16  ;;  %v5769_v55 = vcvt.s32.f32 %v6705_v60  ;;  %v5770_v3 = vcvt.s32.f32 %v6706_v22  ;;  %v5771_v53 = vcvt.s32.f32 %v6707_v56 }
 0x2c2   : > { %v5690_v21 = vor.u32 1065353216, %v5682_v24  ;;  %v4389_v31 = vmax.f32 %v4387_v4, %v4388_v36  ;;  %v5691_v0 = vor.u32 1065353216, %v5683_v6  ;;  %v5704_v33 = vmul.f32 -0.05657085, %v5688_v23 }
 0x2c3   : > { %v5705_v14 = vmul.f32 -0.05657085, %v5689_v45  ;;  %v5776_v7 = vmul.f32 0.6931472, %v5768_v8  ;;  %v5777_v46 = vmul.f32 0.6931472, %v5769_v55 }
 0x2c4   : > { %v5706_v11 = vmul.f32 -0.05657085, %v5690_v21  ;;  %4390 = vmax.xlane.f32.xlu1 %v4389_v31  ;;  %v5707_v1 = vmul.f32 -0.05657085, %v5691_v0  ;;  %v5712_v59 = vadd.f32 0.44717956, %v5704_v33 }
 0x2c5   : > { %v5713_v15 = vadd.f32 0.44717956, %v5705_v14  ;;  %v5778_v30 = vmul.f32 0.6931472, %v5770_v3  ;;  %v5779_v44 = vmul.f32 0.6931472, %v5771_v53 }
 0x2c6   : > { %v5714_v39 = vadd.f32 0.44717956, %v5706_v11  ;;  %v5715_v47 = vadd.f32 0.44717956, %v5707_v1  ;;  %v5720_v43 = vmul.f32 %v5712_v59, %v5688_v23  ;;  %v4462_v20 = vadd.s32 7, %v7207_v26 }
 0x2c7   : > { %v5721_v49 = vmul.f32 %v5713_v15, %v5689_v45  ;;  %v4463_v38 = vadd.s32 7, %v7213_v28  ;;  %v4464_v25 = vadd.s32 7, %v7210_v27  ;;  %v4465_v52 = vadd.s32 7, %v7216_v29 }
 0x2c8   : > { %v5722_v18 = vmul.f32 %v5714_v39, %v5690_v21  ;;  %v5723_v60 = vmul.f32 %v5715_v47, %v5691_v0  ;;  %v5728_v22 = vadd.f32 -1.4699568, %v5720_v43  ;;  %v6572_v4 = vshrl.u32 %v4462_v20, 16 }
 0x2c9   : > { %v5729_v56 = vadd.f32 -1.4699568, %v5721_v49  ;;  %v6573_v24 = vshrl.u32 %v4463_v38, 16  ;;  %v6574_v36 = vshrl.u32 %v4464_v25, 16  ;;  %v6575_v55 = vshrl.u32 %v4465_v52, 16 }
 0x2ca   : > { %v5730_v16 = vadd.f32 -1.4699568, %v5722_v18  ;;  %v5731_v6 = vadd.f32 -1.4699568, %v5723_v60  ;;  %v5736_v8 = vmul.f32 %v5728_v22, %v5688_v23  ;;  %v4486_v3 = vxor.u32 %v6572_v4, %v4462_v20 }
 0x2cb   : > { %v5737_v31 = vmul.f32 %v5729_v56, %v5689_v45  ;;  %v4487_v53 = vxor.u32 %v6573_v24, %v4463_v38  ;;  %v4488_v14 = vxor.u32 %v6574_v36, %v4464_v25  ;;  %v4489_v59 = vxor.u32 %v6575_v55, %v4465_v52 }
 0x2cc   : > { %v5738_v33 = vmul.f32 %v5730_v16, %v5690_v21  ;;  %v5739_v11 = vmul.f32 %v5731_v6, %v5691_v0  ;;  %v5744_v1 = vadd.f32 2.8212025, %v5736_v8  ;;  %v4494_v15 = vmul.u32 2246822507, %v4486_v3 }
 0x2cd   : > { %v5745_v39 = vadd.f32 2.8212025, %v5737_v31  ;;  %v4495_v43 = vmul.u32 2246822507, %v4487_v53  ;;  %v4496_v18 = vmul.u32 2246822507, %v4488_v14 }
 0x2ce   : > { %v5746_v47 = vadd.f32 2.8212025, %v5738_v33  ;;  %v5747_v13 = vadd.f32 2.8212025, %v5739_v11  ;;  %v5752_v49 = vmul.f32 %v5744_v1, %v5688_v23  ;;  %v4497_v32 = vmul.u32 2246822507, %v4489_v59 }
 0x2cf   : > { %v5753_v62 = vmul.f32 %v5745_v39, %v5689_v45  ;;  %v6580_v22 = vshrl.u32 %v4494_v15, 13  ;;  %v6581_v19 = vshrl.u32 %v4495_v43, 13  ;;  %v6582_v56 = vshrl.u32 %v4496_v18, 13 }
 0x2d0   : > { %v5754_v60 = vmul.f32 %v5746_v47, %v5690_v21  ;;  %v5755_v20 = vmul.f32 %v5747_v13, %v5691_v0  ;;  %v5760_v4 = vadd.f32 -1.7417939, %v5752_v49  ;;  %v6583_v38 = vshrl.u32 %v4497_v32, 13 }
 0x2d1   : > { %v5761_v25 = vadd.f32 -1.7417939, %v5753_v62  ;;  %v4518_v24 = vxor.u32 %v6580_v22, %v4494_v15  ;;  %v4519_v52 = vxor.u32 %v6581_v19, %v4495_v43  ;;  %v4520_v8 = vxor.u32 %v6582_v56, %v4496_v18 }
 0x2d2   : > { %v5762_v16 = vadd.f32 -1.7417939, %v5754_v60  ;;  %v5763_v36 = vadd.f32 -1.7417939, %v5755_v20  ;;  %v5784_v6 = vadd.f32 %v5776_v7, %v5760_v4  ;;  %v7738_v55 = vxor.u32 %v6583_v38, %v4497_v32 }
 0x2d3   : > { %v5785_v23 = vadd.f32 %v5777_v46, %v5761_v25  ;;  %v4526_v31 = vmul.u32 3266489909, %v4518_v24  ;;  %v4527_v45 = vmul.u32 3266489909, %v4519_v52 }
 0x2d4   : > { %v5786_v3 = vadd.f32 %v5778_v30, %v5762_v16  ;;  %v5787_v21 = vadd.f32 %v5779_v44, %v5763_v36  ;;  %v5792_v33 = vsub.f32 0.0, %v5784_v6  ;;  %v4528_v53 = vmul.u32 3266489909, %v4520_v8 }
 0x2d5   : > { %v4529_v13 = vmul.u32 3266489909, %v7738_v55  ;;  %v5793_v0 = vsub.f32 0.0, %v5785_v23  ;;  %v6588_v62 = vshrl.u32 %v4526_v31, 16  ;;  %v6589_v11 = vshrl.u32 %v4527_v45, 16 }
 0x2d6   : > { %v5794_v14 = vsub.f32 0.0, %v5786_v3  ;;  %v5795_v1 = vsub.f32 0.0, %v5787_v21  ;;  %v5800_v19 = vmax.f32 %v5792_v33, 1e-10  ;;  %v6590_v59 = vshrl.u32 %v4528_v53, 16 }
 0x2d7   : > { %v6591_v7 = vshrl.u32 %v4529_v13, 16  ;;  %v5801_v15 = vmax.f32 %v5793_v0, 1e-10  ;;  %v4550_v39 = vxor.u32 %v6588_v62, %v4526_v31  ;;  %v4551_v46 = vxor.u32 %v6589_v11, %v4527_v45 }
 0x2d8   : > { %v5802_v32 = vmax.f32 %v5794_v14, 1e-10  ;;  %v5803_v30 = vmax.f32 %v5795_v1, 1e-10  ;;  %v5816_v47 = vshra.s32 %v5800_v19, 23  ;;  %v4552_v44 = vxor.u32 %v6590_v59, %v4528_v53 }
 0x2d9   : > { %v5840_v43 = vand.u32 8388607, %v5800_v19  ;;  %v5817_v49 = vshra.s32 %v5801_v15, 23  ;;  %v5841_v60 = vand.u32 8388607, %v5801_v15 }
 0x2da   : > { %v5818_v18 = vshra.s32 %v5802_v32, 23  ;;  %v5842_v22 = vand.u32 8388607, %v5802_v32  ;;  %v5819_v20 = vshra.s32 %v5803_v30, 23  ;;  %v5824_v4 = vand.u32 255, %v5816_v47 }
 0x2db   : > { %v5843_v56 = vand.u32 8388607, %v5803_v30  ;;  %v5848_v38 = vor.u32 1065353216, %v5840_v43  ;;  %v5825_v25 = vand.u32 255, %v5817_v49  ;;  %v5849_v24 = vor.u32 1065353216, %v5841_v60 }
 0x2dc   : > { %v5826_v16 = vand.u32 255, %v5818_v18  ;;  %v5850_v52 = vor.u32 1065353216, %v5842_v22  ;;  %v5827_v36 = vand.u32 255, %v5819_v20  ;;  %v6712_v6 = vadd.s32 4294967169, %v5824_v4 }
 0x2dd   : > { %v5851_v8 = vor.u32 1065353216, %v5843_v56  ;;  %v5864_v55 = vmul.f32 -0.05657085, %v5848_v38  ;;  %v6713_v23 = vadd.s32 4294967169, %v5825_v25  ;;  %v5865_v31 = vmul.f32 -0.05657085, %v5849_v24 }
 0x2de   : > { %v6714_v3 = vadd.s32 4294967169, %v5826_v16  ;;  %v5866_v45 = vmul.f32 -0.05657085, %v5850_v52  ;;  %v6715_v21 = vadd.s32 4294967169, %v5827_v36  ;;  %v5928_v0 = vcvt.s32.f32 %v6712_v6 }
 0x2df   : > { %v5867_v33 = vmul.f32 -0.05657085, %v5851_v8  ;;  %v5872_v53 = vadd.f32 0.44717956, %v5864_v55  ;;  %v5873_v14 = vadd.f32 0.44717956, %v5865_v31  ;;  %v5929_v11 = vcvt.s32.f32 %v6713_v23 }
 0x2e0   : > { %v5874_v62 = vadd.f32 0.44717956, %v5866_v45  ;;  %v5930_v1 = vcvt.s32.f32 %v6714_v3  ;;  %v5931_v15 = vcvt.s32.f32 %v6715_v21  ;;  %v5936_v32 = vmul.f32 0.6931472, %v5928_v0 }
 0x2e1   : > { %v5875_v19 = vadd.f32 0.44717956, %v5867_v33  ;;  %v5880_v59 = vmul.f32 %v5872_v53, %v5848_v38  ;;  %v5881_v30 = vmul.f32 %v5873_v14, %v5849_v24  ;;  %v5937_v43 = vmul.f32 0.6931472, %v5929_v11 }
 0x2e2   : > { %v5882_v47 = vmul.f32 %v5874_v62, %v5850_v52  ;;  %v5938_v49 = vmul.f32 0.6931472, %v5930_v1  ;;  %v5939_v22 = vmul.f32 0.6931472, %v5931_v15  ;;  %v4553_v20 = vxor.u32 %v6591_v7, %v4529_v13 }
 0x2e3   : > { %v5883_v18 = vmul.f32 %v5875_v19, %v5851_v8  ;;  %v5888_v60 = vadd.f32 -1.4699568, %v5880_v59  ;;  %v5889_v4 = vadd.f32 -1.4699568, %v5881_v30  ;;  %v4558_v25 = vand.u32 8388607, %v4550_v39 }
 0x2e4   : > { %v5890_v56 = vadd.f32 -1.4699568, %v5882_v47  ;;  %v4559_v6 = vand.u32 8388607, %v4551_v46  ;;  %v4560_v55 = vand.u32 8388607, %v4552_v44 }
 0x2e5   : > { %v5891_v16 = vadd.f32 -1.4699568, %v5883_v18  ;;  %v5896_v36 = vmul.f32 %v5888_v60, %v5848_v38  ;;  %v5897_v23 = vmul.f32 %v5889_v4, %v5849_v24  ;;  %v4561_v31 = vand.u32 8388607, %v4553_v20 }
 0x2e6   : > { %v5898_v3 = vmul.f32 %v5890_v56, %v5850_v52  ;;  %v4566_v45 = vor.u32 1065353216, %v4558_v25  ;;  %v4567_v53 = vor.u32 1065353216, %v4559_v6  ;;  %v4568_v0 = vor.u32 1065353216, %v4560_v55 }
 0x2e7   : > { %v5899_v21 = vmul.f32 %v5891_v16, %v5851_v8  ;;  %v5904_v33 = vadd.f32 2.8212025, %v5896_v36  ;;  %v5905_v14 = vadd.f32 2.8212025, %v5897_v23  ;;  %v4569_v11 = vor.u32 1065353216, %v4561_v31 }
 0x2e8   : > { %v5906_v62 = vadd.f32 2.8212025, %v5898_v3  ;;  %v6596_v1 = vadd.f32 -1.0, %v4566_v45  ;;  %v6597_v19 = vadd.f32 -1.0, %v4567_v53  ;;  %v6598_v39 = vadd.f32 -1.0, %v4568_v0 }
 0x2e9   : > { %v5907_v13 = vadd.f32 2.8212025, %v5899_v21  ;;  %v5912_v7 = vmul.f32 %v5904_v33, %v5848_v38  ;;  %v5913_v59 = vmul.f32 %v5905_v14, %v5849_v24  ;;  %v6599_v46 = vadd.f32 -1.0, %v4569_v11 }
 0x2ea   : > { %v5914_v15 = vmul.f32 %v5906_v62, %v5850_v52  ;;  %v4590_v44 = vadd.f32 5.9604645e-08, %v6596_v1  ;;  %v4591_v18 = vadd.f32 5.9604645e-08, %v6597_v19  ;;  %v4592_v60 = vadd.f32 5.9604645e-08, %v6598_v39 }
 0x2eb   : > { %v5915_v30 = vmul.f32 %v5907_v13, %v5851_v8  ;;  %v5920_v47 = vadd.f32 -1.7417939, %v5912_v7  ;;  %v5921_v20 = vadd.f32 -1.7417939, %v5913_v59  ;;  %v4593_v56 = vadd.f32 5.9604645e-08, %v6599_v46 }
 0x2ec   : > { %v5922_v4 = vadd.f32 -1.7417939, %v5914_v15  ;;  %v4606_v25 = vshra.s32 %v4590_v44, 23  ;;  %v4607_v6 = vshra.s32 %v4591_v18, 23  ;;  %v4608_v55 = vshra.s32 %v4592_v60, 23 }
 0x2ed   : > { %v5923_v16 = vadd.f32 -1.7417939, %v5915_v30  ;;  %v5944_v36 = vadd.f32 %v5936_v32, %v5920_v47  ;;  %v5945_v23 = vadd.f32 %v5937_v43, %v5921_v20  ;;  %v4609_v3 = vshra.s32 %v4593_v56, 23 }
 0x2ee   : > { %v5946_v38 = vadd.f32 %v5938_v49, %v5922_v4  ;;  %v4614_v31 = vand.u32 255, %v4606_v25  ;;  %v4615_v8 = vand.u32 255, %v4607_v6  ;;  %v4616_v45 = vand.u32 255, %v4608_v55 }
 0x2ef   : > { %v5947_v24 = vadd.f32 %v5939_v22, %v5923_v16  ;;  %v7742_v52 = vsub.f32 %v7480_v51, %v5944_v36  ;;  %v7745_v21 = vsub.f32 %v7492_v40, %v5945_v23  ;;  %v4617_v53 = vand.u32 255, %v4609_v3 }
 0x2f0   : > { %v7748_v33 = vsub.f32 %v7482_v5, %v5946_v38  ;;  %v6604_v32 = vadd.s32 4294967169, %v4614_v31  ;;  %v6605_v43 = vadd.s32 4294967169, %v4615_v8  ;;  %v6606_v49 = vadd.s32 4294967169, %v4616_v45 }
 0x2f1   : > { %8965 = vst [vmem:[#allocation50_spill] sm:$0xff] %v7742_v52  ;;  %8966 = vst [vmem:[#allocation51_spill] sm:$0xff] %v7745_v21  ;;  %v7751_v0 = vsub.f32 %v7494_v2, %v5947_v24  ;;  %v4630_v14 = vand.u32 8388607, %v4590_v44  ;;  %v6607_v62 = vadd.s32 4294967169, %v4617_v53  ;;  %v6240_v24 = vshrl.u32 %v7364_v37, 16 }
 0x2f2   : > { %8967 = vst [vmem:[#allocation52_spill] sm:$0xff] %v7748_v33  ;;  %v5961_v22 = vmax.f32 %v7742_v52, %v7748_v33  ;;  %v4631_v11 = vand.u32 8388607, %v4591_v18  ;;  %v4632_v1 = vand.u32 8388607, %v4592_v60  ;;  %v4718_v39 = vcvt.s32.f32 %v6604_v32 }
 0x2f3   : > { %8968 = vst [vmem:[#allocation53_spill] sm:$0xff] %v7751_v0  ;;  %v5962_v13 = vmax.f32 %v7745_v21, %v7751_v0  ;;  %v4633_v7 = vand.u32 8388607, %v4593_v56  ;;  %v4638_v19 = vor.u32 1065353216, %v4630_v14  ;;  %v4719_v46 = vcvt.s32.f32 %v6605_v43 }
 0x2f4   : > { %v4639_v59 = vor.u32 1065353216, %v4631_v11  ;;  %v4640_v15 = vor.u32 1065353216, %v4632_v1  ;;  %v4720_v30 = vcvt.s32.f32 %v6606_v49  ;;  %v4721_v44 = vcvt.s32.f32 %v6607_v62 }
 0x2f5   : > { %v5963_v47 = vmax.f32 %v5961_v22, %v5962_v13  ;;  %v4641_v20 = vor.u32 1065353216, %v4633_v7  ;;  %v4654_v4 = vmul.f32 -0.05657085, %v4638_v19  ;;  %v4726_v36 = vmul.f32 0.6931472, %v4718_v39 }
 0x2f6   : > { %v4655_v25 = vmul.f32 -0.05657085, %v4639_v59  ;;  %v4656_v16 = vmul.f32 -0.05657085, %v4640_v15  ;;  %v4727_v6 = vmul.f32 0.6931472, %v4719_v46  ;;  %v829_v22 = vxor.u32 %v6240_v24, %v7364_v37 }
 0x2f7   : > { %5964 = vmax.xlane.f32.xlu0 %v5963_v47  ;;  %v4657_v18 = vmul.f32 -0.05657085, %v4641_v20  ;;  %v4662_v60 = vadd.f32 0.44717956, %v4654_v4  ;;  %v4728_v56 = vmul.f32 0.6931472, %v4720_v30 }
 0x2f8   : > { %v4663_v55 = vadd.f32 0.44717956, %v4655_v25  ;;  %v4664_v23 = vadd.f32 0.44717956, %v4656_v16  ;;  %v4729_v31 = vmul.f32 0.6931472, %v4721_v44 }
 0x2f9   : > { %v4665_v38 = vadd.f32 0.44717956, %v4657_v18  ;;  %v4670_v3 = vmul.f32 %v4662_v60, %v4638_v19  ;;  %v6241_v53 = vshrl.u32 %v7384_v10, 16  ;;  %v6242_v32 = vshrl.u32 %v7387_v41, 16 }
 0x2fa   : > { %v4671_v8 = vmul.f32 %v4663_v55, %v4639_v59  ;;  %v4672_v45 = vmul.f32 %v4664_v23, %v4640_v15  ;;  %v6243_v14 = vshrl.u32 %v7390_v57, 16  ;;  %v837_v30 = vmul.u32 2246822507, %v829_v22 }
 0x2fb   : > { %v4673_v43 = vmul.f32 %v4665_v38, %v4641_v20  ;;  %v4678_v49 = vadd.f32 -1.4699568, %v4670_v3  ;;  %v830_v1 = vxor.u32 %v6241_v53, %v7384_v10  ;;  %v831_v13 = vxor.u32 %v6242_v32, %v7387_v41 }
 0x2fc   : > { %v4679_v62 = vadd.f32 -1.4699568, %v4671_v8  ;;  %v4680_v11 = vadd.f32 -1.4699568, %v4672_v45  ;;  %v832_v46 = vxor.u32 %v6243_v14, %v7390_v57  ;;  %v6248_v55 = vshrl.u32 %v837_v30, 13 }
 0x2fd   : > { %v4681_v7 = vadd.f32 -1.4699568, %v4673_v43  ;;  %v4686_v39 = vmul.f32 %v4678_v49, %v4638_v19  ;;  %v838_v44 = vmul.u32 2246822507, %v830_v1  ;;  %v839_v25 = vmul.u32 2246822507, %v831_v13 }
 0x2fe   : > { %v4687_v47 = vmul.f32 %v4679_v62, %v4639_v59  ;;  %v4688_v4 = vmul.f32 %v4680_v11, %v4640_v15  ;;  %v840_v60 = vmul.u32 2246822507, %v832_v46  ;;  %v861_v32 = vxor.u32 %v6248_v55, %v837_v30 }
 0x2ff   : > { %v4689_v16 = vmul.f32 %v4681_v7, %v4641_v20  ;;  %v4694_v18 = vadd.f32 2.8212025, %v4686_v39  ;;  %v6249_v3 = vshrl.u32 %v838_v44, 13  ;;  %v6250_v24 = vshrl.u32 %v839_v25, 13 }
 0x300   : > { %v4695_v23 = vadd.f32 2.8212025, %v4687_v47  ;;  %v4696_v38 = vadd.f32 2.8212025, %v4688_v4  ;;  %v6251_v53 = vshrl.u32 %v840_v60, 13 }
 0x301   : > { %v4697_v8 = vadd.f32 2.8212025, %v4689_v16  ;;  %v4702_v45 = vmul.f32 %v4694_v18, %v4638_v19  ;;  %v862_v14 = vxor.u32 %v6249_v3, %v838_v44  ;;  %v863_v22 = vxor.u32 %v6250_v24, %v839_v25 }
 0x302   : > { %v4703_v43 = vmul.f32 %v4695_v23, %v4639_v59  ;;  %v4704_v49 = vmul.f32 %v4696_v38, %v4640_v15  ;;  %v864_v1 = vxor.u32 %v6251_v53, %v840_v60  ;;  %v869_v13 = vmul.u32 3266489909, %v861_v32 }
 0x303   : > { %v4705_v62 = vmul.f32 %v4697_v8, %v4641_v20  ;;  %v4710_v11 = vadd.f32 -1.7417939, %v4702_v45  ;;  %v870_v46 = vmul.u32 3266489909, %v862_v14  ;;  %v871_v4 = vmul.u32 3266489909, %v863_v22 }
 0x304   : > { %v4711_v7 = vadd.f32 -1.7417939, %v4703_v43  ;;  %v4712_v39 = vadd.f32 -1.7417939, %v4704_v49  ;;  %v872_v33 = vmul.u32 3266489909, %v864_v1 }
 0x305   : > { %v4713_v0 = vadd.f32 -1.7417939, %v4705_v62  ;;  %v4734_v47 = vadd.f32 %v4726_v36, %v4710_v11  ;;  %v6256_v19 = vshrl.u32 %v869_v13, 16  ;;  %v6257_v18 = vshrl.u32 %v870_v46, 16 }
 0x306   : > { %v4735_v21 = vadd.f32 %v4727_v6, %v4711_v7  ;;  %v4736_v16 = vadd.f32 %v4728_v56, %v4712_v39  ;;  %v6258_v15 = vshrl.u32 %v871_v4, 16  ;;  %v6259_v44 = vshrl.u32 %v872_v33, 16 }
 0x307   : > { %v4737_v30 = vadd.f32 %v4729_v31, %v4713_v0  ;;  %v4742_v59 = vsub.f32 0.0, %v4734_v47  ;;  %v893_v55 = vxor.u32 %v6256_v19, %v869_v13  ;;  %v894_v38 = vxor.u32 %v6257_v18, %v870_v46 }
 0x308   : > { %v4743_v25 = vsub.f32 0.0, %v4735_v21  ;;  %v4744_v20 = vsub.f32 0.0, %v4736_v16  ;;  %v895_v3 = vxor.u32 %v6258_v15, %v871_v4  ;;  %v896_v36 = vxor.u32 %v6259_v44, %v872_v33 }
 0x309   : > { %v4745_v60 = vsub.f32 0.0, %v4737_v30  ;;  %v4750_v23 = vmax.f32 %v4742_v59, 1e-10  ;;  %v901_v45 = vand.u32 8388607, %v893_v55  ;;  %v7766_v32 = vadd.s32 1, %v7364_v37 }
 0x30a   : > { %v4751_v24 = vmax.f32 %v4743_v25, 1e-10  ;;  %v4752_v8 = vmax.f32 %v4744_v20, 1e-10 }
 0x30b   : > { %v4753_v53 = vmax.f32 %v4745_v60, 1e-10  ;;  %v4766_v6 = vshra.s32 %v4750_v23, 23  ;;  %v4790_v56 = vand.u32 8388607, %v4750_v23 }
 0x30c   : > { %v4767_v0 = vshra.s32 %v4751_v24, 23  ;;  %v4768_v31 = vshra.s32 %v4752_v8, 23  ;;  %v4791_v43 = vand.u32 8388607, %v4751_v24  ;;  %v4792_v21 = vand.u32 8388607, %v4752_v8 }
 0x30d   : > { %v4769_v49 = vshra.s32 %v4753_v53, 23  ;;  %v4774_v14 = vand.u32 255, %v4766_v6  ;;  %v4793_v22 = vand.u32 8388607, %v4753_v53  ;;  %v4798_v62 = vor.u32 1065353216, %v4790_v56 }
 0x30e   : > { %v4775_v11 = vand.u32 255, %v4767_v0  ;;  %v4776_v1 = vand.u32 255, %v4768_v31  ;;  %v4799_v13 = vor.u32 1065353216, %v4791_v43  ;;  %v4800_v7 = vor.u32 1065353216, %v4792_v21 }
 0x30f   : > { %v4777_v33 = vand.u32 255, %v4769_v49  ;;  %v6612_v39 = vadd.s32 4294967169, %v4774_v14  ;;  %v4801_v46 = vor.u32 1065353216, %v4793_v22  ;;  %v4814_v47 = vmul.f32 -0.05657085, %v4798_v62 }
 0x310   : > { %v6613_v4 = vadd.s32 4294967169, %v4775_v11  ;;  %v6614_v16 = vadd.s32 4294967169, %v4776_v1  ;;  %v4815_v19 = vmul.f32 -0.05657085, %v4799_v13  ;;  %v4816_v18 = vmul.f32 -0.05657085, %v4800_v7 }
 0x311   : > { %v6615_v30 = vadd.s32 4294967169, %v4777_v33  ;;  %v4817_v59 = vmul.f32 -0.05657085, %v4801_v46  ;;  %v4822_v15 = vadd.f32 0.44717956, %v4814_v47  ;;  %v4878_v44 = vcvt.s32.f32 %v6612_v39 }
 0x312   : > { %v4823_v25 = vadd.f32 0.44717956, %v4815_v19  ;;  %v4824_v20 = vadd.f32 0.44717956, %v4816_v18  ;;  %v4879_v55 = vcvt.s32.f32 %v6613_v4  ;;  %v4880_v60 = vcvt.s32.f32 %v6614_v16 }
 0x313   : > { %v4825_v23 = vadd.f32 0.44717956, %v4817_v59  ;;  %v4830_v24 = vmul.f32 %v4822_v15, %v4798_v62  ;;  %v4881_v8 = vcvt.s32.f32 %v6615_v30  ;;  %v4886_v53 = vmul.f32 0.6931472, %v4878_v44 }
 0x314   : > { %v4831_v6 = vmul.f32 %v4823_v25, %v4799_v13  ;;  %v4832_v56 = vmul.f32 %v4824_v20, %v4800_v7  ;;  %v4887_v0 = vmul.f32 0.6931472, %v4879_v55  ;;  %v4888_v31 = vmul.f32 0.6931472, %v4880_v60 }
 0x315   : > { %v4833_v43 = vmul.f32 %v4825_v23, %v4801_v46  ;;  %v4838_v21 = vadd.f32 -1.4699568, %v4830_v24  ;;  %v4889_v49 = vmul.f32 0.6931472, %v4881_v8  ;;  %v902_v14 = vand.u32 8388607, %v894_v38 }
 0x316   : > { %v4839_v22 = vadd.f32 -1.4699568, %v4831_v6  ;;  %v4840_v11 = vadd.f32 -1.4699568, %v4832_v56  ;;  %v903_v1 = vand.u32 8388607, %v895_v3 }
 0x317   : > { %v4841_v33 = vadd.f32 -1.4699568, %v4833_v43  ;;  %v4846_v39 = vmul.f32 %v4838_v21, %v4798_v62  ;;  %v904_v47 = vand.u32 8388607, %v896_v36  ;;  %v909_v4 = vor.u32 1065353216, %v901_v45 }
 0x318   : > { %v4847_v16 = vmul.f32 %v4839_v22, %v4799_v13  ;;  %v4848_v19 = vmul.f32 %v4840_v11, %v4800_v7  ;;  %v910_v18 = vor.u32 1065353216, %v902_v14  ;;  %v911_v30 = vor.u32 1065353216, %v903_v1 }
 0x319   : > { %v4849_v59 = vmul.f32 %v4841_v33, %v4801_v46  ;;  %v4854_v15 = vadd.f32 2.8212025, %v4846_v39  ;;  %v912_v44 = vor.u32 1065353216, %v904_v47  ;;  %v6264_v25 = vadd.f32 -1.0, %v909_v4 }
 0x31a   : > { %v4855_v20 = vadd.f32 2.8212025, %v4847_v16  ;;  %v4856_v55 = vadd.f32 2.8212025, %v4848_v19  ;;  %v6265_v60 = vadd.f32 -1.0, %v910_v18  ;;  %v6266_v23 = vadd.f32 -1.0, %v911_v30 }
 0x31b   : > { %v4857_v38 = vadd.f32 2.8212025, %v4849_v59  ;;  %v4862_v24 = vmul.f32 %v4854_v15, %v4798_v62  ;;  %v6267_v8 = vadd.f32 -1.0, %v912_v44  ;;  %v933_v3 = vadd.f32 5.9604645e-08, %v6264_v25 }
 0x31c   : > { %v4863_v6 = vmul.f32 %v4855_v20, %v4799_v13  ;;  %v4864_v56 = vmul.f32 %v4856_v55, %v4800_v7  ;;  %v934_v36 = vadd.f32 5.9604645e-08, %v6265_v60  ;;  %v935_v45 = vadd.f32 5.9604645e-08, %v6266_v23 }
 0x31d   : > { %v4865_v43 = vmul.f32 %v4857_v38, %v4801_v46  ;;  %v4870_v21 = vadd.f32 -1.7417939, %v4862_v24  ;;  %v936_v14 = vadd.f32 5.9604645e-08, %v6267_v8  ;;  %v949_v22 = vshra.s32 %v933_v3, 23 }
 0x31e   : > { %v4871_v11 = vadd.f32 -1.7417939, %v4863_v6  ;;  %v4872_v1 = vadd.f32 -1.7417939, %v4864_v56  ;;  %v950_v33 = vshra.s32 %v934_v36, 23  ;;  %v951_v39 = vshra.s32 %v935_v45, 23 }
 0x31f   : > { %v4873_v47 = vadd.f32 -1.7417939, %v4865_v43  ;;  %v4894_v4 = vadd.f32 %v4886_v53, %v4870_v21  ;;  %v952_v16 = vshra.s32 %v936_v14, 23  ;;  %v957_v19 = vand.u32 255, %v949_v22 }
 0x320   : > { %v4895_v18 = vadd.f32 %v4887_v0, %v4871_v11  ;;  %v4896_v62 = vadd.f32 %v4888_v31, %v4872_v1  ;;  %v958_v30 = vand.u32 255, %v950_v33  ;;  %v959_v59 = vand.u32 255, %v951_v39 }
 0x321   : > { %v4897_v13 = vadd.f32 %v4889_v49, %v4873_v47  ;;  %v7769_v7 = vsub.f32 %v7471_v58, %v4894_v4  ;;  %v960_v46 = vand.u32 255, %v952_v16  ;;  %v6272_v15 = vadd.s32 4294967169, %v957_v19 }
 0x322   : > { %v7772_v44 = vsub.f32 %v7475_v35, %v4895_v18  ;;  %v7775_v25 = vsub.f32 %v7473_v42, %v4896_v62  ;;  %v6273_v20 = vadd.s32 4294967169, %v958_v30  ;;  %v6274_v53 = vadd.s32 4294967169, %v959_v59 }
 0x323   : > { %8969 = vst [vmem:[#allocation54_spill] sm:$0xff] %v7769_v7  ;;  %v7778_v55 = vsub.f32 %v7477_v48, %v4897_v13  ;;  %v6275_v0 = vadd.s32 4294967169, %v960_v46  ;;  %v973_v31 = vand.u32 8388607, %v933_v3  ;;  %v974_v60 = vand.u32 8388607, %v934_v36 }
 0x324   : > { %8970 = vst [vmem:[#allocation55_spill] sm:$0xff] %v7772_v44  ;;  %8971 = vst [vmem:[#allocation56_spill] sm:$0xff] %v7775_v25  ;;  %v4910_v49 = vmax.f32 %v7769_v7, %v7775_v25  ;;  %v975_v23 = vand.u32 8388607, %v935_v45  ;;  %v976_v38 = vand.u32 8388607, %v936_v14  ;;  %v1061_v24 = vcvt.s32.f32 %v6272_v15 }
 0x325   : > { %8972 = vst [vmem:[#allocation57_spill] sm:$0xff] %v7778_v55  ;;  %v4911_v8 = vmax.f32 %v7772_v44, %v7778_v55  ;;  %v981_v6 = vor.u32 1065353216, %v973_v31  ;;  %v982_v56 = vor.u32 1065353216, %v974_v60  ;;  %v1062_v43 = vcvt.s32.f32 %v6273_v20 }
 0x326   : > { %v983_v21 = vor.u32 1065353216, %v975_v23  ;;  %v984_v22 = vor.u32 1065353216, %v976_v38  ;;  %v1063_v11 = vcvt.s32.f32 %v6274_v53  ;;  %v1064_v1 = vcvt.s32.f32 %v6275_v0 }
 0x327   : > { %v4912_v33 = vmax.f32 %v4910_v49, %v4911_v8  ;;  %v997_v39 = vmul.f32 -0.05657085, %v981_v6  ;;  %v998_v3 = vmul.f32 -0.05657085, %v982_v56  ;;  %v1069_v36 = vmul.f32 0.6931472, %v1061_v24 }
 0x328   : > { %v999_v47 = vmul.f32 -0.05657085, %v983_v21  ;;  %v1000_v4 = vmul.f32 -0.05657085, %v984_v22  ;;  %v1070_v16 = vmul.f32 0.6931472, %v1062_v43 }
 0x329   : > { %4913 = vmax.xlane.f32.xlu1 %v4912_v33  ;;  %v1005_v45 = vadd.f32 0.44717956, %v997_v39  ;;  %v1006_v14 = vadd.f32 0.44717956, %v998_v3  ;;  %v1071_v19 = vmul.f32 0.6931472, %v1063_v11 }
 0x32a   : > { %v1007_v18 = vadd.f32 0.44717956, %v999_v47  ;;  %v1008_v62 = vadd.f32 0.44717956, %v1000_v4  ;;  %v1072_v30 = vmul.f32 0.6931472, %v1064_v1 }
 0x32b   : > { %v1013_v59 = vmul.f32 %v1005_v45, %v981_v6  ;;  %v1014_v13 = vmul.f32 %v1006_v14, %v982_v56  ;;  %v1329_v46 = vadd.s32 1, %v7384_v10  ;;  %v1330_v15 = vadd.s32 1, %v7387_v41 }
 0x32c   : > { %v1015_v20 = vmul.f32 %v1007_v18, %v983_v21  ;;  %v1016_v53 = vmul.f32 %v1008_v62, %v984_v22  ;;  %v1331_v0 = vadd.s32 1, %v7390_v57  ;;  %v6288_v31 = vshrl.u32 %v7766_v32, 16 }
 0x32d   : > { %v1021_v60 = vadd.f32 -1.4699568, %v1013_v59  ;;  %v1022_v49 = vadd.f32 -1.4699568, %v1014_v13  ;;  %v6289_v23 = vshrl.u32 %v1329_v46, 16  ;;  %v6290_v38 = vshrl.u32 %v1330_v15, 16 }
 0x32e   : > { %v1023_v24 = vadd.f32 -1.4699568, %v1015_v20  ;;  %v1024_v8 = vadd.f32 -1.4699568, %v1016_v53  ;;  %v6291_v43 = vshrl.u32 %v1331_v0, 16  ;;  %v1352_v11 = vxor.u32 %v6288_v31, %v7766_v32 }
 0x32f   : > { %v1029_v1 = vmul.f32 %v1021_v60, %v981_v6  ;;  %v1030_v33 = vmul.f32 %v1022_v49, %v982_v56  ;;  %v1353_v39 = vxor.u32 %v6289_v23, %v1329_v46  ;;  %v1354_v3 = vxor.u32 %v6290_v38, %v1330_v15 }
 0x330   : > { %v1031_v47 = vmul.f32 %v1023_v24, %v983_v21  ;;  %v1032_v4 = vmul.f32 %v1024_v8, %v984_v22  ;;  %v1355_v45 = vxor.u32 %v6291_v43, %v1331_v0  ;;  %v1360_v14 = vmul.u32 2246822507, %v1352_v11 }
 0x331   : > { %v1037_v18 = vadd.f32 2.8212025, %v1029_v1  ;;  %v1038_v62 = vadd.f32 2.8212025, %v1030_v33  ;;  %v1361_v52 = vmul.u32 2246822507, %v1353_v39 }
 0x332   : > { %v1039_v59 = vadd.f32 2.8212025, %v1031_v47  ;;  %v1040_v13 = vadd.f32 2.8212025, %v1032_v4  ;;  %v1362_v55 = vmul.u32 2246822507, %v1354_v3 }
 0x333   : > { %v1045_v25 = vmul.f32 %v1037_v18, %v981_v6  ;;  %v1046_v20 = vmul.f32 %v1038_v62, %v982_v56  ;;  %v1363_v53 = vmul.u32 2246822507, %v1355_v45  ;;  %v6296_v44 = vshrl.u32 %v1360_v14, 13 }
 0x334   : > { %v1047_v7 = vmul.f32 %v1039_v59, %v983_v21  ;;  %v1048_v32 = vmul.f32 %v1040_v13, %v984_v22  ;;  %v6297_v31 = vshrl.u32 %v1361_v52, 13  ;;  %v6298_v60 = vshrl.u32 %v1362_v55, 13 }
 0x335   : > { %v1053_v46 = vadd.f32 -1.7417939, %v1045_v25  ;;  %v1054_v15 = vadd.f32 -1.7417939, %v1046_v20  ;;  %v6299_v49 = vshrl.u32 %v1363_v53, 13  ;;  %v1384_v23 = vxor.u32 %v6296_v44, %v1360_v14 }
 0x336   : > { %v1055_v0 = vadd.f32 -1.7417939, %v1047_v7  ;;  %v1056_v38 = vadd.f32 -1.7417939, %v1048_v32  ;;  %v1385_v24 = vxor.u32 %v6297_v31, %v1361_v52  ;;  %v1386_v8 = vxor.u32 %v6298_v60, %v1362_v55 }
 0x337   : > { %v1077_v43 = vadd.f32 %v1069_v36, %v1053_v46  ;;  %v1078_v11 = vadd.f32 %v1070_v16, %v1054_v15  ;;  %v7789_v1 = vxor.u32 %v6299_v49, %v1363_v53  ;;  %v1392_v6 = vmul.u32 3266489909, %v1384_v23 }
 0x338   : > { %v1079_v56 = vadd.f32 %v1071_v19, %v1055_v0  ;;  %v1080_v33 = vadd.f32 %v1072_v30, %v1056_v38  ;;  %v1393_v39 = vmul.u32 3266489909, %v1385_v24  ;;  %v1394_v21 = vmul.u32 3266489909, %v1386_v8 }
 0x339   : > { %v1085_v22 = vsub.f32 0.0, %v1077_v43  ;;  %v1086_v3 = vsub.f32 0.0, %v1078_v11  ;;  %v1395_v25 = vmul.u32 3266489909, %v7789_v1  ;;  %v6304_v47 = vshrl.u32 %v1392_v6, 16 }
 0x33a   : > { %v1087_v4 = vsub.f32 0.0, %v1079_v56  ;;  %v1088_v44 = vsub.f32 0.0, %v1080_v33  ;;  %v6305_v7 = vshrl.u32 %v1393_v39, 16  ;;  %v6306_v45 = vshrl.u32 %v1394_v21, 16 }
 0x33b   : > { %v1093_v52 = vmax.f32 %v1085_v22, 1e-10  ;;  %v1094_v55 = vmax.f32 %v1086_v3, 1e-10  ;;  %v6307_v36 = vshrl.u32 %v1395_v25, 16  ;;  %v1416_v16 = vxor.u32 %v6304_v47, %v1392_v6 }
 0x33c   : > { %v1095_v14 = vmax.f32 %v1087_v4, 1e-10  ;;  %v1096_v18 = vmax.f32 %v1088_v44, 1e-10  ;;  %v1417_v62 = vxor.u32 %v6305_v7, %v1393_v39  ;;  %v1418_v19 = vxor.u32 %v6306_v45, %v1394_v21 }
 0x33d   : > { %v1109_v30 = vshra.s32 %v1093_v52, 23  ;;  %v1110_v59 = vshra.s32 %v1094_v55, 23  ;;  %v1133_v13 = vand.u32 8388607, %v1093_v52  ;;  %v1134_v20 = vand.u32 8388607, %v1094_v55 }
 0x33e   : > { %v1111_v53 = vshra.s32 %v1095_v14, 23  ;;  %v1112_v32 = vshra.s32 %v1096_v18, 23  ;;  %v1135_v31 = vand.u32 8388607, %v1095_v14  ;;  %v1136_v60 = vand.u32 8388607, %v1096_v18 }
 0x33f   : > { %v1117_v46 = vand.u32 255, %v1109_v30  ;;  %v1118_v15 = vand.u32 255, %v1110_v59  ;;  %v1141_v49 = vor.u32 1065353216, %v1133_v13  ;;  %v1142_v23 = vor.u32 1065353216, %v1134_v20 }
 0x340   : > { %v1119_v0 = vand.u32 255, %v1111_v53  ;;  %v1120_v38 = vand.u32 255, %v1112_v32  ;;  %v1143_v24 = vor.u32 1065353216, %v1135_v31  ;;  %v1144_v8 = vor.u32 1065353216, %v1136_v60 }
 0x341   : > { %v6280_v43 = vadd.s32 4294967169, %v1117_v46  ;;  %v6281_v11 = vadd.s32 4294967169, %v1118_v15  ;;  %v1157_v1 = vmul.f32 -0.05657085, %v1141_v49  ;;  %v1158_v6 = vmul.f32 -0.05657085, %v1142_v23 }
 0x342   : > { %v6282_v56 = vadd.s32 4294967169, %v1119_v0  ;;  %v6283_v33 = vadd.s32 4294967169, %v1120_v38  ;;  %v1159_v39 = vmul.f32 -0.05657085, %v1143_v24  ;;  %v1160_v21 = vmul.f32 -0.05657085, %v1144_v8 }
 0x343   : > { %v1165_v22 = vadd.f32 0.44717956, %v1157_v1  ;;  %v1166_v3 = vadd.f32 0.44717956, %v1158_v6  ;;  %v1221_v47 = vcvt.s32.f32 %v6280_v43  ;;  %v1222_v4 = vcvt.s32.f32 %v6281_v11 }
 0x344   : > { %v1167_v44 = vadd.f32 0.44717956, %v1159_v39  ;;  %v1168_v7 = vadd.f32 0.44717956, %v1160_v21  ;;  %v1223_v45 = vcvt.s32.f32 %v6282_v56  ;;  %v1224_v52 = vcvt.s32.f32 %v6283_v33 }
 0x345   : > { %v1173_v55 = vmul.f32 %v1165_v22, %v1141_v49  ;;  %v1174_v14 = vmul.f32 %v1166_v3, %v1142_v23  ;;  %v1229_v18 = vmul.f32 0.6931472, %v1221_v47  ;;  %v1230_v30 = vmul.f32 0.6931472, %v1222_v4 }
 0x346   : > { %v1175_v59 = vmul.f32 %v1167_v44, %v1143_v24  ;;  %v1176_v13 = vmul.f32 %v1168_v7, %v1144_v8  ;;  %v1231_v20 = vmul.f32 0.6931472, %v1223_v45  ;;  %v1232_v53 = vmul.f32 0.6931472, %v1224_v52 }
 0x347   : > { %v1181_v32 = vadd.f32 -1.4699568, %v1173_v55  ;;  %v1182_v31 = vadd.f32 -1.4699568, %v1174_v14  ;;  %v1419_v60 = vxor.u32 %v6307_v36, %v1395_v25  ;;  %v1424_v46 = vand.u32 8388607, %v1416_v16 }
 0x348   : > { %v1183_v15 = vadd.f32 -1.4699568, %v1175_v59  ;;  %v1184_v0 = vadd.f32 -1.4699568, %v1176_v13  ;;  %v1425_v38 = vand.u32 8388607, %v1417_v62 }
 0x349   : > { %v1189_v43 = vmul.f32 %v1181_v32, %v1141_v49  ;;  %v1190_v11 = vmul.f32 %v1182_v31, %v1142_v23  ;;  %v1426_v1 = vand.u32 8388607, %v1418_v19  ;;  %v1427_v6 = vand.u32 8388607, %v1419_v60 }
 0x34a   : > { %v1191_v56 = vmul.f32 %v1183_v15, %v1143_v24  ;;  %v1192_v33 = vmul.f32 %v1184_v0, %v1144_v8  ;;  %v1432_v39 = vor.u32 1065353216, %v1424_v46  ;;  %v1433_v21 = vor.u32 1065353216, %v1425_v38 }
 0x34b   : > { %v1197_v22 = vadd.f32 2.8212025, %v1189_v43  ;;  %v1198_v3 = vadd.f32 2.8212025, %v1190_v11  ;;  %v1434_v47 = vor.u32 1065353216, %v1426_v1  ;;  %v1435_v4 = vor.u32 1065353216, %v1427_v6 }
 0x34c   : > { %v1199_v44 = vadd.f32 2.8212025, %v1191_v56  ;;  %v1200_v7 = vadd.f32 2.8212025, %v1192_v33  ;;  %v6312_v45 = vadd.f32 -1.0, %v1432_v39  ;;  %v6313_v25 = vadd.f32 -1.0, %v1433_v21 }
 0x34d   : > { %v1205_v36 = vmul.f32 %v1197_v22, %v1141_v49  ;;  %v1206_v16 = vmul.f32 %v1198_v3, %v1142_v23  ;;  %v6314_v52 = vadd.f32 -1.0, %v1434_v47  ;;  %v6315_v62 = vadd.f32 -1.0, %v1435_v4 }
 0x34e   : > { %v1207_v55 = vmul.f32 %v1199_v44, %v1143_v24  ;;  %v1208_v14 = vmul.f32 %v1200_v7, %v1144_v8  ;;  %v1456_v19 = vadd.f32 5.9604645e-08, %v6312_v45  ;;  %v1457_v59 = vadd.f32 5.9604645e-08, %v6313_v25 }
 0x34f   : > { %v1213_v13 = vadd.f32 -1.7417939, %v1205_v36  ;;  %v1214_v32 = vadd.f32 -1.7417939, %v1206_v16  ;;  %v1458_v31 = vadd.f32 5.9604645e-08, %v6314_v52  ;;  %v1459_v60 = vadd.f32 5.9604645e-08, %v6315_v62 }
 0x350   : > { %v1215_v46 = vadd.f32 -1.7417939, %v1207_v55  ;;  %v1216_v15 = vadd.f32 -1.7417939, %v1208_v14  ;;  %v1472_v0 = vshra.s32 %v1456_v19, 23  ;;  %v1473_v38 = vshra.s32 %v1457_v59, 23 }
 0x351   : > { %v1237_v43 = vadd.f32 %v1229_v18, %v1213_v13  ;;  %v1238_v11 = vadd.f32 %v1230_v30, %v1214_v32  ;;  %v1474_v1 = vshra.s32 %v1458_v31, 23  ;;  %v1475_v6 = vshra.s32 %v1459_v60, 23 }
 0x352   : > { %v1239_v49 = vadd.f32 %v1231_v20, %v1215_v46  ;;  %v1240_v23 = vadd.f32 %v1232_v53, %v1216_v15  ;;  %v1480_v56 = vand.u32 255, %v1472_v0  ;;  %v1481_v33 = vand.u32 255, %v1473_v38 }
 0x353   : > { %v7793_v24 = vsub.f32 %v7480_v51, %v1237_v43  ;;  %v7796_v8 = vsub.f32 %v7492_v40, %v1238_v11  ;;  %v1482_v39 = vand.u32 255, %v1474_v1  ;;  %v1483_v21 = vand.u32 255, %v1475_v6 }
 0x354   : > { %v7799_v22 = vsub.f32 %v7482_v5, %v1239_v49  ;;  %v7802_v18 = vsub.f32 %v7494_v2, %v1240_v23  ;;  %v6320_v30 = vadd.s32 4294967169, %v1480_v56  ;;  %v6321_v3 = vadd.s32 4294967169, %v1481_v33 }
 0x355   : > { %8973 = vst [vmem:[#allocation58_spill] sm:$0xff] %v7793_v24  ;;  %8974 = vst [vmem:[#allocation59_spill] sm:$0xff] %v7796_v8  ;;  %v6322_v20 = vadd.s32 4294967169, %v1482_v39  ;;  %v6323_v53 = vadd.s32 4294967169, %v1483_v21  ;;  %v1496_v47 = vand.u32 8388607, %v1456_v19 }
 0x356   : > { %8975 = vst [vmem:[#allocation60_spill] sm:$0xff] %v7799_v22  ;;  %8976 = vst [vmem:[#allocation61_spill] sm:$0xff] %v7802_v18  ;;  %v1497_v4 = vand.u32 8388607, %v1457_v59  ;;  %v1254_v44 = vmax.f32 %v7793_v24, %v7799_v22  ;;  %v1255_v7 = vmax.f32 %v7796_v8, %v7802_v18  ;;  %v1498_v45 = vand.u32 8388607, %v1458_v31 }
 0x357   : > { %v1499_v25 = vand.u32 8388607, %v1459_v60  ;;  %v1504_v36 = vor.u32 1065353216, %v1496_v47  ;;  %v1584_v52 = vcvt.s32.f32 %v6320_v30  ;;  %v1585_v62 = vcvt.s32.f32 %v6321_v3 }
 0x358   : > { %v1505_v16 = vor.u32 1065353216, %v1497_v4  ;;  %v1256_v55 = vmax.f32 %v1254_v44, %v1255_v7  ;;  %v1506_v14 = vor.u32 1065353216, %v1498_v45  ;;  %v1586_v32 = vcvt.s32.f32 %v6322_v20 }
 0x359   : > { %v1507_v13 = vor.u32 1065353216, %v1499_v25  ;;  %v1520_v46 = vmul.f32 -0.05657085, %v1504_v36  ;;  %v1587_v19 = vcvt.s32.f32 %v6323_v53  ;;  %v1592_v59 = vmul.f32 0.6931472, %v1584_v52 }
 0x35a   : > { %v1521_v15 = vmul.f32 -0.05657085, %v1505_v16  ;;  %1257 = vmax.xlane.f32.xlu1 %v1256_v55  ;;  %v1522_v0 = vmul.f32 -0.05657085, %v1506_v14  ;;  %v1593_v43 = vmul.f32 0.6931472, %v1585_v62 }
 0x35b   : > { %v1523_v38 = vmul.f32 -0.05657085, %v1507_v13  ;;  %v1528_v11 = vadd.f32 0.44717956, %v1520_v46  ;;  %v1594_v31 = vmul.f32 0.6931472, %v1586_v32 }
 0x35c   : > { %v1529_v1 = vadd.f32 0.44717956, %v1521_v15  ;;  %v1530_v60 = vadd.f32 0.44717956, %v1522_v0  ;;  %v1595_v49 = vmul.f32 0.6931472, %v1587_v19 }
 0x35d   : > { %v1531_v6 = vadd.f32 0.44717956, %v1523_v38  ;;  %v1536_v23 = vmul.f32 %v1528_v11, %v1504_v36  ;;  %v1851_v33 = vadd.s32 2, %v7364_v37  ;;  %v1852_v39 = vadd.s32 2, %v7384_v10 }
 0x35e   : > { %v1537_v56 = vmul.f32 %v1529_v1, %v1505_v16  ;;  %v1538_v21 = vmul.f32 %v1530_v60, %v1506_v14  ;;  %v1853_v3 = vadd.s32 2, %v7387_v41  ;;  %v1854_v20 = vadd.s32 2, %v7390_v57 }
 0x35f   : > { %v1539_v30 = vmul.f32 %v1531_v6, %v1507_v13  ;;  %v1544_v53 = vadd.f32 -1.4699568, %v1536_v23  ;;  %v6336_v4 = vshrl.u32 %v1851_v33, 16  ;;  %v6337_v44 = vshrl.u32 %v1852_v39, 16 }
 0x360   : > { %v1545_v47 = vadd.f32 -1.4699568, %v1537_v56  ;;  %v1546_v7 = vadd.f32 -1.4699568, %v1538_v21  ;;  %v6338_v25 = vshrl.u32 %v1853_v3, 16  ;;  %v6339_v52 = vshrl.u32 %v1854_v20, 16 }
 0x361   : > { %v1547_v45 = vadd.f32 -1.4699568, %v1539_v30  ;;  %v1552_v62 = vmul.f32 %v1544_v53, %v1504_v36  ;;  %v1875_v32 = vxor.u32 %v6336_v4, %v1851_v33  ;;  %v1876_v46 = vxor.u32 %v6337_v44, %v1852_v39 }
 0x362   : > { %v1553_v55 = vmul.f32 %v1545_v47, %v1505_v16  ;;  %v1554_v15 = vmul.f32 %v1546_v7, %v1506_v14  ;;  %v1877_v0 = vxor.u32 %v6338_v25, %v1853_v3  ;;  %v1878_v38 = vxor.u32 %v6339_v52, %v1854_v20 }
 0x363   : > { %v1555_v19 = vmul.f32 %v1547_v45, %v1507_v13  ;;  %v1560_v11 = vadd.f32 2.8212025, %v1552_v62  ;;  %v1883_v60 = vmul.u32 2246822507, %v1875_v32  ;;  %v1884_v56 = vmul.u32 2246822507, %v1876_v46 }
 0x364   : > { %v1561_v1 = vadd.f32 2.8212025, %v1553_v55  ;;  %v1562_v6 = vadd.f32 2.8212025, %v1554_v15  ;;  %v1885_v21 = vmul.u32 2246822507, %v1877_v0 }
 0x365   : > { %v1563_v23 = vadd.f32 2.8212025, %v1555_v19  ;;  %v1568_v18 = vmul.f32 %v1560_v11, %v1504_v36  ;;  %v1886_v30 = vmul.u32 2246822507, %v1878_v38  ;;  %v6344_v53 = vshrl.u32 %v1883_v60, 13 }
 0x366   : > { %v1569_v22 = vmul.f32 %v1561_v1, %v1505_v16  ;;  %v1570_v8 = vmul.f32 %v1562_v6, %v1506_v14  ;;  %v6345_v47 = vshrl.u32 %v1884_v56, 13  ;;  %v6346_v4 = vshrl.u32 %v1885_v21, 13 }
 0x367   : > { %v1571_v24 = vmul.f32 %v1563_v23, %v1507_v13  ;;  %v1576_v33 = vadd.f32 -1.7417939, %v1568_v18  ;;  %v6347_v44 = vshrl.u32 %v1886_v30, 13  ;;  %v1907_v7 = vxor.u32 %v6344_v53, %v1883_v60 }
 0x368   : > { %v1577_v39 = vadd.f32 -1.7417939, %v1569_v22  ;;  %v1578_v3 = vadd.f32 -1.7417939, %v1570_v8  ;;  %v1908_v45 = vxor.u32 %v6345_v47, %v1884_v56  ;;  %v7812_v62 = vxor.u32 %v6346_v4, %v1885_v21 }
 0x369   : > { %v1579_v20 = vadd.f32 -1.7417939, %v1571_v24  ;;  %v1600_v25 = vadd.f32 %v1592_v59, %v1576_v33  ;;  %v7814_v36 = vxor.u32 %v6347_v44, %v1886_v30  ;;  %v1915_v14 = vmul.u32 3266489909, %v1907_v7 }
 0x36a   : > { %v1601_v52 = vadd.f32 %v1593_v43, %v1577_v39  ;;  %v1602_v16 = vadd.f32 %v1594_v31, %v1578_v3  ;;  %v1916_v13 = vmul.u32 3266489909, %v1908_v45  ;;  %v1917_v22 = vmul.u32 3266489909, %v7812_v62 }
 0x36b   : > { %v1603_v55 = vadd.f32 %v1595_v49, %v1579_v20  ;;  %v1608_v32 = vsub.f32 0.0, %v1600_v25  ;;  %v1918_v18 = vmul.u32 3266489909, %v7814_v36  ;;  %v6352_v15 = vshrl.u32 %v1915_v14, 16 }
 0x36c   : > { %v1609_v46 = vsub.f32 0.0, %v1601_v52  ;;  %v1610_v8 = vsub.f32 0.0, %v1602_v16  ;;  %v6353_v19 = vshrl.u32 %v1916_v13, 16  ;;  %v6354_v0 = vshrl.u32 %v1917_v22, 16 }
 0x36d   : > { %v1611_v24 = vsub.f32 0.0, %v1603_v55  ;;  %v1616_v59 = vmax.f32 %v1608_v32, 1e-10  ;;  %v6355_v38 = vshrl.u32 %v1918_v18, 16  ;;  %v1939_v31 = vxor.u32 %v6352_v15, %v1915_v14 }
 0x36e   : > { %v1617_v43 = vmax.f32 %v1609_v46, 1e-10  ;;  %v1618_v11 = vmax.f32 %v1610_v8, 1e-10  ;;  %v1940_v49 = vxor.u32 %v6353_v19, %v1916_v13 }
 0x36f   : > { %v1619_v1 = vmax.f32 %v1611_v24, 1e-10  ;;  %v1632_v60 = vshra.s32 %v1616_v59, 23  ;;  %v1656_v23 = vand.u32 8388607, %v1616_v59 }
 0x370   : > { %v1633_v6 = vshra.s32 %v1617_v43, 23  ;;  %v1657_v56 = vand.u32 8388607, %v1617_v43  ;;  %v1634_v21 = vshra.s32 %v1618_v11, 23  ;;  %v1658_v53 = vand.u32 8388607, %v1618_v11 }
 0x371   : > { %v1635_v30 = vshra.s32 %v1619_v1, 23  ;;  %v1659_v47 = vand.u32 8388607, %v1619_v1  ;;  %v1640_v33 = vand.u32 255, %v1632_v60  ;;  %v1664_v4 = vor.u32 1065353216, %v1656_v23 }
 0x372   : > { %v1641_v39 = vand.u32 255, %v1633_v6  ;;  %v1665_v44 = vor.u32 1065353216, %v1657_v56  ;;  %v1642_v3 = vand.u32 255, %v1634_v21  ;;  %v1666_v7 = vor.u32 1065353216, %v1658_v53 }
 0x373   : > { %v1643_v20 = vand.u32 255, %v1635_v30  ;;  %v1667_v45 = vor.u32 1065353216, %v1659_v47  ;;  %v6328_v25 = vadd.s32 4294967169, %v1640_v33  ;;  %v1680_v62 = vmul.f32 -0.05657085, %v1664_v4 }
 0x374   : > { %v6329_v52 = vadd.s32 4294967169, %v1641_v39  ;;  %v1681_v36 = vmul.f32 -0.05657085, %v1665_v44  ;;  %v6330_v16 = vadd.s32 4294967169, %v1642_v3  ;;  %v1682_v14 = vmul.f32 -0.05657085, %v1666_v7 }
 0x375   : > { %v6331_v55 = vadd.s32 4294967169, %v1643_v20  ;;  %v1683_v13 = vmul.f32 -0.05657085, %v1667_v45  ;;  %v1688_v32 = vadd.f32 0.44717956, %v1680_v62  ;;  %v1744_v8 = vcvt.s32.f32 %v6328_v25 }
 0x376   : > { %v1689_v46 = vadd.f32 0.44717956, %v1681_v36  ;;  %v1745_v24 = vcvt.s32.f32 %v6329_v52  ;;  %v1690_v15 = vadd.f32 0.44717956, %v1682_v14  ;;  %v1746_v59 = vcvt.s32.f32 %v6330_v16 }
 0x377   : > { %v1691_v19 = vadd.f32 0.44717956, %v1683_v13  ;;  %v1747_v43 = vcvt.s32.f32 %v6331_v55  ;;  %v1696_v11 = vmul.f32 %v1688_v32, %v1664_v4  ;;  %v1752_v60 = vmul.f32 0.6931472, %v1744_v8 }
 0x378   : > { %v1697_v1 = vmul.f32 %v1689_v46, %v1665_v44  ;;  %v1753_v6 = vmul.f32 0.6931472, %v1745_v24  ;;  %v1698_v23 = vmul.f32 %v1690_v15, %v1666_v7  ;;  %v1754_v21 = vmul.f32 0.6931472, %v1746_v59 }
 0x379   : > { %v1699_v56 = vmul.f32 %v1691_v19, %v1667_v45  ;;  %v1755_v30 = vmul.f32 0.6931472, %v1747_v43  ;;  %v1704_v53 = vadd.f32 -1.4699568, %v1696_v11  ;;  %v1941_v33 = vxor.u32 %v6354_v0, %v1917_v22 }
 0x37a   : > { %v1705_v47 = vadd.f32 -1.4699568, %v1697_v1  ;;  %v1942_v39 = vxor.u32 %v6355_v38, %v1918_v18  ;;  %v1706_v3 = vadd.f32 -1.4699568, %v1698_v23  ;;  %v1947_v25 = vand.u32 8388607, %v1939_v31 }
 0x37b   : > { %v1707_v20 = vadd.f32 -1.4699568, %v1699_v56  ;;  %v1712_v52 = vmul.f32 %v1704_v53, %v1664_v4  ;;  %v1948_v36 = vand.u32 8388607, %v1940_v49  ;;  %v1949_v16 = vand.u32 8388607, %v1941_v33 }
 0x37c   : > { %v1713_v62 = vmul.f32 %v1705_v47, %v1665_v44  ;;  %v1714_v55 = vmul.f32 %v1706_v3, %v1666_v7  ;;  %v1950_v13 = vand.u32 8388607, %v1942_v39  ;;  %v1955_v32 = vor.u32 1065353216, %v1947_v25 }
 0x37d   : > { %v1715_v14 = vmul.f32 %v1707_v20, %v1667_v45  ;;  %v1720_v46 = vadd.f32 2.8212025, %v1712_v52  ;;  %v1956_v24 = vor.u32 1065353216, %v1948_v36  ;;  %v1957_v15 = vor.u32 1065353216, %v1949_v16 }
 0x37e   : > { %v1721_v8 = vadd.f32 2.8212025, %v1713_v62  ;;  %v1722_v19 = vadd.f32 2.8212025, %v1714_v55  ;;  %v1958_v43 = vor.u32 1065353216, %v1950_v13  ;;  %v6360_v22 = vadd.f32 -1.0, %v1955_v32 }
 0x37f   : > { %v1723_v59 = vadd.f32 2.8212025, %v1715_v14  ;;  %v1728_v18 = vmul.f32 %v1720_v46, %v1664_v4  ;;  %v6361_v38 = vadd.f32 -1.0, %v1956_v24  ;;  %v6362_v31 = vadd.f32 -1.0, %v1957_v15 }
 0x380   : > { %v1729_v0 = vmul.f32 %v1721_v8, %v1665_v44  ;;  %v1730_v11 = vmul.f32 %v1722_v19, %v1666_v7  ;;  %v6363_v49 = vadd.f32 -1.0, %v1958_v43  ;;  %v1979_v23 = vadd.f32 5.9604645e-08, %v6360_v22 }
 0x381   : > { %v1731_v1 = vmul.f32 %v1723_v59, %v1667_v45  ;;  %v1736_v56 = vadd.f32 -1.7417939, %v1728_v18  ;;  %v1980_v47 = vadd.f32 5.9604645e-08, %v6361_v38  ;;  %v1981_v33 = vadd.f32 5.9604645e-08, %v6362_v31 }
 0x382   : > { %v1737_v53 = vadd.f32 -1.7417939, %v1729_v0  ;;  %v1738_v39 = vadd.f32 -1.7417939, %v1730_v11  ;;  %v1982_v20 = vadd.f32 5.9604645e-08, %v6363_v49  ;;  %v1995_v25 = vshra.s32 %v1979_v23, 23 }
 0x383   : > { %v1739_v3 = vadd.f32 -1.7417939, %v1731_v1  ;;  %v1760_v52 = vadd.f32 %v1752_v60, %v1736_v56  ;;  %v1996_v36 = vshra.s32 %v1980_v47, 23  ;;  %v1997_v16 = vshra.s32 %v1981_v33, 23 }
 0x384   : > { %v1761_v62 = vadd.f32 %v1753_v6, %v1737_v53  ;;  %v1762_v4 = vadd.f32 %v1754_v21, %v1738_v39  ;;  %v1998_v55 = vshra.s32 %v1982_v20, 23  ;;  %v2003_v14 = vand.u32 255, %v1995_v25 }
 0x385   : > { %v1763_v44 = vadd.f32 %v1755_v30, %v1739_v3  ;;  %v7819_v7 = vsub.f32 %v7480_v51, %v1760_v52  ;;  %v2004_v13 = vand.u32 255, %v1996_v36  ;;  %v2005_v32 = vand.u32 255, %v1997_v16 }
 0x386   : > { %v7822_v45 = vsub.f32 %v7492_v40, %v1761_v62  ;;  %v7825_v46 = vsub.f32 %v7482_v5, %v1762_v4  ;;  %v2006_v6 = vand.u32 255, %v1998_v55  ;;  %v6368_v8 = vadd.s32 4294967169, %v2003_v14 }
 0x387   : > { %8977 = vst [vmem:[#allocation62_spill] sm:$0xff] %v7819_v7  ;;  %v7828_v60 = vsub.f32 %v7494_v2, %v1763_v44  ;;  %v6369_v21 = vadd.s32 4294967169, %v2004_v13  ;;  %v6370_v30 = vadd.s32 4294967169, %v2005_v32  ;;  %v2019_v24 = vand.u32 8388607, %v1979_v23 }
 0x388   : > { %8978 = vst [vmem:[#allocation63_spill] sm:$0xff] %v7822_v45  ;;  %8979 = vst [vmem:[#allocation64_spill] sm:$0xff] %v7825_v46  ;;  %v2020_v15 = vand.u32 8388607, %v1980_v47  ;;  %v1777_v19 = vmax.f32 %v7819_v7, %v7825_v46  ;;  %v6371_v43 = vadd.s32 4294967169, %v2006_v6  ;;  %v2107_v31 = vcvt.s32.f32 %v6368_v8 }
 0x389   : > { %8980 = vst [vmem:[#allocation65_spill] sm:$0xff] %v7828_v60  ;;  %v1778_v59 = vmax.f32 %v7822_v45, %v7828_v60  ;;  %v2021_v22 = vand.u32 8388607, %v1981_v33  ;;  %v2022_v18 = vand.u32 8388607, %v1982_v20  ;;  %v2027_v0 = vor.u32 1065353216, %v2019_v24 }
 0x38a   : > { %v2028_v38 = vor.u32 1065353216, %v2020_v15  ;;  %v2108_v49 = vcvt.s32.f32 %v6369_v21  ;;  %v2109_v56 = vcvt.s32.f32 %v6370_v30  ;;  %v2110_v47 = vcvt.s32.f32 %v6371_v43 }
 0x38b   : > { %v1779_v11 = vmax.f32 %v1777_v19, %v1778_v59  ;;  %v2029_v1 = vor.u32 1065353216, %v2021_v22  ;;  %v2030_v53 = vor.u32 1065353216, %v2022_v18  ;;  %v2043_v39 = vmul.f32 -0.05657085, %v2027_v0 }
 0x38c   : > { %v2044_v23 = vmul.f32 -0.05657085, %v2028_v38  ;;  %v2115_v25 = vmul.f32 0.6931472, %v2107_v31  ;;  %v2116_v52 = vmul.f32 0.6931472, %v2108_v49 }
 0x38d   : > { %1780 = vmax.xlane.f32.xlu1 %v1779_v11  ;;  %v2045_v3 = vmul.f32 -0.05657085, %v2029_v1  ;;  %v2046_v62 = vmul.f32 -0.05657085, %v2030_v53  ;;  %v2051_v36 = vadd.f32 0.44717956, %v2043_v39 }
 0x38e   : > { %v2052_v16 = vadd.f32 0.44717956, %v2044_v23  ;;  %v2117_v20 = vmul.f32 0.6931472, %v2109_v56  ;;  %v2118_v4 = vmul.f32 0.6931472, %v2110_v47 }
 0x38f   : > { %v2053_v33 = vadd.f32 0.44717956, %v2045_v3  ;;  %v2054_v44 = vadd.f32 0.44717956, %v2046_v62  ;;  %v2059_v55 = vmul.f32 %v2051_v36, %v2027_v0  ;;  %v2374_v13 = vadd.s32 3, %v7364_v37 }
 0x390   : > { %v2060_v14 = vmul.f32 %v2052_v16, %v2028_v38  ;;  %v2375_v6 = vadd.s32 3, %v7384_v10  ;;  %v2376_v8 = vadd.s32 3, %v7387_v41  ;;  %v2377_v21 = vadd.s32 3, %v7390_v57 }
 0x391   : > { %v2061_v32 = vmul.f32 %v2053_v33, %v2029_v1  ;;  %v2062_v30 = vmul.f32 %v2054_v44, %v2030_v53  ;;  %v2067_v24 = vadd.f32 -1.4699568, %v2059_v55  ;;  %v6384_v19 = vshrl.u32 %v2374_v13, 16 }
 0x392   : > { %v2068_v15 = vadd.f32 -1.4699568, %v2060_v14  ;;  %v6385_v43 = vshrl.u32 %v2375_v6, 16  ;;  %v6386_v22 = vshrl.u32 %v2376_v8, 16  ;;  %v6387_v18 = vshrl.u32 %v2377_v21, 16 }
 0x393   : > { %v2069_v59 = vadd.f32 -1.4699568, %v2061_v32  ;;  %v2070_v31 = vadd.f32 -1.4699568, %v2062_v30  ;;  %v2075_v11 = vmul.f32 %v2067_v24, %v2027_v0  ;;  %v2398_v56 = vxor.u32 %v6384_v19, %v2374_v13 }
 0x394   : > { %v2076_v49 = vmul.f32 %v2068_v15, %v2028_v38  ;;  %v2399_v23 = vxor.u32 %v6385_v43, %v2375_v6  ;;  %v2400_v47 = vxor.u32 %v6386_v22, %v2376_v8  ;;  %v2401_v3 = vxor.u32 %v6387_v18, %v2377_v21 }
 0x395   : > { %v2077_v39 = vmul.f32 %v2069_v59, %v2029_v1  ;;  %v2078_v62 = vmul.f32 %v2070_v31, %v2030_v53  ;;  %v2083_v36 = vadd.f32 2.8212025, %v2075_v11  ;;  %v2406_v33 = vmul.u32 2246822507, %v2398_v56 }
 0x396   : > { %v2084_v16 = vadd.f32 2.8212025, %v2076_v49  ;;  %v2407_v55 = vmul.u32 2246822507, %v2399_v23  ;;  %v2408_v14 = vmul.u32 2246822507, %v2400_v47 }
 0x397   : > { %v2085_v44 = vadd.f32 2.8212025, %v2077_v39  ;;  %v2086_v60 = vadd.f32 2.8212025, %v2078_v62  ;;  %v2091_v32 = vmul.f32 %v2083_v36, %v2027_v0  ;;  %v2409_v45 = vmul.u32 2246822507, %v2401_v3 }
 0x398   : > { %v2092_v46 = vmul.f32 %v2084_v16, %v2028_v38  ;;  %v6392_v30 = vshrl.u32 %v2406_v33, 13  ;;  %v6393_v24 = vshrl.u32 %v2407_v55, 13  ;;  %v6394_v15 = vshrl.u32 %v2408_v14, 13 }
 0x399   : > { %v2093_v7 = vmul.f32 %v2085_v44, %v2029_v1  ;;  %v2094_v13 = vmul.f32 %v2086_v60, %v2030_v53  ;;  %v2099_v19 = vadd.f32 -1.7417939, %v2091_v32  ;;  %v6395_v8 = vshrl.u32 %v2409_v45, 13 }
 0x39a   : > { %v2100_v6 = vadd.f32 -1.7417939, %v2092_v46  ;;  %v2430_v59 = vxor.u32 %v6392_v30, %v2406_v33  ;;  %v2431_v43 = vxor.u32 %v6393_v24, %v2407_v55  ;;  %v2432_v22 = vxor.u32 %v6394_v15, %v2408_v14 }
 0x39b   : > { %v2101_v21 = vadd.f32 -1.7417939, %v2093_v7  ;;  %v2102_v18 = vadd.f32 -1.7417939, %v2094_v13  ;;  %v2123_v31 = vadd.f32 %v2115_v25, %v2099_v19  ;;  %v2433_v49 = vxor.u32 %v6395_v8, %v2409_v45 }
 0x39c   : > { %v2124_v11 = vadd.f32 %v2116_v52, %v2100_v6  ;;  %v2438_v0 = vmul.u32 3266489909, %v2430_v59  ;;  %v2439_v38 = vmul.u32 3266489909, %v2431_v43  ;;  %v7839_v1 = vadd.s32 4, %v7364_v37 }
 0x39d   : > { %v2125_v56 = vadd.f32 %v2117_v20, %v2101_v21  ;;  %v2126_v39 = vadd.f32 %v2118_v4, %v2102_v18  ;;  %v2131_v23 = vsub.f32 0.0, %v2123_v31  ;;  %v2440_v53 = vmul.u32 3266489909, %v2432_v22 }
 0x39e   : > { %v2132_v60 = vsub.f32 0.0, %v2124_v11  ;;  %v2441_v47 = vmul.u32 3266489909, %v2433_v49  ;;  %v6400_v7 = vshrl.u32 %v2438_v0, 16  ;;  %v6401_v3 = vshrl.u32 %v2439_v38, 16 }
 0x39f   : > { %v2133_v46 = vsub.f32 0.0, %v2125_v56  ;;  %v2134_v62 = vsub.f32 0.0, %v2126_v39  ;;  %v2139_v36 = vmax.f32 %v2131_v23, 1e-10  ;;  %v6402_v25 = vshrl.u32 %v2440_v53, 16 }
 0x3a0   : > { %v2140_v16 = vmax.f32 %v2132_v60, 1e-10  ;;  %v6403_v45 = vshrl.u32 %v2441_v47, 16  ;;  %v2462_v20 = vxor.u32 %v6400_v7, %v2438_v0  ;;  %v2463_v33 = vxor.u32 %v6401_v3, %v2439_v38 }
 0x3a1   : > { %v2141_v52 = vmax.f32 %v2133_v46, 1e-10  ;;  %v2142_v44 = vmax.f32 %v2134_v62, 1e-10  ;;  %v2155_v55 = vshra.s32 %v2139_v36, 23  ;;  %v2464_v24 = vxor.u32 %v6402_v25, %v2440_v53 }
 0x3a2   : > { %v2156_v37 = vshra.s32 %v2140_v16, 23  ;;  %v2179_v14 = vand.u32 8388607, %v2139_v36  ;;  %v2180_v32 = vand.u32 8388607, %v2140_v16  ;;  %v2465_v38 = vxor.u32 %v6403_v45, %v2441_v47 }
 0x3a3   : > { %v2157_v4 = vshra.s32 %v2141_v52, 23  ;;  %v2181_v30 = vand.u32 8388607, %v2141_v52  ;;  %v2158_v15 = vshra.s32 %v2142_v44, 23  ;;  %v2163_v13 = vand.u32 255, %v2155_v55 }
 0x3a4   : > { %v2164_v19 = vand.u32 255, %v2156_v37  ;;  %v2182_v6 = vand.u32 8388607, %v2142_v44  ;;  %v2187_v21 = vor.u32 1065353216, %v2179_v14  ;;  %v2188_v59 = vor.u32 1065353216, %v2180_v32 }
 0x3a5   : > { %v2165_v8 = vand.u32 255, %v2157_v4  ;;  %v2189_v43 = vor.u32 1065353216, %v2181_v30  ;;  %v2166_v22 = vand.u32 255, %v2158_v15  ;;  %v6376_v18 = vadd.s32 4294967169, %v2163_v13 }
 0x3a6   : > { %v6377_v31 = vadd.s32 4294967169, %v2164_v19  ;;  %v2190_v11 = vor.u32 1065353216, %v2182_v6  ;;  %v2203_v56 = vmul.f32 -0.05657085, %v2187_v21  ;;  %v2204_v0 = vmul.f32 -0.05657085, %v2188_v59 }
 0x3a7   : > { %v6378_v49 = vadd.s32 4294967169, %v2165_v8  ;;  %v6379_v39 = vadd.s32 4294967169, %v2166_v22  ;;  %v2205_v23 = vmul.f32 -0.05657085, %v2189_v43  ;;  %v2267_v53 = vcvt.s32.f32 %v6376_v18 }
 0x3a8   : > { %v2206_v60 = vmul.f32 -0.05657085, %v2190_v11  ;;  %v2211_v46 = vadd.f32 0.44717956, %v2203_v56  ;;  %v2212_v7 = vadd.f32 0.44717956, %v2204_v0  ;;  %v2268_v3 = vcvt.s32.f32 %v6377_v31 }
 0x3a9   : > { %v2269_v62 = vcvt.s32.f32 %v6378_v49  ;;  %v2213_v36 = vadd.f32 0.44717956, %v2205_v23  ;;  %v2270_v25 = vcvt.s32.f32 %v6379_v39  ;;  %v2275_v52 = vmul.f32 0.6931472, %v2267_v53 }
 0x3aa   : > { %v2214_v16 = vadd.f32 0.44717956, %v2206_v60  ;;  %v2219_v44 = vmul.f32 %v2211_v46, %v2187_v21  ;;  %v2220_v55 = vmul.f32 %v2212_v7, %v2188_v59  ;;  %v2276_v37 = vmul.f32 0.6931472, %v2268_v3 }
 0x3ab   : > { %v2277_v14 = vmul.f32 0.6931472, %v2269_v62  ;;  %v2221_v4 = vmul.f32 %v2213_v36, %v2189_v43  ;;  %v2278_v30 = vmul.f32 0.6931472, %v2270_v25  ;;  %v2470_v47 = vand.u32 8388607, %v2462_v20 }
 0x3ac   : > { %v2222_v32 = vmul.f32 %v2214_v16, %v2190_v11  ;;  %v2227_v45 = vadd.f32 -1.4699568, %v2219_v44  ;;  %v2228_v15 = vadd.f32 -1.4699568, %v2220_v55  ;;  %v2471_v13 = vand.u32 8388607, %v2463_v33 }
 0x3ad   : > { %v2229_v19 = vadd.f32 -1.4699568, %v2221_v4  ;;  %v2472_v8 = vand.u32 8388607, %v2464_v24  ;;  %v2473_v31 = vand.u32 8388607, %v2465_v38 }
 0x3ae   : > { %v2230_v6 = vadd.f32 -1.4699568, %v2222_v32  ;;  %v2235_v22 = vmul.f32 %v2227_v45, %v2187_v21  ;;  %v2236_v18 = vmul.f32 %v2228_v15, %v2188_v59  ;;  %v2478_v49 = vor.u32 1065353216, %v2470_v47 }
 0x3af   : > { %v2237_v56 = vmul.f32 %v2229_v19, %v2189_v43  ;;  %v2479_v39 = vor.u32 1065353216, %v2471_v13  ;;  %v2480_v23 = vor.u32 1065353216, %v2472_v8  ;;  %v2481_v46 = vor.u32 1065353216, %v2473_v31 }
 0x3b0   : > { %v2238_v0 = vmul.f32 %v2230_v6, %v2190_v11  ;;  %v2243_v60 = vadd.f32 2.8212025, %v2235_v22  ;;  %v2244_v53 = vadd.f32 2.8212025, %v2236_v18  ;;  %v6408_v7 = vadd.f32 -1.0, %v2478_v49 }
 0x3b1   : > { %v2245_v3 = vadd.f32 2.8212025, %v2237_v56  ;;  %v6409_v62 = vadd.f32 -1.0, %v2479_v39  ;;  %v6410_v36 = vadd.f32 -1.0, %v2480_v23  ;;  %v6411_v25 = vadd.f32 -1.0, %v2481_v46 }
 0x3b2   : > { %v2246_v20 = vadd.f32 2.8212025, %v2238_v0  ;;  %v2251_v33 = vmul.f32 %v2243_v60, %v2187_v21  ;;  %v2252_v16 = vmul.f32 %v2244_v53, %v2188_v59  ;;  %v2502_v24 = vadd.f32 5.9604645e-08, %v6408_v7 }
 0x3b3   : > { %v2253_v44 = vmul.f32 %v2245_v3, %v2189_v43  ;;  %v2503_v38 = vadd.f32 5.9604645e-08, %v6409_v62  ;;  %v2504_v4 = vadd.f32 5.9604645e-08, %v6410_v36  ;;  %v2505_v45 = vadd.f32 5.9604645e-08, %v6411_v25 }
 0x3b4   : > { %v2254_v55 = vmul.f32 %v2246_v20, %v2190_v11  ;;  %v2259_v32 = vadd.f32 -1.7417939, %v2251_v33  ;;  %v2260_v47 = vadd.f32 -1.7417939, %v2252_v16  ;;  %v2518_v15 = vshra.s32 %v2502_v24, 23 }
 0x3b5   : > { %v2261_v13 = vadd.f32 -1.7417939, %v2253_v44  ;;  %v2519_v6 = vshra.s32 %v2503_v38, 23  ;;  %v2520_v8 = vshra.s32 %v2504_v4, 23  ;;  %v2521_v31 = vshra.s32 %v2505_v45, 23 }
 0x3b6   : > { %v2262_v19 = vadd.f32 -1.7417939, %v2254_v55  ;;  %v2283_v22 = vadd.f32 %v2275_v52, %v2259_v32  ;;  %v2284_v18 = vadd.f32 %v2276_v37, %v2260_v47  ;;  %v2526_v49 = vand.u32 255, %v2518_v15 }
 0x3b7   : > { %v2285_v21 = vadd.f32 %v2277_v14, %v2261_v13  ;;  %v2527_v56 = vand.u32 255, %v2519_v6  ;;  %v2528_v0 = vand.u32 255, %v2520_v8  ;;  %v2529_v39 = vand.u32 255, %v2521_v31 }
 0x3b8   : > { %v2286_v59 = vadd.f32 %v2278_v30, %v2262_v19  ;;  %v7842_v43 = vsub.f32 %v7480_v51, %v2283_v22  ;;  %v7845_v11 = vsub.f32 %v7492_v40, %v2284_v18  ;;  %v6416_v23 = vadd.s32 4294967169, %v2526_v49 }
 0x3b9   : > { %v7848_v60 = vsub.f32 %v7482_v5, %v2285_v21  ;;  %v6417_v37 = vadd.s32 4294967169, %v2527_v56  ;;  %v6418_v53 = vadd.s32 4294967169, %v2528_v0  ;;  %v6419_v14 = vadd.s32 4294967169, %v2529_v39 }
 0x3ba   : > { %v7851_v52 = vsub.f32 %v7494_v2, %v2286_v59  ;;  %v2542_v30 = vand.u32 8388607, %v2502_v24  ;;  %v2543_v46 = vand.u32 8388607, %v2503_v38  ;;  %v2630_v7 = vcvt.s32.f32 %v6416_v23 }
 0x3bb   : > { %v2300_v3 = vmax.f32 %v7842_v43, %v7848_v60  ;;  %v2544_v62 = vand.u32 8388607, %v2504_v4  ;;  %v2545_v36 = vand.u32 8388607, %v2505_v45  ;;  %v2631_v25 = vcvt.s32.f32 %v6417_v37 }
 0x3bc   : > { %v2301_v20 = vmax.f32 %v7845_v11, %v7851_v52  ;;  %v2550_v33 = vor.u32 1065353216, %v2542_v30  ;;  %v2551_v16 = vor.u32 1065353216, %v2543_v46  ;;  %v2632_v44 = vcvt.s32.f32 %v6418_v53 }
 0x3bd   : > { %v2552_v32 = vor.u32 1065353216, %v2544_v62  ;;  %v2553_v47 = vor.u32 1065353216, %v2545_v36  ;;  %v2633_v15 = vcvt.s32.f32 %v6419_v14  ;;  %v2638_v38 = vmul.f32 0.6931472, %v2630_v7 }
 0x3be   : > { %v2302_v55 = vmax.f32 %v2300_v3, %v2301_v20  ;;  %v2566_v13 = vmul.f32 -0.05657085, %v2550_v33  ;;  %v2567_v24 = vmul.f32 -0.05657085, %v2551_v16  ;;  %v2639_v8 = vmul.f32 0.6931472, %v2631_v25 }
 0x3bf   : > { %v2568_v19 = vmul.f32 -0.05657085, %v2552_v32  ;;  %v2569_v6 = vmul.f32 -0.05657085, %v2553_v47  ;;  %v2640_v31 = vmul.f32 0.6931472, %v2632_v44 }
 0x3c0   : > { %2303 = vmax.xlane.f32.xlu1 %v2302_v55  ;;  %v2574_v22 = vadd.f32 0.44717956, %v2566_v13  ;;  %v2575_v18 = vadd.f32 0.44717956, %v2567_v24  ;;  %v2641_v49 = vmul.f32 0.6931472, %v2633_v15 }
 0x3c1   : > { %v2576_v4 = vadd.f32 0.44717956, %v2568_v19  ;;  %v2577_v45 = vadd.f32 0.44717956, %v2569_v6  ;;  %v2898_v56 = vadd.s32 4, %v7384_v10  ;;  %v2899_v0 = vadd.s32 4, %v7387_v41 }
 0x3c2   : > { %v2582_v21 = vmul.f32 %v2574_v22, %v2550_v33  ;;  %v2583_v59 = vmul.f32 %v2575_v18, %v2551_v16  ;;  %v2900_v37 = vadd.s32 4, %v7390_v57  ;;  %v6432_v53 = vshrl.u32 %v7839_v1, 16 }
 0x3c3   : > { %v2584_v39 = vmul.f32 %v2576_v4, %v2552_v32  ;;  %v2585_v23 = vmul.f32 %v2577_v45, %v2553_v47  ;;  %v6433_v46 = vshrl.u32 %v2898_v56, 16  ;;  %v6434_v7 = vshrl.u32 %v2899_v0, 16 }
 0x3c4   : > { %v2590_v14 = vadd.f32 -1.4699568, %v2582_v21  ;;  %v2591_v30 = vadd.f32 -1.4699568, %v2583_v59  ;;  %v6435_v62 = vshrl.u32 %v2900_v37, 16  ;;  %v2921_v36 = vxor.u32 %v6432_v53, %v7839_v1 }
 0x3c5   : > { %v2592_v3 = vadd.f32 -1.4699568, %v2584_v39  ;;  %v2593_v20 = vadd.f32 -1.4699568, %v2585_v23  ;;  %v2922_v10 = vxor.u32 %v6433_v46, %v2898_v56  ;;  %v2923_v55 = vxor.u32 %v6434_v7, %v2899_v0 }
 0x3c6   : > { %v2598_v25 = vmul.f32 %v2590_v14, %v2550_v33  ;;  %v2599_v44 = vmul.f32 %v2591_v30, %v2551_v16  ;;  %v2924_v13 = vxor.u32 %v6435_v62, %v2900_v37  ;;  %v2929_v24 = vmul.u32 2246822507, %v2921_v36 }
 0x3c7   : > { %v2600_v41 = vmul.f32 %v2592_v3, %v2552_v32  ;;  %v2601_v15 = vmul.f32 %v2593_v20, %v2553_v47  ;;  %v2930_v6 = vmul.u32 2246822507, %v2922_v10  ;;  %v2931_v4 = vmul.u32 2246822507, %v2923_v55 }
 0x3c8   : > { %v2606_v57 = vadd.f32 2.8212025, %v2598_v25  ;;  %v2607_v19 = vadd.f32 2.8212025, %v2599_v44  ;;  %v2932_v59 = vmul.u32 2246822507, %v2924_v13 }
 0x3c9   : > { %v2608_v22 = vadd.f32 2.8212025, %v2600_v41  ;;  %v2609_v18 = vadd.f32 2.8212025, %v2601_v15  ;;  %v6440_v39 = vshrl.u32 %v2929_v24, 13  ;;  %v6441_v53 = vshrl.u32 %v2930_v6, 13 }
 0x3ca   : > { %v2614_v45 = vmul.f32 %v2606_v57, %v2550_v33  ;;  %v2615_v21 = vmul.f32 %v2607_v19, %v2551_v16  ;;  %v6442_v14 = vshrl.u32 %v2931_v4, 13  ;;  %v6443_v30 = vshrl.u32 %v2932_v59, 13 }
 0x3cb   : > { %v2616_v23 = vmul.f32 %v2608_v22, %v2552_v32  ;;  %v2617_v1 = vmul.f32 %v2609_v18, %v2553_v47  ;;  %v2953_v46 = vxor.u32 %v6440_v39, %v2929_v24  ;;  %v2954_v3 = vxor.u32 %v6441_v53, %v2930_v6 }
 0x3cc   : > { %v2622_v56 = vadd.f32 -1.7417939, %v2614_v45  ;;  %v2623_v0 = vadd.f32 -1.7417939, %v2615_v21  ;;  %v2955_v20 = vxor.u32 %v6442_v14, %v2931_v4  ;;  %v7862_v25 = vxor.u32 %v6443_v30, %v2932_v59 }
 0x3cd   : > { %v2624_v37 = vadd.f32 -1.7417939, %v2616_v23  ;;  %v2625_v7 = vadd.f32 -1.7417939, %v2617_v1  ;;  %v2961_v33 = vmul.u32 3266489909, %v2953_v46 }
 0x3ce   : > { %v2646_v62 = vadd.f32 %v2638_v38, %v2622_v56  ;;  %v2647_v36 = vadd.f32 %v2639_v8, %v2623_v0  ;;  %v2962_v10 = vmul.u32 3266489909, %v2954_v3  ;;  %v2963_v32 = vmul.u32 3266489909, %v2955_v20 }
 0x3cf   : > { %v2648_v16 = vadd.f32 %v2640_v31, %v2624_v37  ;;  %v2649_v44 = vadd.f32 %v2641_v49, %v2625_v7  ;;  %v2964_v41 = vmul.u32 3266489909, %v7862_v25  ;;  %v6448_v15 = vshrl.u32 %v2961_v33, 16 }
 0x3d0   : > { %v2654_v47 = vsub.f32 0.0, %v2646_v62  ;;  %v2655_v55 = vsub.f32 0.0, %v2647_v36  ;;  %v6449_v57 = vshrl.u32 %v2962_v10, 16  ;;  %v6450_v19 = vshrl.u32 %v2963_v32, 16 }
 0x3d1   : > { %v2656_v13 = vsub.f32 0.0, %v2648_v16  ;;  %v2657_v24 = vsub.f32 0.0, %v2649_v44  ;;  %v6451_v38 = vshrl.u32 %v2964_v41, 16  ;;  %v2985_v8 = vxor.u32 %v6448_v15, %v2961_v33 }
 0x3d2   : > { %v2662_v6 = vmax.f32 %v2654_v47, 1e-10  ;;  %v2663_v22 = vmax.f32 %v2655_v55, 1e-10  ;;  %v2986_v45 = vxor.u32 %v6449_v57, %v2962_v10  ;;  %v2987_v31 = vxor.u32 %v6450_v19, %v2963_v32 }
 0x3d3   : > { %v2664_v18 = vmax.f32 %v2656_v13, 1e-10  ;;  %v2665_v4 = vmax.f32 %v2657_v24, 1e-10 }
 0x3d4   : > { %v2678_v49 = vshra.s32 %v2662_v6, 23  ;;  %v2679_v21 = vshra.s32 %v2663_v22, 23  ;;  %v2702_v59 = vand.u32 8388607, %v2662_v6  ;;  %v2703_v39 = vand.u32 8388607, %v2663_v22 }
 0x3d5   : > { %v2680_v23 = vshra.s32 %v2664_v18, 23  ;;  %v2681_v1 = vshra.s32 %v2665_v4, 23  ;;  %v2704_v53 = vand.u32 8388607, %v2664_v18  ;;  %v2705_v14 = vand.u32 8388607, %v2665_v4 }
 0x3d6   : > { %v2686_v56 = vand.u32 255, %v2678_v49  ;;  %v2687_v0 = vand.u32 255, %v2679_v21  ;;  %v2710_v30 = vor.u32 1065353216, %v2702_v59  ;;  %v2711_v46 = vor.u32 1065353216, %v2703_v39 }
 0x3d7   : > { %v2688_v37 = vand.u32 255, %v2680_v23  ;;  %v2689_v7 = vand.u32 255, %v2681_v1  ;;  %v2712_v3 = vor.u32 1065353216, %v2704_v53  ;;  %v2713_v20 = vor.u32 1065353216, %v2705_v14 }
 0x3d8   : > { %v6424_v62 = vadd.s32 4294967169, %v2686_v56  ;;  %v6425_v36 = vadd.s32 4294967169, %v2687_v0  ;;  %v2726_v25 = vmul.f32 -0.05657085, %v2710_v30  ;;  %v2727_v33 = vmul.f32 -0.05657085, %v2711_v46 }
 0x3d9   : > { %v6426_v16 = vadd.s32 4294967169, %v2688_v37  ;;  %v6427_v44 = vadd.s32 4294967169, %v2689_v7  ;;  %v2728_v10 = vmul.f32 -0.05657085, %v2712_v3  ;;  %v2729_v32 = vmul.f32 -0.05657085, %v2713_v20 }
 0x3da   : > { %v2734_v47 = vadd.f32 0.44717956, %v2726_v25  ;;  %v2735_v55 = vadd.f32 0.44717956, %v2727_v33  ;;  %v2790_v15 = vcvt.s32.f32 %v6424_v62  ;;  %v2791_v13 = vcvt.s32.f32 %v6425_v36 }
 0x3db   : > { %v2736_v24 = vadd.f32 0.44717956, %v2728_v10  ;;  %v2737_v57 = vadd.f32 0.44717956, %v2729_v32  ;;  %v2792_v19 = vcvt.s32.f32 %v6426_v16  ;;  %v2793_v6 = vcvt.s32.f32 %v6427_v44 }
 0x3dc   : > { %v2742_v22 = vmul.f32 %v2734_v47, %v2710_v30  ;;  %v2743_v18 = vmul.f32 %v2735_v55, %v2711_v46  ;;  %v2798_v4 = vmul.f32 0.6931472, %v2790_v15  ;;  %v2799_v49 = vmul.f32 0.6931472, %v2791_v13 }
 0x3dd   : > { %v2744_v21 = vmul.f32 %v2736_v24, %v2712_v3  ;;  %v2745_v59 = vmul.f32 %v2737_v57, %v2713_v20  ;;  %v2800_v39 = vmul.f32 0.6931472, %v2792_v19  ;;  %v2801_v23 = vmul.f32 0.6931472, %v2793_v6 }
 0x3de   : > { %v2750_v1 = vadd.f32 -1.4699568, %v2742_v22  ;;  %v2751_v53 = vadd.f32 -1.4699568, %v2743_v18  ;;  %v2988_v14 = vxor.u32 %v6451_v38, %v2964_v41  ;;  %v2993_v56 = vand.u32 8388607, %v2985_v8 }
 0x3df   : > { %v2752_v0 = vadd.f32 -1.4699568, %v2744_v21  ;;  %v2753_v37 = vadd.f32 -1.4699568, %v2745_v59  ;;  %v2994_v7 = vand.u32 8388607, %v2986_v45 }
 0x3e0   : > { %v2758_v62 = vmul.f32 %v2750_v1, %v2710_v30  ;;  %v2759_v36 = vmul.f32 %v2751_v53, %v2711_v46  ;;  %v2995_v25 = vand.u32 8388607, %v2987_v31  ;;  %v2996_v33 = vand.u32 8388607, %v2988_v14 }
 0x3e1   : > { %v2760_v16 = vmul.f32 %v2752_v0, %v2712_v3  ;;  %v2761_v44 = vmul.f32 %v2753_v37, %v2713_v20  ;;  %v3001_v10 = vor.u32 1065353216, %v2993_v56  ;;  %v3002_v32 = vor.u32 1065353216, %v2994_v7 }
 0x3e2   : > { %v2766_v47 = vadd.f32 2.8212025, %v2758_v62  ;;  %v2767_v55 = vadd.f32 2.8212025, %v2759_v36  ;;  %v3003_v15 = vor.u32 1065353216, %v2995_v25  ;;  %v3004_v13 = vor.u32 1065353216, %v2996_v33 }
 0x3e3   : > { %v2768_v24 = vadd.f32 2.8212025, %v2760_v16  ;;  %v2769_v57 = vadd.f32 2.8212025, %v2761_v44  ;;  %v6456_v19 = vadd.f32 -1.0, %v3001_v10  ;;  %v6457_v41 = vadd.f32 -1.0, %v3002_v32 }
 0x3e4   : > { %v2774_v38 = vmul.f32 %v2766_v47, %v2710_v30  ;;  %v2775_v8 = vmul.f32 %v2767_v55, %v2711_v46  ;;  %v6458_v6 = vadd.f32 -1.0, %v3003_v15  ;;  %v6459_v45 = vadd.f32 -1.0, %v3004_v13 }
 0x3e5   : > { %v2776_v22 = vmul.f32 %v2768_v24, %v2712_v3  ;;  %v2777_v18 = vmul.f32 %v2769_v57, %v2713_v20  ;;  %v3025_v31 = vadd.f32 5.9604645e-08, %v6456_v19  ;;  %v3026_v21 = vadd.f32 5.9604645e-08, %v6457_v41 }
 0x3e6   : > { %v2782_v59 = vadd.f32 -1.7417939, %v2774_v38  ;;  %v2783_v1 = vadd.f32 -1.7417939, %v2775_v8  ;;  %v3027_v53 = vadd.f32 5.9604645e-08, %v6458_v6  ;;  %v3028_v14 = vadd.f32 5.9604645e-08, %v6459_v45 }
 0x3e7   : > { %v2784_v56 = vadd.f32 -1.7417939, %v2776_v22  ;;  %v2785_v0 = vadd.f32 -1.7417939, %v2777_v18  ;;  %v3041_v37 = vshra.s32 %v3025_v31, 23  ;;  %v3042_v7 = vshra.s32 %v3026_v21, 23 }
 0x3e8   : > { %v2806_v62 = vadd.f32 %v2798_v4, %v2782_v59  ;;  %v2807_v36 = vadd.f32 %v2799_v49, %v2783_v1  ;;  %v3043_v25 = vshra.s32 %v3027_v53, 23  ;;  %v3044_v33 = vshra.s32 %v3028_v14, 23 }
 0x3e9   : > { %v2808_v30 = vadd.f32 %v2800_v39, %v2784_v56  ;;  %v2809_v46 = vadd.f32 %v2801_v23, %v2785_v0  ;;  %v3049_v16 = vand.u32 255, %v3041_v37  ;;  %v3050_v44 = vand.u32 255, %v3042_v7 }
 0x3ea   : > { %v7866_v3 = vsub.f32 %v7480_v51, %v2806_v62  ;;  %v7869_v20 = vsub.f32 %v7492_v40, %v2807_v36  ;;  %v3051_v10 = vand.u32 255, %v3043_v25  ;;  %v3052_v32 = vand.u32 255, %v3044_v33 }
 0x3eb   : > { %v7872_v47 = vsub.f32 %v7482_v5, %v2808_v30  ;;  %v7875_v4 = vsub.f32 %v7494_v2, %v2809_v46  ;;  %v6464_v49 = vadd.s32 4294967169, %v3049_v16  ;;  %v6465_v55 = vadd.s32 4294967169, %v3050_v44 }
 0x3ec   : > { %8981 = vst [vmem:[#allocation66_spill] sm:$0xff] %v7866_v3  ;;  %8982 = vst [vmem:[#allocation67_spill] sm:$0xff] %v7869_v20  ;;  %v6466_v39 = vadd.s32 4294967169, %v3051_v10  ;;  %v6467_v23 = vadd.s32 4294967169, %v3052_v32  ;;  %v3065_v15 = vand.u32 8388607, %v3025_v31 }
 0x3ed   : > { %8983 = vst [vmem:[#allocation68_spill] sm:$0xff] %v7872_v47  ;;  %8984 = vst [vmem:[#allocation69_spill] sm:$0xff] %v7875_v4  ;;  %v3066_v13 = vand.u32 8388607, %v3026_v21  ;;  %v2823_v24 = vmax.f32 %v7866_v3, %v7872_v47  ;;  %v2824_v57 = vmax.f32 %v7869_v20, %v7875_v4  ;;  %v3067_v19 = vand.u32 8388607, %v3027_v53 }
 0x3ee   : > { %v3068_v41 = vand.u32 8388607, %v3028_v14  ;;  %v3073_v38 = vor.u32 1065353216, %v3065_v15  ;;  %v3153_v6 = vcvt.s32.f32 %v6464_v49  ;;  %v3154_v45 = vcvt.s32.f32 %v6465_v55 }
 0x3ef   : > { %v3074_v8 = vor.u32 1065353216, %v3066_v13  ;;  %v2825_v22 = vmax.f32 %v2823_v24, %v2824_v57  ;;  %v3075_v18 = vor.u32 1065353216, %v3067_v19  ;;  %v3155_v1 = vcvt.s32.f32 %v6466_v39 }
 0x3f0   : > { %v3076_v59 = vor.u32 1065353216, %v3068_v41  ;;  %v3089_v56 = vmul.f32 -0.05657085, %v3073_v38  ;;  %v3156_v31 = vcvt.s32.f32 %v6467_v23  ;;  %v3161_v21 = vmul.f32 0.6931472, %v3153_v6 }
 0x3f1   : > { %v3090_v0 = vmul.f32 -0.05657085, %v3074_v8  ;;  %2826 = vmax.xlane.f32.xlu1 %v2825_v22  ;;  %v3091_v37 = vmul.f32 -0.05657085, %v3075_v18  ;;  %v3162_v62 = vmul.f32 0.6931472, %v3154_v45 }
 0x3f2   : > { %v3092_v7 = vmul.f32 -0.05657085, %v3076_v59  ;;  %v3097_v36 = vadd.f32 0.44717956, %v3089_v56  ;;  %v3163_v53 = vmul.f32 0.6931472, %v3155_v1 }
 0x3f3   : > { %v3098_v25 = vadd.f32 0.44717956, %v3090_v0  ;;  %v3099_v14 = vadd.f32 0.44717956, %v3091_v37  ;;  %v3164_v30 = vmul.f32 0.6931472, %v3156_v31 }
 0x3f4   : > { %v3100_v33 = vadd.f32 0.44717956, %v3092_v7  ;;  %v3105_v46 = vmul.f32 %v3097_v36, %v3073_v38  ;;  %v4985_v44 = vadd.s32 8, %v7207_v26  ;;  %v4986_v10 = vadd.s32 8, %v7213_v28 }
 0x3f5   : > { %v3106_v16 = vmul.f32 %v3098_v25, %v3074_v8  ;;  %v3107_v32 = vmul.f32 %v3099_v14, %v3075_v18  ;;  %v4987_v55 = vadd.s32 8, %v7210_v27  ;;  %v4988_v39 = vadd.s32 8, %v7216_v29 }
 0x3f6   : > { %v3108_v49 = vmul.f32 %v3100_v33, %v3076_v59  ;;  %v3113_v23 = vadd.f32 -1.4699568, %v3105_v46  ;;  %v6620_v13 = vshrl.u32 %v4985_v44, 16  ;;  %v6621_v24 = vshrl.u32 %v4986_v10, 16 }
 0x3f7   : > { %v3114_v15 = vadd.f32 -1.4699568, %v3106_v16  ;;  %v3115_v57 = vadd.f32 -1.4699568, %v3107_v32  ;;  %v6622_v41 = vshrl.u32 %v4987_v55, 16  ;;  %v6623_v6 = vshrl.u32 %v4988_v39, 16 }
 0x3f8   : > { %v3116_v19 = vadd.f32 -1.4699568, %v3108_v49  ;;  %v3121_v45 = vmul.f32 %v3113_v23, %v3073_v38  ;;  %v5009_v1 = vxor.u32 %v6620_v13, %v4985_v44  ;;  %v5010_v56 = vxor.u32 %v6621_v24, %v4986_v10 }
 0x3f9   : > { %v3122_v22 = vmul.f32 %v3114_v15, %v3074_v8  ;;  %v3123_v0 = vmul.f32 %v3115_v57, %v3075_v18  ;;  %v5011_v37 = vxor.u32 %v6622_v41, %v4987_v55  ;;  %v5012_v7 = vxor.u32 %v6623_v6, %v4988_v39 }
 0x3fa   : > { %v3124_v31 = vmul.f32 %v3116_v19, %v3076_v59  ;;  %v3129_v36 = vadd.f32 2.8212025, %v3121_v45  ;;  %v5017_v14 = vmul.u32 2246822507, %v5009_v1  ;;  %v5018_v16 = vmul.u32 2246822507, %v5010_v56 }
 0x3fb   : > { %v3130_v25 = vadd.f32 2.8212025, %v3122_v22  ;;  %v3131_v33 = vadd.f32 2.8212025, %v3123_v0  ;;  %v5019_v32 = vmul.u32 2246822507, %v5011_v37 }
 0x3fc   : > { %v3132_v46 = vadd.f32 2.8212025, %v3124_v31  ;;  %v3137_v4 = vmul.f32 %v3129_v36, %v3073_v38  ;;  %v5020_v49 = vmul.u32 2246822507, %v5012_v7  ;;  %v6628_v23 = vshrl.u32 %v5017_v14, 13 }
 0x3fd   : > { %v3138_v47 = vmul.f32 %v3130_v25, %v3074_v8  ;;  %v3139_v20 = vmul.f32 %v3131_v33, %v3075_v18  ;;  %v6629_v15 = vshrl.u32 %v5018_v16, 13  ;;  %v6630_v13 = vshrl.u32 %v5019_v32, 13 }
 0x3fe   : > { %v3140_v3 = vmul.f32 %v3132_v46, %v3076_v59  ;;  %v3145_v44 = vadd.f32 -1.7417939, %v3137_v4  ;;  %v6631_v24 = vshrl.u32 %v5020_v49, 13  ;;  %v5041_v57 = vxor.u32 %v6628_v23, %v5017_v14 }
 0x3ff   : > { %v3146_v10 = vadd.f32 -1.7417939, %v3138_v47  ;;  %v3147_v55 = vadd.f32 -1.7417939, %v3139_v20  ;;  %v5042_v19 = vxor.u32 %v6629_v15, %v5018_v16  ;;  %v7885_v45 = vxor.u32 %v6630_v13, %v5019_v32 }
 0x400   : > { %v3148_v39 = vadd.f32 -1.7417939, %v3140_v3  ;;  %v3169_v41 = vadd.f32 %v3161_v21, %v3145_v44  ;;  %v7887_v38 = vxor.u32 %v6631_v24, %v5020_v49  ;;  %v5049_v18 = vmul.u32 3266489909, %v5041_v57 }
 0x401   : > { %v3170_v6 = vadd.f32 %v3162_v62, %v3146_v10  ;;  %v3171_v8 = vadd.f32 %v3163_v53, %v3147_v55  ;;  %v5050_v59 = vmul.u32 3266489909, %v5042_v19  ;;  %v5051_v47 = vmul.u32 3266489909, %v7885_v45 }
 0x402   : > { %v3172_v22 = vadd.f32 %v3164_v30, %v3148_v39  ;;  %v3177_v1 = vsub.f32 0.0, %v3169_v41  ;;  %v5052_v4 = vmul.u32 3266489909, %v7887_v38  ;;  %v6636_v0 = vshrl.u32 %v5049_v18, 16 }
 0x403   : > { %v3178_v56 = vsub.f32 0.0, %v3170_v6  ;;  %v3179_v20 = vsub.f32 0.0, %v3171_v8  ;;  %v6637_v31 = vshrl.u32 %v5050_v59, 16  ;;  %v6638_v37 = vshrl.u32 %v5051_v47, 16 }
 0x404   : > { %v3180_v3 = vsub.f32 0.0, %v3172_v22  ;;  %v3185_v21 = vmax.f32 %v3177_v1, 1e-10  ;;  %v6639_v7 = vshrl.u32 %v5052_v4, 16  ;;  %v5073_v53 = vxor.u32 %v6636_v0, %v5049_v18 }
 0x405   : > { %v3186_v62 = vmax.f32 %v3178_v56, 1e-10  ;;  %v3187_v36 = vmax.f32 %v3179_v20, 1e-10  ;;  %v5074_v30 = vxor.u32 %v6637_v31, %v5050_v59 }
 0x406   : > { %v3188_v25 = vmax.f32 %v3180_v3, 1e-10  ;;  %v3201_v14 = vshra.s32 %v3185_v21, 23  ;;  %v3225_v46 = vand.u32 8388607, %v3185_v21 }
 0x407   : > { %v3202_v33 = vshra.s32 %v3186_v62, 23  ;;  %v3226_v16 = vand.u32 8388607, %v3186_v62  ;;  %v3203_v32 = vshra.s32 %v3187_v36, 23  ;;  %v3227_v23 = vand.u32 8388607, %v3187_v36 }
 0x408   : > { %v3204_v49 = vshra.s32 %v3188_v25, 23  ;;  %v3228_v15 = vand.u32 8388607, %v3188_v25  ;;  %v3209_v44 = vand.u32 255, %v3201_v14  ;;  %v3233_v13 = vor.u32 1065353216, %v3225_v46 }
 0x409   : > { %v3210_v10 = vand.u32 255, %v3202_v33  ;;  %v3234_v24 = vor.u32 1065353216, %v3226_v16  ;;  %v3211_v55 = vand.u32 255, %v3203_v32  ;;  %v3235_v57 = vor.u32 1065353216, %v3227_v23 }
 0x40a   : > { %v3212_v39 = vand.u32 255, %v3204_v49  ;;  %v3236_v19 = vor.u32 1065353216, %v3228_v15  ;;  %v6472_v41 = vadd.s32 4294967169, %v3209_v44  ;;  %v3249_v45 = vmul.f32 -0.05657085, %v3233_v13 }
 0x40b   : > { %v6473_v6 = vadd.s32 4294967169, %v3210_v10  ;;  %v3250_v38 = vmul.f32 -0.05657085, %v3234_v24  ;;  %v6474_v8 = vadd.s32 4294967169, %v3211_v55  ;;  %v3251_v18 = vmul.f32 -0.05657085, %v3235_v57 }
 0x40c   : > { %v6475_v22 = vadd.s32 4294967169, %v3212_v39  ;;  %v3252_v59 = vmul.f32 -0.05657085, %v3236_v19  ;;  %v3257_v1 = vadd.f32 0.44717956, %v3249_v45  ;;  %v3313_v20 = vcvt.s32.f32 %v6472_v41 }
 0x40d   : > { %v3258_v56 = vadd.f32 0.44717956, %v3250_v38  ;;  %v3314_v3 = vcvt.s32.f32 %v6473_v6  ;;  %v3259_v0 = vadd.f32 0.44717956, %v3251_v18  ;;  %v3315_v21 = vcvt.s32.f32 %v6474_v8 }
 0x40e   : > { %v3260_v31 = vadd.f32 0.44717956, %v3252_v59  ;;  %v3316_v62 = vcvt.s32.f32 %v6475_v22  ;;  %v3265_v36 = vmul.f32 %v3257_v1, %v3233_v13  ;;  %v3321_v14 = vmul.f32 0.6931472, %v3313_v20 }
 0x40f   : > { %v3266_v25 = vmul.f32 %v3258_v56, %v3234_v24  ;;  %v3322_v33 = vmul.f32 0.6931472, %v3314_v3  ;;  %v3267_v46 = vmul.f32 %v3259_v0, %v3235_v57  ;;  %v3323_v32 = vmul.f32 0.6931472, %v3315_v21 }
 0x410   : > { %v3268_v16 = vmul.f32 %v3260_v31, %v3236_v19  ;;  %v3324_v49 = vmul.f32 0.6931472, %v3316_v62  ;;  %v3273_v23 = vadd.f32 -1.4699568, %v3265_v36  ;;  %v5075_v44 = vxor.u32 %v6638_v37, %v5051_v47 }
 0x411   : > { %v3274_v15 = vadd.f32 -1.4699568, %v3266_v25  ;;  %v5076_v10 = vxor.u32 %v6639_v7, %v5052_v4  ;;  %v3275_v55 = vadd.f32 -1.4699568, %v3267_v46  ;;  %v5081_v41 = vand.u32 8388607, %v5073_v53 }
 0x412   : > { %v3276_v39 = vadd.f32 -1.4699568, %v3268_v16  ;;  %v3281_v6 = vmul.f32 %v3273_v23, %v3233_v13  ;;  %v5082_v38 = vand.u32 8388607, %v5074_v30  ;;  %v5083_v8 = vand.u32 8388607, %v5075_v44 }
 0x413   : > { %v3282_v45 = vmul.f32 %v3274_v15, %v3234_v24  ;;  %v3283_v22 = vmul.f32 %v3275_v55, %v3235_v57  ;;  %v5084_v59 = vand.u32 8388607, %v5076_v10  ;;  %v5089_v1 = vor.u32 1065353216, %v5081_v41 }
 0x414   : > { %v3284_v18 = vmul.f32 %v3276_v39, %v3236_v19  ;;  %v3289_v56 = vadd.f32 2.8212025, %v3281_v6  ;;  %v5090_v3 = vor.u32 1065353216, %v5082_v38  ;;  %v5091_v0 = vor.u32 1065353216, %v5083_v8 }
 0x415   : > { %v3290_v20 = vadd.f32 2.8212025, %v3282_v45  ;;  %v3291_v31 = vadd.f32 2.8212025, %v3283_v22  ;;  %v5092_v62 = vor.u32 1065353216, %v5084_v59  ;;  %v6644_v47 = vadd.f32 -1.0, %v5089_v1 }
 0x416   : > { %v3292_v21 = vadd.f32 2.8212025, %v3284_v18  ;;  %v3297_v4 = vmul.f32 %v3289_v56, %v3233_v13  ;;  %v6645_v7 = vadd.f32 -1.0, %v5090_v3  ;;  %v6646_v53 = vadd.f32 -1.0, %v5091_v0 }
 0x417   : > { %v3298_v37 = vmul.f32 %v3290_v20, %v3234_v24  ;;  %v3299_v36 = vmul.f32 %v3291_v31, %v3235_v57  ;;  %v6647_v30 = vadd.f32 -1.0, %v5092_v62  ;;  %v5113_v46 = vadd.f32 5.9604645e-08, %v6644_v47 }
 0x418   : > { %v3300_v25 = vmul.f32 %v3292_v21, %v3236_v19  ;;  %v3305_v16 = vadd.f32 -1.7417939, %v3297_v4  ;;  %v5114_v15 = vadd.f32 5.9604645e-08, %v6645_v7  ;;  %v5115_v44 = vadd.f32 5.9604645e-08, %v6646_v53 }
 0x419   : > { %v3306_v23 = vadd.f32 -1.7417939, %v3298_v37  ;;  %v3307_v10 = vadd.f32 -1.7417939, %v3299_v36  ;;  %v5116_v39 = vadd.f32 5.9604645e-08, %v6647_v30  ;;  %v5129_v41 = vshra.s32 %v5113_v46, 23 }
 0x41a   : > { %v3308_v55 = vadd.f32 -1.7417939, %v3300_v25  ;;  %v3329_v6 = vadd.f32 %v3321_v14, %v3305_v16  ;;  %v5130_v38 = vshra.s32 %v5114_v15, 23  ;;  %v5131_v8 = vshra.s32 %v5115_v44, 23 }
 0x41b   : > { %v3330_v45 = vadd.f32 %v3322_v33, %v3306_v23  ;;  %v3331_v13 = vadd.f32 %v3323_v32, %v3307_v10  ;;  %v5132_v22 = vshra.s32 %v5116_v39, 23  ;;  %v5137_v18 = vand.u32 255, %v5129_v41 }
 0x41c   : > { %v3332_v24 = vadd.f32 %v3324_v49, %v3308_v55  ;;  %v7892_v57 = vsub.f32 %v7480_v51, %v3329_v6  ;;  %v5138_v59 = vand.u32 255, %v5130_v38  ;;  %v5139_v1 = vand.u32 255, %v5131_v8 }
 0x41d   : > { %v7895_v19 = vsub.f32 %v7492_v40, %v3330_v45  ;;  %v7898_v56 = vsub.f32 %v7482_v5, %v3331_v13  ;;  %v5140_v33 = vand.u32 255, %v5132_v22  ;;  %v6652_v20 = vadd.s32 4294967169, %v5137_v18 }
 0x41e   : > { %v7901_v14 = vsub.f32 %v7494_v2, %v3332_v24  ;;  %v6653_v32 = vadd.s32 4294967169, %v5138_v59  ;;  %v6654_v49 = vadd.s32 4294967169, %v5139_v1  ;;  %v5153_v3 = vand.u32 8388607, %v5113_v46 }
 0x41f   : > { %v5154_v0 = vand.u32 8388607, %v5114_v15  ;;  %v3346_v51 = vmax.f32 %v7892_v57, %v7898_v56  ;;  %v6655_v31 = vadd.s32 4294967169, %v5140_v33  ;;  %v5155_v21 = vand.u32 8388607, %v5115_v44 }
 0x420   : > { %v3347_v40 = vmax.f32 %v7895_v19, %v7901_v14  ;;  %v5156_v62 = vand.u32 8388607, %v5116_v39  ;;  %v5161_v5 = vor.u32 1065353216, %v5153_v3  ;;  %v5241_v4 = vcvt.s32.f32 %v6652_v20 }
 0x421   : > { %v5162_v47 = vor.u32 1065353216, %v5154_v0  ;;  %v5163_v37 = vor.u32 1065353216, %v5155_v21  ;;  %v5242_v7 = vcvt.s32.f32 %v6653_v32  ;;  %v5243_v53 = vcvt.s32.f32 %v6654_v49 }
 0x422   : > { %v3348_v2 = vmax.f32 %v3346_v51, %v3347_v40  ;;  %v5164_v36 = vor.u32 1065353216, %v5156_v62  ;;  %v5177_v25 = vmul.f32 -0.05657085, %v5161_v5  ;;  %v5244_v46 = vcvt.s32.f32 %v6655_v31 }
 0x423   : > { %v5178_v30 = vmul.f32 -0.05657085, %v5162_v47  ;;  %v5179_v16 = vmul.f32 -0.05657085, %v5163_v37  ;;  %v5249_v23 = vmul.f32 0.6931472, %v5241_v4 }
 0x424   : > { %3349 = vmax.xlane.f32.xlu1 %v3348_v2  ;;  %v5250_v15 = vmul.f32 0.6931472, %v5242_v7  ;;  %v5180_v10 = vmul.f32 -0.05657085, %v5164_v36  ;;  %v5185_v55 = vadd.f32 0.44717956, %v5177_v25 }
 0x425   : > { %v5186_v41 = vadd.f32 0.44717956, %v5178_v30  ;;  %v5187_v44 = vadd.f32 0.44717956, %v5179_v16  ;;  %v5251_v39 = vmul.f32 0.6931472, %v5243_v53 }
 0x426   : > { %v5252_v6 = vmul.f32 0.6931472, %v5244_v46  ;;  %v5188_v45 = vadd.f32 0.44717956, %v5180_v10  ;;  %v5193_v38 = vmul.f32 %v5185_v55, %v5161_v5  ;;  %v5508_v13 = vadd.s32 9, %v7207_v26 }
 0x427   : > { %v5194_v8 = vmul.f32 %v5186_v41, %v5162_v47  ;;  %v5195_v24 = vmul.f32 %v5187_v44, %v5163_v37  ;;  %v5509_v22 = vadd.s32 9, %v7213_v28  ;;  %v5510_v18 = vadd.s32 9, %v7210_v27 }
 0x428   : > { %v5511_v59 = vadd.s32 9, %v7216_v29  ;;  %v5196_v1 = vmul.f32 %v5188_v45, %v5164_v36  ;;  %v5201_v33 = vadd.f32 -1.4699568, %v5193_v38  ;;  %v6668_v32 = vshrl.u32 %v5508_v13, 16 }
 0x429   : > { %v5202_v20 = vadd.f32 -1.4699568, %v5194_v8  ;;  %v5203_v49 = vadd.f32 -1.4699568, %v5195_v24  ;;  %v6669_v3 = vshrl.u32 %v5509_v22, 16  ;;  %v6670_v0 = vshrl.u32 %v5510_v18, 16 }
 0x42a   : > { %v6671_v51 = vshrl.u32 %v5511_v59, 16  ;;  %v5204_v40 = vadd.f32 -1.4699568, %v5196_v1  ;;  %v5209_v31 = vmul.f32 %v5201_v33, %v5161_v5  ;;  %v5532_v62 = vxor.u32 %v6668_v32, %v5508_v13 }
 0x42b   : > { %v5210_v21 = vmul.f32 %v5202_v20, %v5162_v47  ;;  %v5211_v26 = vmul.f32 %v5203_v49, %v5163_v37  ;;  %v5533_v4 = vxor.u32 %v6669_v3, %v5509_v22  ;;  %v5534_v2 = vxor.u32 %v6670_v0, %v5510_v18 }
 0x42c   : > { %v5535_v28 = vxor.u32 %v6671_v51, %v5511_v59  ;;  %v5212_v7 = vmul.f32 %v5204_v40, %v5164_v36  ;;  %v5217_v27 = vadd.f32 2.8212025, %v5209_v31  ;;  %v5540_v29 = vmul.u32 2246822507, %v5532_v62 }
 0x42d   : > { %v5218_v53 = vadd.f32 2.8212025, %v5210_v21  ;;  %v5219_v25 = vadd.f32 2.8212025, %v5211_v26  ;;  %v5541_v30 = vmul.u32 2246822507, %v5533_v4 }
 0x42e   : > { %v5542_v46 = vmul.u32 2246822507, %v5534_v2  ;;  %v5220_v16 = vadd.f32 2.8212025, %v5212_v7  ;;  %v5225_v10 = vmul.f32 %v5217_v27, %v5161_v5  ;;  %v5543_v41 = vmul.u32 2246822507, %v5535_v28 }
 0x42f   : > { %v5226_v55 = vmul.f32 %v5218_v53, %v5162_v47  ;;  %v5227_v44 = vmul.f32 %v5219_v25, %v5163_v37  ;;  %v6676_v45 = vshrl.u32 %v5540_v29, 13  ;;  %v6677_v38 = vshrl.u32 %v5541_v30, 13 }
 0x430   : > { %v6678_v8 = vshrl.u32 %v5542_v46, 13  ;;  %v5228_v13 = vmul.f32 %v5220_v16, %v5164_v36  ;;  %v5233_v24 = vadd.f32 -1.7417939, %v5225_v10  ;;  %v6679_v18 = vshrl.u32 %v5543_v41, 13 }
 0x431   : > { %v5234_v22 = vadd.f32 -1.7417939, %v5226_v55  ;;  %v5235_v59 = vadd.f32 -1.7417939, %v5227_v44  ;;  %v5564_v1 = vxor.u32 %v6676_v45, %v5540_v29  ;;  %v5565_v33 = vxor.u32 %v6677_v38, %v5541_v30 }
 0x432   : > { %v5566_v20 = vxor.u32 %v6678_v8, %v5542_v46  ;;  %v5236_v32 = vadd.f32 -1.7417939, %v5228_v13  ;;  %v5257_v49 = vadd.f32 %v5249_v23, %v5233_v24  ;;  %v5567_v0 = vxor.u32 %v6679_v18, %v5543_v41 }
 0x433   : > { %v5258_v3 = vadd.f32 %v5250_v15, %v5234_v22  ;;  %v5259_v51 = vadd.f32 %v5251_v39, %v5235_v59  ;;  %v5572_v5 = vmul.u32 3266489909, %v5564_v1  ;;  %v5573_v47 = vmul.u32 3266489909, %v5565_v33 }
 0x434   : > { %v5260_v40 = vadd.f32 %v5252_v6, %v5236_v32  ;;  %v5265_v37 = vsub.f32 0.0, %v5257_v49  ;;  %v5574_v21 = vmul.u32 3266489909, %v5566_v20  ;;  %v5575_v36 = vmul.u32 3266489909, %v5567_v0 }
 0x435   : > { %v5266_v31 = vsub.f32 0.0, %v5258_v3  ;;  %v5267_v62 = vsub.f32 0.0, %v5259_v51  ;;  %v6684_v26 = vshrl.u32 %v5572_v5, 16  ;;  %v6685_v4 = vshrl.u32 %v5573_v47, 16 }
 0x436   : > { %v5268_v2 = vsub.f32 0.0, %v5260_v40  ;;  %v5273_v28 = vmax.f32 %v5265_v37, 1e-10  ;;  %v6686_v27 = vshrl.u32 %v5574_v21, 16  ;;  %v6687_v29 = vshrl.u32 %v5575_v36, 16 }
 0x437   : > { %v5274_v7 = vmax.f32 %v5266_v31, 1e-10  ;;  %v5275_v53 = vmax.f32 %v5267_v62, 1e-10  ;;  %v5596_v23 = vxor.u32 %v6684_v26, %v5572_v5  ;;  %v5597_v15 = vxor.u32 %v6685_v4, %v5573_v47 }
 0x438   : > { %v5276_v25 = vmax.f32 %v5268_v2, 1e-10  ;;  %v5289_v39 = vshra.s32 %v5273_v28, 23  ;;  %v5313_v46 = vand.u32 8388607, %v5273_v28  ;;  %v5598_v55 = vxor.u32 %v6686_v27, %v5574_v21 }
 0x439   : > { %v5290_v30 = vshra.s32 %v5274_v7, 23  ;;  %v5291_v6 = vshra.s32 %v5275_v53, 23  ;;  %v5314_v16 = vand.u32 8388607, %v5274_v7  ;;  %v5315_v10 = vand.u32 8388607, %v5275_v53 }
 0x43a   : > { %v5292_v41 = vshra.s32 %v5276_v25, 23  ;;  %v5297_v44 = vand.u32 255, %v5289_v39  ;;  %v5316_v38 = vand.u32 8388607, %v5276_v25  ;;  %v5321_v13 = vor.u32 1065353216, %v5313_v46 }
 0x43b   : > { %v5298_v45 = vand.u32 255, %v5290_v30  ;;  %v5299_v8 = vand.u32 255, %v5291_v6  ;;  %v5322_v24 = vor.u32 1065353216, %v5314_v16  ;;  %v5323_v22 = vor.u32 1065353216, %v5315_v10 }
 0x43c   : > { %v5300_v18 = vand.u32 255, %v5292_v41  ;;  %v6660_v59 = vadd.s32 4294967169, %v5297_v44  ;;  %v5324_v33 = vor.u32 1065353216, %v5316_v38  ;;  %v5337_v32 = vmul.f32 -0.05657085, %v5321_v13 }
 0x43d   : > { %v6661_v1 = vadd.s32 4294967169, %v5298_v45  ;;  %v6662_v20 = vadd.s32 4294967169, %v5299_v8  ;;  %v5338_v49 = vmul.f32 -0.05657085, %v5322_v24  ;;  %v5599_v3 = vxor.u32 %v6687_v29, %v5575_v36 }
 0x43e   : > { %v6663_v0 = vadd.s32 4294967169, %v5300_v18  ;;  %v5339_v51 = vmul.f32 -0.05657085, %v5323_v22  ;;  %v5340_v5 = vmul.f32 -0.05657085, %v5324_v33  ;;  %v5401_v47 = vcvt.s32.f32 %v6660_v59 }
 0x43f   : > { %v5345_v40 = vadd.f32 0.44717956, %v5337_v32  ;;  %v5346_v37 = vadd.f32 0.44717956, %v5338_v49  ;;  %v5402_v31 = vcvt.s32.f32 %v6661_v1  ;;  %v5403_v21 = vcvt.s32.f32 %v6662_v20 }
 0x440   : > { %v5347_v62 = vadd.f32 0.44717956, %v5339_v51  ;;  %v5348_v26 = vadd.f32 0.44717956, %v5340_v5  ;;  %v5404_v4 = vcvt.s32.f32 %v6663_v0  ;;  %v5409_v2 = vmul.f32 0.6931472, %v5401_v47  ;;  %v7911_v5 = vpop.xlane.xlu1 %1252 }
 0x441   : > { %v5353_v28 = vmul.f32 %v5345_v40, %v5321_v13  ;;  %v5354_v7 = vmul.f32 %v5346_v37, %v5322_v24  ;;  %v5410_v27 = vmul.f32 0.6931472, %v5402_v31  ;;  %v5411_v53 = vmul.f32 0.6931472, %v5403_v21 }
 0x442   : > { %v5355_v25 = vmul.f32 %v5347_v62, %v5323_v22  ;;  %v5356_v39 = vmul.f32 %v5348_v26, %v5324_v33  ;;  %v5412_v30 = vmul.f32 0.6931472, %v5404_v4  ;;  %v5604_v36 = vand.u32 8388607, %v5596_v23 }
 0x443   : > { %v5361_v29 = vadd.f32 -1.4699568, %v5353_v28  ;;  %v5362_v46 = vadd.f32 -1.4699568, %v5354_v7  ;;  %v5605_v6 = vand.u32 8388607, %v5597_v15  ;;  %vm1259_vm1 = vcmp.eq.f32.partialorder %v7508_v61, %v7911_v5 }
 0x444   : > { %v5363_v16 = vadd.f32 -1.4699568, %v5355_v25  ;;  %v5364_v10 = vadd.f32 -1.4699568, %v5356_v39  ;;  %v5606_v41 = vand.u32 8388607, %v5598_v55  ;;  %vm1260_vm2 = vcmp.eq.f32.partialorder %v7512_v17, %v7911_v5 }
 0x445   : > { %v5369_v44 = vmul.f32 %v5361_v29, %v5321_v13  ;;  %v5370_v45 = vmul.f32 %v5362_v46, %v5322_v24  ;;  %v5607_v38 = vand.u32 8388607, %v5599_v3  ;;  %v5612_v8 = vor.u32 1065353216, %v5604_v36 }
 0x446   : > { %v5371_v18 = vmul.f32 %v5363_v16, %v5323_v22  ;;  %v5372_v59 = vmul.f32 %v5364_v10, %v5324_v33  ;;  %v5613_v1 = vor.u32 1065353216, %v5605_v6  ;;  %v5614_v20 = vor.u32 1065353216, %v5606_v41 }
 0x447   : > { %v5377_v32 = vadd.f32 2.8212025, %v5369_v44  ;;  %v5378_v49 = vadd.f32 2.8212025, %v5370_v45  ;;  %v5615_v0 = vor.u32 1065353216, %v5607_v38  ;;  %v6692_v51 = vadd.f32 -1.0, %v5612_v8  ;;  %v7915_v45 = vpop.xlane.xlu0 %1775 }
 0x448   : > { %v5379_v23 = vadd.f32 2.8212025, %v5371_v18  ;;  %v5380_v47 = vadd.f32 2.8212025, %v5372_v59  ;;  %v6693_v15 = vadd.f32 -1.0, %v5613_v1  ;;  %v6694_v40 = vadd.f32 -1.0, %v5614_v20 }
 0x449   : > { %v5385_v37 = vmul.f32 %v5377_v32, %v5321_v13  ;;  %v5386_v55 = vmul.f32 %v5378_v49, %v5322_v24  ;;  %v6695_v31 = vadd.f32 -1.0, %v5615_v0  ;;  %v5636_v21 = vadd.f32 5.9604645e-08, %v6692_v51 }
 0x44a   : > { %v5387_v3 = vmul.f32 %v5379_v23, %v5323_v22  ;;  %v5388_v62 = vmul.f32 %v5380_v47, %v5324_v33  ;;  %v5637_v26 = vadd.f32 5.9604645e-08, %v6693_v15  ;;  %v5638_v4 = vadd.f32 5.9604645e-08, %v6694_v40 }
 0x44b   : > { %v5393_v28 = vadd.f32 -1.7417939, %v5385_v37  ;;  %v5394_v7 = vadd.f32 -1.7417939, %v5386_v55  ;;  %v5639_v25 = vadd.f32 5.9604645e-08, %v6695_v31  ;;  %v5652_v39 = vshra.s32 %v5636_v21, 23 }
 0x44c   : > { %v5395_v36 = vadd.f32 -1.7417939, %v5387_v3  ;;  %v5396_v29 = vadd.f32 -1.7417939, %v5388_v62  ;;  %v5653_v46 = vshra.s32 %v5637_v26, 23  ;;  %v5654_v6 = vshra.s32 %v5638_v4, 23 }
 0x44d   : > { %v5417_v16 = vadd.f32 %v5409_v2, %v5393_v28  ;;  %v5418_v13 = vadd.f32 %v5410_v27, %v5394_v7  ;;  %v5655_v24 = vshra.s32 %v5639_v25, 23  ;;  %v5660_v10 = vand.u32 255, %v5652_v39  ;;  %v7947_v39 = vpop.xlane.xlu1 %2298 }
 0x44e   : > { %v5419_v41 = vadd.f32 %v5411_v53, %v5395_v36  ;;  %v5420_v22 = vadd.f32 %v5412_v30, %v5396_v29  ;;  %v5661_v33 = vand.u32 255, %v5653_v46  ;;  %v5662_v44 = vand.u32 255, %v5654_v6 }
 0x44f   : > { %vm1261_vm3 = vcmp.eq.f32.partialorder %v7516_v63, %v7911_v5  ;;  %v7922_v38 = vsub.f32 %v7471_v58, %v5417_v16  ;;  %v7925_v2 = vsub.f32 %v7475_v35, %v5418_v13  ;;  %v5663_v27 = vand.u32 255, %v5655_v24  ;;  %v8985_v24 = vld [vmem:[#allocation13_spill] sm:$0xff] }
 0x450   : > { %v6700_v8 = vadd.s32 4294967169, %v5660_v10  ;;  %vm1262_vm4 = vcmp.eq.f32.partialorder %v7522_v34, %v7911_v5  ;;  %v7930_v53 = vsub.f32 %v7473_v42, %v5419_v41  ;;  %v7933_v30 = vsub.f32 %v7477_v48, %v5420_v22  ;;  %v8986_v22 = vld [vmem:[#allocation11_spill] sm:$0xff] }
 0x451   : > { %v6701_v18 = vadd.s32 4294967169, %v5661_v33  ;;  %v6702_v59 = vadd.s32 4294967169, %v5662_v44  ;;  %v5676_v1 = vand.u32 8388607, %v5636_v21  ;;  %v5677_v20 = vand.u32 8388607, %v5637_v26 }
 0x452   : > { %v5764_v32 = vcvt.s32.f32 %v6700_v8  ;;  %vm1782_vm5 = vcmp.eq.f32.partialorder %v7486_v50, %v7915_v45  ;;  %v5433_v49 = vmax.f32 %v7922_v38, %v7930_v53  ;;  %v5434_v0 = vmax.f32 %v7925_v2, %v7933_v30  ;;  %v8987_v44 = vld [vmem:[#allocation10_spill] sm:$0xff] }
 0x453   : > { %v5678_v51 = vand.u32 8388607, %v5638_v4  ;;  %v5679_v23 = vand.u32 8388607, %v5639_v25  ;;  %v6703_v47 = vadd.s32 4294967169, %v5663_v27  ;;  %v5684_v15 = vor.u32 1065353216, %v5676_v1 }
 0x454   : > { %v5685_v40 = vor.u32 1065353216, %v5677_v20  ;;  %v5765_v37 = vcvt.s32.f32 %v6701_v18  ;;  %v5435_v55 = vmax.f32 %v5433_v49, %v5434_v0  ;;  %v5766_v3 = vcvt.s32.f32 %v6702_v59  ;;  %v8988_v8 = vld [vmem:[#allocation14_spill] sm:$0xff]  ;;  %v8989_v1 = vld [vmem:[#allocation12_spill] sm:$0xff]  ;;  %v8990_v0 = vld [vmem:[#allocation15_spill] sm:$0xff] }
 0x455   : > { %v5686_v31 = vor.u32 1065353216, %v5678_v51  ;;  %v5687_v21 = vor.u32 1065353216, %v5679_v23  ;;  %v5700_v62 = vmul.f32 -0.05657085, %v5684_v15  ;;  %v1267_v28 = vsel %vm1259_vm1, %v7192_v12, 2147483647 }
 0x456   : > { %v5701_v26 = vmul.f32 -0.05657085, %v5685_v40  ;;  %vm1783_vm6 = vcmp.eq.f32.partialorder %v7498_v54, %v7915_v45  ;;  %5436 = vmax.xlane.f32.xlu1 %v5435_v55  ;;  %v5772_v25 = vmul.f32 0.6931472, %v5764_v32  ;;  %vm1784_vm7 = vcmp.eq.f32.partialorder %v7490_v9, %v7915_v45 }
 0x457   : > { %v5702_v4 = vmul.f32 -0.05657085, %v5686_v31  ;;  %v5703_v7 = vmul.f32 -0.05657085, %v5687_v21  ;;  %v5708_v36 = vadd.f32 0.44717956, %v5700_v62  ;;  %v5767_v46 = vcvt.s32.f32 %v6703_v47 }
 0x458   : > { %v5709_v29 = vadd.f32 0.44717956, %v5701_v26  ;;  %v5773_v6 = vmul.f32 0.6931472, %v5765_v37  ;;  %v5774_v61 = vmul.f32 0.6931472, %v5766_v3  ;;  %vm1785_vm8 = vcmp.eq.f32.partialorder %v8985_v24, %v7915_v45 }
 0x459   : > { %v5710_v16 = vadd.f32 0.44717956, %v5702_v4  ;;  %v5711_v13 = vadd.f32 0.44717956, %v5703_v7  ;;  %v5716_v10 = vmul.f32 %v5708_v36, %v5684_v15  ;;  %v1268_v33 = vsel %vm1260_vm2, %v8986_v22, 2147483647 }
 0x45a   : > { %v5717_v41 = vmul.f32 %v5709_v29, %v5685_v40  ;;  %v1269_v27 = vsel %vm1261_vm3, %v8987_v44, 2147483647  ;;  %vm2305_vm9 = vcmp.eq.f32.partialorder %v8988_v8, %v7947_v39  ;;  %v1270_v20 = vsel %vm1262_vm4, %v8989_v1, 2147483647  ;;  %v8007_v8 = vpop.xlane.xlu1 %2821 }
 0x45b   : > { %v5718_v18 = vmul.f32 %v5710_v16, %v5686_v31  ;;  %v5719_v59 = vmul.f32 %v5711_v13, %v5687_v21  ;;  %vm1275_vm10 = vcmp.lt.s32.totalorder %v1267_v28, %v1269_v27  ;;  %v5724_v32 = vadd.f32 -1.4699568, %v5716_v10  ;;  %v8991_v10 = vld [vmem:[#allocation16_spill] sm:$0xff] }
 0x45c   : > { %v5725_v49 = vadd.f32 -1.4699568, %v5717_v41  ;;  %v1276_v17 = vsel %vm1275_vm10, %v1267_v28, %v1269_v27  ;;  %vm1277_vm11 = vcmp.lt.s32.totalorder %v1268_v33, %v1270_v20  ;;  %vm2306_vm12 = vcmp.eq.f32.partialorder %v8990_v0, %v7947_v39 }
 0x45d   : > { %v5726_v63 = vadd.f32 -1.4699568, %v5718_v18  ;;  %v5727_v51 = vadd.f32 -1.4699568, %v5719_v59  ;;  %v1278_v23 = vsel %vm1277_vm11, %v1268_v33, %v1270_v20  ;;  %v1790_v47 = vsel %vm1782_vm5, %v7192_v12, 2147483647 }
 0x45e   : > { %v5732_v37 = vmul.f32 %v5724_v32, %v5684_v15  ;;  %v5733_v55 = vmul.f32 %v5725_v49, %v5685_v40  ;;  %v5775_v34 = vmul.f32 0.6931472, %v5767_v46  ;;  %vm1279_vm13 = vcmp.lt.s32.totalorder %v1276_v17, %v1278_v23  ;;  %v8992_v20 = vld [vmem:[#allocation17_spill] sm:$0xff] }
 0x45f   : > { %v5734_v3 = vmul.f32 %v5726_v63, %v5686_v31  ;;  %v5735_v62 = vmul.f32 %v5727_v51, %v5687_v21  ;;  %v1791_v26 = vsel %vm1783_vm6, %v8986_v22, 2147483647  ;;  %v1792_v28 = vsel %vm1784_vm7, %v8987_v44, 2147483647 }
 0x460   : > { %v5740_v4 = vadd.f32 2.8212025, %v5732_v37  ;;  %v5741_v7 = vadd.f32 2.8212025, %v5733_v55  ;;  %v7981_v50 = vsel %vm1279_vm13, %v1276_v17, %v1278_v23  ;;  %vm1798_vm14 = vcmp.lt.s32.totalorder %v1790_v47, %v1792_v28 }
 0x461   : > { %v5742_v36 = vadd.f32 2.8212025, %v5734_v3  ;;  %v5743_v29 = vadd.f32 2.8212025, %v5735_v62  ;;  %v1793_v46 = vsel %vm1785_vm8, %v8989_v1, 2147483647  ;;  %v1799_v16 = vsel %vm1798_vm14, %v1790_v47, %v1792_v28 }
 0x462   : > { %v5748_v54 = vmul.f32 %v5740_v4, %v5684_v15  ;;  %v5749_v13 = vmul.f32 %v5741_v7, %v5685_v40  ;;  %vm1800_vm15 = vcmp.lt.s32.totalorder %v1791_v26, %v1793_v46  ;;  %vm2307_vm1 = vcmp.eq.f32.partialorder %v8991_v10, %v7947_v39 }
 0x463   : > { %v5750_v9 = vmul.f32 %v5742_v36, %v5686_v31  ;;  %v5751_v41 = vmul.f32 %v5743_v29, %v5687_v21  ;;  %v1282_v33 = vshra.s32 %v7981_v50, 16  ;;  %v1801_v27 = vsel %vm1800_vm15, %v1791_v26, %v1793_v46 }
 0x464   : > { %v5756_v18 = vadd.f32 -1.7417939, %v5748_v54  ;;  %v5757_v59 = vadd.f32 -1.7417939, %v5749_v13  ;;  %vm1802_vm2 = vcmp.lt.s32.totalorder %v1799_v16, %v1801_v27  ;;  %vm2308_vm3 = vcmp.eq.f32.partialorder %v8992_v20, %v7947_v39 }
 0x465   : > { %v5758_v24 = vadd.f32 -1.7417939, %v5750_v9  ;;  %v5759_v32 = vadd.f32 -1.7417939, %v5751_v41  ;;  %v7992_v49 = vsel %vm1802_vm2, %v1799_v16, %v1801_v27  ;;  %v2313_v15 = vsel %vm2305_vm9, %v7192_v12, 2147483647  ;;  %v8016_v27 = vpop.xlane.xlu1 %3344 }
 0x466   : > { %v5780_v40 = vadd.f32 %v5772_v25, %v5756_v18  ;;  %v5781_v31 = vadd.f32 %v5773_v6, %v5757_v59  ;;  %v1805_v21 = vshra.s32 %v7992_v49, 16  ;;  %v2315_v17 = vsel %vm2307_vm1, %v8987_v44, 2147483647 }
 0x467   : > { %v5782_v63 = vadd.f32 %v5774_v61, %v5758_v24  ;;  %v5783_v51 = vadd.f32 %v5775_v34, %v5759_v32  ;;  %v2314_v23 = vsel %vm2306_vm12, %v8986_v22, 2147483647  ;;  %v2316_v25 = vsel %vm2308_vm3, %v8989_v1, 2147483647 }
 0x468   : > { %v5788_v47 = vsub.f32 0.0, %v5780_v40  ;;  %v5789_v37 = vsub.f32 0.0, %v5781_v31  ;;  %vm2321_vm4 = vcmp.lt.s32.totalorder %v2313_v15, %v2315_v17  ;;  %v8010_v26 = vcvt.s32.f32 %v1282_v33 }
 0x469   : > { %v5790_v6 = vsub.f32 0.0, %v5782_v63  ;;  %v5791_v55 = vsub.f32 0.0, %v5783_v51  ;;  %v8012_v61 = vcvt.s32.f32 %v1805_v21  ;;  %v8014_v4 = vsel %vm2321_vm4, %v2313_v15, %v2315_v17 }
 0x46a   : > { %v5796_v3 = vmax.f32 %v5788_v47, 1e-10  ;;  %v5797_v62 = vmax.f32 %v5789_v37, 1e-10  ;;  %vm2323_vm5 = vcmp.lt.s32.totalorder %v2314_v23, %v2316_v25 }
 0x46b   : > { %v5798_v34 = vmax.f32 %v5790_v6, 1e-10  ;;  %v5799_v28 = vmax.f32 %v5791_v55, 1e-10  ;;  %v2324_v51 = vsel %vm2323_vm5, %v2314_v23, %v2316_v25 }
 0x46c   : > { %v5812_v0 = vshra.s32 %v5796_v3, 23  ;;  %v5813_v7 = vshra.s32 %v5797_v62, 23  ;;  %v5836_v36 = vand.u32 8388607, %v5796_v3  ;;  %v5837_v29 = vand.u32 8388607, %v5797_v62 }
 0x46d   : > { %v5814_v46 = vshra.s32 %v5798_v34, 23  ;;  %v5815_v16 = vshra.s32 %v5799_v28, 23  ;;  %v5838_v54 = vand.u32 8388607, %v5798_v34  ;;  %v5839_v13 = vand.u32 8388607, %v5799_v28 }
 0x46e   : > { %v5820_v10 = vand.u32 255, %v5812_v0  ;;  %v5821_v9 = vand.u32 255, %v5813_v7  ;;  %v5844_v41 = vor.u32 1065353216, %v5836_v36  ;;  %v5845_v33 = vor.u32 1065353216, %v5837_v29  ;;  %v8993_v28 = vld [vmem:[#allocation22_spill] sm:$0xff]  ;;  %v8021_v36 = vpop.xlane.xlu1 %3867  ;;  %v8994_v29 = vld [vmem:[#allocation23_spill] sm:$0xff] }
 0x46f   : > { %v5822_v18 = vand.u32 255, %v5814_v46  ;;  %v5823_v59 = vand.u32 255, %v5815_v16  ;;  %v5846_v20 = vor.u32 1065353216, %v5838_v54  ;;  %v5847_v24 = vor.u32 1065353216, %v5839_v13  ;;  %v8995_v16 = vld [vmem:[#allocation24_spill] sm:$0xff] }
 0x470   : > { %v6708_v32 = vadd.s32 4294967169, %v5820_v10  ;;  %v6709_v15 = vadd.s32 4294967169, %v5821_v9  ;;  %v5860_v40 = vmul.f32 -0.05657085, %v5844_v41  ;;  %v5861_v31 = vmul.f32 -0.05657085, %v5845_v33 }
 0x471   : > { %v6710_v21 = vadd.s32 4294967169, %v5822_v18  ;;  %v5862_v17 = vmul.f32 -0.05657085, %v5846_v20  ;;  %v5863_v63 = vmul.f32 -0.05657085, %v5847_v24  ;;  %v6711_v47 = vadd.s32 4294967169, %v5823_v59 }
 0x472   : > { %v5868_v37 = vadd.f32 0.44717956, %v5860_v40  ;;  %v5869_v6 = vadd.f32 0.44717956, %v5861_v31  ;;  %v5924_v55 = vcvt.s32.f32 %v6708_v32  ;;  %v5925_v34 = vcvt.s32.f32 %v6709_v15  ;;  %v8996_v15 = vld [vmem:[#allocation25_spill] sm:$0xff] }
 0x473   : > { %v5870_v3 = vadd.f32 0.44717956, %v5862_v17  ;;  %v5871_v62 = vadd.f32 0.44717956, %v5863_v63  ;;  %vm2828_vm6 = vcmp.eq.f32.partialorder %v8993_v28, %v8007_v8  ;;  %vm2325_vm7 = vcmp.lt.s32.totalorder %v8014_v4, %v2324_v51 }
 0x474   : > { %v5876_v0 = vmul.f32 %v5868_v37, %v5844_v41  ;;  %v5877_v7 = vmul.f32 %v5869_v6, %v5845_v33  ;;  %vm2829_vm8 = vcmp.eq.f32.partialorder %v8994_v29, %v8007_v8  ;;  %v5926_v46 = vcvt.s32.f32 %v6710_v21 }
 0x475   : > { %v5878_v23 = vmul.f32 %v5870_v3, %v5846_v20  ;;  %v5879_v25 = vmul.f32 %v5871_v62, %v5847_v24  ;;  %vm2830_vm9 = vcmp.eq.f32.partialorder %v8995_v16, %v8007_v8  ;;  %v5927_v10 = vcvt.s32.f32 %v6711_v47  ;;  %v8042_v62 = vpop.xlane.xlu1 %4390  ;;  %v8997_v16 = vld [vmem:[#allocation30_spill] sm:$0xff] }
 0x476   : > { %v5884_v54 = vadd.f32 -1.4699568, %v5876_v0  ;;  %v5885_v13 = vadd.f32 -1.4699568, %v5877_v7  ;;  %v5932_v9 = vmul.f32 0.6931472, %v5924_v55  ;;  %vm2831_vm10 = vcmp.eq.f32.partialorder %v8996_v15, %v8007_v8 }
 0x477   : > { %v5886_v18 = vadd.f32 -1.4699568, %v5878_v23  ;;  %v5887_v59 = vadd.f32 -1.4699568, %v5879_v25  ;;  %v5933_v32 = vmul.f32 0.6931472, %v5925_v34  ;;  %vm3351_vm13 = vcmp.eq.f32.partialorder %v8997_v16, %v8016_v27 }
 0x478   : > { %v5892_v40 = vmul.f32 %v5884_v54, %v5844_v41  ;;  %v5893_v31 = vmul.f32 %v5885_v13, %v5845_v33  ;;  %v2836_v21 = vsel %vm2828_vm6, %v7192_v12, 2147483647  ;;  %v2837_v17 = vsel %vm2829_vm8, %v8986_v22, 2147483647 }
 0x479   : > { %v5894_v63 = vmul.f32 %v5886_v18, %v5846_v20  ;;  %v5895_v47 = vmul.f32 %v5887_v59, %v5847_v24  ;;  %v5934_v37 = vmul.f32 0.6931472, %v5926_v46  ;;  %v2838_v6 = vsel %vm2830_vm9, %v8987_v44, 2147483647  ;;  %v8998_v18 = vld [vmem:[#allocation31_spill] sm:$0xff] }
 0x47a   : > { %v5900_v55 = vadd.f32 2.8212025, %v5892_v40  ;;  %v5901_v3 = vadd.f32 2.8212025, %v5893_v31  ;;  %v2839_v34 = vsel %vm2831_vm10, %v8989_v1, 2147483647  ;;  %vm2844_vm11 = vcmp.lt.s32.totalorder %v2836_v21, %v2838_v6 }
 0x47b   : > { %v5902_v28 = vadd.f32 2.8212025, %v5894_v63  ;;  %v5903_v0 = vadd.f32 2.8212025, %v5895_v47  ;;  %v5935_v7 = vmul.f32 0.6931472, %v5927_v10  ;;  %vm2846_vm12 = vcmp.lt.s32.totalorder %v2837_v17, %v2839_v34 }
 0x47c   : > { %v5908_v29 = vmul.f32 %v5900_v55, %v5844_v41  ;;  %v5909_v23 = vmul.f32 %v5901_v3, %v5845_v33  ;;  %v2845_v25 = vsel %vm2844_vm11, %v2836_v21, %v2838_v6  ;;  %v2847_v46 = vsel %vm2846_vm12, %v2837_v17, %v2839_v34  ;;  %v8999_v41 = vld [vmem:[#allocation32_spill] sm:$0xff]  ;;  %v8058_v21 = vpop.xlane.xlu1 %4913  ;;  %v9001_v6 = vld [vmem:[#allocation38_spill] sm:$0xff] }
 0x47d   : > { %v5910_v54 = vmul.f32 %v5902_v28, %v5846_v20  ;;  %v5911_v13 = vmul.f32 %v5903_v0, %v5847_v24  ;;  %vm3352_vm14 = vcmp.eq.f32.partialorder %v8998_v18, %v8016_v27  ;;  %v8052_v40 = vsel %vm2325_vm7, %v8014_v4, %v2324_v51  ;;  %v9000_v20 = vld [vmem:[#allocation33_spill] sm:$0xff]  ;;  %v9002_v0 = vld [vmem:[#allocation39_spill] sm:$0xff] }
 0x47e   : > { %v5916_v59 = vadd.f32 -1.7417939, %v5908_v29  ;;  %v5917_v15 = vadd.f32 -1.7417939, %v5909_v23  ;;  %vm3353_vm15 = vcmp.eq.f32.partialorder %v8999_v41, %v8016_v27  ;;  %vm2848_vm1 = vcmp.lt.s32.totalorder %v2845_v25, %v2847_v46 }
 0x47f   : > { %v5918_v33 = vadd.f32 -1.7417939, %v5910_v54  ;;  %v5919_v10 = vadd.f32 -1.7417939, %v5911_v13  ;;  %vm3354_vm2 = vcmp.eq.f32.partialorder %v9000_v20, %v8016_v27  ;;  %v3359_v17 = vsel %vm3351_vm13, %v7192_v12, 2147483647 }
 0x480   : > { %v5940_v24 = vadd.f32 %v5932_v9, %v5916_v59  ;;  %v5941_v31 = vadd.f32 %v5933_v32, %v5917_v15  ;;  %v3360_v63 = vsel %vm3352_vm14, %v8986_v22, 2147483647  ;;  %v3361_v51 = vsel %vm3353_vm15, %v8987_v44, 2147483647  ;;  %v8095_v23 = vpop.xlane.xlu1 %1257  ;;  %v9007_v20 = vld [vmem:[#allocation48_spill] sm:$0xff] }
 0x481   : > { %v5942_v47 = vadd.f32 %v5934_v37, %v5918_v33  ;;  %v5943_v4 = vadd.f32 %v5935_v7, %v5919_v10  ;;  %vm3874_vm3 = vcmp.eq.f32.partialorder %v9001_v6, %v8021_v36  ;;  %v3362_v9 = vsel %vm3354_vm2, %v8989_v1, 2147483647  ;;  %v9005_v33 = vld [vmem:[#allocation46_spill] sm:$0xff] }
 0x482   : > { %v8066_v55 = vsub.f32 %v7471_v58, %v5940_v24  ;;  %v8069_v3 = vsub.f32 %v7475_v35, %v5941_v31  ;;  %vm3367_vm4 = vcmp.lt.s32.totalorder %v3359_v17, %v3361_v51  ;;  %vm3369_vm5 = vcmp.lt.s32.totalorder %v3360_v63, %v3362_v9  ;;  %v9003_v58 = vld [vmem:[#allocation40_spill] sm:$0xff]  ;;  %v9004_v35 = vld [vmem:[#allocation41_spill] sm:$0xff] }
 0x483   : > { %v8073_v32 = vsub.f32 %v7473_v42, %v5942_v47  ;;  %v8076_v37 = vsub.f32 %v7477_v48, %v5943_v4  ;;  %v3368_v34 = vsel %vm3367_vm4, %v3359_v17, %v3361_v51  ;;  %v3370_v28 = vsel %vm3369_vm5, %v3360_v63, %v3362_v9  ;;  %v9008_v24 = vld [vmem:[#allocation49_spill] sm:$0xff]  ;;  %v9009_v51 = vld [vmem:[#allocation54_spill] sm:$0xff] }
 0x484   : > { %vm3875_vm6 = vcmp.eq.f32.partialorder %v9002_v0, %v8021_v36  ;;  %vm3876_vm7 = vcmp.eq.f32.partialorder %v9003_v58, %v8021_v36  ;;  %vm3877_vm8 = vcmp.eq.f32.partialorder %v9004_v35, %v8021_v36  ;;  %vm3371_vm9 = vcmp.lt.s32.totalorder %v3368_v34, %v3370_v28  ;;  %v8119_v6 = vpop.xlane.xlu1 %1780  ;;  %v9013_v35 = vld [vmem:[#allocation57_spill] sm:$0xff] }
 0x485   : > { %v5956_v7 = vmax.f32 %v8066_v55, %v8073_v32  ;;  %v5957_v42 = vmax.f32 %v8069_v3, %v8076_v37  ;;  %v3882_v48 = vsel %vm3874_vm3, %v7192_v12, 2147483647  ;;  %v8093_v29 = vsel %vm2848_vm1, %v2845_v25, %v2847_v46  ;;  %v9006_v25 = vld [vmem:[#allocation47_spill] sm:$0xff] }
 0x486   : > { %v3883_v54 = vsel %vm3875_vm6, %v8986_v22, 2147483647  ;;  %v3884_v13 = vsel %vm3876_vm7, %v8987_v44, 2147483647  ;;  %v3885_v16 = vsel %vm3877_vm8, %v8989_v1, 2147483647  ;;  %v8100_v59 = vsel %vm3371_vm9, %v3368_v34, %v3370_v28 }
 0x487   : > { %v5958_v18 = vmax.f32 %v5956_v7, %v5957_v42  ;;  %vm3890_vm10 = vcmp.lt.s32.totalorder %v3882_v48, %v3884_v13  ;;  %vm3892_vm11 = vcmp.lt.s32.totalorder %v3883_v54, %v3885_v16  ;;  %vm4397_vm12 = vcmp.eq.f32.partialorder %v9005_v33, %v8042_v62  ;;  %v9010_v34 = vld [vmem:[#allocation55_spill] sm:$0xff]  ;;  %v9011_v28 = vld [vmem:[#allocation56_spill] sm:$0xff] }
 0x488   : > { %v3891_v15 = vsel %vm3890_vm10, %v3882_v48, %v3884_v13  ;;  %v3893_v41 = vsel %vm3892_vm11, %v3883_v54, %v3885_v16  ;;  %vm4398_vm13 = vcmp.eq.f32.partialorder %v9006_v25, %v8042_v62  ;;  %v2328_v46 = vshra.s32 %v8052_v40, 16  ;;  %v9014_v16 = vld [vmem:[#allocation58_spill] sm:$0xff]  ;;  %v9017_v33 = vld [vmem:[#allocation59_spill] sm:$0xff] }
 0x489   : > { %5959 = vmax.xlane.f32.xlu1 %v5958_v18  ;;  %v2851_v10 = vshra.s32 %v8093_v29, 16  ;;  %vm4399_vm14 = vcmp.eq.f32.partialorder %v9007_v20, %v8042_v62  ;;  %vm4400_vm15 = vcmp.eq.f32.partialorder %v9008_v24, %v8042_v62  ;;  %vm3894_vm1 = vcmp.lt.s32.totalorder %v3891_v15, %v3893_v41  ;;  %v9019_v20 = vld [vmem:[#allocation61_spill] sm:$0xff]  ;;  %v8153_v24 = vpop.xlane.xlu1 %2303 }
 0x48a   : > { %v4405_v31 = vsel %vm4397_vm12, %v7192_v12, 2147483647  ;;  %v4406_v17 = vsel %vm4398_vm13, %v8986_v22, 2147483647  ;;  %v4407_v63 = vsel %vm4399_vm14, %v8987_v44, 2147483647  ;;  %vm4920_vm3 = vcmp.eq.f32.partialorder %v9009_v51, %v8058_v21 }
 0x48b   : > { %v3374_v47 = vshra.s32 %v8100_v59, 16  ;;  %v4408_v4 = vsel %vm4400_vm15, %v8989_v1, 2147483647  ;;  %vm4413_vm2 = vcmp.lt.s32.totalorder %v4405_v31, %v4407_v63  ;;  %vm4921_vm5 = vcmp.eq.f32.partialorder %v9010_v34, %v8058_v21 }
 0x48c   : > { %v4414_v9 = vsel %vm4413_vm2, %v4405_v31, %v4407_v63  ;;  %vm4415_vm4 = vcmp.lt.s32.totalorder %v4406_v17, %v4408_v4  ;;  %vm4922_vm6 = vcmp.eq.f32.partialorder %v9011_v28, %v8058_v21  ;;  %v8126_v0 = vsel %vm3894_vm1, %v3891_v15, %v3893_v41  ;;  %v9021_v28 = vld [vmem:[#allocation63_spill] sm:$0xff] }
 0x48d   : > { %1285 = vmin.xlane.f32.xlu1 %v8010_v26  ;;  %9012 = vst [vmem:[#allocation13_spill] sm:$0xff] %v8126_v0  ;;  %v4416_v58 = vsel %vm4415_vm4, %v4406_v17, %v4408_v4  ;;  %vm4923_vm7 = vcmp.eq.f32.partialorder %v9013_v35, %v8058_v21  ;;  %v4928_v7 = vsel %vm4920_vm3, %v7192_v12, 2147483647  ;;  %v4929_v42 = vsel %vm4921_vm5, %v8986_v22, 2147483647 }
 0x48e   : > { %vm4417_vm8 = vcmp.lt.s32.totalorder %v4414_v9, %v4416_v58  ;;  %v4930_v48 = vsel %vm4922_vm6, %v8987_v44, 2147483647  ;;  %v4931_v54 = vsel %vm4923_vm7, %v8989_v1, 2147483647  ;;  %v8134_v13 = vcvt.s32.f32 %v2328_v46  ;;  %v9018_v46 = vld [vmem:[#allocation60_spill] sm:$0xff] }
 0x48f   : > { %vm4936_vm9 = vcmp.lt.s32.totalorder %v4928_v7, %v4930_v48  ;;  %vm4938_vm10 = vcmp.lt.s32.totalorder %v4929_v42, %v4931_v54  ;;  %vm1263_vm11 = vcmp.eq.f32.partialorder %v9014_v16, %v8095_v23  ;;  %v8138_v18 = vcvt.s32.f32 %v2851_v10 }
 0x490   : > { %v8140_v15 = vcvt.s32.f32 %v3374_v47  ;;  %v8142_v41 = vsel %vm4417_vm8, %v4414_v9, %v4416_v58  ;;  %vm1264_vm12 = vcmp.eq.f32.partialorder %v9017_v33, %v8095_v23  ;;  %v3897_v25 = vshra.s32 %v8126_v0, 16  ;;  %v9020_v9 = vld [vmem:[#allocation62_spill] sm:$0xff]  ;;  %v9022_v58 = vld [vmem:[#allocation64_spill] sm:$0xff]  ;;  %v9052_v0 = vld [vmem:[#allocation45_spill] sm:$0xff] }
 0x491   : > { %9016 = vst [vmem:[#allocation10_spill] sm:$0xff] %v8142_v41  ;;  %1808 = vmin.xlane.f32.xlu1 %v8012_v61  ;;  %vm1265_vm13 = vcmp.eq.f32.partialorder %v9018_v46, %v8095_v23  ;;  %vm1266_vm14 = vcmp.eq.f32.partialorder %v9019_v20, %v8095_v23  ;;  %v1271_v10 = vsel %vm1263_vm11, %v7192_v12, 2147483647  ;;  %v8155_v31 = vsel %vm4936_vm9, %v4928_v7, %v4930_v48  ;;  %v9023_v7 = vld [vmem:[#allocation65_spill] sm:$0xff]  ;;  %v8180_v20 = vpop.xlane.xlu1 %2826 }
 0x492   : > { %9015 = vst [vmem:[#allocation11_spill] sm:$0xff] %v8140_v15  ;;  %v4939_v17 = vsel %vm4938_vm10, %v4929_v42, %v4931_v54  ;;  %v1272_v63 = vsel %vm1264_vm12, %v8986_v22, 2147483647  ;;  %v1273_v47 = vsel %vm1265_vm13, %v8987_v44, 2147483647  ;;  %v4420_v4 = vshra.s32 %v8142_v41, 16 }
 0x493   : > { %v1274_v51 = vsel %vm1266_vm14, %v8989_v1, 2147483647  ;;  %vm1295_vm15 = vcmp.lt.s32.totalorder %v1271_v10, %v1273_v47  ;;  %vm1786_vm1 = vcmp.eq.f32.partialorder %v9020_v9, %v8119_v6  ;;  %vm1787_vm3 = vcmp.eq.f32.partialorder %v9021_v28, %v8119_v6  ;;  %v9046_v41 = vld [vmem:[#allocation35_spill] sm:$0xff] }
 0x494   : > { %v1296_v34 = vsel %vm1295_vm15, %v1271_v10, %v1273_v47  ;;  %vm1297_vm2 = vcmp.lt.s32.totalorder %v1272_v63, %v1274_v51  ;;  %vm1788_vm4 = vcmp.eq.f32.partialorder %v9022_v58, %v8119_v6  ;;  %vm4940_vm5 = vcmp.lt.s32.totalorder %v8155_v31, %v4939_v17  ;;  %v9025_v58 = vld [vmem:[#allocation67_spill] sm:$0xff] }
 0x495   : > { %2331 = vmin.xlane.f32.xlu1 %v8134_v13  ;;  %v1298_v35 = vsel %vm1297_vm2, %v1272_v63, %v1274_v51  ;;  %vm1789_vm6 = vcmp.eq.f32.partialorder %v9023_v7, %v8119_v6  ;;  %v1794_v42 = vsel %vm1786_vm1, %v7192_v12, 2147483647  ;;  %v1795_v48 = vsel %vm1787_vm3, %v8986_v22, 2147483647  ;;  %v8205_v7 = vpop.xlane.xlu0 %3872 }
 0x496   : > { %vm1299_vm7 = vcmp.lt.s32.totalorder %v1296_v34, %v1298_v35  ;;  %v1796_v54 = vsel %vm1788_vm4, %v8987_v44, 2147483647  ;;  %v1797_v16 = vsel %vm1789_vm6, %v8989_v1, 2147483647  ;;  %vm2309_vm10 = vcmp.eq.f32.partialorder %v7842_v43, %v8153_v24 }
 0x497   : > { %v8175_v33 = vsel %vm1299_vm7, %v1296_v34, %v1298_v35  ;;  %vm1818_vm8 = vcmp.lt.s32.totalorder %v1794_v42, %v1796_v54  ;;  %vm1820_vm9 = vcmp.lt.s32.totalorder %v1795_v48, %v1797_v16  ;;  %vm2310_vm11 = vcmp.eq.f32.partialorder %v7845_v11, %v8153_v24  ;;  %v9026_v35 = vld [vmem:[#allocation68_spill] sm:$0xff] }
 0x498   : > { %v1302_v46 = vshra.s32 %v8175_v33, 16  ;;  %v1819_v10 = vsel %vm1818_vm8, %v1794_v42, %v1796_v54  ;;  %v1821_v63 = vsel %vm1820_vm9, %v1795_v48, %v1797_v16  ;;  %vm2311_vm13 = vcmp.eq.f32.partialorder %v7848_v60, %v8153_v24  ;;  %v9024_v60 = vld [vmem:[#allocation66_spill] sm:$0xff]  ;;  %v9028_v54 = vld [vmem:[#allocation69_spill] sm:$0xff] }
 0x499   : > { %2854 = vmin.xlane.f32.xlu1 %v8138_v18  ;;  %vm1822_vm12 = vcmp.lt.s32.totalorder %v1819_v10, %v1821_v63  ;;  %vm2312_vm14 = vcmp.eq.f32.partialorder %v7851_v52, %v8153_v24  ;;  %v2317_v43 = vsel %vm2309_vm10, %v7192_v12, 2147483647  ;;  %v2318_v9 = vsel %vm2310_vm11, %v8986_v22, 2147483647 }
 0x49a   : > { %v8190_v47 = vcvt.s32.f32 %v1302_v46  ;;  %v8192_v51 = vsel %vm1822_vm12, %v1819_v10, %v1821_v63  ;;  %v2319_v34 = vsel %vm2311_vm13, %v8987_v44, 2147483647  ;;  %v2320_v28 = vsel %vm2312_vm14, %v8989_v1, 2147483647 }
 0x49b   : > { %v1825_v11 = vshra.s32 %v8192_v51, 16  ;;  %vm2341_vm15 = vcmp.lt.s32.totalorder %v2317_v43, %v2319_v34  ;;  %vm2832_vm1 = vcmp.eq.f32.partialorder %v9024_v60, %v8180_v20  ;;  %vm2343_vm2 = vcmp.lt.s32.totalorder %v2318_v9, %v2320_v28 }
 0x49c   : > { %1305 = vmin.xlane.f32.xlu0 %v8190_v47  ;;  %v2342_v52 = vsel %vm2341_vm15, %v2317_v43, %v2319_v34  ;;  %vm2833_vm3 = vcmp.eq.f32.partialorder %v9025_v58, %v8180_v20  ;;  %vm2834_vm4 = vcmp.eq.f32.partialorder %v9026_v35, %v8180_v20  ;;  %v2344_v48 = vsel %vm2343_vm2, %v2318_v9, %v2320_v28  ;;  %v8238_v35 = vpop.xlane.xlu0 %4395 }
 0x49d   : > { %3377 = vmin.xlane.f32.xlu1 %v8140_v15  ;;  %v8208_v42 = vcvt.s32.f32 %v1825_v11  ;;  %vm2835_vm6 = vcmp.eq.f32.partialorder %v9028_v54, %v8180_v20  ;;  %v2840_v16 = vsel %vm2832_vm1, %v7192_v12, 2147483647  ;;  %vm2345_vm7 = vcmp.lt.s32.totalorder %v2342_v52, %v2344_v48  ;;  %v9036_v54 = vld [vmem:[#allocation20_spill] sm:$0xff] }
 0x49e   : > { %v2841_v46 = vsel %vm2833_vm3, %v8986_v22, 2147483647  ;;  %v2842_v10 = vsel %vm2834_vm4, %v8987_v44, 2147483647  ;;  %v2843_v63 = vsel %vm2835_vm6, %v8989_v1, 2147483647  ;;  %v8218_v43 = vcvt.s32.f32 %v3897_v25 }
 0x49f   : > { %9027 = vst [vmem:[#allocation14_spill] sm:$0xff] %v8208_v42  ;;  %v8220_v34 = vsel %vm2345_vm7, %v2342_v52, %v2344_v48  ;;  %vm2864_vm8 = vcmp.lt.s32.totalorder %v2840_v16, %v2842_v10  ;;  %vm2866_vm9 = vcmp.lt.s32.totalorder %v2841_v46, %v2843_v63  ;;  %v8225_v9 = vsel %vm4940_vm5, %v8155_v31, %v4939_v17  ;;  %v9035_v48 = vld [vmem:[#allocation18_spill] sm:$0xff] }
 0x4a0   : > { %9029 = vst [vmem:[#allocation12_spill] sm:$0xff] %v8218_v43  ;;  %9030 = vst [vmem:[#allocation15_spill] sm:$0xff] %v8220_v34  ;;  %1828 = vmin.xlane.f32.xlu0 %v8208_v42  ;;  %v2348_v11 = vshra.s32 %v8220_v34, 16  ;;  %v2865_v28 = vsel %vm2864_vm8, %v2840_v16, %v2842_v10  ;;  %v2867_v60 = vsel %vm2866_vm9, %v2841_v46, %v2843_v63  ;;  %v8232_v25 = vcvt.s32.f32 %v4420_v4  ;;  %v9037_v4 = vld [vmem:[#allocation19_spill] sm:$0xff]  ;;  %v9038_v16 = vld [vmem:[#allocation21_spill] sm:$0xff] }
 0x4a1   : > { %9031 = vst [vmem:[#allocation16_spill] sm:$0xff] %v8225_v9  ;;  %3900 = vmin.xlane.f32.xlu1 %v8218_v43  ;;  %vm2868_vm10 = vcmp.lt.s32.totalorder %v2865_v28, %v2867_v60  ;;  %v4943_v31 = vshra.s32 %v8225_v9, 16  ;;  %vm3878_vm5 = vcmp.eq.f32.partialorder %v9035_v48, %v8205_v7  ;;  %vm3880_vm11 = vcmp.eq.f32.partialorder %v9036_v54, %v8205_v7  ;;  %v9041_v48 = vld [vmem:[#allocation26_spill] sm:$0xff]  ;;  %v9042_v54 = vld [vmem:[#allocation28_spill] sm:$0xff] }
 0x4a2   : > { %9032 = vst [vmem:[#allocation17_spill] sm:$0xff] %v8232_v25  ;;  %v8234_v52 = vcvt.s32.f32 %v2348_v11  ;;  %v8236_v58 = vsel %vm2868_vm10, %v2865_v28, %v2867_v60  ;;  %vm3879_vm12 = vcmp.eq.f32.partialorder %v9037_v4, %v8205_v7  ;;  %vm3881_vm13 = vcmp.eq.f32.partialorder %v9038_v16, %v8205_v7  ;;  %v9044_v4 = vld [vmem:[#allocation29_spill] sm:$0xff] }
 0x4a3   : > { %9034 = vst [vmem:[#allocation23_spill] sm:$0xff] %v8236_v58  ;;  %v2871_v17 = vshra.s32 %v8236_v58, 16  ;;  %v3886_v10 = vsel %vm3878_vm5, %v7192_v12, 2147483647  ;;  %v3888_v63 = vsel %vm3880_vm11, %v8987_v44, 2147483647  ;;  %v8256_v11 = vcvt.s32.f32 %v4943_v31 }
 0x4a4   : > { %9033 = vst [vmem:[#allocation22_spill] sm:$0xff] %v8234_v52  ;;  %2351 = vmin.xlane.f32.xlu0 %v8234_v52  ;;  %v3887_v28 = vsel %vm3879_vm12, %v8986_v22, 2147483647  ;;  %v3889_v60 = vsel %vm3881_vm13, %v8989_v1, 2147483647  ;;  %vm4401_vm14 = vcmp.eq.f32.partialorder %v9041_v48, %v8238_v35  ;;  %vm4403_vm15 = vcmp.eq.f32.partialorder %v9042_v54, %v8238_v35  ;;  %v9043_v31 = vld [vmem:[#allocation27_spill] sm:$0xff] }
 0x4a5   : > { %4423 = vmin.xlane.f32.xlu1 %v8232_v25  ;;  %v8252_v46 = vcvt.s32.f32 %v2871_v17  ;;  %9040 = vst [vmem:[#allocation25_spill] sm:$0xff] %v8256_v11  ;;  %v8265_v17 = vpop.xlane.xlu0 %4918  ;;  %vm3910_vm1 = vcmp.lt.s32.totalorder %v3886_v10, %v3888_v63  ;;  %vm3912_vm2 = vcmp.lt.s32.totalorder %v3887_v28, %v3889_v60  ;;  %vm4402_vm3 = vcmp.eq.f32.partialorder %v9043_v31, %v8238_v35  ;;  %v9047_v31 = vld [vmem:[#allocation36_spill] sm:$0xff] }
 0x4a6   : > { %vm4404_vm4 = vcmp.eq.f32.partialorder %v9044_v4, %v8238_v35  ;;  %v4409_v16 = vsel %vm4401_vm14, %v7192_v12, 2147483647  ;;  %v4411_v9 = vsel %vm4403_vm15, %v8987_v44, 2147483647  ;;  %v3911_v48 = vsel %vm3910_vm1, %v3886_v10, %v3888_v63  ;;  %v9048_v4 = vld [vmem:[#allocation37_spill] sm:$0xff] }
 0x4a7   : > { %9039 = vst [vmem:[#allocation24_spill] sm:$0xff] %v8252_v46  ;;  %v3913_v25 = vsel %vm3912_vm2, %v3887_v28, %v3889_v60  ;;  %v4410_v54 = vsel %vm4402_vm3, %v8986_v22, 2147483647  ;;  %vm4433_vm7 = vcmp.lt.s32.totalorder %v4409_v16, %v4411_v9  ;;  %vm4925_vm8 = vcmp.eq.f32.partialorder %v9046_v41, %v8265_v17 }
 0x4a8   : > { %2874 = vmin.xlane.f32.xlu0 %v8252_v46  ;;  %v4412_v46 = vsel %vm4404_vm4, %v8989_v1, 2147483647  ;;  %vm4926_vm9 = vcmp.eq.f32.partialorder %v9047_v31, %v8265_v17  ;;  %vm4927_vm10 = vcmp.eq.f32.partialorder %v9048_v4, %v8265_v17  ;;  %vm3914_vm5 = vcmp.lt.s32.totalorder %v3911_v48, %v3913_v25 }
 0x4a9   : > { %4946 = vmin.xlane.f32.xlu1 %v8256_v11  ;;  %v9045_v11 = vld [vmem:[#allocation34_spill] sm:$0xff]  ;;  %v8284_v43 = vpop.xlane.xlu0 %5441  ;;  %vm4435_vm11 = vcmp.lt.s32.totalorder %v4410_v54, %v4412_v46  ;;  %v4434_v28 = vsel %vm4433_vm7, %v4409_v16, %v4411_v9  ;;  %v4934_v60 = vsel %vm4926_vm9, %v8987_v44, 2147483647  ;;  %v4935_v41 = vsel %vm4927_vm10, %v8989_v1, 2147483647 }
 0x4aa   : > { %vm4924_vm6 = vcmp.eq.f32.partialorder %v9045_v11, %v8265_v17  ;;  %v4933_v11 = vsel %vm4925_vm8, %v8986_v22, 2147483647  ;;  %v4436_v4 = vsel %vm4435_vm11, %v4410_v54, %v4412_v46  ;;  %vm5450_vm7 = vcmp.eq.f32.partialorder %v9052_v0, %v8284_v43  ;;  %v9054_v0 = vld [vmem:[#allocation50_spill] sm:$0xff] }
 0x4ab   : > { %v4932_v10 = vsel %vm4924_vm6, %v7192_v12, 2147483647  ;;  %v8315_v54 = vsel %vm3914_vm5, %v3911_v48, %v3913_v25  ;;  %vm4437_vm8 = vcmp.lt.s32.totalorder %v4434_v28, %v4436_v4  ;;  %vm4958_vm11 = vcmp.lt.s32.totalorder %v4933_v11, %v4935_v41  ;;  %v9056_v48 = vld [vmem:[#allocation52_spill] sm:$0xff] }
 0x4ac   : > { %vm4956_vm9 = vcmp.lt.s32.totalorder %v4932_v10, %v4934_v60  ;;  %v4959_v15 = vsel %vm4958_vm11, %v4933_v11, %v4935_v41 }
 0x4b1   : > { %v8287_v63 = vpop.xlane.xlu1 %3349 }
 0x4b2   : > { %vm3355_vm12 = vcmp.eq.f32.partialorder %v7892_v57, %v8287_v63  ;;  %vm3356_vm13 = vcmp.eq.f32.partialorder %v7895_v19, %v8287_v63  ;;  %vm3357_vm14 = vcmp.eq.f32.partialorder %v7898_v56, %v8287_v63  ;;  %vm3358_vm15 = vcmp.eq.f32.partialorder %v7901_v14, %v8287_v63  ;;  %v9049_v57 = vld [vmem:[#allocation42_spill] sm:$0xff]  ;;  %v9050_v19 = vld [vmem:[#allocation43_spill] sm:$0xff]  ;;  %v8308_v56 = vpop.xlane.xlu0 %5964  ;;  %v9051_v14 = vld [vmem:[#allocation44_spill] sm:$0xff] }
 0x4b3   : > { %v3363_v9 = vsel %vm3355_vm12, %v7192_v12, 2147483647  ;;  %v3364_v16 = vsel %vm3356_vm13, %v8986_v22, 2147483647  ;;  %v3365_v31 = vsel %vm3357_vm14, %v8987_v44, 2147483647  ;;  %vm5447_vm2 = vcmp.eq.f32.partialorder %v9049_v57, %v8284_v43 }
 0x4b4   : > { %v3366_v52 = vsel %vm3358_vm15, %v8989_v1, 2147483647  ;;  %vm3387_vm1 = vcmp.lt.s32.totalorder %v3363_v9, %v3365_v31  ;;  %vm5448_vm3 = vcmp.eq.f32.partialorder %v9050_v19, %v8284_v43  ;;  %vm5449_vm6 = vcmp.eq.f32.partialorder %v9051_v14, %v8284_v43 }
 0x4b5   : > { %v3388_v58 = vsel %vm3387_vm1, %v3363_v9, %v3365_v31  ;;  %vm3389_vm4 = vcmp.lt.s32.totalorder %v3364_v16, %v3366_v52  ;;  %v5455_v57 = vsel %vm5447_vm2, %v7192_v12, 2147483647  ;;  %v5456_v19 = vsel %vm5448_vm3, %v8986_v22, 2147483647 }
 0x4b6   : > { %v3390_v46 = vsel %vm3389_vm4, %v3364_v16, %v3366_v52  ;;  %v5457_v31 = vsel %vm5449_vm6, %v8987_v44, 2147483647  ;;  %v5458_v14 = vsel %vm5450_vm7, %v8989_v1, 2147483647  ;;  %vm5970_vm12 = vcmp.eq.f32.partialorder %v9054_v0, %v8308_v56  ;;  %v9055_v52 = vld [vmem:[#allocation51_spill] sm:$0xff]  ;;  %v9057_v16 = vld [vmem:[#allocation53_spill] sm:$0xff] }
 0x4b7   : > { %vm3391_vm10 = vcmp.lt.s32.totalorder %v3388_v58, %v3390_v46  ;;  %vm5971_vm5 = vcmp.eq.f32.partialorder %v9055_v52, %v8308_v56  ;;  %vm5972_vm13 = vcmp.eq.f32.partialorder %v9056_v48, %v8308_v56  ;;  %vm5973_vm14 = vcmp.eq.f32.partialorder %v9057_v16, %v8308_v56 }
 0x4b8   : > { %v8319_v9 = vsel %vm3391_vm10, %v3388_v58, %v3390_v46  ;;  %v3917_v58 = vshra.s32 %v8315_v54, 16  ;;  %v4957_v46 = vsel %vm4956_vm9, %v4932_v10, %v4934_v60  ;;  %vm5479_vm15 = vcmp.lt.s32.totalorder %v5455_v57, %v5457_v31 }
 0x4b9   : > { %9053 = vst [vmem:[#allocation30_spill] sm:$0xff] %v8319_v9  ;;  %v3394_v25 = vshra.s32 %v8319_v9, 16  ;;  %vm5481_vm1 = vcmp.lt.s32.totalorder %v5456_v19, %v5458_v14  ;;  %v5978_v0 = vsel %vm5970_vm12, %v7192_v12, 2147483647  ;;  %v8337_v9 = vsel %vm4437_vm8, %v4434_v28, %v4436_v4 }
 0x4ba   : > { %v5979_v52 = vsel %vm5971_vm5, %v8986_v22, 2147483647  ;;  %v5980_v48 = vsel %vm5972_vm13, %v8987_v44, 2147483647  ;;  %v5981_v34 = vsel %vm5973_vm14, %v8989_v1, 2147483647  ;;  %vm4960_vm2 = vcmp.lt.s32.totalorder %v4957_v46, %v4959_v15 }
 0x4bb   : > { %v8333_v42 = vcvt.s32.f32 %v3394_v25  ;;  %v5480_v10 = vsel %vm5479_vm15, %v5455_v57, %v5457_v31  ;;  %v5482_v11 = vsel %vm5481_vm1, %v5456_v19, %v5458_v14  ;;  %v8343_v60 = vcvt.s32.f32 %v3917_v58 }
 0x4bc   : > { %v4440_v41 = vshra.s32 %v8337_v9, 16  ;;  %vm6002_vm3 = vcmp.lt.s32.totalorder %v5978_v0, %v5980_v48  ;;  %vm6004_vm4 = vcmp.lt.s32.totalorder %v5979_v52, %v5981_v34  ;;  %v8346_v25 = vsel %vm4960_vm2, %v4957_v46, %v4959_v15 }
 0x4bd   : > { %3397 = vmin.xlane.f32.xlu0 %v8333_v42  ;;  %9058 = vst [vmem:[#allocation31_spill] sm:$0xff] %v8343_v60  ;;  %vm5483_vm6 = vcmp.lt.s32.totalorder %v5480_v10, %v5482_v11  ;;  %v6968_v28 = vmov -inf   ;;  %v6003_v4 = vsel %vm6002_vm3, %v5978_v0, %v5980_v48  ;;  %v6005_v16 = vsel %vm6004_vm4, %v5979_v52, %v5981_v34  ;;  %v9059_v34 = vld [vmem:[#allocation9_spill] sm:$0xff] }
 0x4be   : > { %256 = vst.msk [vmem:[#allocation2] sm:$0xff] %vm8901_vm0, %v6968_v28  ;;  %257 = vst.msk [vmem:[#allocation2 + $0x8] sm:$0xff] %vm8901_vm0, %v6968_v28  ;;  %v8351_v57 = vcvt.s32.f32 %v4440_v41  ;;  %v4963_v19 = vshra.s32 %v8346_v25, 16  ;;  %v8354_v31 = vsel %vm5483_vm6, %v5480_v10, %v5482_v11  ;;  %vm6006_vm7 = vcmp.lt.s32.totalorder %v6003_v4, %v6005_v16 }
 0x4bf   : > { %v5486_v14 = vshra.s32 %v8354_v31, 16  ;;  %v8360_v58 = vsel %vm6006_vm7, %v6003_v4, %v6005_v16  ;;  %vm1315_vm8 = vcmp.eq.s32.totalorder %v9059_v34, 0  ;;  %vm1838_vm5 = vcmp.eq.s32.totalorder %v9059_v34, 1 }
 0x4c0   : > { %v8357_v15 = vcvt.s32.f32 %v4963_v19  ;;  %v6009_v52 = vshra.s32 %v8360_v58, 16  ;;  %vm2361_vm15 = vcmp.eq.s32.totalorder %v9059_v34, 2  ;;  %vm8903_vm4 = vcmp.eq.s32.totalorder %v9059_v34, 3 }
 0x4c1   : > { %3920 = vmin.xlane.f32.xlu0 %v8343_v60  ;;  %v8366_v0 = vcvt.s32.f32 %v5486_v14  ;;  %v9072_v19 = vmov 0 }
 0x4c2   : > { %v8389_v28 = vcvt.s32.f32 %v6009_v52 }
 0x4c5   : > { %4443 = vmin.xlane.f32.xlu0 %v8351_v57  ;;  %v805_v46 = vld [vmem:[#allocation2] sm:$0xff]  ;;  %v806_v60 = vld [vmem:[#allocation2 + $0x8] sm:$0xff] }
 0x4c6   : > { %vm1316_vm9 = vcmp.gt.f32.partialorder %v7911_v5, %v805_v46  ;;  %vm1317_vm10 = vcmp.gt.f32.partialorder %v8095_v23, %v806_v60 }
 0x4c7   : > { %vm8369_vm11 = vmand %vm1315_vm8, %vm1317_vm10 }
 0x4c8   : > { %vm8373_vm12 = vmand %vm1315_vm8, %vm1316_vm9  ;;  %v1321_v11 = vsel %vm8369_vm11, %v8095_v23, %v806_v60  ;;  %v9066_v60 = vmov 0  ;;  %vm8900_vm9 = vcmp.eq.s32.totalorder %v9059_v34, 4 }
 0x4c9   : > { %4966 = vmin.xlane.f32.xlu0 %v8357_v15  ;;  %vm1840_vm13 = vcmp.gt.f32.partialorder %v8119_v6, %v1321_v11  ;;  %v1320_v4 = vsel %vm8373_vm12, %v7911_v5, %v805_v46 }
 0x4ca   : > { %vm8385_vm14 = vmand %vm1838_vm5, %vm1840_vm13  ;;  %vm1839_vm3 = vcmp.gt.f32.partialorder %v7915_v45, %v1320_v4 }
 0x4cb   : > { %v1844_v23 = vsel %vm8385_vm14, %v8119_v6, %v1321_v11  ;;  %v9068_v6 = vmov 0  ;;  %vm8420_vm8 = vmand %vm1838_vm5, %vm1839_vm3  ;;  %vm8902_vm5 = vcmp.eq.s32.totalorder %v9059_v34, 5  ;;  %v9080_v11 = vmov 0 }
 0x4cc   : > { %vm2363_vm1 = vcmp.gt.f32.partialorder %v8153_v24, %v1844_v23  ;;  %v1843_v14 = vsel %vm8420_vm8, %v7915_v45, %v1320_v4 }
 0x4cd   : > { %5489 = vmin.xlane.f32.xlu0 %v8366_v0  ;;  %vm8402_vm2 = vmand %vm2361_vm15, %vm2363_vm1 }
 0x4ce   : > { %v9067_v60 = vsel %vm8402_vm2, 4294967295, %v9066_v60  ;;  %v2367_v5 = vsel %vm8402_vm2, %v8153_v24, %v1844_v23 }
 0x4cf   : > { %vm2886_vm6 = vcmp.gt.f32.partialorder %v8180_v20, %v2367_v5 }
 0x4d0   : > { %vm8414_vm7 = vmand %vm8903_vm4, %vm2886_vm6  ;;  %vm2362_vm6 = vcmp.gt.f32.partialorder %v7947_v39, %v1843_v14 }
 0x4d1   : > { %6012 = vmin.xlane.f32.xlu0 %v8389_v28  ;;  %v9069_v6 = vsel %vm8414_vm7, 4294967295, %v9068_v6  ;;  %v2890_v24 = vsel %vm8414_vm7, %v8180_v20, %v2367_v5  ;;  %v9074_v20 = vmov 0 }
 0x4d2   : > { %vm3409_vm10 = vcmp.gt.f32.partialorder %v8287_v63, %v2890_v24 }
 0x4d3   : > { %vm8431_vm13 = vmand %vm8900_vm9, %vm3409_vm10  ;;  %vm8904_vm10 = vcmp.eq.s32.totalorder %v9059_v34, 6 }
 0x4d4   : > { %v9073_v19 = vsel %vm8431_vm13, 4294967295, %v9072_v19  ;;  %v3413_v46 = vsel %vm8431_vm13, %v8287_v63, %v2890_v24  ;;  %v9076_v63 = vmov 0  ;;  %vm8914_vm13 = vcmp.eq.s32.totalorder %v9059_v34, 9 }
 0x4d5   : > { %vm3932_vm1 = vcmp.gt.f32.partialorder %v8205_v7, %v3413_v46 }
 0x4d6   : > { %vm8445_vm3 = vmand %vm8902_vm5, %vm3932_vm1  ;;  %vm8905_vm5 = vcmp.eq.s32.totalorder %v9059_v34, 7 }
 0x4d7   : > { %v9075_v20 = vsel %vm8445_vm3, 4294967295, %v9074_v20  ;;  %v3936_v45 = vsel %vm8445_vm3, %v8205_v7, %v3413_v46  ;;  %vm8463_vm1 = vmand %vm2361_vm15, %vm2362_vm6  ;;  %vm8909_vm15 = vcmp.eq.s32.totalorder %v9059_v34, 8 }
 0x4d8   : > { %vm4455_vm9 = vcmp.gt.f32.partialorder %v8238_v35, %v3936_v45  ;;  %v2366_v4 = vsel %vm8463_vm1, %v7947_v39, %v1843_v14 }
 0x4d9   : > { %vm8457_vm0 = vmand %vm8904_vm10, %vm4455_vm9 }
 0x4da   : > { %v9077_v63 = vsel %vm8457_vm0, 4294967295, %v9076_v63  ;;  %v4459_v7 = vsel %vm8457_vm0, %v8238_v35, %v3936_v45  ;;  %v9082_v35 = vmov 0 }
 0x4db   : > { %vm4978_vm4 = vcmp.gt.f32.partialorder %v8265_v17, %v4459_v7 }
 0x4dc   : > { %vm8474_vm9 = vmand %vm8905_vm5, %vm4978_vm4  ;;  %vm2885_vm4 = vcmp.gt.f32.partialorder %v8007_v8, %v2366_v4 }
 0x4dd   : > { %v9081_v11 = vsel %vm8474_vm9, 4294967295, %v9080_v11  ;;  %v4982_v23 = vsel %vm8474_vm9, %v8265_v17, %v4459_v7 }
 0x4de   : > { %vm5501_vm6 = vcmp.gt.f32.partialorder %v8284_v43, %v4982_v23 }
 0x4df   : > { %vm8488_vm10 = vmand %vm8909_vm15, %vm5501_vm6  ;;  %vm9084_vm15 = vcmp.eq.s32.totalorder %v9059_v34, 3 }
 0x4e0   : > { %v9083_v35 = vsel %vm8488_vm10, 4294967295, %v9082_v35  ;;  %v5505_v39 = vsel %vm8488_vm10, %v8284_v43, %v4982_v23  ;;  %vm8507_vm10 = vmand %vm9084_vm15, %vm2885_vm4 }
 0x4e1   : > { %vm6024_vm7 = vcmp.gt.f32.partialorder %v8308_v56, %v5505_v39  ;;  %v2889_v45 = vsel %vm8507_vm10, %v8007_v8, %v2366_v4 }
 0x4e3   : > { %v5437_v5 = vpop.xlane.xlu1 %5436 }
 0x4e4   : > { %vm5443_vm5 = vcmp.eq.f32.partialorder %v7922_v38, %v5437_v5  ;;  %vm5444_vm9 = vcmp.eq.f32.partialorder %v7925_v2, %v5437_v5  ;;  %vm5445_vm0 = vcmp.eq.f32.partialorder %v7930_v53, %v5437_v5  ;;  %vm5446_vm3 = vcmp.eq.f32.partialorder %v7933_v30, %v5437_v5 }
 0x4e5   : > { %v5451_v17 = vsel %vm5443_vm5, %v7192_v12, 2147483647  ;;  %v5452_v24 = vsel %vm5444_vm9, %v8986_v22, 2147483647  ;;  %v5453_v14 = vsel %vm5445_vm0, %v8987_v44, 2147483647  ;;  %vm8515_vm5 = vmand %vm8914_vm13, %vm6024_vm7 }
 0x4e6   : > { %v5454_v46 = vsel %vm5446_vm3, %v8989_v1, 2147483647  ;;  %vm5459_vm6 = vcmp.lt.s32.totalorder %v5451_v17, %v5453_v14  ;;  %v9087_v53 = vmov 0  ;;  %v6028_v43 = vsel %vm8515_vm5, %v8308_v56, %v5505_v39 }
 0x4e7   : > { %v5460_v2 = vsel %vm5459_vm6, %v5451_v17, %v5453_v14  ;;  %vm5461_vm2 = vcmp.lt.s32.totalorder %v5452_v24, %v5454_v46  ;;  %v9088_v53 = vsel %vm8515_vm5, 4294967295, %v9087_v53  ;;  %vm9089_vm3 = vcmask 80896  }
 0x4e8   : > { %v5462_v30 = vsel %vm5461_vm2, %v5452_v24, %v5454_v46  ;;  %6033 = vst.msk [vmem:[#allocation2 + $0x8] sm:$0xff] %vm9089_vm3, %v6028_v43  ;;  %vm3408_vm2 = vcmp.gt.f32.partialorder %v8016_v27, %v2889_v45  ;;  %vm9090_vm7 = vcmp.eq.s32.totalorder %v9059_v34, 4  ;;  %vm9093_vm15 = vmmov %vm9089_vm3  ;;  %vm9094_vm6 = vcmp.eq.s32.totalorder %v9059_v34, 5 }
 0x4e9   : > { %vm5463_vm0 = vcmp.lt.s32.totalorder %v5460_v2, %v5462_v30  ;;  %vm8541_vm9 = vmand %vm9090_vm7, %vm3408_vm2  ;;  %v9095_v39 = vmov 0  ;;  %vm9097_vm2 = vcmp.eq.s32.totalorder %v9059_v34, 6  ;;  %v9098_v14 = vmov 0 }
 0x4ea   : > { %v8531_v7 = vsel %vm5463_vm0, %v5460_v2, %v5462_v30  ;;  %v3412_v4 = vsel %vm8541_vm9, %v8016_v27, %v2889_v45  ;;  %v9101_v46 = vmov 0  ;;  %v9104_v2 = vmov 0 }
 0x4eb   : > { %v5466_v23 = vshra.s32 %v8531_v7, 16  ;;  %vm3931_vm4 = vcmp.gt.f32.partialorder %v8021_v36, %v3412_v4 }
 0x4ec   : > { %vm8560_vm0 = vmand %vm9094_vm6, %vm3931_vm4  ;;  %vm9100_vm4 = vcmp.eq.s32.totalorder %v9059_v34, 7 }
 0x4ed   : > { %v8535_v17 = vcvt.s32.f32 %v5466_v23  ;;  %v9096_v39 = vsel %vm8560_vm0, 4294967295, %v9095_v39  ;;  %v3935_v24 = vsel %vm8560_vm0, %v8021_v36, %v3412_v4  ;;  %v1804_v4 = vand.u32 65535, %v7992_v49 }
 0x4ee   : > { %vm4454_vm3 = vcmp.gt.f32.partialorder %v8042_v62, %v3935_v24 }
 0x4ef   : > { %5469 = vmin.xlane.f32.xlu1 %v8535_v17  ;;  %v6040_v56 = vld [vmem:[#allocation2 + $0x8] sm:$0xff]  ;;  %vm8570_vm7 = vmand %vm9097_vm2, %vm4454_vm3  ;;  %vm9103_vm2 = vcmp.eq.s32.totalorder %v9059_v34, 8 }
 0x4f0   : > { %6042 = vst.msk [vmem:[%s8550_s11 + $0x8] sm:$0xff] %vm9093_vm15, %v6040_v56  ;;  %v9099_v14 = vsel %vm8570_vm7, 4294967295, %v9098_v14  ;;  %v4458_v27 = vsel %vm8570_vm7, %v8042_v62, %v3935_v24 }
 0x4f1   : > { %vm4977_vm15 = vcmp.gt.f32.partialorder %v8058_v21, %v4458_v27 }
 0x4f2   : > { %vm8580_vm6 = vmand %vm9100_vm4, %vm4977_vm15 }
 0x4f3   : > { %v9102_v46 = vsel %vm8580_vm6, 4294967295, %v9101_v46  ;;  %v4981_v36 = vsel %vm8580_vm6, %v8058_v21, %v4458_v27 }
 0x4f4   : > { %vm5500_vm3 = vcmp.gt.f32.partialorder %v5437_v5, %v4981_v36 }
 0x4f5   : > { %vm8589_vm13 = vmand %vm9103_vm2, %vm5500_vm3 }
 0x4f6   : > { %v9105_v2 = vsel %vm8589_vm13, 4294967295, %v9104_v2  ;;  %v5504_v62 = vsel %vm8589_vm13, %v5437_v5, %v4981_v36  ;;  %vm9106_vm13 = vcmp.eq.s32.totalorder %v9059_v34, 9 }
 0x516   : > { %v5960_v30 = vpop.xlane.xlu1 %5959 }
 0x517   : > { %vm5966_vm15 = vcmp.eq.f32.partialorder %v8066_v55, %v5960_v30  ;;  %vm5967_vm4 = vcmp.eq.f32.partialorder %v8069_v3, %v5960_v30  ;;  %vm5968_vm5 = vcmp.eq.f32.partialorder %v8073_v32, %v5960_v30  ;;  %vm5969_vm7 = vcmp.eq.f32.partialorder %v8076_v37, %v5960_v30 }
 0x518   : > { %v5974_v21 = vsel %vm5966_vm15, %v7192_v12, 2147483647  ;;  %v5975_v43 = vsel %vm5967_vm4, %v8986_v22, 2147483647  ;;  %v5976_v45 = vsel %vm5968_vm5, %v8987_v44, 2147483647  ;;  %vm6023_vm3 = vcmp.gt.f32.partialorder %v5960_v30, %v5504_v62 }
 0x519   : > { %v5977_v23 = vsel %vm5969_vm7, %v8989_v1, 2147483647  ;;  %vm5982_vm2 = vcmp.lt.s32.totalorder %v5974_v21, %v5976_v45  ;;  %vm8605_vm6 = vmand %vm9106_vm13, %vm6023_vm3  ;;  %vm9109_vm5 = vcmask 80896   ;;  %v1281_v1 = vand.u32 65535, %v7981_v50 }
 0x51a   : > { %v5983_v3 = vsel %vm5982_vm2, %v5974_v21, %v5976_v45  ;;  %vm5984_vm0 = vcmp.lt.s32.totalorder %v5975_v43, %v5977_v23  ;;  %v8609_v32 = vpop.xlane.xlu1 %1285  ;;  %v6027_v12 = vsel %vm8605_vm6, %v5960_v30, %v5504_v62  ;;  %v1806_v50 = vcvt.s32.f32 %v1804_v4 }
 0x51b   : > { %v5985_v22 = vsel %vm5984_vm0, %v5975_v43, %v5977_v23  ;;  %6032 = vst.msk [vmem:[#allocation2] sm:$0xff] %vm9109_vm5, %v6027_v12  ;;  %vm1287_vm13 = vcmp.eq.f32.partialorder %v8010_v26, %v8609_v32  ;;  %v1283_v56 = vcvt.s32.f32 %v1281_v1  ;;  %vm9110_vm0 = vmmov %vm9109_vm5  ;;  %v2327_v62 = vand.u32 65535, %v8052_v40  ;;  %v9111_v1 = vld [vmem:[#allocation15_spill] sm:$0xff] }
 0x51c   : > { %vm5986_vm15 = vcmp.lt.s32.totalorder %v5983_v3, %v5985_v22  ;;  %v1301_v30 = vand.u32 65535, %v8175_v33  ;;  %v2850_v43 = vand.u32 65535, %v8093_v29  ;;  %v3373_v29 = vand.u32 65535, %v8100_v59 }
 0x51d   : > { %v8614_v44 = vsel %vm5986_vm15, %v5983_v3, %v5985_v22  ;;  %v1288_v36 = vsel %vm1287_vm13, %v1283_v56, inf  ;;  %v2329_v21 = vcvt.s32.f32 %v2327_v62  ;;  %v9112_v56 = vld [vmem:[#allocation14_spill] sm:$0xff] }
 0x51e   : > { %v5989_v37 = vshra.s32 %v8614_v44, 16  ;;  %v8618_v34 = vpop.xlane.xlu1 %1808  ;;  %v1303_v23 = vcvt.s32.f32 %v1301_v30  ;;  %v9115_v30 = vld [vmem:[#allocation23_spill] sm:$0xff] }
 0x51f   : > { %vm1810_vm7 = vcmp.eq.f32.partialorder %v8012_v61, %v8618_v34  ;;  %v1824_v61 = vand.u32 65535, %v8192_v51  ;;  %v2347_v51 = vand.u32 65535, %v9111_v1 }
 0x520   : > { %v8620_v5 = vcvt.s32.f32 %v5989_v37  ;;  %v1811_v49 = vsel %vm1810_vm7, %v1806_v50, inf }
 0x521   : > { %v1826_v22 = vcvt.s32.f32 %v1824_v61  ;;  %v2349_v62 = vcvt.s32.f32 %v2347_v51  ;;  %v9119_v51 = vld [vmem:[#allocation24_spill] sm:$0xff] }
 0x522   : > { %5992 = vmin.xlane.f32.xlu1 %v8620_v5  ;;  %v8626_v24 = vpop.xlane.xlu1 %2331  ;;  %v6039_v27 = vld [vmem:[#allocation2] sm:$0xff] }
 0x523   : > { %6041 = vst.msk [vmem:[%s8550_s11] sm:$0xff] %vm9110_vm0, %v6039_v27  ;;  %vm2333_vm4 = vcmp.eq.f32.partialorder %v8134_v13, %v8626_v24  ;;  %v2852_v13 = vcvt.s32.f32 %v2850_v43  ;;  %v9113_v27 = vld [vmem:[#allocation11_spill] sm:$0xff] }
 0x524   : > { %v2334_v40 = vsel %vm2333_vm4, %v2329_v21, inf  ;;  %v9116_v21 = vld [vmem:[#allocation22_spill] sm:$0xff] }
 0x526   : > { %1289 = vmin.xlane.f32.xlu1 %v1288_v36  ;;  %v8634_v26 = vpop.xlane.xlu1 %2854  ;;  %v9114_v36 = vld [vmem:[#allocation13_spill] sm:$0xff] }
 0x527   : > { %vm2856_vm2 = vcmp.eq.f32.partialorder %v8138_v18, %v8634_v26  ;;  %v3375_v18 = vcvt.s32.f32 %v3373_v29  ;;  %v3896_v59 = vand.u32 65535, %v9114_v36  ;;  %v9121_v36 = vld [vmem:[#allocation16_spill] sm:$0xff] }
 0x529   : > { %v8639_v45 = vpop.xlane.xlu0 %1305 }
 0x52a   : > { %1812 = vmin.xlane.f32.xlu1 %v1811_v49  ;;  %v8642_v3 = vpop.xlane.xlu1 %3377  ;;  %vm1307_vm3 = vcmp.eq.f32.partialorder %v8190_v47, %v8639_v45  ;;  %v2857_v47 = vsel %vm2856_vm2, %v2852_v13, inf  ;;  %v2870_v49 = vand.u32 65535, %v9115_v30  ;;  %v9118_v13 = vld [vmem:[#allocation10_spill] sm:$0xff]  ;;  %v9122_v30 = vld [vmem:[#allocation25_spill] sm:$0xff] }
 0x52b   : > { %v1308_v33 = vsel %vm1307_vm3, %v1303_v23, inf  ;;  %vm3379_vm15 = vcmp.eq.f32.partialorder %v9113_v27, %v8642_v3  ;;  %v4419_v29 = vand.u32 65535, %v9118_v13  ;;  %v3916_v13 = vand.u32 65535, %v8315_v54 }
 0x52c   : > { %1309 = vmin.xlane.f32.xlu0 %v1308_v33  ;;  %v3380_v43 = vsel %vm3379_vm15, %v3375_v18, inf  ;;  %v3898_v33 = vcvt.s32.f32 %v3896_v59  ;;  %v2872_v1 = vcvt.s32.f32 %v2870_v49  ;;  %v4942_v59 = vand.u32 65535, %v9121_v36 }
 0x52d   : > { %v8649_v12 = vpop.xlane.xlu0 %1828  ;;  %v4421_v27 = vcvt.s32.f32 %v4419_v29  ;;  %v4962_v54 = vand.u32 65535, %v8346_v25  ;;  %v6008_v25 = vand.u32 65535, %v8360_v58 }
 0x52e   : > { %2335 = vmin.xlane.f32.xlu1 %v2334_v40  ;;  %v8652_v37 = vpop.xlane.xlu1 %3900  ;;  %vm1830_vm5 = vcmp.eq.f32.partialorder %v9112_v56, %v8649_v12  ;;  %v9117_v40 = vld [vmem:[#allocation12_spill] sm:$0xff]  ;;  %v4944_v49 = vcvt.s32.f32 %v4942_v59 }
 0x52f   : > { %v1831_v4 = vsel %vm1830_vm5, %v1826_v22, inf  ;;  %vm3902_vm0 = vcmp.eq.f32.partialorder %v9117_v40, %v8652_v37 }
 0x530   : > { %1832 = vmin.xlane.f32.xlu0 %v1831_v4  ;;  %v3903_v56 = vsel %vm3902_vm0, %v3898_v33, inf  ;;  %v9120_v4 = vld [vmem:[#allocation17_spill] sm:$0xff] }
 0x531   : > { %v8659_v50 = vpop.xlane.xlu0 %2351 }
 0x532   : > { %2858 = vmin.xlane.f32.xlu1 %v2857_v47  ;;  %vm2353_vm13 = vcmp.eq.f32.partialorder %v9116_v21, %v8659_v50  ;;  %v8664_v23 = vpop.xlane.xlu1 %4423 }
 0x533   : > { %v2354_v61 = vsel %vm2353_vm13, %v2349_v62, inf  ;;  %vm4425_vm4 = vcmp.eq.f32.partialorder %v9120_v4, %v8664_v23 }
 0x534   : > { %2355 = vmin.xlane.f32.xlu0 %v2354_v61  ;;  %v4426_v62 = vsel %vm4425_vm4, %v4421_v27, inf }
 0x535   : > { %v8669_v22 = vpop.xlane.xlu0 %2874 }
 0x536   : > { %3381 = vmin.xlane.f32.xlu1 %v3380_v43  ;;  %vm2876_vm7 = vcmp.eq.f32.partialorder %v9119_v51, %v8669_v22  ;;  %v8675_v18 = vpop.xlane.xlu1 %4946  ;;  %v9123_v43 = vld [vmem:[#allocation30_spill] sm:$0xff]  ;;  %v3918_v51 = vcvt.s32.f32 %v3916_v13 }
 0x537   : > { %v2877_v47 = vsel %vm2876_vm7, %v2872_v1, inf  ;;  %vm4948_vm3 = vcmp.eq.f32.partialorder %v9122_v30, %v8675_v18  ;;  %v3393_v61 = vand.u32 65535, %v9123_v43 }
 0x538   : > { %2878 = vmin.xlane.f32.xlu0 %v2877_v47  ;;  %v4949_v21 = vsel %vm4948_vm3, %v4944_v49, inf  ;;  %v9124_v47 = vld [vmem:[#allocation31_spill] sm:$0xff] }
 0x539   : > { %v3395_v33 = vcvt.s32.f32 %v3393_v61  ;;  %v6010_v61 = vcvt.s32.f32 %v6008_v25 }
 0x53a   : > { %3904 = vmin.xlane.f32.xlu1 %v3903_v56  ;;  %v4439_v56 = vand.u32 65535, %v8337_v9  ;;  %v5485_v9 = vand.u32 65535, %v8354_v31 }
 0x53c   : > { %v4441_v36 = vcvt.s32.f32 %v4439_v56 }
 0x53e   : > { %4427 = vmin.xlane.f32.xlu1 %v4426_v62  ;;  %v4964_v62 = vcvt.s32.f32 %v4962_v54 }
 0x542   : > { %4950 = vmin.xlane.f32.xlu1 %v4949_v21  ;;  %v5487_v21 = vcvt.s32.f32 %v5485_v9  ;;  %v807_v9 = vld [vmem:[#allocation3] sm:$0xff] }
 0x54a   : > { %v8681_v40 = vpop.xlane.xlu0 %3397 }
 0x54b   : > { %vm3399_vm2 = vcmp.eq.f32.partialorder %v8333_v42, %v8681_v40 }
 0x54c   : > { %v3400_v29 = vsel %vm3399_vm2, %v3395_v33, inf  ;;  %vm9132_vm2 = vnez %v9081_v11 }
 0x54d   : > { %3401 = vmin.xlane.f32.xlu0 %v3400_v29 }
 0x54e   : > { %v8686_v1 = vpop.xlane.xlu0 %3920 }
 0x54f   : > { %vm3922_vm5 = vcmp.eq.f32.partialorder %v9124_v47, %v8686_v1  ;;  %v1815_v47 = vcvt.f32.s32 %v8618_v34 }
 0x550   : > { %v3923_v4 = vsel %vm3922_vm5, %v3918_v51, inf  ;;  %vm9133_vm5 = vnez %v9083_v35 }
 0x551   : > { %3924 = vmin.xlane.f32.xlu0 %v3923_v4 }
 0x552   : > { %v8691_v27 = vpop.xlane.xlu0 %4443 }
 0x553   : > { %vm4445_vm15 = vcmp.eq.f32.partialorder %v8351_v57, %v8691_v27 }
 0x554   : > { %v4446_v42 = vsel %vm4445_vm15, %v4441_v36, inf  ;;  %vm9134_vm15 = vnez %v9088_v53 }
 0x555   : > { %4447 = vmin.xlane.f32.xlu0 %v4446_v42 }
 0x556   : > { %v8696_v59 = vpop.xlane.xlu0 %4966 }
 0x557   : > { %vm4968_vm13 = vcmp.eq.f32.partialorder %v8357_v15, %v8696_v59  ;;  %v5465_v15 = vand.u32 65535, %v8531_v7 }
 0x558   : > { %v4969_v30 = vsel %vm4968_vm13, %v4964_v62, inf  ;;  %v2338_v62 = vcvt.f32.s32 %v8626_v24  ;;  %v2358_v24 = vcvt.f32.s32 %v8659_v50  ;;  %vm9135_vm13 = vcmask 80896  }
 0x559   : > { %4970 = vmin.xlane.f32.xlu0 %v4969_v30  ;;  %v5467_v13 = vcvt.s32.f32 %v5465_v15 }
 0x55a   : > { %v8701_v49 = vpop.xlane.xlu0 %5489  ;;  %v2359_v16 = vshll.u32 %v2358_v24, 16 }
 0x55b   : > { %vm5491_vm0 = vcmp.eq.f32.partialorder %v8366_v0, %v8701_v49  ;;  %v5988_v0 = vand.u32 65535, %v8614_v44  ;;  %v1816_v44 = vshll.u32 %v1815_v47, 16  ;;  %v3384_v47 = vcvt.f32.s32 %v8642_v3 }
 0x55c   : > { %v5492_v57 = vsel %vm5491_vm0, %v5487_v21, inf  ;;  %vm9136_vm0 = vmmov %vm9135_vm13 }
 0x55d   : > { %5493 = vmin.xlane.f32.xlu0 %v5492_v57  ;;  %v5990_v51 = vcvt.s32.f32 %v5988_v0  ;;  %v2861_v57 = vcvt.f32.s32 %v8634_v26 }
 0x55e   : > { %v8706_v43 = vpop.xlane.xlu0 %6012 }
 0x55f   : > { %vm6014_vm7 = vcmp.eq.f32.partialorder %v8389_v28, %v8706_v43  ;;  %v1292_v28 = vcvt.f32.s32 %v8609_v32 }
 0x560   : > { %v6015_v31 = vsel %vm6014_vm7, %v6010_v61, inf  ;;  %vm9137_vm7 = vnez %v9102_v46 }
 0x561   : > { %6016 = vmin.xlane.f32.xlu0 %v6015_v31  ;;  %v1293_v36 = vshll.u32 %v1292_v28, 16  ;;  %v808_v28 = vld [vmem:[#allocation3 + $0x8] sm:$0xff] }
 0x57c   : > { %v8711_v33 = vpop.xlane.xlu1 %5469 }
 0x57d   : > { %vm5471_vm4 = vcmp.eq.f32.partialorder %v8535_v17, %v8711_v33  ;;  %v1312_v17 = vcvt.f32.s32 %v8639_v45  ;;  %v2339_v45 = vshll.u32 %v2338_v62, 16 }
 0x57e   : > { %v5472_v58 = vsel %vm5471_vm4, %v5467_v13, inf  ;;  %vm9138_vm4 = vnez %v9105_v2 }
 0x57f   : > { %5473 = vmin.xlane.f32.xlu1 %v5472_v58  ;;  %v1313_v61 = vshll.u32 %v1312_v17, 16 }
 0x5af   : > { %v8716_v29 = vpop.xlane.xlu1 %5992 }
 0x5b0   : > { %vm5994_vm3 = vcmp.eq.f32.partialorder %v8620_v5, %v8716_v29  ;;  %v1835_v5 = vcvt.f32.s32 %v8649_v12 }
 0x5b1   : > { %v5995_v56 = vsel %vm5994_vm3, %v5990_v51, inf  ;;  %vm9139_vm3 = vmmov %vm9136_vm0 }
 0x5b2   : > { %5996 = vmin.xlane.f32.xlu1 %v5995_v56  ;;  %v1836_v51 = vshll.u32 %v1835_v5, 16 }
 0x5b3   : > { %v1290_v7 = vpop.xlane.xlu1 %1289 }
 0x5b4   : > { %v1291_v4 = vcvt.f32.s32 %v1290_v7  ;;  %v2862_v7 = vshll.u32 %v2861_v57, 16 }
 0x5b6   : > { %v1294_v54 = vadd.s32 %v1293_v36, %v1291_v4 }
 0x5b7   : > { %v1813_v42 = vpop.xlane.xlu1 %1812 }
 0x5b8   : > { %v1814_v30 = vcvt.f32.s32 %v1813_v42  ;;  %v1322_v34 = vsel %vm8373_vm12, %v1294_v54, %v807_v9  ;;  %v2881_v54 = vcvt.f32.s32 %v8669_v22  ;;  %v3907_v9 = vcvt.f32.s32 %v8652_v37 }
 0x5b9   : > { %v1310_v21 = vpop.xlane.xlu0 %1309  ;;  %vm9126_vm12 = vnez %v9069_v6 }
 0x5ba   : > { %v1817_v32 = vadd.s32 %v1816_v44, %v1814_v30  ;;  %v1311_v25 = vcvt.f32.s32 %v1310_v21  ;;  %v3385_v30 = vshll.u32 %v3384_v47, 16  ;;  %v2882_v48 = vshll.u32 %v2881_v54, 16 }
 0x5bb   : > { %v2336_v31 = vpop.xlane.xlu1 %2335  ;;  %v4450_v47 = vcvt.f32.s32 %v8691_v27 }
 0x5bc   : > { %v1845_v15 = vsel %vm8420_vm8, %v1817_v32, %v1322_v34  ;;  %v2337_v13 = vcvt.f32.s32 %v2336_v31  ;;  %v1314_v58 = vadd.s32 %v1313_v61, %v1311_v25  ;;  %v3908_v61 = vshll.u32 %v3907_v9, 16 }
 0x5bd   : > { %v1833_v0 = vpop.xlane.xlu0 %1832  ;;  %v4430_v34 = vcvt.f32.s32 %v8664_v23  ;;  %vm9128_vm8 = vnez %v9099_v14  ;;  %v3404_v23 = vcvt.f32.s32 %v8681_v40  ;;  %v4451_v14 = vshll.u32 %v4450_v47, 16 }
 0x5be   : > { %v2340_v12 = vadd.s32 %v2339_v45, %v2337_v13  ;;  %v1834_v56 = vcvt.f32.s32 %v1833_v0  ;;  %v1323_v17 = vsel %vm8369_vm11, %v1314_v58, %v808_v28  ;;  %vm9125_vm11 = vnez %v9067_v60 }
 0x5bf   : > { %v2859_v26 = vpop.xlane.xlu1 %2858  ;;  %v4431_v24 = vshll.u32 %v4430_v34, 16  ;;  %v3927_v28 = vcvt.f32.s32 %v8686_v1 }
 0x5c0   : > { %v2368_v10 = vsel %vm8463_vm1, %v2340_v12, %v1845_v15  ;;  %v2860_v4 = vcvt.f32.s32 %v2859_v26  ;;  %v1837_v36 = vadd.s32 %v1836_v51, %v1834_v56  ;;  %v3405_v12 = vshll.u32 %v3404_v23, 16 }
 0x5c1   : > { %v2356_v50 = vpop.xlane.xlu0 %2355  ;;  %v3928_v26 = vshll.u32 %v3927_v28, 16  ;;  %vm9130_vm1 = vnez %v9075_v20 }
 0x5c2   : > { %v2863_v42 = vadd.s32 %v2862_v7, %v2860_v4  ;;  %v1846_v44 = vsel %vm8385_vm14, %v1837_v36, %v1323_v17  ;;  %v2357_v62 = vcvt.f32.s32 %v2356_v50  ;;  %vm9127_vm14 = vnez %v9096_v39 }
 0x5c3   : > { %v3382_v3 = vpop.xlane.xlu1 %3381 }
 0x5c4   : > { %v2891_v52 = vsel %vm8507_vm10, %v2863_v42, %v2368_v10  ;;  %v3383_v21 = vcvt.f32.s32 %v3382_v3  ;;  %v2360_v5 = vadd.s32 %v2359_v16, %v2357_v62  ;;  %vm9129_vm10 = vnez %v9073_v19 }
 0x5c5   : > { %v2879_v32 = vpop.xlane.xlu0 %2878  ;;  %v4973_v16 = vcvt.f32.s32 %v8696_v59  ;;  %v5496_v42 = vcvt.f32.s32 %v8701_v49  ;;  %v6019_v3 = vcvt.f32.s32 %v8706_v43 }
 0x5c6   : > { %v3386_v25 = vadd.s32 %v3385_v30, %v3383_v21  ;;  %v2369_v22 = vsel %vm9125_vm11, %v2360_v5, %v1846_v44  ;;  %v2880_v57 = vcvt.f32.s32 %v2879_v32  ;;  %vm9140_vm11 = vmmov %vm9136_vm0 }
 0x5c7   : > { %v3905_v41 = vpop.xlane.xlu1 %3904  ;;  %v4974_v54 = vshll.u32 %v4973_v16, 16  ;;  %v5497_v9 = vshll.u32 %v5496_v42, 16  ;;  %v6020_v21 = vshll.u32 %v6019_v3, 16 }
 0x5c8   : > { %v3414_v37 = vsel %vm8541_vm9, %v3386_v25, %v2891_v52  ;;  %v3906_v31 = vcvt.f32.s32 %v3905_v41  ;;  %v2883_v45 = vadd.s32 %v2882_v48, %v2880_v57  ;;  %vm9131_vm9 = vnez %v9077_v63 }
 0x5c9   : > { %v4953_v48 = vcvt.f32.s32 %v8675_v18  ;;  %v5476_v25 = vcvt.f32.s32 %v8711_v33 }
 0x5ca   : > { %v3909_v38 = vadd.s32 %v3908_v61, %v3906_v31  ;;  %v2892_v15 = vsel %vm9126_vm12, %v2883_v45, %v2369_v22  ;;  %v5999_v45 = vcvt.f32.s32 %v8716_v29 }
 0x5cb   : > { %v4428_v13 = vpop.xlane.xlu1 %4427  ;;  %v4954_v22 = vshll.u32 %v4953_v48, 16  ;;  %v5477_v61 = vshll.u32 %v5476_v25, 16 }
 0x5cc   : > { %v3937_v60 = vsel %vm9127_vm14, %v3909_v38, %v3414_v37  ;;  %v4429_v58 = vcvt.f32.s32 %v4428_v13 }
 0x5ce   : > { %v4432_v0 = vadd.s32 %v4431_v24, %v4429_v58 }
 0x5cf   : > { %v4951_v43 = vpop.xlane.xlu1 %4950 }
 0x5d0   : > { %v4460_v51 = vsel %vm9128_vm8, %v4432_v0, %v3937_v60  ;;  %v4952_v35 = vcvt.f32.s32 %v4951_v43 }
 0x5d2   : > { %v4955_v57 = vadd.s32 %v4954_v22, %v4952_v35 }
 0x5d4   : > { %v4983_v37 = vsel %vm9137_vm7, %v4955_v57, %v4460_v51 }
 0x5da   : > { %v3402_v8 = vpop.xlane.xlu0 %3401 }
 0x5db   : > { %v3403_v56 = vcvt.f32.s32 %v3402_v8 }
 0x5dd   : > { %v3406_v7 = vadd.s32 %v3405_v12, %v3403_v56 }
 0x5de   : > { %v3925_v6 = vpop.xlane.xlu0 %3924 }
 0x5df   : > { %v3415_v39 = vsel %vm9129_vm10, %v3406_v7, %v2892_v15  ;;  %v3926_v10 = vcvt.f32.s32 %v3925_v6  ;;  %v6000_v15 = vshll.u32 %v5999_v45, 16 }
 0x5e1   : > { %v3929_v4 = vadd.s32 %v3928_v26, %v3926_v10 }
 0x5e2   : > { %v4448_v36 = vpop.xlane.xlu0 %4447 }
 0x5e3   : > { %v3938_v40 = vsel %vm9130_vm1, %v3929_v4, %v3415_v39  ;;  %v4449_v17 = vcvt.f32.s32 %v4448_v36 }
 0x5e5   : > { %v4452_v1 = vadd.s32 %v4451_v14, %v4449_v17 }
 0x5e6   : > { %v4971_v50 = vpop.xlane.xlu0 %4970 }
 0x5e7   : > { %v4461_v27 = vsel %vm9131_vm9, %v4452_v1, %v3938_v40  ;;  %v4972_v19 = vcvt.f32.s32 %v4971_v50 }
 0x5e9   : > { %v4975_v44 = vadd.s32 %v4974_v54, %v4972_v19 }
 0x5ea   : > { %v5494_v62 = vpop.xlane.xlu0 %5493 }
 0x5eb   : > { %v4984_v20 = vsel %vm9132_vm2, %v4975_v44, %v4461_v27  ;;  %v5495_v59 = vcvt.f32.s32 %v5494_v62 }
 0x5ed   : > { %v5498_v30 = vadd.s32 %v5497_v9, %v5495_v59 }
 0x5ee   : > { %v6017_v52 = vpop.xlane.xlu0 %6016 }
 0x5ef   : > { %v5507_v49 = vsel %vm9133_vm5, %v5498_v30, %v4984_v20  ;;  %v6018_v5 = vcvt.f32.s32 %v6017_v52 }
 0x5f1   : > { %v6021_v63 = vadd.s32 %v6020_v21, %v6018_v5 }
 0x5f3   : > { %v6030_v32 = vsel %vm9134_vm15, %v6021_v63, %v5507_v49 }
 0x5f4   : > { %6035 = vst.msk [vmem:[#allocation3 + $0x8] sm:$0xff] %vm9135_vm13, %v6030_v32 }
 0x5fb   : > { %v6044_v11 = vld [vmem:[#allocation3 + $0x8] sm:$0xff] }
 0x5fc   : > { %6046 = vst.msk [vmem:[%s249_s18 + $0x8] sm:$0xff] %vm9136_vm0, %v6044_v11 }
 0x60c   : > { %v5474_v53 = vpop.xlane.xlu1 %5473 }
 0x60d   : > { %v5475_v41 = vcvt.f32.s32 %v5474_v53 }
 0x60f   : > { %v5478_v34 = vadd.s32 %v5477_v61, %v5475_v41 }
 0x611   : > { %v5506_v31 = vsel %vm9138_vm4, %v5478_v34, %v4983_v37 }
 0x63f   : > { %v5997_v38 = vpop.xlane.xlu1 %5996 }
 0x640   : > { %v5998_v18 = vcvt.f32.s32 %v5997_v38 }
 0x642   : > { %v6001_v13 = vadd.s32 %v6000_v15, %v5998_v18 }
 0x644   : > { %v6029_v33 = vsel %vm8605_vm6, %v6001_v13, %v5506_v31 }
 0x645   : > { %6034 = vst.msk [vmem:[#allocation3] sm:$0xff] %vm9139_vm3, %v6029_v33 }
 0x64c   : > { %v6043_v24 = vld [vmem:[#allocation3] sm:$0xff] }
 0x64d   : > { %6045 = vst.msk [vmem:[%s249_s18] sm:$0xff] %vm9140_vm11, %v6043_v24 }
 0x64e PF: > { %s20_s25 = sadd.s32 1, %s6961_s25   ;;  %s9141_s20 = smov %s6945_s21 }
 0x64f   : > { %p17_p9 = scmp.ge.s32.totalorder %s20_s25, 4   ;;  %s9142_s21 = smov %s6949_s22 }
 0x650   : > { %s9143_s22 = smov %s7051_s6  ;;  %s9144_s23 = smov %s6957_s24 }
 0x651   : > { %s9145_s24 = smov %s9147_s26  ;;  %19 = sbr.rel (!%p17_p9) target bundleno = 6 (0x6), region = 92 }
 0x658   :  { %6084 = vsyncpa [#allocation7], 1 }
 0x659   :  { %6086 = vsyncpa [#allocation7 + $0x1], 1 }

</bundles_post_ra>
